<compile_context>
chip_gen: v6e
topology: v6e:2x2x1
jax: 0.10.0
libtpu: 0.0.40
codegen_flags: <defaults>
</compile_context>

<pallas_src>
import functools

import jax
import jax.numpy as jnp
from jax import lax
from jax.experimental import pallas as pl
from jax.experimental.pallas import tpu as pltpu


def _round_up(x, m):
    return ((x + m - 1) // m) * m


# ---------------------------------------------------------------------------
# Fused  act((X @ W) * scale + shift)  Pallas kernels
# ---------------------------------------------------------------------------
def _fused_matmul_single_k_kernel(x_ref, w_ref, scale_ref, shift_ref, o_ref, *, relu):
    # Whole K fits in one tile: no accumulator scratch, epilogue fused with the store.
    y = jnp.dot(x_ref[...], w_ref[...], preferred_element_type=jnp.float32)
    y = y * scale_ref[...] + shift_ref[...]
    if relu:
        y = jnp.maximum(y, 0.0)
    o_ref[...] = y.astype(o_ref.dtype)


def _fused_matmul_multi_k_kernel(x_ref, w_ref, scale_ref, shift_ref, o_ref, acc_ref,
                                 *, relu):
    @pl.when(pl.program_id(2) == 0)
    def _():
        acc_ref[...] = jnp.zeros_like(acc_ref)

    acc_ref[...] += jnp.dot(x_ref[...], w_ref[...],
                            preferred_element_type=jnp.float32)

    @pl.when(pl.program_id(2) == pl.num_programs(2) - 1)
    def _():
        y = acc_ref[...] * scale_ref[...] + shift_ref[...]
        if relu:
            y = jnp.maximum(y, 0.0)
        o_ref[...] = y.astype(o_ref.dtype)


def fused_linear(x, w, scale, shift, *, relu, out_dtype=jnp.float32):
    """x: (M, K), w: (K, N), scale/shift: (N,) f32 -> (M, N) out_dtype."""
    M, K = x.shape
    Kw, N = w.shape
    assert K == Kw

    # (8,128)-aligned tiles; zero-pad operands to the tile grid (exact zero products).
    tm = min(256, _round_up(M, 8))
    tn = min(512, _round_up(N, 128))
    tk = _round_up(K, 128) if K <= 4096 else 4096
    Mp, Np, Kp = _round_up(M, tm), _round_up(N, tn), _round_up(K, tk)

    xp = x.astype(jnp.bfloat16)
    wp = w.astype(jnp.bfloat16)
    if (Mp, Kp) != (M, K):
        xp = jnp.pad(xp, ((0, Mp - M), (0, Kp - K)))
    if (Kp, Np) != (K, N):
        wp = jnp.pad(wp, ((0, Kp - K), (0, Np - N)))
    sc = scale if Np == N else jnp.pad(scale, (0, Np - N))
    sh = shift if Np == N else jnp.pad(shift, (0, Np - N))
    sc = sc.reshape(1, Np).astype(jnp.float32)
    sh = sh.reshape(1, Np).astype(jnp.float32)

    nk = Kp // tk
    flops = int(2 * Mp * Np * Kp)
    bytes_accessed = int((Mp * Kp + Kp * Np) * 2
                         + Mp * Np * jnp.dtype(out_dtype).itemsize + 2 * Np * 4)
    ce = pl.CostEstimate(flops=flops, transcendentals=0, bytes_accessed=bytes_accessed)

    if nk == 1:
        out = pl.pallas_call(
            functools.partial(_fused_matmul_single_k_kernel, relu=relu),
            out_shape=jax.ShapeDtypeStruct((Mp, Np), out_dtype),
            grid_spec=pltpu.PrefetchScalarGridSpec(
                num_scalar_prefetch=0,
                grid=(Mp // tm, Np // tn),
                in_specs=[
                    pl.BlockSpec((tm, Kp), lambda i, j: (i, 0)),
                    pl.BlockSpec((Kp, tn), lambda i, j: (0, j)),
                    pl.BlockSpec((1, tn), lambda i, j: (0, j)),
                    pl.BlockSpec((1, tn), lambda i, j: (0, j)),
                ],
                out_specs=pl.BlockSpec((tm, tn), lambda i, j: (i, j)),
            ),
            compiler_params=pltpu.CompilerParams(
                dimension_semantics=("parallel", "parallel")),
            cost_estimate=ce,
        )(xp, wp, sc, sh)
    else:
        out = pl.pallas_call(
            functools.partial(_fused_matmul_multi_k_kernel, relu=relu),
            out_shape=jax.ShapeDtypeStruct((Mp, Np), out_dtype),
            grid_spec=pltpu.PrefetchScalarGridSpec(
                num_scalar_prefetch=0,
                grid=(Mp // tm, Np // tn, nk),
                in_specs=[
                    pl.BlockSpec((tm, tk), lambda i, j, k: (i, k)),
                    pl.BlockSpec((tk, tn), lambda i, j, k: (k, j)),
                    pl.BlockSpec((1, tn), lambda i, j, k: (0, j)),
                    pl.BlockSpec((1, tn), lambda i, j, k: (0, j)),
                ],
                out_specs=pl.BlockSpec((tm, tn), lambda i, j, k: (i, j)),
                scratch_shapes=[pltpu.VMEM((tm, tn), jnp.float32)],
            ),
            compiler_params=pltpu.CompilerParams(
                dimension_semantics=("parallel", "parallel", "arbitrary")),
            cost_estimate=ce,
        )(xp, wp, sc, sh)

    return out[:M, :N]


# ---------------------------------------------------------------------------
# Conv block = im2col (wrapper) + fused GEMM/BN/ReLU (Pallas)
# ---------------------------------------------------------------------------
def _im2col_3x3_valid(x_nhwc):
    B, H, W, C = x_nhwc.shape
    Ho, Wo = H - 2, W - 2
    cols = [x_nhwc[:, dy:dy + Ho, dx:dx + Wo, :]
            for dy in range(3) for dx in range(3)]
    patches = jnp.concatenate(cols, axis=-1)          # (B, Ho, Wo, 9*C)
    return patches.reshape(B * Ho * Wo, 9 * C), (B, Ho, Wo)


# ---------------------------------------------------------------------------
# One-time parameter preparation (layout plumbing + BN folding, outside forward)
# ---------------------------------------------------------------------------
def prepare_params(params, eps=1e-5):
    conv_params, fc_params = params

    prepared_convs = []
    for (w, b, gamma, beta, mean, var) in conv_params:
        cout = w.shape[0]
        # (Cout, Cin, 3, 3) -> (3, 3, Cin, Cout) -> (9*Cin, Cout); matches im2col order.
        w2d = w.transpose(2, 3, 1, 0).reshape(-1, cout).astype(jnp.bfloat16)
        inv_std = 1.0 / jnp.sqrt(var + eps)
        scale = (gamma * inv_std).astype(jnp.float32)
        shift = (beta + scale * (b - mean)).astype(jnp.float32)
        prepared_convs.append((w2d, scale, shift))

    (w1, b1), (w2, b2), (w3, b3) = fc_params          # PyTorch (out, in) layout
    C, Ho, Wo = 128, 24, 24                           # conv tower output (32->24, 128 ch)
    d1 = w1.shape[0]
    # Permute fc1 weight rows from PyTorch's (C, H, W) flatten order to the NHWC
    # flatten order used by the kernel path (done once, not per forward call).
    w1_t = (w1.T.reshape(C, Ho, Wo, d1)
                .transpose(1, 2, 0, 3)
                .reshape(Ho * Wo * C, d1)).astype(jnp.bfloat16)
    prepared_fcs = (
        (w1_t, jnp.ones_like(b1), b1.astype(jnp.float32)),
        (w2.T.astype(jnp.bfloat16), jnp.ones_like(b2), b2.astype(jnp.float32)),
        (w3.T.astype(jnp.bfloat16), jnp.ones_like(b3), b3.astype(jnp.float32)),
    )
    return prepared_convs, prepared_fcs


# ---------------------------------------------------------------------------
# Full forward (takes prepared params)
# ---------------------------------------------------------------------------
def two_step_vgg_forward(x_nchw, prepared):
    conv_p, fc_p = prepared
    # NCHW -> NHWC (channels on lanes); bf16 activations end-to-end.
    h = jnp.transpose(x_nchw, (0, 2, 3, 1)).astype(jnp.bfloat16)

    for (w2d, scale, shift) in conv_p:
        patches, (B, Ho, Wo) = _im2col_3x3_valid(h)
        y = fused_linear(patches, w2d, scale, shift, relu=True, out_dtype=jnp.bfloat16)
        h = y.reshape(B, Ho, Wo, w2d.shape[1])

    B, Ho, Wo, C = h.shape                            # (B, 24, 24, 128)
    feats = h.reshape(B, Ho * Wo * C)                 # NHWC flatten (transpose-free)

    (w1t, s1, b1), (w2t, s2, b2), (w3t, s3, b3) = fc_p
    h = fused_linear(feats, w1t, s1, b1, relu=True, out_dtype=jnp.bfloat16)
    h = fused_linear(h, w2t, s2, b2, relu=True, out_dtype=jnp.bfloat16)
    return fused_linear(h, w3t, s3, b3, relu=False, out_dtype=jnp.float32)


# ---------------------------------------------------------------------------
# Deterministic init (mimics nn.Conv2d / nn.Linear defaults; BN eval params)
# ---------------------------------------------------------------------------
def init_params(key):
    conv_dims = [(3, 64), (64, 64), (64, 128), (128, 128)]
    conv_params = []
    for cin, cout in conv_dims:
        key, kw, kb, kg, kbt, km, kv = jax.random.split(key, 7)
        bound = 1.0 / jnp.sqrt(jnp.float32(cin * 9))
        w = jax.random.uniform(kw, (cout, cin, 3, 3), jnp.float32, -bound, bound)
        b = jax.random.uniform(kb, (cout,), jnp.float32, -bound, bound)
        gamma = jax.random.uniform(kg, (cout,), jnp.float32, 0.8, 1.2)
        beta = jax.random.uniform(kbt, (cout,), jnp.float32, -0.1, 0.1)
        mean = jax.random.uniform(km, (cout,), jnp.float32, -0.1, 0.1)
        var = jax.random.uniform(kv, (cout,), jnp.float32, 0.8, 1.2)
        conv_params.append((w, b, gamma, beta, mean, var))

    fc_dims = [(128 * 24 * 24, 512), (512, 512), (512, 10)]
    fc_params = []
    for din, dout in fc_dims:
        key, kw, kb = jax.random.split(key, 3)
        bound = 1.0 / jnp.sqrt(jnp.float32(din))
        w = jax.random.uniform(kw, (dout, din), jnp.float32, -bound, bound)
        b = jax.random.uniform(kb, (dout,), jnp.float32, -bound, bound)
        fc_params.append((w, b))
    return conv_params, fc_params


# ---------------------------------------------------------------------------
# Pure-JAX reference (mirrors the PyTorch module in f32, NCHW)
# ---------------------------------------------------------------------------
def reference_forward(x_nchw, params, eps=1e-5):
    conv_params, fc_params = params
    h = x_nchw
    for (w, b, gamma, beta, mean, var) in conv_params:
        h = lax.conv_general_dilated(
            h, w, window_strides=(1, 1), padding="VALID",
            dimension_numbers=("NCHW", "OIHW", "NCHW"),
            precision=lax.Precision.HIGHEST)
        h = h + b[None, :, None, None]
        h = (h - mean[None, :, None, None]) / jnp.sqrt(var + eps)[None, :, None, None]
        h = h * gamma[None, :, None, None] + beta[None, :, None, None]
        h = jnp.maximum(h, 0.0)
    h = h.reshape(h.shape[0], -1)                     # PyTorch Flatten: (C, H, W) order
    (w1, b1), (w2, b2), (w3, b3) = fc_params
    hi = lax.Precision.HIGHEST
    h = jnp.maximum(jnp.dot(h, w1.T, precision=hi) + b1, 0.0)
    h = jnp.maximum(jnp.dot(h, w2.T, precision=hi) + b2, 0.0)
    return jnp.dot(h, w3.T, precision=hi) + b3


if __name__ == "__main__":
    key = jax.random.PRNGKey(0)
    k_params, k_x = jax.random.split(key)
    params = init_params(k_params)
    prepared = prepare_params(params)                 # one-time layout plumbing

    B = 2
    x = jax.random.normal(k_x, (B, 3, 32, 32), jnp.float32)  # 32x32 required by fc1

    fwd = jax.jit(two_step_vgg_forward)
    out = jax.block_until_ready(fwd(x, prepared))

    ref = reference_forward(x, params)
    assert out.shape == (B, 10)
    # bf16 matmul operands / activations -> loose tolerance relative to logit scale.
    max_err = float(jnp.max(jnp.abs(out - ref)))
    tol = 2e-2 * (1.0 + float(jnp.max(jnp.abs(ref))))
    assert max_err <= tol, f"max abs err {max_err} > tol {tol}"

    print("KERNEL_OK")
</pallas_src>

<mosaic_0001>
module attributes {stable_mosaic.version = 11 : i64} {
  func.func @_fused_matmul_single_k_kernel(%arg0: i32, %arg1: i32, %arg2: memref<256x128xbf16, #tpu.memory_space<vmem>>, %arg3: memref<128x128xbf16, #tpu.memory_space<vmem>>, %arg4: memref<1x128xf32, #tpu.memory_space<vmem>>, %arg5: memref<1x128xf32, #tpu.memory_space<vmem>>, %arg6: memref<256x128xbf16, #tpu.memory_space<vmem>>) attributes {dimension_semantics = [#tpu.dimension_semantics<parallel>, #tpu.dimension_semantics<parallel>], iteration_bounds = array<i64: 8, 1>, scalar_prefetch = 0 : i64, scratch_operands = 0 : i64, tpu.core_type = #tpu.core_type<tc>, window_params = [{transform_indices = @transform_0, window_bounds = array<i64: 256, 128>}, {transform_indices = @transform_1, window_bounds = array<i64: 128, 128>}, {transform_indices = @transform_2, window_bounds = array<i64: 1, 128>}, {transform_indices = @transform_3, window_bounds = array<i64: 1, 128>}, {transform_indices = @transform_4, window_bounds = array<i64: 256, 128>}]} {
    %c0 = arith.constant 0 : index
    %c0_0 = arith.constant 0 : index
    %0 = vector.load %arg2[%c0, %c0_0] : memref<256x128xbf16, #tpu.memory_space<vmem>>, vector<256x128xbf16>
    %c0_1 = arith.constant 0 : index
    %c0_2 = arith.constant 0 : index
    %1 = vector.load %arg3[%c0_1, %c0_2] : memref<128x128xbf16, #tpu.memory_space<vmem>>, vector<128x128xbf16>
    %cst = arith.constant dense<0.000000e+00> : vector<256x128xf32>
    %2 = tpu.matmul %0, %1, %cst {dimension_numbers = #tpu.dot_dimension_numbers<[1], [0], [0], [1], [0, 0, 1, 1], [], []>} : vector<256x128xbf16>, vector<128x128xbf16>, vector<256x128xf32> -> vector<256x128xf32>
    %c0_3 = arith.constant 0 : index
    %c0_4 = arith.constant 0 : index
    %3 = vector.load %arg4[%c0_3, %c0_4] : memref<1x128xf32, #tpu.memory_space<vmem>>, vector<1x128xf32>
    %4 = vector.broadcast %3 : vector<1x128xf32> to vector<256x128xf32>
    %5 = arith.mulf %2, %4 : vector<256x128xf32>
    %c0_5 = arith.constant 0 : index
    %c0_6 = arith.constant 0 : index
    %6 = vector.load %arg5[%c0_5, %c0_6] : memref<1x128xf32, #tpu.memory_space<vmem>>, vector<1x128xf32>
    %7 = vector.broadcast %6 : vector<1x128xf32> to vector<256x128xf32>
    %8 = arith.addf %5, %7 : vector<256x128xf32>
    %cst_7 = arith.constant 0.000000e+00 : f32
    %9 = vector.broadcast %cst_7 : f32 to vector<256x128xf32>
    %10 = arith.maximumf %8, %9 : vector<256x128xf32>
    %11 = arith.truncf %10 : vector<256x128xf32> to vector<256x128xbf16>
    %c0_8 = arith.constant 0 : index
    %c0_9 = arith.constant 0 : index
    %12 = vector.load %arg6[%c0_8, %c0_9] : memref<256x128xbf16, #tpu.memory_space<vmem>>, vector<256x128xbf16>
    tpu.vector_store %arg6[%c0_8, %c0_9], %11 {strides = array<i32>} : memref<256x128xbf16, #tpu.memory_space<vmem>>, vector<256x128xbf16>,
    return
  }
  func.func @transform_0(%arg0: i32, %arg1: i32) -> (i32, i32) {
    %c0_i32 = arith.constant 0 : i32
    %c0_i32_0 = arith.constant 0 : i32
    return %arg0, %c0_i32 : i32, i32
  }
  func.func @transform_1(%arg0: i32, %arg1: i32) -> (i32, i32) {
    %c0_i32 = arith.constant 0 : i32
    %c0_i32_0 = arith.constant 0 : i32
    return %c0_i32, %arg1 : i32, i32
  }
  func.func @transform_2(%arg0: i32, %arg1: i32) -> (i32, i32) {
    %c0_i32 = arith.constant 0 : i32
    %c0_i32_0 = arith.constant 0 : i32
    return %c0_i32, %arg1 : i32, i32
  }
  func.func @transform_3(%arg0: i32, %arg1: i32) -> (i32, i32) {
    %c0_i32 = arith.constant 0 : i32
    %c0_i32_0 = arith.constant 0 : i32
    return %c0_i32, %arg1 : i32, i32
  }
  func.func @transform_4(%arg0: i32, %arg1: i32) -> (i32, i32) {
    %c0_i32 = arith.constant 0 : i32
    return %arg0, %arg1 : i32, i32
  }
}

module attributes {stable_mosaic.version = 11 : i64} {
  func.func @_fused_matmul_single_k_kernel(%arg0: i32, %arg1: i32, %arg2: memref<256x640xbf16, #tpu.memory_space<vmem>>, %arg3: memref<640x128xbf16, #tpu.memory_space<vmem>>, %arg4: memref<1x128xf32, #tpu.memory_space<vmem>>, %arg5: memref<1x128xf32, #tpu.memory_space<vmem>>, %arg6: memref<256x128xbf16, #tpu.memory_space<vmem>>) attributes {dimension_semantics = [#tpu.dimension_semantics<parallel>, #tpu.dimension_semantics<parallel>], iteration_bounds = array<i64: 7, 1>, scalar_prefetch = 0 : i64, scratch_operands = 0 : i64, tpu.core_type = #tpu.core_type<tc>, window_params = [{transform_indices = @transform_0, window_bounds = array<i64: 256, 640>}, {transform_indices = @transform_1, window_bounds = array<i64: 640, 128>}, {transform_indices = @transform_2, window_bounds = array<i64: 1, 128>}, {transform_indices = @transform_3, window_bounds = array<i64: 1, 128>}, {transform_indices = @transform_4, window_bounds = array<i64: 256, 128>}]} {
    %c0 = arith.constant 0 : index
    %c0_0 = arith.constant 0 : index
    %0 = vector.load %arg2[%c0, %c0_0] : memref<256x640xbf16, #tpu.memory_space<vmem>>, vector<256x640xbf16>
    %c0_1 = arith.constant 0 : index
    %c0_2 = arith.constant 0 : index
    %1 = vector.load %arg3[%c0_1, %c0_2] : memref<640x128xbf16, #tpu.memory_space<vmem>>, vector<640x128xbf16>
    %cst = arith.constant dense<0.000000e+00> : vector<256x128xf32>
    %2 = tpu.matmul %0, %1, %cst {dimension_numbers = #tpu.dot_dimension_numbers<[1], [0], [0], [1], [0, 0, 1, 1], [], []>} : vector<256x640xbf16>, vector<640x128xbf16>, vector<256x128xf32> -> vector<256x128xf32>
    %c0_3 = arith.constant 0 : index
    %c0_4 = arith.constant 0 : index
    %3 = vector.load %arg4[%c0_3, %c0_4] : memref<1x128xf32, #tpu.memory_space<vmem>>, vector<1x128xf32>
    %4 = vector.broadcast %3 : vector<1x128xf32> to vector<256x128xf32>
    %5 = arith.mulf %2, %4 : vector<256x128xf32>
    %c0_5 = arith.constant 0 : index
    %c0_6 = arith.constant 0 : index
    %6 = vector.load %arg5[%c0_5, %c0_6] : memref<1x128xf32, #tpu.memory_space<vmem>>, vector<1x128xf32>
    %7 = vector.broadcast %6 : vector<1x128xf32> to vector<256x128xf32>
    %8 = arith.addf %5, %7 : vector<256x128xf32>
    %cst_7 = arith.constant 0.000000e+00 : f32
    %9 = vector.broadcast %cst_7 : f32 to vector<256x128xf32>
    %10 = arith.maximumf %8, %9 : vector<256x128xf32>
    %11 = arith.truncf %10 : vector<256x128xf32> to vector<256x128xbf16>
    %c0_8 = arith.constant 0 : index
    %c0_9 = arith.constant 0 : index
    %12 = vector.load %arg6[%c0_8, %c0_9] : memref<256x128xbf16, #tpu.memory_space<vmem>>, vector<256x128xbf16>
    tpu.vector_store %arg6[%c0_8, %c0_9], %11 {strides = array<i32>} : memref<256x128xbf16, #tpu.memory_space<vmem>>, vector<256x128xbf16>,
    return
  }
  func.func @transform_0(%arg0: i32, %arg1: i32) -> (i32, i32) {
    %c0_i32 = arith.constant 0 : i32
    %c0_i32_0 = arith.constant 0 : i32
    return %arg0, %c0_i32 : i32, i32
  }
  func.func @transform_1(%arg0: i32, %arg1: i32) -> (i32, i32) {
    %c0_i32 = arith.constant 0 : i32
    %c0_i32_0 = arith.constant 0 : i32
    return %c0_i32, %arg1 : i32, i32
  }
  func.func @transform_2(%arg0: i32, %arg1: i32) -> (i32, i32) {
    %c0_i32 = arith.constant 0 : i32
    %c0_i32_0 = arith.constant 0 : i32
    return %c0_i32, %arg1 : i32, i32
  }
  func.func @transform_3(%arg0: i32, %arg1: i32) -> (i32, i32) {
    %c0_i32 = arith.constant 0 : i32
    %c0_i32_0 = arith.constant 0 : i32
    return %c0_i32, %arg1 : i32, i32
  }
  func.func @transform_4(%arg0: i32, %arg1: i32) -> (i32, i32) {
    %c0_i32 = arith.constant 0 : i32
    return %arg0, %arg1 : i32, i32
  }
}

module attributes {stable_mosaic.version = 11 : i64} {
  func.func @_fused_matmul_single_k_kernel(%arg0: i32, %arg1: i32, %arg2: memref<256x640xbf16, #tpu.memory_space<vmem>>, %arg3: memref<640x128xbf16, #tpu.memory_space<vmem>>, %arg4: memref<1x128xf32, #tpu.memory_space<vmem>>, %arg5: memref<1x128xf32, #tpu.memory_space<vmem>>, %arg6: memref<256x128xbf16, #tpu.memory_space<vmem>>) attributes {dimension_semantics = [#tpu.dimension_semantics<parallel>, #tpu.dimension_semantics<parallel>], iteration_bounds = array<i64: 6, 1>, scalar_prefetch = 0 : i64, scratch_operands = 0 : i64, tpu.core_type = #tpu.core_type<tc>, window_params = [{transform_indices = @transform_0, window_bounds = array<i64: 256, 640>}, {transform_indices = @transform_1, window_bounds = array<i64: 640, 128>}, {transform_indices = @transform_2, window_bounds = array<i64: 1, 128>}, {transform_indices = @transform_3, window_bounds = array<i64: 1, 128>}, {transform_indices = @transform_4, window_bounds = array<i64: 256, 128>}]} {
    %c0 = arith.constant 0 : index
    %c0_0 = arith.constant 0 : index
    %0 = vector.load %arg2[%c0, %c0_0] : memref<256x640xbf16, #tpu.memory_space<vmem>>, vector<256x640xbf16>
    %c0_1 = arith.constant 0 : index
    %c0_2 = arith.constant 0 : index
    %1 = vector.load %arg3[%c0_1, %c0_2] : memref<640x128xbf16, #tpu.memory_space<vmem>>, vector<640x128xbf16>
    %cst = arith.constant dense<0.000000e+00> : vector<256x128xf32>
    %2 = tpu.matmul %0, %1, %cst {dimension_numbers = #tpu.dot_dimension_numbers<[1], [0], [0], [1], [0, 0, 1, 1], [], []>} : vector<256x640xbf16>, vector<640x128xbf16>, vector<256x128xf32> -> vector<256x128xf32>
    %c0_3 = arith.constant 0 : index
    %c0_4 = arith.constant 0 : index
    %3 = vector.load %arg4[%c0_3, %c0_4] : memref<1x128xf32, #tpu.memory_space<vmem>>, vector<1x128xf32>
    %4 = vector.broadcast %3 : vector<1x128xf32> to vector<256x128xf32>
    %5 = arith.mulf %2, %4 : vector<256x128xf32>
    %c0_5 = arith.constant 0 : index
    %c0_6 = arith.constant 0 : index
    %6 = vector.load %arg5[%c0_5, %c0_6] : memref<1x128xf32, #tpu.memory_space<vmem>>, vector<1x128xf32>
    %7 = vector.broadcast %6 : vector<1x128xf32> to vector<256x128xf32>
    %8 = arith.addf %5, %7 : vector<256x128xf32>
    %cst_7 = arith.constant 0.000000e+00 : f32
    %9 = vector.broadcast %cst_7 : f32 to vector<256x128xf32>
    %10 = arith.maximumf %8, %9 : vector<256x128xf32>
    %11 = arith.truncf %10 : vector<256x128xf32> to vector<256x128xbf16>
    %c0_8 = arith.constant 0 : index
    %c0_9 = arith.constant 0 : index
    %12 = vector.load %arg6[%c0_8, %c0_9] : memref<256x128xbf16, #tpu.memory_space<vmem>>, vector<256x128xbf16>
    tpu.vector_store %arg6[%c0_8, %c0_9], %11 {strides = array<i32>} : memref<256x128xbf16, #tpu.memory_space<vmem>>, vector<256x128xbf16>,
    return
  }
  func.func @transform_0(%arg0: i32, %arg1: i32) -> (i32, i32) {
    %c0_i32 = arith.constant 0 : i32
    %c0_i32_0 = arith.constant 0 : i32
    return %arg0, %c0_i32 : i32, i32
  }
  func.func @transform_1(%arg0: i32, %arg1: i32) -> (i32, i32) {
    %c0_i32 = arith.constant 0 : i32
    %c0_i32_0 = arith.constant 0 : i32
    return %c0_i32, %arg1 : i32, i32
  }
  func.func @transform_2(%arg0: i32, %arg1: i32) -> (i32, i32) {
    %c0_i32 = arith.constant 0 : i32
    %c0_i32_0 = arith.constant 0 : i32
    return %c0_i32, %arg1 : i32, i32
  }
  func.func @transform_3(%arg0: i32, %arg1: i32) -> (i32, i32) {
    %c0_i32 = arith.constant 0 : i32
    %c0_i32_0 = arith.constant 0 : i32
    return %c0_i32, %arg1 : i32, i32
  }
  func.func @transform_4(%arg0: i32, %arg1: i32) -> (i32, i32) {
    %c0_i32 = arith.constant 0 : i32
    return %arg0, %arg1 : i32, i32
  }
}

module attributes {stable_mosaic.version = 11 : i64} {
  func.func @_fused_matmul_single_k_kernel(%arg0: i32, %arg1: i32, %arg2: memref<256x1152xbf16, #tpu.memory_space<vmem>>, %arg3: memref<1152x128xbf16, #tpu.memory_space<vmem>>, %arg4: memref<1x128xf32, #tpu.memory_space<vmem>>, %arg5: memref<1x128xf32, #tpu.memory_space<vmem>>, %arg6: memref<256x128xbf16, #tpu.memory_space<vmem>>) attributes {dimension_semantics = [#tpu.dimension_semantics<parallel>, #tpu.dimension_semantics<parallel>], iteration_bounds = array<i64: 5, 1>, scalar_prefetch = 0 : i64, scratch_operands = 0 : i64, tpu.core_type = #tpu.core_type<tc>, window_params = [{transform_indices = @transform_0, window_bounds = array<i64: 256, 1152>}, {transform_indices = @transform_1, window_bounds = array<i64: 1152, 128>}, {transform_indices = @transform_2, window_bounds = array<i64: 1, 128>}, {transform_indices = @transform_3, window_bounds = array<i64: 1, 128>}, {transform_indices = @transform_4, window_bounds = array<i64: 256, 128>}]} {
    %c0 = arith.constant 0 : index
    %c0_0 = arith.constant 0 : index
    %0 = vector.load %arg2[%c0, %c0_0] : memref<256x1152xbf16, #tpu.memory_space<vmem>>, vector<256x1152xbf16>
    %c0_1 = arith.constant 0 : index
    %c0_2 = arith.constant 0 : index
    %1 = vector.load %arg3[%c0_1, %c0_2] : memref<1152x128xbf16, #tpu.memory_space<vmem>>, vector<1152x128xbf16>
    %cst = arith.constant dense<0.000000e+00> : vector<256x128xf32>
    %2 = tpu.matmul %0, %1, %cst {dimension_numbers = #tpu.dot_dimension_numbers<[1], [0], [0], [1], [0, 0, 1, 1], [], []>} : vector<256x1152xbf16>, vector<1152x128xbf16>, vector<256x128xf32> -> vector<256x128xf32>
    %c0_3 = arith.constant 0 : index
    %c0_4 = arith.constant 0 : index
    %3 = vector.load %arg4[%c0_3, %c0_4] : memref<1x128xf32, #tpu.memory_space<vmem>>, vector<1x128xf32>
    %4 = vector.broadcast %3 : vector<1x128xf32> to vector<256x128xf32>
    %5 = arith.mulf %2, %4 : vector<256x128xf32>
    %c0_5 = arith.constant 0 : index
    %c0_6 = arith.constant 0 : index
    %6 = vector.load %arg5[%c0_5, %c0_6] : memref<1x128xf32, #tpu.memory_space<vmem>>, vector<1x128xf32>
    %7 = vector.broadcast %6 : vector<1x128xf32> to vector<256x128xf32>
    %8 = arith.addf %5, %7 : vector<256x128xf32>
    %cst_7 = arith.constant 0.000000e+00 : f32
    %9 = vector.broadcast %cst_7 : f32 to vector<256x128xf32>
    %10 = arith.maximumf %8, %9 : vector<256x128xf32>
    %11 = arith.truncf %10 : vector<256x128xf32> to vector<256x128xbf16>
    %c0_8 = arith.constant 0 : index
    %c0_9 = arith.constant 0 : index
    %12 = vector.load %arg6[%c0_8, %c0_9] : memref<256x128xbf16, #tpu.memory_space<vmem>>, vector<256x128xbf16>
    tpu.vector_store %arg6[%c0_8, %c0_9], %11 {strides = array<i32>} : memref<256x128xbf16, #tpu.memory_space<vmem>>, vector<256x128xbf16>,
    return
  }
  func.func @transform_0(%arg0: i32, %arg1: i32) -> (i32, i32) {
    %c0_i32 = arith.constant 0 : i32
    %c0_i32_0 = arith.constant 0 : i32
    return %arg0, %c0_i32 : i32, i32
  }
  func.func @transform_1(%arg0: i32, %arg1: i32) -> (i32, i32) {
    %c0_i32 = arith.constant 0 : i32
    %c0_i32_0 = arith.constant 0 : i32
    return %c0_i32, %arg1 : i32, i32
  }
  func.func @transform_2(%arg0: i32, %arg1: i32) -> (i32, i32) {
    %c0_i32 = arith.constant 0 : i32
    %c0_i32_0 = arith.constant 0 : i32
    return %c0_i32, %arg1 : i32, i32
  }
  func.func @transform_3(%arg0: i32, %arg1: i32) -> (i32, i32) {
    %c0_i32 = arith.constant 0 : i32
    %c0_i32_0 = arith.constant 0 : i32
    return %c0_i32, %arg1 : i32, i32
  }
  func.func @transform_4(%arg0: i32, %arg1: i32) -> (i32, i32) {
    %c0_i32 = arith.constant 0 : i32
    return %arg0, %arg1 : i32, i32
  }
}

module attributes {stable_mosaic.version = 11 : i64} {
  func.func @_fused_matmul_multi_k_kernel(%arg0: i32, %arg1: i32, %arg2: i32, %arg3: memref<8x4096xbf16, #tpu.memory_space<vmem>>, %arg4: memref<4096x512xbf16, #tpu.memory_space<vmem>>, %arg5: memref<1x512xf32, #tpu.memory_space<vmem>>, %arg6: memref<1x512xf32, #tpu.memory_space<vmem>>, %arg7: memref<8x512xbf16, #tpu.memory_space<vmem>>, %arg8: memref<8x512xf32, #tpu.memory_space<vmem>>) attributes {dimension_semantics = [#tpu.dimension_semantics<parallel>, #tpu.dimension_semantics<parallel>, #tpu.dimension_semantics<arbitrary>], iteration_bounds = array<i64: 1, 1, 18>, scalar_prefetch = 0 : i64, scratch_operands = 1 : i64, tpu.core_type = #tpu.core_type<tc>, window_params = [{transform_indices = @transform_0, window_bounds = array<i64: 8, 4096>}, {transform_indices = @transform_1, window_bounds = array<i64: 4096, 512>}, {transform_indices = @transform_2, window_bounds = array<i64: 1, 512>}, {transform_indices = @transform_3, window_bounds = array<i64: 1, 512>}, {transform_indices = @transform_4, window_bounds = array<i64: 8, 512>}]} {
    %c0_i32 = arith.constant 0 : i32
    %0 = arith.cmpi eq, %arg2, %c0_i32 : i32
    %1 = arith.extui %0 : i1 to i32
    %c0_i32_0 = arith.constant 0 : i32
    %2 = arith.cmpi ne, %1, %c0_i32_0 : i32
    scf.if %2 {
      %cst_9 = arith.constant 0.000000e+00 : f32
      %12 = vector.broadcast %cst_9 : f32 to vector<8x512xf32>
      %c0_10 = arith.constant 0 : index
      %c0_11 = arith.constant 0 : index
      %13 = vector.load %arg8[%c0_10, %c0_11] : memref<8x512xf32, #tpu.memory_space<vmem>>, vector<8x512xf32>
      tpu.vector_store %arg8[%c0_10, %c0_11], %12 {strides = array<i32>} : memref<8x512xf32, #tpu.memory_space<vmem>>, vector<8x512xf32>,
    } else {
    }
    %c0 = arith.constant 0 : index
    %c0_1 = arith.constant 0 : index
    %3 = vector.load %arg8[%c0, %c0_1] : memref<8x512xf32, #tpu.memory_space<vmem>>, vector<8x512xf32>
    %c0_2 = arith.constant 0 : index
    %c0_3 = arith.constant 0 : index
    %4 = vector.load %arg3[%c0_2, %c0_3] : memref<8x4096xbf16, #tpu.memory_space<vmem>>, vector<8x4096xbf16>
    %c0_4 = arith.constant 0 : index
    %c0_5 = arith.constant 0 : index
    %5 = vector.load %arg4[%c0_4, %c0_5] : memref<4096x512xbf16, #tpu.memory_space<vmem>>, vector<4096x512xbf16>
    %cst = arith.constant dense<0.000000e+00> : vector<8x512xf32>
    %6 = tpu.matmul %4, %5, %cst {dimension_numbers = #tpu.dot_dimension_numbers<[1], [0], [0], [1], [0, 0, 1, 1], [], []>} : vector<8x4096xbf16>, vector<4096x512xbf16>, vector<8x512xf32> -> vector<8x512xf32>
    %7 = arith.addf %3, %6 : vector<8x512xf32>
    %c0_6 = arith.constant 0 : index
    %c0_7 = arith.constant 0 : index
    %8 = vector.load %arg8[%c0_6, %c0_7] : memref<8x512xf32, #tpu.memory_space<vmem>>, vector<8x512xf32>
    tpu.vector_store %arg8[%c0_6, %c0_7], %7 {strides = array<i32>} : memref<8x512xf32, #tpu.memory_space<vmem>>, vector<8x512xf32>,
    %c17_i32 = arith.constant 17 : i32
    %9 = arith.cmpi eq, %arg2, %c17_i32 : i32
    %10 = arith.extui %9 : i1 to i32
    %c0_i32_8 = arith.constant 0 : i32
    %11 = arith.cmpi ne, %10, %c0_i32_8 : i32
    scf.if %11 {
      %c0_9 = arith.constant 0 : index
      %c0_10 = arith.constant 0 : index
      %12 = vector.load %arg8[%c0_9, %c0_10] : memref<8x512xf32, #tpu.memory_space<vmem>>, vector<8x512xf32>
      %c0_11 = arith.constant 0 : index
      %c0_12 = arith.constant 0 : index
      %13 = vector.load %arg5[%c0_11, %c0_12] : memref<1x512xf32, #tpu.memory_space<vmem>>, vector<1x512xf32>
      %14 = vector.broadcast %13 : vector<1x512xf32> to vector<8x512xf32>
      %15 = arith.mulf %12, %14 : vector<8x512xf32>
      %c0_13 = arith.constant 0 : index
      %c0_14 = arith.constant 0 : index
      %16 = vector.load %arg6[%c0_13, %c0_14] : memref<1x512xf32, #tpu.memory_space<vmem>>, vector<1x512xf32>
      %17 = vector.broadcast %16 : vector<1x512xf32> to vector<8x512xf32>
      %18 = arith.addf %15, %17 : vector<8x512xf32>
      %cst_15 = arith.constant 0.000000e+00 : f32
      %19 = vector.broadcast %cst_15 : f32 to vector<8x512xf32>
      %20 = arith.maximumf %18, %19 : vector<8x512xf32>
      %21 = arith.truncf %20 : vector<8x512xf32> to vector<8x512xbf16>
      %c0_16 = arith.constant 0 : index
      %c0_17 = arith.constant 0 : index
      %22 = vector.load %arg7[%c0_16, %c0_17] : memref<8x512xbf16, #tpu.memory_space<vmem>>, vector<8x512xbf16>
      tpu.vector_store %arg7[%c0_16, %c0_17], %21 {strides = array<i32>} : memref<8x512xbf16, #tpu.memory_space<vmem>>, vector<8x512xbf16>,
    } else {
    }
    return
  }
  func.func @transform_0(%arg0: i32, %arg1: i32, %arg2: i32) -> (i32, i32) {
    %c0_i32 = arith.constant 0 : i32
    return %arg0, %arg2 : i32, i32
  }
  func.func @transform_1(%arg0: i32, %arg1: i32, %arg2: i32) -> (i32, i32) {
    %c0_i32 = arith.constant 0 : i32
    return %arg2, %arg1 : i32, i32
  }
  func.func @transform_2(%arg0: i32, %arg1: i32, %arg2: i32) -> (i32, i32) {
    %c0_i32 = arith.constant 0 : i32
    %c0_i32_0 = arith.constant 0 : i32
    return %c0_i32, %arg1 : i32, i32
  }
  func.func @transform_3(%arg0: i32, %arg1: i32, %arg2: i32) -> (i32, i32) {
    %c0_i32 = arith.constant 0 : i32
    %c0_i32_0 = arith.constant 0 : i32
    return %c0_i32, %arg1 : i32, i32
  }
  func.func @transform_4(%arg0: i32, %arg1: i32, %arg2: i32) -> (i32, i32) {
    %c0_i32 = arith.constant 0 : i32
    return %arg0, %arg1 : i32, i32
  }
}

module attributes {stable_mosaic.version = 11 : i64} {
  func.func @_fused_matmul_single_k_kernel(%arg0: i32, %arg1: i32, %arg2: memref<8x512xbf16, #tpu.memory_space<vmem>>, %arg3: memref<512x512xbf16, #tpu.memory_space<vmem>>, %arg4: memref<1x512xf32, #tpu.memory_space<vmem>>, %arg5: memref<1x512xf32, #tpu.memory_space<vmem>>, %arg6: memref<8x512xbf16, #tpu.memory_space<vmem>>) attributes {dimension_semantics = [#tpu.dimension_semantics<parallel>, #tpu.dimension_semantics<parallel>], iteration_bounds = array<i64: 1, 1>, scalar_prefetch = 0 : i64, scratch_operands = 0 : i64, tpu.core_type = #tpu.core_type<tc>, window_params = [{transform_indices = @transform_0, window_bounds = array<i64: 8, 512>}, {transform_indices = @transform_1, window_bounds = array<i64: 512, 512>}, {transform_indices = @transform_2, window_bounds = array<i64: 1, 512>}, {transform_indices = @transform_3, window_bounds = array<i64: 1, 512>}, {transform_indices = @transform_4, window_bounds = array<i64: 8, 512>}]} {
    %c0 = arith.constant 0 : index
    %c0_0 = arith.constant 0 : index
    %0 = vector.load %arg2[%c0, %c0_0] : memref<8x512xbf16, #tpu.memory_space<vmem>>, vector<8x512xbf16>
    %c0_1 = arith.constant 0 : index
    %c0_2 = arith.constant 0 : index
    %1 = vector.load %arg3[%c0_1, %c0_2] : memref<512x512xbf16, #tpu.memory_space<vmem>>, vector<512x512xbf16>
    %cst = arith.constant dense<0.000000e+00> : vector<8x512xf32>
    %2 = tpu.matmul %0, %1, %cst {dimension_numbers = #tpu.dot_dimension_numbers<[1], [0], [0], [1], [0, 0, 1, 1], [], []>} : vector<8x512xbf16>, vector<512x512xbf16>, vector<8x512xf32> -> vector<8x512xf32>
    %c0_3 = arith.constant 0 : index
    %c0_4 = arith.constant 0 : index
    %3 = vector.load %arg4[%c0_3, %c0_4] : memref<1x512xf32, #tpu.memory_space<vmem>>, vector<1x512xf32>
    %4 = vector.broadcast %3 : vector<1x512xf32> to vector<8x512xf32>
    %5 = arith.mulf %2, %4 : vector<8x512xf32>
    %c0_5 = arith.constant 0 : index
    %c0_6 = arith.constant 0 : index
    %6 = vector.load %arg5[%c0_5, %c0_6] : memref<1x512xf32, #tpu.memory_space<vmem>>, vector<1x512xf32>
    %7 = vector.broadcast %6 : vector<1x512xf32> to vector<8x512xf32>
    %8 = arith.addf %5, %7 : vector<8x512xf32>
    %cst_7 = arith.constant 0.000000e+00 : f32
    %9 = vector.broadcast %cst_7 : f32 to vector<8x512xf32>
    %10 = arith.maximumf %8, %9 : vector<8x512xf32>
    %11 = arith.truncf %10 : vector<8x512xf32> to vector<8x512xbf16>
    %c0_8 = arith.constant 0 : index
    %c0_9 = arith.constant 0 : index
    %12 = vector.load %arg6[%c0_8, %c0_9] : memref<8x512xbf16, #tpu.memory_space<vmem>>, vector<8x512xbf16>
    tpu.vector_store %arg6[%c0_8, %c0_9], %11 {strides = array<i32>} : memref<8x512xbf16, #tpu.memory_space<vmem>>, vector<8x512xbf16>,
    return
  }
  func.func @transform_0(%arg0: i32, %arg1: i32) -> (i32, i32) {
    %c0_i32 = arith.constant 0 : i32
    %c0_i32_0 = arith.constant 0 : i32
    return %arg0, %c0_i32 : i32, i32
  }
  func.func @transform_1(%arg0: i32, %arg1: i32) -> (i32, i32) {
    %c0_i32 = arith.constant 0 : i32
    %c0_i32_0 = arith.constant 0 : i32
    return %c0_i32, %arg1 : i32, i32
  }
  func.func @transform_2(%arg0: i32, %arg1: i32) -> (i32, i32) {
    %c0_i32 = arith.constant 0 : i32
    %c0_i32_0 = arith.constant 0 : i32
    return %c0_i32, %arg1 : i32, i32
  }
  func.func @transform_3(%arg0: i32, %arg1: i32) -> (i32, i32) {
    %c0_i32 = arith.constant 0 : i32
    %c0_i32_0 = arith.constant 0 : i32
    return %c0_i32, %arg1 : i32, i32
  }
  func.func @transform_4(%arg0: i32, %arg1: i32) -> (i32, i32) {
    %c0_i32 = arith.constant 0 : i32
    return %arg0, %arg1 : i32, i32
  }
}

module attributes {stable_mosaic.version = 11 : i64} {
  func.func @_fused_matmul_single_k_kernel(%arg0: i32, %arg1: i32, %arg2: memref<8x512xbf16, #tpu.memory_space<vmem>>, %arg3: memref<512x128xbf16, #tpu.memory_space<vmem>>, %arg4: memref<1x128xf32, #tpu.memory_space<vmem>>, %arg5: memref<1x128xf32, #tpu.memory_space<vmem>>, %arg6: memref<8x128xf32, #tpu.memory_space<vmem>>) attributes {dimension_semantics = [#tpu.dimension_semantics<parallel>, #tpu.dimension_semantics<parallel>], iteration_bounds = array<i64: 1, 1>, scalar_prefetch = 0 : i64, scratch_operands = 0 : i64, tpu.core_type = #tpu.core_type<tc>, window_params = [{transform_indices = @transform_0, window_bounds = array<i64: 8, 512>}, {transform_indices = @transform_1, window_bounds = array<i64: 512, 128>}, {transform_indices = @transform_2, window_bounds = array<i64: 1, 128>}, {transform_indices = @transform_3, window_bounds = array<i64: 1, 128>}, {transform_indices = @transform_4, window_bounds = array<i64: 8, 128>}]} {
    %c0 = arith.constant 0 : index
    %c0_0 = arith.constant 0 : index
    %0 = vector.load %arg2[%c0, %c0_0] : memref<8x512xbf16, #tpu.memory_space<vmem>>, vector<8x512xbf16>
    %c0_1 = arith.constant 0 : index
    %c0_2 = arith.constant 0 : index
    %1 = vector.load %arg3[%c0_1, %c0_2] : memref<512x128xbf16, #tpu.memory_space<vmem>>, vector<512x128xbf16>
    %cst = arith.constant dense<0.000000e+00> : vector<8x128xf32>
    %2 = tpu.matmul %0, %1, %cst {dimension_numbers = #tpu.dot_dimension_numbers<[1], [0], [0], [1], [0, 0, 1, 1], [], []>} : vector<8x512xbf16>, vector<512x128xbf16>, vector<8x128xf32> -> vector<8x128xf32>
    %c0_3 = arith.constant 0 : index
    %c0_4 = arith.constant 0 : index
    %3 = vector.load %arg4[%c0_3, %c0_4] : memref<1x128xf32, #tpu.memory_space<vmem>>, vector<1x128xf32>
    %4 = vector.broadcast %3 : vector<1x128xf32> to vector<8x128xf32>
    %5 = arith.mulf %2, %4 : vector<8x128xf32>
    %c0_5 = arith.constant 0 : index
    %c0_6 = arith.constant 0 : index
    %6 = vector.load %arg5[%c0_5, %c0_6] : memref<1x128xf32, #tpu.memory_space<vmem>>, vector<1x128xf32>
    %7 = vector.broadcast %6 : vector<1x128xf32> to vector<8x128xf32>
    %8 = arith.addf %5, %7 : vector<8x128xf32>
    %c0_7 = arith.constant 0 : index
    %c0_8 = arith.constant 0 : index
    %9 = vector.load %arg6[%c0_7, %c0_8] : memref<8x128xf32, #tpu.memory_space<vmem>>, vector<8x128xf32>
    tpu.vector_store %arg6[%c0_7, %c0_8], %8 {strides = array<i32>} : memref<8x128xf32, #tpu.memory_space<vmem>>, vector<8x128xf32>,
    return
  }
  func.func @transform_0(%arg0: i32, %arg1: i32) -> (i32, i32) {
    %c0_i32 = arith.constant 0 : i32
    %c0_i32_0 = arith.constant 0 : i32
    return %arg0, %c0_i32 : i32, i32
  }
  func.func @transform_1(%arg0: i32, %arg1: i32) -> (i32, i32) {
    %c0_i32 = arith.constant 0 : i32
    %c0_i32_0 = arith.constant 0 : i32
    return %c0_i32, %arg1 : i32, i32
  }
  func.func @transform_2(%arg0: i32, %arg1: i32) -> (i32, i32) {
    %c0_i32 = arith.constant 0 : i32
    %c0_i32_0 = arith.constant 0 : i32
    return %c0_i32, %arg1 : i32, i32
  }
  func.func @transform_3(%arg0: i32, %arg1: i32) -> (i32, i32) {
    %c0_i32 = arith.constant 0 : i32
    %c0_i32_0 = arith.constant 0 : i32
    return %c0_i32, %arg1 : i32, i32
  }
  func.func @transform_4(%arg0: i32, %arg1: i32) -> (i32, i32) {
    %c0_i32 = arith.constant 0 : i32
    return %arg0, %arg1 : i32, i32
  }
}

</mosaic_0001>

<bundles_post_ra>
// kernel: two_step_vgg_forward.7
= control target key start
LH: loop header
LB: loop body
LE: loop exit
PB: predicated region body
PF: predicated region fallthrough
CT: control target
= control target key end

     0   :  { %s1388_s15 = smov 0   ;;  %s1390_s16 = smov 0   ;;  %s1562_s0 = inlined_call_operand.vmem [shape: bf16[2048,128], index: 0, kind: input, shape index: {}]   ;;  %s1563_s1 = inlined_call_operand.vmem [shape: bf16[128,128], index: 1, kind: input, shape index: {}]   ;;  %s1564_s2 = inlined_call_operand.vmem [shape: f32[1,128], index: 2, kind: input, shape index: {}]   ;;  %s1565_s3 = inlined_call_operand.vmem [shape: f32[1,128], index: 3, kind: input, shape index: {}]   ;;  %s1566_s4 = inlined_call_operand.vmem [shape: bf16[2048,128], index: 4, kind: output, shape index: {}]  }
   0x1   :  { %s1392_s17 = smov 0  }
   0x2 LB: > { %s26_s18 = sadd.s32 1, %s1357_s16  ;;  %p1011_p0 = scmp.ge.s32.totalorder %s1361_s17, 1  ;;  %s1361_s17 = sphi %s1392_s17, %s14_s17   ;;  %s1357_s16 = sphi %s1390_s16, %s1568_s16   ;;  %s1353_s15 = sphi %s1388_s15, %s1567_s15  }
   0x3   : > { %p28_p1 = scmp.ge.s32.totalorder %s26_s18, 8  ;;  %p202_p2 = scmp.lt.s32.totalorder %s1361_s17, 9 }
   0x5   : > { %s1570_s18 = smov (%p28_p1, %s26_s18), 0  ;;  %p203_p3 = pnand %p1011_p0, %p202_p2 }
   0x6   : > { %s1012_s21 = sshll.u32 (!%p203_p3), %s1353_s15, 5 }
   0x7   : > { %206 = sbr.rel (%p203_p3) target bundleno = 277 (0x115), region = 36  ;;  %p242_p4 = scmp.lt.s32.totalorder (!%p203_p3), %s1012_s21, 255 }
   0xc   : > { %v1315_v0 = vld [vmem:[%s1563_s1 + $0x38] sm:$0xff]   ;;  %v1316_v1 = vld [vmem:[%s1563_s1 + $0x30] sm:$0xff]   ;;  %s1572_s21 = smov (!%p242_p4, %s1012_s21), 255  ;;  %v1317_v2 = vld [vmem:[%s1563_s1 + $0x28] sm:$0xff]  }
   0xd   : > { %1227 = vmatprep.subr.bf16.mxu0 %v1315_v0  ;;  %1275 = vmatprep.subr.bf16.mxu1 %v1315_v0  ;;  %s1013_s26 = sshll.u32 %s1572_s21, 2  ;;  %v1318_v3 = vld [vmem:[%s1563_s1 + $0x20] sm:$0xff]   ;;  %v1319_v6 = vld [vmem:[%s1563_s1 + $0x18] sm:$0xff]   ;;  %v1320_v7 = vld [vmem:[%s1563_s1 + $0x10] sm:$0xff]  }
   0xe   : > { %1228 = vmatpush3.bf16.msra.mxu0 %v1315_v0  ;;  %1283 = vmatpush3.bf16.msra.mxu1 %v1315_v0  ;;  %s1423_s29 = scalar_lea.vmem %s1562_s0, %s1013_s26  ;;  %v1321_v8 = vld [vmem:[%s1563_s1 + $0x8] sm:$0xff]   ;;  %v1322_v9 = vld [vmem:[%s1563_s1] sm:$0xff]   ;;  %s1489_s24 = scalar_lea.vmem %s1566_s4, %s1013_s26 }
   0xf   : > { %1229 = vmatprep.subr.bf16.mxu0 %v1316_v1  ;;  %1276 = vmatprep.subr.bf16.mxu1 %v1316_v1  ;;  %v1323_v4 = vld [vmem:[%s1423_s29] sm:$0xff]   ;;  %v1325_v10 = vld [vmem:[%s1423_s29 + $0x8] sm:$0xff]   ;;  %v1327_v12 = vld [vmem:[%s1423_s29 + $0x10] sm:$0xff]  }
  0x10   : > { %v1324_v5 = vld [vmem:[%s1423_s29 + $0x40] sm:$0xff]   ;;  %1243 = vmatprep.mubr.bf16.mxu0 %v1323_v4  ;;  %v1326_v11 = vld [vmem:[%s1423_s29 + $0x48] sm:$0xff]   ;;  %v1328_v13 = vld [vmem:[%s1423_s29 + $0x50] sm:$0xff]  }
  0x11   : > { %1259 = vmatprep.mubr.bf16.mxu1 %v1324_v5  ;;  %v1329_v14 = vld [vmem:[%s1423_s29 + $0x18] sm:$0xff]   ;;  %v1331_v16 = vld [vmem:[%s1423_s29 + $0x20] sm:$0xff]   ;;  %v1333_v18 = vld [vmem:[%s1423_s29 + $0x28] sm:$0xff]  }
  0x12   : > { %1230 = vmatpush3.bf16.msra.mxu0 %v1316_v1  ;;  %1284 = vmatpush3.bf16.msra.mxu1 %v1316_v1  ;;  %v1330_v15 = vld [vmem:[%s1423_s29 + $0x58] sm:$0xff]   ;;  %v1332_v17 = vld [vmem:[%s1423_s29 + $0x60] sm:$0xff]   ;;  %v1334_v19 = vld [vmem:[%s1423_s29 + $0x68] sm:$0xff]  }
  0x13   : > { %1231 = vmatprep.subr.bf16.mxu0 %v1317_v2  ;;  %1277 = vmatprep.subr.bf16.mxu1 %v1317_v2  ;;  %v1335_v20 = vld [vmem:[%s1423_s29 + $0x30] sm:$0xff]   ;;  %v1337_v22 = vld [vmem:[%s1423_s29 + $0x38] sm:$0xff]   ;;  %v1459_v24 = vld [vmem:[%s1564_s2] ss:$0 sm:$0xff] }
  0x14   : > { %v1336_v21 = vld [vmem:[%s1423_s29 + $0x70] sm:$0xff]   ;;  %v1338_v23 = vld [vmem:[%s1423_s29 + $0x78] sm:$0xff]   ;;  %v1466_v29 = vld [vmem:[%s1565_s3] ss:$0 sm:$0xff] }
  0x16   : > { %1232 = vmatpush3.bf16.msra.mxu0 %v1317_v2  ;;  %1285 = vmatpush3.bf16.msra.mxu1 %v1317_v2 }
  0x17   : > { %1233 = vmatprep.subr.bf16.mxu0 %v1318_v3  ;;  %1278 = vmatprep.subr.bf16.mxu1 %v1318_v3 }
  0x1a   : > { %1234 = vmatpush3.bf16.msra.mxu0 %v1318_v3  ;;  %1286 = vmatpush3.bf16.msra.mxu1 %v1318_v3 }
  0x1b   : > { %1235 = vmatprep.subr.bf16.mxu0 %v1319_v6  ;;  %1279 = vmatprep.subr.bf16.mxu1 %v1319_v6 }
  0x1e   : > { %1236 = vmatpush3.bf16.msra.mxu0 %v1319_v6  ;;  %1287 = vmatpush3.bf16.msra.mxu1 %v1319_v6 }
  0x1f   : > { %1237 = vmatprep.subr.bf16.mxu0 %v1320_v7  ;;  %1280 = vmatprep.subr.bf16.mxu1 %v1320_v7 }
  0x22   : > { %1238 = vmatpush3.bf16.msra.mxu0 %v1320_v7  ;;  %1288 = vmatpush3.bf16.msra.mxu1 %v1320_v7 }
  0x23   : > { %1239 = vmatprep.subr.bf16.mxu0 %v1321_v8  ;;  %1281 = vmatprep.subr.bf16.mxu1 %v1321_v8 }
  0x26   : > { %1240 = vmatpush3.bf16.msra.mxu0 %v1321_v8  ;;  %1289 = vmatpush3.bf16.msra.mxu1 %v1321_v8 }
  0x27   : > { %1241 = vmatprep.subr.bf16.mxu0 %v1322_v9  ;;  %1282 = vmatprep.subr.bf16.mxu1 %v1322_v9 }
  0x2a   : > { %1242 = vmatpush3.bf16.msra.mxu0 %v1322_v9  ;;  %1290 = vmatpush3.bf16.msra.mxu1 %v1322_v9 }
  0x2d   : > { %1244 = vmatmul.mubr.bf16.vlgmr.msra.gmra.mxu0 %v1325_v10  ;;  %1260 = vmatmul.mubr.bf16.vlgmr.msra.gmra.mxu1 %v1326_v11 }
  0x2e   : > { %1247 = vmatprep.mubr.bf16.mxu0 %v1327_v12  ;;  %1263 = vmatprep.mubr.bf16.mxu1 %v1328_v13 }
  0x35   : > { %1248 = vmatmul.mubr.bf16.gmra.mxu0 %v1329_v14  ;;  %1264 = vmatmul.mubr.bf16.gmra.mxu1 %v1330_v15 }
  0x36   : > { %1251 = vmatprep.mubr.bf16.mxu0 %v1331_v16  ;;  %1267 = vmatprep.mubr.bf16.mxu1 %v1332_v17 }
  0x3d   : > { %1252 = vmatmul.mubr.bf16.gmra.mxu0 %v1333_v18  ;;  %1268 = vmatmul.mubr.bf16.gmra.mxu1 %v1334_v19 }
  0x3e   : > { %1255 = vmatprep.mubr.bf16.mxu0 %v1335_v20  ;;  %1271 = vmatprep.mubr.bf16.mxu1 %v1336_v21 }
  0x45   : > { %1256 = vmatmul.mubr.bf16.gmra.mxu0 %v1337_v22  ;;  %1272 = vmatmul.mubr.bf16.gmra.mxu1 %v1338_v23 }
  0xed   : > { %v1245_v25 = vpop.f32.mrf.mxu0  ;;  %v1261_v26 = vpop.f32.mrf.mxu1 }
  0xee   : > { %v629_v27 = vmul.f32 %v1245_v25, %v1459_v24  ;;  %v645_v28 = vmul.f32 %v1261_v26, %v1459_v24 }
  0xef   : > { %v493_v30 = vpop.f32.mrf.mxu0  ;;  %v557_v31 = vpop.f32.mrf.mxu1 }
  0xf0   : > { %v627_v32 = vmul.f32 %v1459_v24, %v493_v30  ;;  %v643_v33 = vmul.f32 %v1459_v24, %v557_v31  ;;  %v668_v36 = vadd.f32 %v1466_v29, %v629_v27  ;;  %v684_v37 = vadd.f32 %v1466_v29, %v645_v28 }
  0xf1   : > { %v1246_v34 = vpop.f32.mrf.mxu0  ;;  %v1262_v35 = vpop.f32.mrf.mxu1 }
  0xf2   : > { %v630_v38 = vmul.f32 %v1246_v34, %v1459_v24  ;;  %v646_v39 = vmul.f32 %v1262_v35, %v1459_v24  ;;  %v666_v42 = vadd.f32 %v1466_v29, %v627_v32  ;;  %v682_v43 = vadd.f32 %v1466_v29, %v643_v33 }
  0xf3   : > { %v496_v40 = vpop.f32.mrf.mxu0  ;;  %v560_v41 = vpop.f32.mrf.mxu1  ;;  %v700_v50 = vmax.f32 %v668_v36, 0.0  ;;  %v716_v51 = vmax.f32 %v684_v37, 0.0 }
  0xf4   : > { %v628_v44 = vmul.f32 %v1459_v24, %v496_v40  ;;  %v644_v45 = vmul.f32 %v1459_v24, %v560_v41  ;;  %v669_v46 = vadd.f32 %v1466_v29, %v630_v38  ;;  %v685_v47 = vadd.f32 %v1466_v29, %v646_v39 }
  0xf5   : > { %v1249_v48 = vpop.f32.mrf.mxu0  ;;  %v1265_v49 = vpop.f32.mrf.mxu1  ;;  %v698_v60 = vmax.f32 %v666_v42, 0.0  ;;  %v714_v61 = vmax.f32 %v682_v43, 0.0 }
  0xf6   : > { %v667_v52 = vadd.f32 %v1466_v29, %v628_v44  ;;  %v683_v53 = vadd.f32 %v1466_v29, %v644_v45  ;;  %v701_v54 = vmax.f32 %v669_v46, 0.0  ;;  %v717_v55 = vmax.f32 %v685_v47, 0.0 }
  0xf7   : > { %v633_v56 = vmul.f32 %v1249_v48, %v1459_v24  ;;  %v649_v57 = vmul.f32 %v1265_v49, %v1459_v24  ;;  %v509_v58 = vpop.f32.mrf.mxu0  ;;  %v573_v59 = vpop.f32.mrf.mxu1 }
  0xf8   : > { %v699_v62 = vmax.f32 %v667_v52, 0.0  ;;  %v715_v63 = vmax.f32 %v683_v53, 0.0  ;;  %v1116_v0 = vpack.c.bf16 %v701_v54, %v700_v50  ;;  %v1156_v1 = vpack.c.bf16 %v717_v55, %v716_v51 }
  0xf9   : > { %v631_v2 = vmul.f32 %v1459_v24, %v509_v58  ;;  %v647_v3 = vmul.f32 %v1459_v24, %v573_v59  ;;  %v1250_v4 = vpop.f32.mrf.mxu0  ;;  %v1266_v5 = vpop.f32.mrf.mxu1  ;;  %v672_v8 = vadd.f32 %v1466_v29, %v633_v56  ;;  %v688_v9 = vadd.f32 %v1466_v29, %v649_v57 }
  0xfa   : > { %v1111_v6 = vpack.c.bf16 %v699_v62, %v698_v60  ;;  %v1151_v7 = vpack.c.bf16 %v715_v63, %v714_v61  ;;  %1188 = vst [vmem:[%s1489_s24 + $0x8] sm:$0xff] %v1116_v0   ;;  %1196 = vst [vmem:[%s1489_s24 + $0x48] sm:$0xff] %v1156_v1   ;;  %v634_v10 = vmul.f32 %v1250_v4, %v1459_v24 }
  0xfb   : > { %v650_v11 = vmul.f32 %v1266_v5, %v1459_v24  ;;  %v512_v12 = vpop.f32.mrf.mxu0  ;;  %v576_v13 = vpop.f32.mrf.mxu1  ;;  %v670_v14 = vadd.f32 %v1466_v29, %v631_v2  ;;  %v686_v15 = vadd.f32 %v1466_v29, %v647_v3  ;;  %v704_v27 = vmax.f32 %v672_v8, 0.0 }
  0xfc   : > { %1112 = vst [vmem:[%s1489_s24] sm:$0xff] %v1111_v6   ;;  %1195 = vst [vmem:[%s1489_s24 + $0x40] sm:$0xff] %v1151_v7   ;;  %v632_v16 = vmul.f32 %v1459_v24, %v512_v12  ;;  %v648_v17 = vmul.f32 %v1459_v24, %v576_v13  ;;  %v673_v18 = vadd.f32 %v1466_v29, %v634_v10  ;;  %v720_v28 = vmax.f32 %v688_v9, 0.0 }
  0xfd   : > { %v689_v19 = vadd.f32 %v1466_v29, %v650_v11  ;;  %v1253_v20 = vpop.f32.mrf.mxu0  ;;  %v1269_v21 = vpop.f32.mrf.mxu1  ;;  %v702_v34 = vmax.f32 %v670_v14, 0.0  ;;  %v718_v35 = vmax.f32 %v686_v15, 0.0 }
  0xfe   : > { %v671_v22 = vadd.f32 %v1466_v29, %v632_v16  ;;  %v687_v23 = vadd.f32 %v1466_v29, %v648_v17  ;;  %v637_v25 = vmul.f32 %v1253_v20, %v1459_v24  ;;  %v653_v26 = vmul.f32 %v1269_v21, %v1459_v24 }
  0xff   : > { %v705_v30 = vmax.f32 %v673_v18, 0.0  ;;  %v721_v31 = vmax.f32 %v689_v19, 0.0  ;;  %v525_v32 = vpop.f32.mrf.mxu0  ;;  %v589_v33 = vpop.f32.mrf.mxu1 }
 0x100   : > { %v703_v36 = vmax.f32 %v671_v22, 0.0  ;;  %v719_v37 = vmax.f32 %v687_v23, 0.0  ;;  %v635_v40 = vmul.f32 %v1459_v24, %v525_v32  ;;  %v651_v41 = vmul.f32 %v1459_v24, %v589_v33 }
 0x101   : > { %v1126_v38 = vpack.c.bf16 %v705_v30, %v704_v27  ;;  %v1166_v39 = vpack.c.bf16 %v721_v31, %v720_v28  ;;  %v1254_v42 = vpop.f32.mrf.mxu0  ;;  %v1270_v43 = vpop.f32.mrf.mxu1  ;;  %v676_v46 = vadd.f32 %v1466_v29, %v637_v25  ;;  %v692_v47 = vadd.f32 %v1466_v29, %v653_v26 }
 0x102   : > { %v1121_v44 = vpack.c.bf16 %v703_v36, %v702_v34  ;;  %v1161_v45 = vpack.c.bf16 %v719_v37, %v718_v35  ;;  %v638_v48 = vmul.f32 %v1254_v42, %v1459_v24  ;;  %v654_v49 = vmul.f32 %v1270_v43, %v1459_v24 }
 0x103   : > { %1190 = vst [vmem:[%s1489_s24 + $0x18] sm:$0xff] %v1126_v38   ;;  %1198 = vst [vmem:[%s1489_s24 + $0x58] sm:$0xff] %v1166_v39   ;;  %v528_v50 = vpop.f32.mrf.mxu0  ;;  %v592_v51 = vpop.f32.mrf.mxu1  ;;  %v674_v52 = vadd.f32 %v1466_v29, %v635_v40  ;;  %v690_v53 = vadd.f32 %v1466_v29, %v651_v41  ;;  %v708_v60 = vmax.f32 %v676_v46, 0.0  ;;  %v724_v61 = vmax.f32 %v692_v47, 0.0 }
 0x104   : > { %1189 = vst [vmem:[%s1489_s24 + $0x10] sm:$0xff] %v1121_v44   ;;  %1197 = vst [vmem:[%s1489_s24 + $0x50] sm:$0xff] %v1161_v45   ;;  %v636_v54 = vmul.f32 %v1459_v24, %v528_v50  ;;  %v652_v55 = vmul.f32 %v1459_v24, %v592_v51  ;;  %v677_v56 = vadd.f32 %v1466_v29, %v638_v48 }
 0x105   : > { %v693_v57 = vadd.f32 %v1466_v29, %v654_v49  ;;  %v1257_v58 = vpop.f32.mrf.mxu0  ;;  %v1273_v59 = vpop.f32.mrf.mxu1  ;;  %v706_v6 = vmax.f32 %v674_v52, 0.0  ;;  %v722_v7 = vmax.f32 %v690_v53, 0.0 }
 0x106   : > { %v675_v62 = vadd.f32 %v1466_v29, %v636_v54  ;;  %v691_v63 = vadd.f32 %v1466_v29, %v652_v55  ;;  %v709_v0 = vmax.f32 %v677_v56, 0.0  ;;  %v641_v2 = vmul.f32 %v1257_v58, %v1459_v24 }
 0x107   : > { %v725_v1 = vmax.f32 %v693_v57, 0.0  ;;  %v657_v3 = vmul.f32 %v1273_v59, %v1459_v24  ;;  %v541_v4 = vpop.f32.mrf.mxu0  ;;  %v605_v5 = vpop.f32.mrf.mxu1 }
 0x108   : > { %v707_v8 = vmax.f32 %v675_v62, 0.0  ;;  %v723_v9 = vmax.f32 %v691_v63, 0.0  ;;  %v1136_v10 = vpack.c.bf16 %v709_v0, %v708_v60  ;;  %v639_v12 = vmul.f32 %v1459_v24, %v541_v4 }
 0x109   : > { %v1176_v11 = vpack.c.bf16 %v725_v1, %v724_v61  ;;  %v655_v13 = vmul.f32 %v1459_v24, %v605_v5  ;;  %v1258_v14 = vpop.f32.mrf.mxu0  ;;  %v1274_v15 = vpop.f32.mrf.mxu1  ;;  %v680_v18 = vadd.f32 %v1466_v29, %v641_v2  ;;  %v696_v19 = vadd.f32 %v1466_v29, %v657_v3 }
 0x10a   : > { %v1131_v16 = vpack.c.bf16 %v707_v8, %v706_v6  ;;  %v1171_v17 = vpack.c.bf16 %v723_v9, %v722_v7  ;;  %1192 = vst [vmem:[%s1489_s24 + $0x28] sm:$0xff] %v1136_v10   ;;  %v642_v20 = vmul.f32 %v1258_v14, %v1459_v24  ;;  %v658_v21 = vmul.f32 %v1274_v15, %v1459_v24 }
 0x10b   : > { %1200 = vst [vmem:[%s1489_s24 + $0x68] sm:$0xff] %v1176_v11   ;;  %v544_v22 = vpop.f32.mrf.mxu0  ;;  %v608_v23 = vpop.f32.mrf.mxu1  ;;  %v678_v25 = vadd.f32 %v1466_v29, %v639_v12  ;;  %v694_v26 = vadd.f32 %v1466_v29, %v655_v13  ;;  %v712_v34 = vmax.f32 %v680_v18, 0.0  ;;  %v728_v35 = vmax.f32 %v696_v19, 0.0 }
 0x10c   : > { %1191 = vst [vmem:[%s1489_s24 + $0x20] sm:$0xff] %v1131_v16   ;;  %1199 = vst [vmem:[%s1489_s24 + $0x60] sm:$0xff] %v1171_v17   ;;  %v640_v27 = vmul.f32 %v1459_v24, %v544_v22  ;;  %v656_v28 = vmul.f32 %v1459_v24, %v608_v23  ;;  %v681_v30 = vadd.f32 %v1466_v29, %v642_v20 }
 0x10d   : > { %v697_v31 = vadd.f32 %v1466_v29, %v658_v21  ;;  %v710_v38 = vmax.f32 %v678_v25, 0.0  ;;  %v726_v39 = vmax.f32 %v694_v26, 0.0 }
 0x10e   : > { %v679_v32 = vadd.f32 %v1466_v29, %v640_v27  ;;  %v695_v33 = vadd.f32 %v1466_v29, %v656_v28  ;;  %v713_v36 = vmax.f32 %v681_v30, 0.0 }
 0x10f   : > { %v729_v37 = vmax.f32 %v697_v31, 0.0 }
 0x110   : > { %v711_v40 = vmax.f32 %v679_v32, 0.0  ;;  %v727_v24 = vmax.f32 %v695_v33, 0.0  ;;  %v1146_v41 = vpack.c.bf16 %v713_v36, %v712_v34 }
 0x111   : > { %v1186_v42 = vpack.c.bf16 %v729_v37, %v728_v35 }
 0x112   : > { %v1141_v43 = vpack.c.bf16 %v711_v40, %v710_v38  ;;  %v1181_v44 = vpack.c.bf16 %v727_v24, %v726_v39  ;;  %1194 = vst [vmem:[%s1489_s24 + $0x38] sm:$0xff] %v1146_v41  }
 0x113   : > { %1202 = vst [vmem:[%s1489_s24 + $0x78] sm:$0xff] %v1186_v42  }
 0x114   : > { %1193 = vst [vmem:[%s1489_s24 + $0x30] sm:$0xff] %v1141_v43   ;;  %1201 = vst [vmem:[%s1489_s24 + $0x70] sm:$0xff] %v1181_v44  }
 0x115 PF: > { %s14_s17 = sadd.s32 1, %s1361_s17   ;;  %s1567_s15 = smov %s1357_s16 }
 0x116   : > { %p11_p5 = scmp.ge.s32.totalorder %s14_s17, 10   ;;  %s1568_s16 = smov %s1570_s18 }
 0x118   :  { %13 = sbr.rel (!%p11_p5) target bundleno = 2 (0x2), region = 75 }

// kernel: two_step_vgg_forward.8
= control target key start
LH: loop header
LB: loop body
LE: loop exit
PB: predicated region body
PF: predicated region fallthrough
CT: control target
= control target key end

     0   :  { %s2802_s15 = smov 0   ;;  %s2804_s16 = smov 0   ;;  %s3352_s0 = inlined_call_operand.vmem [shape: bf16[1792,640], index: 0, kind: input, shape index: {}]   ;;  %s3353_s1 = inlined_call_operand.vmem [shape: bf16[640,128], index: 1, kind: input, shape index: {}]   ;;  %s3354_s2 = inlined_call_operand.vmem [shape: f32[1,128], index: 2, kind: input, shape index: {}]   ;;  %s3355_s3 = inlined_call_operand.vmem [shape: f32[1,128], index: 3, kind: input, shape index: {}]   ;;  %s3356_s4 = inlined_call_operand.vmem [shape: bf16[1792,128], index: 4, kind: output, shape index: {}]  }
   0x1   :  { %s2806_s17 = smov 0  }
   0x2 LB: > { %s26_s18 = sadd.s32 1, %s2771_s16  ;;  %p1976_p0 = scmp.ge.s32.totalorder %s2775_s17, 1  ;;  %s2775_s17 = sphi %s2806_s17, %s14_s17   ;;  %s2771_s16 = sphi %s2804_s16, %s3398_s16   ;;  %s2767_s15 = sphi %s2802_s15, %s3397_s15  }
   0x3   : > { %p28_p1 = scmp.ge.s32.totalorder %s26_s18, 7  ;;  %p203_p2 = scmp.lt.s32.totalorder %s2775_s17, 8 }
   0x5   : > { %s3400_s18 = smov (%p28_p1, %s26_s18), 0  ;;  %p204_p3 = pnand %p1976_p0, %p203_p2 }
   0x7   : > { %207 = sbr.rel (%p204_p3) target bundleno = 411 (0x19b), region = 36 }
   0xc   : > { %v2601_v0 = vld [vmem:[%s3353_s1 + $0x78] sm:$0xff]   ;;  %s1977_s21 = sshll.u32 %s2767_s15, 5  ;;  %v2603_v2 = vld [vmem:[%s3353_s1 + $0x70] sm:$0xff]   ;;  %v2605_v4 = vld [vmem:[%s3353_s1 + $0x68] sm:$0xff]  }
   0xd   : > { %v2602_v1 = vld [vmem:[%s3353_s1 + $0x38] sm:$0xff]   ;;  %2264 = vmatprep.subr.bf16.mxu0 %v2601_v0  ;;  %2560 = vmatprep.subr.bf16.mxu1 %v2601_v0  ;;  %p244_p4 = scmp.lt.s32.totalorder %s1977_s21, 223  ;;  %v2604_v3 = vld [vmem:[%s3353_s1 + $0x30] sm:$0xff]   ;;  %v2606_v5 = vld [vmem:[%s3353_s1 + $0x28] sm:$0xff]  }
   0xe   : > { %2265 = vmatpush3.bf16.msra.mxu0 %v2602_v1  ;;  %2568 = vmatpush3.bf16.msra.mxu1 %v2602_v1  ;;  %v2607_v6 = vld [vmem:[%s3353_s1 + $0x60] sm:$0xff]   ;;  %v2609_v8 = vld [vmem:[%s3353_s1 + $0x58] sm:$0xff]   ;;  %v2611_v10 = vld [vmem:[%s3353_s1 + $0x50] sm:$0xff]  }
   0xf   : > { %2266 = vmatprep.subr.bf16.mxu0 %v2603_v2  ;;  %2561 = vmatprep.subr.bf16.mxu1 %v2603_v2  ;;  %s3402_s21 = smov (!%p244_p4, %s1977_s21), 223  ;;  %v2608_v7 = vld [vmem:[%s3353_s1 + $0x20] sm:$0xff]   ;;  %v2610_v9 = vld [vmem:[%s3353_s1 + $0x18] sm:$0xff]   ;;  %v2612_v13 = vld [vmem:[%s3353_s1 + $0x10] sm:$0xff]  }
  0x10   : > { %s2576_s8 = smul.u32 20, %s3402_s21  ;;  %v2613_v14 = vld [vmem:[%s3353_s1 + $0x48] sm:$0xff]   ;;  %v2615_v16 = vld [vmem:[%s3353_s1 + $0x40] sm:$0xff]   ;;  %v2623_v18 = vld [vmem:[%s3353_s1 + $0xf8] sm:$0xff]   ;;  %s1980_s22 = sshll.u32 %s3402_s21, 2 }
  0x11   : > { %v2614_v15 = vld [vmem:[%s3353_s1 + $0x8] sm:$0xff]   ;;  %v2616_v17 = vld [vmem:[%s3353_s1] sm:$0xff]   ;;  %v2626_v19 = vld [vmem:[%s3353_s1 + $0x138] sm:$0xff]   ;;  %s3197_s24 = scalar_lea.vmem %s3356_s4, %s1980_s22 }
  0x12   : > { %2267 = vmatpush3.bf16.msra.mxu0 %v2604_v3  ;;  %2569 = vmatpush3.bf16.msra.mxu1 %v2604_v3  ;;  %s2853_s15 = scalar_lea.vmem %s3352_s0, %s2576_s8  ;;  %v2624_v22 = vld [vmem:[%s3353_s1 + $0xb8] sm:$0xff]   ;;  %v2625_v23 = vld [vmem:[%s3353_s1 + $0xf0] sm:$0xff]   ;;  %v2634_v29 = vld [vmem:[%s3353_s1 + $0xe8] sm:$0xff]  }
  0x13   : > { %2268 = vmatprep.subr.bf16.mxu0 %v2605_v4  ;;  %2562 = vmatprep.subr.bf16.mxu1 %v2605_v4  ;;  %v2619_v11 = vld [vmem:[%s2853_s15 + $0x4] ss:$20 sps:$4 sm:$0xff]   ;;  %v2617_v20 = vld [vmem:[%s2853_s15] ss:$20 sps:$4 sm:$0xff]   ;;  %v2632_v28 = vld [vmem:[%s2853_s15 + $0x28] ss:$20 sps:$4 sm:$0xff]  }
  0x14   : > { %v2622_v12 = vld [vmem:[%s2853_s15 + $0x1e4] ss:$20 sps:$4 sm:$0xff]   ;;  %1134 = vmatprep.mubr.bf16.mxu0 %v2619_v11  ;;  %v2620_v21 = vld [vmem:[%s2853_s15 + $0x1e0] ss:$20 sps:$4 sm:$0xff]   ;;  %v2633_v30 = vld [vmem:[%s2853_s15 + $0x208] ss:$20 sps:$4 sm:$0xff]  }
  0x15   : > { %1230 = vmatprep.mubr.bf16.mxu1 %v2622_v12  ;;  %v2628_v24 = vld [vmem:[%s2853_s15 + $0x2c] ss:$20 sps:$4 sm:$0xff]   ;;  %v2645_v26 = vld [vmem:[%s3353_s1 + $0x130] sm:$0xff]   ;;  %v2644_v36 = vld [vmem:[%s3353_s1 + $0xd8] sm:$0xff]  }
  0x16   : > { %2269 = vmatpush3.bf16.msra.mxu0 %v2606_v5  ;;  %2570 = vmatpush3.bf16.msra.mxu1 %v2606_v5  ;;  %v2630_v25 = vld [vmem:[%s2853_s15 + $0x20c] ss:$20 sps:$4 sm:$0xff]   ;;  %v2627_v27 = vld [vmem:[%s3353_s1 + $0xb0] sm:$0xff]   ;;  %v2646_v40 = vld [vmem:[%s3353_s1 + $0x98] sm:$0xff]  }
  0x17   : > { %2270 = vmatprep.subr.bf16.mxu0 %v2607_v6  ;;  %2563 = vmatprep.subr.bf16.mxu1 %v2607_v6  ;;  %v2635_v31 = vld [vmem:[%s3353_s1 + $0xa8] sm:$0xff]   ;;  %v2636_v33 = vld [vmem:[%s3353_s1 + $0xe0] sm:$0xff]   ;;  %v2647_v41 = vld [vmem:[%s3353_s1 + $0xd0] sm:$0xff]  }
  0x18   : > { %v2638_v32 = vld [vmem:[%s2853_s15 + $0x54] ss:$20 sps:$4 sm:$0xff]   ;;  %v2637_v35 = vld [vmem:[%s3353_s1 + $0xa0] sm:$0xff]   ;;  %v2649_v42 = vld [vmem:[%s2853_s15 + $0x7c] ss:$20 sps:$4 sm:$0xff]  }
  0x19   : > { %v2640_v34 = vld [vmem:[%s2853_s15 + $0x234] ss:$20 sps:$4 sm:$0xff]   ;;  %v2642_v37 = vld [vmem:[%s2853_s15 + $0x50] ss:$20 sps:$4 sm:$0xff]   ;;  %v2653_v46 = vld [vmem:[%s2853_s15 + $0x78] ss:$20 sps:$4 sm:$0xff]  }
  0x1a   : > { %2271 = vmatpush3.bf16.msra.mxu0 %v2608_v7  ;;  %2571 = vmatpush3.bf16.msra.mxu1 %v2608_v7  ;;  %v2658_v38 = vld [vmem:[%s3353_s1 + $0x128] sm:$0xff]   ;;  %v2643_v39 = vld [vmem:[%s2853_s15 + $0x230] ss:$20 sps:$4 sm:$0xff]   ;;  %v2679_v52 = vld [vmem:[%s3353_s1 + $0x118] sm:$0xff]  }
  0x1b   : > { %2272 = vmatprep.subr.bf16.mxu0 %v2609_v8  ;;  %2564 = vmatprep.subr.bf16.mxu1 %v2609_v8  ;;  %v2651_v43 = vld [vmem:[%s2853_s15 + $0x25c] ss:$20 sps:$4 sm:$0xff]   ;;  %v2672_v45 = vld [vmem:[%s3353_s1 + $0x120] sm:$0xff]   ;;  %v2654_v47 = vld [vmem:[%s2853_s15 + $0x258] ss:$20 sps:$4 sm:$0xff]  }
  0x1c   : > { %v2648_v44 = vld [vmem:[%s3353_s1 + $0x90] sm:$0xff]   ;;  %v2655_v48 = vld [vmem:[%s3353_s1 + $0xc8] sm:$0xff]   ;;  %v2657_v50 = vld [vmem:[%s3353_s1 + $0xc0] sm:$0xff]  }
  0x1d   : > { %v2656_v49 = vld [vmem:[%s3353_s1 + $0x88] sm:$0xff]   ;;  %v2660_v51 = vld [vmem:[%s2853_s15 + $0xa4] ss:$20 sps:$4 sm:$0xff]   ;;  %v2665_v56 = vld [vmem:[%s2853_s15 + $0xa0] ss:$20 sps:$4 sm:$0xff]  }
  0x1e   : > { %2273 = vmatpush3.bf16.msra.mxu0 %v2610_v9  ;;  %2572 = vmatpush3.bf16.msra.mxu1 %v2610_v9  ;;  %v2664_v53 = vld [vmem:[%s2853_s15 + $0xc] ss:$20 sps:$4 sm:$0xff]   ;;  %v2662_v55 = vld [vmem:[%s2853_s15 + $0x8] ss:$20 sps:$4 sm:$0xff]   ;;  %v2692_v57 = vld [vmem:[%s3353_s1 + $0x110] sm:$0xff]  }
  0x1f   : > { %2274 = vmatprep.subr.bf16.mxu0 %v2611_v10  ;;  %2565 = vmatprep.subr.bf16.mxu1 %v2611_v10  ;;  %v2659_v54 = vld [vmem:[%s3353_s1 + $0x80] sm:$0xff]   ;;  %v2668_v59 = vld [vmem:[%s2853_s15 + $0x34] ss:$20 sps:$4 sm:$0xff]   ;;  %v2675_v0 = vld [vmem:[%s2853_s15 + $0x5c] ss:$20 sps:$4 sm:$0xff]  }
  0x20   : > { %v2666_v58 = vld [vmem:[%s2853_s15 + $0xcc] ss:$20 sps:$4 sm:$0xff]   ;;  %v2670_v61 = vld [vmem:[%s2853_s15 + $0xc8] ss:$20 sps:$4 sm:$0xff]   ;;  %v2671_v62 = vld [vmem:[%s2853_s15 + $0x30] ss:$20 sps:$4 sm:$0xff]  }
  0x21   : > { %v2699_v60 = vld [vmem:[%s3353_s1 + $0x108] sm:$0xff]   ;;  %v2712_v1 = vld [vmem:[%s3353_s1 + $0x100] sm:$0xff]   ;;  %v2680_v4 = vld [vmem:[%s2853_s15 + $0x11c] ss:$20 sps:$4 sm:$0xff]  }
  0x22   : > { %2275 = vmatpush3.bf16.msra.mxu0 %v2612_v13  ;;  %2573 = vmatpush3.bf16.msra.mxu1 %v2612_v13  ;;  %v2673_v63 = vld [vmem:[%s2853_s15 + $0xf4] ss:$20 sps:$4 sm:$0xff]   ;;  %v2677_v2 = vld [vmem:[%s2853_s15 + $0xf0] ss:$20 sps:$4 sm:$0xff]   ;;  %v2678_v3 = vld [vmem:[%s2853_s15 + $0x58] ss:$20 sps:$4 sm:$0xff]  }
  0x23   : > { %2276 = vmatprep.subr.bf16.mxu0 %v2613_v14  ;;  %2566 = vmatprep.subr.bf16.mxu1 %v2613_v14  ;;  %v2682_v5 = vld [vmem:[%s2853_s15 + $0x84] ss:$20 sps:$4 sm:$0xff]   ;;  %v2685_v7 = vld [vmem:[%s2853_s15 + $0x80] ss:$20 sps:$4 sm:$0xff]   ;;  %v2691_v11 = vld [vmem:[%s2853_s15 + $0xa8] ss:$20 sps:$4 sm:$0xff]  }
  0x24   : > { %v2684_v6 = vld [vmem:[%s2853_s15 + $0x118] ss:$20 sps:$4 sm:$0xff]   ;;  %v2690_v10 = vld [vmem:[%s2853_s15 + $0x140] ss:$20 sps:$4 sm:$0xff]   ;;  %v2697_v14 = vld [vmem:[%s2853_s15 + $0x168] ss:$20 sps:$4 sm:$0xff]  }
  0x25   : > { %v2686_v8 = vld [vmem:[%s2853_s15 + $0x144] ss:$20 sps:$4 sm:$0xff]   ;;  %v2688_v9 = vld [vmem:[%s2853_s15 + $0xac] ss:$20 sps:$4 sm:$0xff]   ;;  %v2695_v13 = vld [vmem:[%s2853_s15 + $0xd4] ss:$20 sps:$4 sm:$0xff]  }
  0x26   : > { %2277 = vmatpush3.bf16.msra.mxu0 %v2614_v15  ;;  %2574 = vmatpush3.bf16.msra.mxu1 %v2614_v15  ;;  %v2693_v12 = vld [vmem:[%s2853_s15 + $0x16c] ss:$20 sps:$4 sm:$0xff]   ;;  %v2698_v15 = vld [vmem:[%s2853_s15 + $0xd0] ss:$20 sps:$4 sm:$0xff]  }
  0x27   : > { %2278 = vmatprep.subr.bf16.mxu0 %v2615_v16  ;;  %2567 = vmatprep.subr.bf16.mxu1 %v2615_v16  ;;  %v2700_v16 = vld [vmem:[%s2853_s15 + $0x194] ss:$20 sps:$4 sm:$0xff]  }
  0x2a   : > { %2279 = vmatpush3.bf16.msra.mxu0 %v2616_v17  ;;  %2575 = vmatpush3.bf16.msra.mxu1 %v2616_v17  ;;  %v2702_v17 = vld [vmem:[%s2853_s15 + $0xfc] ss:$20 sps:$4 sm:$0xff]  }
  0x2b   : > { %2376 = vmatprep.subr.bf16.mxu1 %v2623_v18  ;;  %2512 = vmatprep.subr.bf16.mxu0 %v2626_v19  ;;  %v2704_v18 = vld [vmem:[%s2853_s15 + $0x190] ss:$20 sps:$4 sm:$0xff]  }
  0x2d   : > { %1135 = vmatmul.mubr.bf16.vlgmr.msra.gmra.mxu0 %v2617_v20  ;;  %1231 = vmatmul.mubr.bf16.vlgmr.msra.gmra.mxu1 %v2620_v21  ;;  %v2706_v20 = vld [vmem:[%s2853_s15 + $0x1bc] ss:$20 sps:$4 sm:$0xff]   ;;  %v2708_v21 = vld [vmem:[%s2853_s15 + $0x124] ss:$20 sps:$4 sm:$0xff]  }
  0x2e   : > { %2377 = vmatpush3.bf16.msra.mxu1 %v2624_v22  ;;  %2513 = vmatpush3.bf16.msra.mxu0 %v2626_v19  ;;  %v2705_v19 = vld [vmem:[%s2853_s15 + $0xf8] ss:$20 sps:$4 sm:$0xff]  }
  0x2f   : > { %2378 = vmatprep.subr.bf16.mxu1 %v2625_v23  ;;  %1142 = vmatprep.mubr.bf16.mxu0 %v2628_v24  ;;  %v2710_v22 = vld [vmem:[%s2853_s15 + $0x1b8] ss:$20 sps:$4 sm:$0xff]   ;;  %v2711_v23 = vld [vmem:[%s2853_s15 + $0x120] ss:$20 sps:$4 sm:$0xff]  }
  0x30   : > { %1238 = vmatprep.mubr.bf16.mxu1 %v2630_v25  ;;  %2514 = vmatprep.subr.bf16.mxu0 %v2645_v26  ;;  %v2713_v24 = vld [vmem:[%s2853_s15 + $0x14c] ss:$20 sps:$4 sm:$0xff]   ;;  %v2715_v25 = vld [vmem:[%s2853_s15 + $0x10] ss:$20 sps:$4 sm:$0xff]  }
  0x32   : > { %2379 = vmatpush3.bf16.msra.mxu1 %v2627_v27  ;;  %2515 = vmatpush3.bf16.msra.mxu0 %v2645_v26  ;;  %v2716_v26 = vld [vmem:[%s2853_s15 + $0x148] ss:$20 sps:$4 sm:$0xff]   ;;  %v2717_v27 = vld [vmem:[%s2853_s15 + $0x38] ss:$20 sps:$4 sm:$0xff]  }
  0x33   : > { %2380 = vmatprep.subr.bf16.mxu1 %v2634_v29  ;;  %2516 = vmatprep.subr.bf16.mxu0 %v2658_v38  ;;  %v2720_v29 = vld [vmem:[%s2853_s15 + $0x60] ss:$20 sps:$4 sm:$0xff]  }
  0x35   : > { %1143 = vmatmul.mubr.bf16.gmra.mxu0 %v2632_v28  ;;  %1239 = vmatmul.mubr.bf16.gmra.mxu1 %v2633_v30  ;;  %v2718_v28 = vld [vmem:[%s2853_s15 + $0x174] ss:$20 sps:$4 sm:$0xff]   ;;  %v2721_v30 = vld [vmem:[%s2853_s15 + $0x170] ss:$20 sps:$4 sm:$0xff]  }
  0x36   : > { %2381 = vmatpush3.bf16.msra.mxu1 %v2635_v31  ;;  %1150 = vmatprep.mubr.bf16.mxu0 %v2638_v32  ;;  %v2722_v31 = vld [vmem:[%s2853_s15 + $0x88] ss:$20 sps:$4 sm:$0xff]  }
  0x37   : > { %2382 = vmatprep.subr.bf16.mxu1 %v2636_v33  ;;  %1246 = vmatprep.mubr.bf16.mxu1 %v2640_v34  ;;  %v2723_v32 = vld [vmem:[%s2853_s15 + $0x19c] ss:$20 sps:$4 sm:$0xff]   ;;  %v2726_v34 = vld [vmem:[%s2853_s15 + $0x198] ss:$20 sps:$4 sm:$0xff]  }
  0x38   : > { %2517 = vmatpush3.bf16.msra.mxu0 %v2658_v38  ;;  %v2725_v33 = vld [vmem:[%s2853_s15 + $0xb0] ss:$20 sps:$4 sm:$0xff]   ;;  %v2731_v38 = vld [vmem:[%s2853_s15 + $0x1c0] ss:$20 sps:$4 sm:$0xff]  }
  0x39   : > { %2518 = vmatprep.subr.bf16.mxu0 %v2672_v45 }
  0x3a   : > { %2383 = vmatpush3.bf16.msra.mxu1 %v2637_v35  ;;  %v2727_v35 = vld [vmem:[%s2853_s15 + $0xd8] ss:$20 sps:$4 sm:$0xff]  }
  0x3b   : > { %2384 = vmatprep.subr.bf16.mxu1 %v2644_v36  ;;  %v2728_v36 = vld [vmem:[%s2853_s15 + $0x1c4] ss:$20 sps:$4 sm:$0xff]  }
  0x3c   : > { %2519 = vmatpush3.bf16.msra.mxu0 %v2672_v45  ;;  %v2740_v45 = vld [vmem:[%s2853_s15 + $0x1a0] ss:$20 sps:$4 sm:$0xff]  }
  0x3d   : > { %1151 = vmatmul.mubr.bf16.gmra.mxu0 %v2642_v37  ;;  %1247 = vmatmul.mubr.bf16.gmra.mxu1 %v2643_v39  ;;  %v2730_v37 = vld [vmem:[%s2853_s15 + $0x100] ss:$20 sps:$4 sm:$0xff]   ;;  %v2732_v39 = vld [vmem:[%s2853_s15 + $0x128] ss:$20 sps:$4 sm:$0xff]  }
  0x3e   : > { %2385 = vmatpush3.bf16.msra.mxu1 %v2646_v40  ;;  %1158 = vmatprep.mubr.bf16.mxu0 %v2649_v42  ;;  %v2733_v40 = vld [vmem:[%s2853_s15 + $0x1ec] ss:$20 sps:$4 sm:$0xff]   ;;  %v2736_v42 = vld [vmem:[%s2853_s15 + $0x1e8] ss:$20 sps:$4 sm:$0xff]  }
  0x3f   : > { %2386 = vmatprep.subr.bf16.mxu1 %v2647_v41  ;;  %1254 = vmatprep.mubr.bf16.mxu1 %v2651_v43  ;;  %v2735_v41 = vld [vmem:[%s2853_s15 + $0x150] ss:$20 sps:$4 sm:$0xff]   ;;  %v2737_v43 = vld [vmem:[%s2853_s15 + $0x178] ss:$20 sps:$4 sm:$0xff]  }
  0x40   : > { %2520 = vmatprep.subr.bf16.mxu0 %v2679_v52 }
  0x41   : > { %2521 = vmatpush3.bf16.msra.mxu0 %v2679_v52  ;;  %v2748_v52 = vld [vmem:[%s2853_s15 + $0x264] ss:$20 sps:$4 sm:$0xff]  }
  0x42   : > { %2387 = vmatpush3.bf16.msra.mxu1 %v2648_v44  ;;  %2522 = vmatprep.subr.bf16.mxu0 %v2692_v57  ;;  %v2738_v44 = vld [vmem:[%s2853_s15 + $0x214] ss:$20 sps:$4 sm:$0xff]  }
  0x43   : > { %2388 = vmatprep.subr.bf16.mxu1 %v2655_v48  ;;  %v2743_v48 = vld [vmem:[%s2853_s15 + $0x23c] ss:$20 sps:$4 sm:$0xff]  }
  0x45   : > { %1159 = vmatmul.mubr.bf16.gmra.mxu0 %v2653_v46  ;;  %1255 = vmatmul.mubr.bf16.gmra.mxu1 %v2654_v47  ;;  %v2741_v46 = vld [vmem:[%s2853_s15 + $0x210] ss:$20 sps:$4 sm:$0xff]   ;;  %v2742_v47 = vld [vmem:[%s2853_s15 + $0x1c8] ss:$20 sps:$4 sm:$0xff]  }
  0x46   : > { %2389 = vmatpush3.bf16.msra.mxu1 %v2656_v49  ;;  %1166 = vmatprep.mubr.bf16.mxu0 %v2660_v51  ;;  %v2745_v49 = vld [vmem:[%s2853_s15 + $0x1f0] ss:$20 sps:$4 sm:$0xff]   ;;  %v2747_v51 = vld [vmem:[%s2853_s15 + $0x218] ss:$20 sps:$4 sm:$0xff]  }
  0x47   : > { %2390 = vmatprep.subr.bf16.mxu1 %v2657_v50  ;;  %1295 = vmatprep.mubr.bf16.mxu1 %v2664_v53  ;;  %v2746_v50 = vld [vmem:[%s2853_s15 + $0x238] ss:$20 sps:$4 sm:$0xff]   ;;  %v2750_v53 = vld [vmem:[%s2853_s15 + $0x240] ss:$20 sps:$4 sm:$0xff]  }
  0x48   : > { %2523 = vmatpush3.bf16.msra.mxu0 %v2692_v57 }
  0x49   : > { %2524 = vmatprep.subr.bf16.mxu0 %v2699_v60 }
  0x4a   : > { %2391 = vmatpush3.bf16.msra.mxu1 %v2659_v54  ;;  %v2751_v54 = vld [vmem:[%s2853_s15 + $0x260] ss:$20 sps:$4 sm:$0xff]  }
  0x4c   : > { %2525 = vmatpush3.bf16.msra.mxu0 %v2699_v60 }
  0x4d   : > { %1167 = vmatmul.mubr.bf16.gmra.mxu0 %v2665_v56  ;;  %1296 = vmatmul.mubr.bf16.vlgmr.msra.gmra.mxu1 %v2662_v55  ;;  %v2752_v55 = vld [vmem:[%s2853_s15 + $0x268] ss:$20 sps:$4 sm:$0xff]  }
  0x4e   : > { %1174 = vmatprep.mubr.bf16.mxu0 %v2666_v58  ;;  %1303 = vmatprep.mubr.bf16.mxu1 %v2668_v59 }
  0x4f   : > { %2526 = vmatprep.subr.bf16.mxu0 %v2712_v1 }
  0x50   : > { %2527 = vmatpush3.bf16.msra.mxu0 %v2712_v1 }
  0x55   : > { %1175 = vmatmul.mubr.bf16.gmra.mxu0 %v2670_v61  ;;  %1304 = vmatmul.mubr.bf16.gmra.mxu1 %v2671_v62 }
  0x56   : > { %1182 = vmatprep.mubr.bf16.mxu0 %v2673_v63  ;;  %1311 = vmatprep.mubr.bf16.mxu1 %v2675_v0 }
  0x5d   : > { %1183 = vmatmul.mubr.bf16.gmra.mxu0 %v2677_v2  ;;  %1312 = vmatmul.mubr.bf16.gmra.mxu1 %v2678_v3 }
  0x5e   : > { %1190 = vmatprep.mubr.bf16.mxu0 %v2680_v4  ;;  %1319 = vmatprep.mubr.bf16.mxu1 %v2682_v5 }
  0x65   : > { %1191 = vmatmul.mubr.bf16.gmra.mxu0 %v2684_v6  ;;  %1320 = vmatmul.mubr.bf16.gmra.mxu1 %v2685_v7 }
  0x66   : > { %1198 = vmatprep.mubr.bf16.mxu0 %v2686_v8  ;;  %1327 = vmatprep.mubr.bf16.mxu1 %v2688_v9 }
  0x6d   : > { %1199 = vmatmul.mubr.bf16.gmra.mxu0 %v2690_v10  ;;  %1328 = vmatmul.mubr.bf16.gmra.mxu1 %v2691_v11 }
  0x6e   : > { %1206 = vmatprep.mubr.bf16.mxu0 %v2693_v12  ;;  %1335 = vmatprep.mubr.bf16.mxu1 %v2695_v13 }
  0x75   : > { %1207 = vmatmul.mubr.bf16.gmra.mxu0 %v2697_v14  ;;  %1336 = vmatmul.mubr.bf16.gmra.mxu1 %v2698_v15 }
  0x76   : > { %1214 = vmatprep.mubr.bf16.mxu0 %v2700_v16  ;;  %1343 = vmatprep.mubr.bf16.mxu1 %v2702_v17 }
  0x7d   : > { %1215 = vmatmul.mubr.bf16.gmra.mxu0 %v2704_v18  ;;  %1344 = vmatmul.mubr.bf16.gmra.mxu1 %v2705_v19 }
  0x7e   : > { %1222 = vmatprep.mubr.bf16.mxu0 %v2706_v20  ;;  %1351 = vmatprep.mubr.bf16.mxu1 %v2708_v21 }
  0x85   : > { %1223 = vmatmul.mubr.bf16.gmra.mxu0 %v2710_v22  ;;  %1352 = vmatmul.mubr.bf16.gmra.mxu1 %v2711_v23 }
  0x86   : > { %1359 = vmatprep.mubr.bf16.mxu1 %v2713_v24  ;;  %2528 = vmatprep.mubr.bf16.mxu0 %v2715_v25 }
  0x8d   : > { %1360 = vmatmul.mubr.bf16.gmra.mxu1 %v2716_v26  ;;  %2529 = vmatmul.mubr.bf16.vlgmr.msra.gmra.mxu0 %v2717_v27 }
  0x8e   : > { %1367 = vmatprep.mubr.bf16.mxu1 %v2718_v28  ;;  %2532 = vmatprep.mubr.bf16.mxu0 %v2720_v29 }
  0x95   : > { %1368 = vmatmul.mubr.bf16.gmra.mxu1 %v2721_v30  ;;  %2533 = vmatmul.mubr.bf16.gmra.mxu0 %v2722_v31 }
  0x96   : > { %1375 = vmatprep.mubr.bf16.mxu1 %v2723_v32  ;;  %2536 = vmatprep.mubr.bf16.mxu0 %v2725_v33 }
  0x9d   : > { %1376 = vmatmul.mubr.bf16.gmra.mxu1 %v2726_v34  ;;  %2537 = vmatmul.mubr.bf16.gmra.mxu0 %v2727_v35 }
  0x9e   : > { %1383 = vmatprep.mubr.bf16.mxu1 %v2728_v36  ;;  %2540 = vmatprep.mubr.bf16.mxu0 %v2730_v37 }
  0xa5   : > { %1384 = vmatmul.mubr.bf16.gmra.mxu1 %v2731_v38  ;;  %2541 = vmatmul.mubr.bf16.gmra.mxu0 %v2732_v39 }
  0xa6   : > { %1391 = vmatprep.mubr.bf16.mxu1 %v2733_v40  ;;  %2544 = vmatprep.mubr.bf16.mxu0 %v2735_v41 }
  0xad   : > { %1392 = vmatmul.mubr.bf16.gmra.mxu1 %v2736_v42  ;;  %2545 = vmatmul.mubr.bf16.gmra.mxu0 %v2737_v43 }
  0xae   : > { %1399 = vmatprep.mubr.bf16.mxu1 %v2738_v44  ;;  %2548 = vmatprep.mubr.bf16.mxu0 %v2740_v45 }
  0xb5   : > { %1400 = vmatmul.mubr.bf16.gmra.mxu1 %v2741_v46  ;;  %2549 = vmatmul.mubr.bf16.gmra.mxu0 %v2742_v47 }
  0xb6   : > { %1407 = vmatprep.mubr.bf16.mxu1 %v2743_v48  ;;  %2552 = vmatprep.mubr.bf16.mxu0 %v2745_v49 }
  0xbd   : > { %1408 = vmatmul.mubr.bf16.gmra.mxu1 %v2746_v50  ;;  %2553 = vmatmul.mubr.bf16.gmra.mxu0 %v2747_v51 }
  0xbe   : > { %1415 = vmatprep.mubr.bf16.mxu1 %v2748_v52  ;;  %2556 = vmatprep.mubr.bf16.mxu0 %v2750_v53 }
  0xc5   : > { %1416 = vmatmul.mubr.bf16.gmra.mxu1 %v2751_v54  ;;  %2557 = vmatmul.mubr.bf16.gmra.mxu0 %v2752_v55 }
  0xed   : > { %v2280_v56 = vpop.f32.mrf.mxu0  ;;  %v2352_v57 = vpop.f32.mrf.mxu1 }
  0xef   : > { %v2281_v58 = vpop.f32.mrf.mxu0  ;;  %v2353_v59 = vpop.f32.mrf.mxu1 }
  0xf0   : > { %v2282_v60 = vadd.f32 %v2281_v58, %v2280_v56  ;;  %v3028_v61 = vadd.f32 %v2353_v59, %v2352_v57 }
  0xf1   : > { %v2283_v62 = vpop.f32.mrf.mxu0  ;;  %v2355_v63 = vpop.f32.mrf.mxu1 }
  0xf2   : > { %3357 = vst [vmem:[#allocation2_spill] sm:$0xff] %v3028_v61 }
  0xf3   : > { %v2284_v0 = vpop.f32.mrf.mxu0  ;;  %v2356_v1 = vpop.f32.mrf.mxu1 }
  0xf4   : > { %v3030_v2 = vadd.f32 %v2284_v0, %v2283_v62  ;;  %v3032_v3 = vadd.f32 %v2356_v1, %v2355_v63 }
  0xf5   : > { %v2286_v4 = vpop.f32.mrf.mxu0  ;;  %v2358_v5 = vpop.f32.mrf.mxu1 }
  0xf6   : > { %3358 = vst [vmem:[#allocation3_spill] sm:$0xff] %v3032_v3 }
  0xf7   : > { %v2287_v6 = vpop.f32.mrf.mxu0  ;;  %v2359_v7 = vpop.f32.mrf.mxu1 }
  0xf8   : > { %v3034_v8 = vadd.f32 %v2287_v6, %v2286_v4  ;;  %v3036_v9 = vadd.f32 %v2359_v7, %v2358_v5 }
  0xf9   : > { %v2289_v10 = vpop.f32.mrf.mxu0  ;;  %v2361_v11 = vpop.f32.mrf.mxu1 }
  0xfa   : > { %3359 = vst [vmem:[#allocation4_spill] sm:$0xff] %v3036_v9 }
  0xfb   : > { %v2290_v12 = vpop.f32.mrf.mxu0  ;;  %v2362_v13 = vpop.f32.mrf.mxu1 }
  0xfc   : > { %v3038_v14 = vadd.f32 %v2290_v12, %v2289_v10  ;;  %v3040_v15 = vadd.f32 %v2362_v13, %v2361_v11 }
  0xfd   : > { %v2292_v16 = vpop.f32.mrf.mxu0  ;;  %v2364_v17 = vpop.f32.mrf.mxu1 }
  0xfe   : > { %3360 = vst [vmem:[#allocation5_spill] sm:$0xff] %v3040_v15 }
  0xff   : > { %v2293_v18 = vpop.f32.mrf.mxu0  ;;  %v2365_v19 = vpop.f32.mrf.mxu1 }
 0x100   : > { %v3042_v20 = vadd.f32 %v2293_v18, %v2292_v16  ;;  %v3044_v21 = vadd.f32 %v2365_v19, %v2364_v17 }
 0x101   : > { %v2295_v22 = vpop.f32.mrf.mxu0  ;;  %v2367_v23 = vpop.f32.mrf.mxu1 }
 0x102   : > { %3361 = vst [vmem:[#allocation6_spill] sm:$0xff] %v3044_v21 }
 0x103   : > { %v2296_v24 = vpop.f32.mrf.mxu0  ;;  %v2368_v25 = vpop.f32.mrf.mxu1 }
 0x104   : > { %v3046_v26 = vadd.f32 %v2296_v24, %v2295_v22  ;;  %v3048_v27 = vadd.f32 %v2368_v25, %v2367_v23 }
 0x105   : > { %v2298_v28 = vpop.f32.mrf.mxu0  ;;  %v2370_v29 = vpop.f32.mrf.mxu1 }
 0x106   : > { %3362 = vst [vmem:[#allocation7_spill] sm:$0xff] %v3048_v27 }
 0x107   : > { %v2299_v30 = vpop.f32.mrf.mxu0  ;;  %v2371_v31 = vpop.f32.mrf.mxu1 }
 0x108   : > { %v3050_v32 = vadd.f32 %v2299_v30, %v2298_v28  ;;  %v3052_v33 = vadd.f32 %v2371_v31, %v2370_v29 }
 0x109   : > { %v2301_v34 = vpop.f32.mrf.mxu0  ;;  %v2373_v35 = vpop.f32.mrf.mxu1 }
 0x10a   : > { %3363 = vst [vmem:[#allocation8_spill] sm:$0xff] %v3052_v33 }
 0x10b   : > { %v2302_v36 = vpop.f32.mrf.mxu0  ;;  %v2374_v37 = vpop.f32.mrf.mxu1 }
 0x10c   : > { %v3054_v38 = vadd.f32 %v2302_v36, %v2301_v34  ;;  %v3056_v39 = vadd.f32 %v2374_v37, %v2373_v35 }
 0x10d   : > { %v2304_v40 = vpop.f32.mrf.mxu0  ;;  %v2392_v41 = vpop.f32.mrf.mxu1 }
 0x10e   : > { %3364 = vst [vmem:[#allocation9_spill] sm:$0xff] %v3056_v39 }
 0x10f   : > { %v2305_v42 = vpop.f32.mrf.mxu0  ;;  %v2393_v43 = vpop.f32.mrf.mxu1 }
 0x110   : > { %v3058_v44 = vadd.f32 %v2305_v42, %v2304_v40  ;;  %v2394_v45 = vadd.f32 %v2393_v43, %v2392_v41 }
 0x111   : > { %v2307_v46 = vpop.f32.mrf.mxu0  ;;  %v3060_v47 = vpop.f32.mrf.mxu1 }
 0x112   : > { %v3062_v48 = vadd.f32 %v2394_v45, %v2282_v60 }
 0x113   : > { %v2308_v49 = vpop.f32.mrf.mxu0  ;;  %v3064_v50 = vpop.f32.mrf.mxu1 }
 0x114   : > { %v3066_v51 = vadd.f32 %v2308_v49, %v2307_v46 }
 0x115   : > { %v2310_v52 = vpop.f32.mrf.mxu0  ;;  %v2398_v53 = vpop.f32.mrf.mxu1 }
 0x117   : > { %v2311_v54 = vpop.f32.mrf.mxu0  ;;  %v2399_v55 = vpop.f32.mrf.mxu1 }
 0x118   : > { %v3068_v56 = vadd.f32 %v2311_v54, %v2310_v52  ;;  %v2400_v21 = vadd.f32 %v2399_v55, %v2398_v53  ;;  %v2397_v55 = vadd.f32 %v3064_v50, %v3060_v47 }
 0x119   : > { %v2313_v57 = vpop.f32.mrf.mxu0  ;;  %v2401_v58 = vpop.f32.mrf.mxu1 }
 0x11b   : > { %v2314_v59 = vpop.f32.mrf.mxu0  ;;  %v2402_v62 = vpop.f32.mrf.mxu1 }
 0x11c   : > { %v3070_v63 = vadd.f32 %v2314_v59, %v2313_v57 }
 0x11d   : > { %v2316_v0 = vpop.f32.mrf.mxu0  ;;  %v3072_v60 = vpop.f32.mrf.mxu1 }
 0x11f   : > { %v2317_v1 = vpop.f32.mrf.mxu0  ;;  %v3074_v4 = vpop.f32.mrf.mxu1 }
 0x120   : > { %v3076_v5 = vadd.f32 %v2317_v1, %v2316_v0  ;;  %v2406_v47 = vadd.f32 %v3074_v4, %v3072_v60 }
 0x121   : > { %v2319_v6 = vpop.f32.mrf.mxu0  ;;  %v3078_v7 = vpop.f32.mrf.mxu1 }
 0x123   : > { %v2320_v10 = vpop.f32.mrf.mxu0  ;;  %v3080_v11 = vpop.f32.mrf.mxu1 }
 0x124   : > { %v3082_v12 = vadd.f32 %v2320_v10, %v2319_v6  ;;  %v2409_v60 = vadd.f32 %v3080_v11, %v3078_v7 }
 0x125   : > { %v3084_v13 = vpop.f32.mrf.mxu0  ;;  %v2410_v16 = vpop.f32.mrf.mxu1 }
 0x127   : > { %v3086_v17 = vpop.f32.mrf.mxu0  ;;  %v2411_v18 = vpop.f32.mrf.mxu1 }
 0x129   : > { %v3088_v19 = vpop.f32.mrf.mxu0  ;;  %v2413_v22 = vpop.f32.mrf.mxu1 }
 0x12b   : > { %v3090_v23 = vpop.f32.mrf.mxu0  ;;  %v2414_v24 = vpop.f32.mrf.mxu1 }
 0x12d   : > { %v2328_v25 = vpop.f32.mrf.mxu0  ;;  %v3092_v28 = vpop.f32.mrf.mxu1 }
 0x12f   : > { %v2329_v29 = vpop.f32.mrf.mxu0  ;;  %v3094_v30 = vpop.f32.mrf.mxu1 }
 0x130   : > { %v3096_v31 = vadd.f32 %v2329_v29, %v2328_v25 }
 0x131   : > { %v3098_v34 = vpop.f32.mrf.mxu0  ;;  %v3100_v35 = vpop.f32.mrf.mxu1 }
 0x132   : > { %3365 = vst [vmem:[#allocation10_spill] sm:$0xff] %v3096_v31  ;;  %3366 = vst [vmem:[#allocation11_spill] sm:$0xff] %v3098_v34 }
 0x133   : > { %v3102_v36 = vpop.f32.mrf.mxu0  ;;  %v3104_v37 = vpop.f32.mrf.mxu1 }
 0x134   : > { %3367 = vst [vmem:[#allocation12_spill] sm:$0xff] %v3102_v36 }
 0x135   : > { %v3106_v40 = vpop.f32.mrf.mxu0  ;;  %v2422_v41 = vpop.f32.mrf.mxu1 }
 0x137   : > { %v3108_v42 = vpop.f32.mrf.mxu0  ;;  %v2423_v43 = vpop.f32.mrf.mxu1 }
 0x139   : > { %v3110_v45 = vpop.f32.mrf.mxu0  ;;  %v3112_v46 = vpop.f32.mrf.mxu1 }
 0x13b   : > { %v3114_v49 = vpop.f32.mrf.mxu0  ;;  %v3116_v52 = vpop.f32.mrf.mxu1 }
 0x13d   : > { %v3118_v54 = vpop.f32.mrf.mxu0  ;;  %v3120_v57 = vpop.f32.mrf.mxu1 }
 0x13e   : > { %3368 = vst [vmem:[#allocation13_spill] sm:$0xff] %v3118_v54 }
 0x13f   : > { %v3122_v59 = vpop.f32.mrf.mxu0  ;;  %v3124_v0 = vpop.f32.mrf.mxu1 }
 0x140   : > { %3369 = vst [vmem:[#allocation14_spill] sm:$0xff] %v3122_v59 }
 0x141   : > { %v3126_v1 = vpop.f32.mrf.mxu0  ;;  %v3128_v6 = vpop.f32.mrf.mxu1 }
 0x142   : > { %3370 = vst [vmem:[#allocation15_spill] sm:$0xff] %v3126_v1  ;;  %v1306_v1 = vadd.f32 %v2400_v21, %v3034_v8 }
 0x143   : > { %v3130_v10 = vpop.f32.mrf.mxu0  ;;  %v3132_v25 = vpop.f32.mrf.mxu1 }
 0x144   : > { %3371 = vst [vmem:[#allocation16_spill] sm:$0xff] %v3130_v10  ;;  %v2403_v10 = vadd.f32 %v2402_v62, %v2401_v58  ;;  %v3168_v62 = vld [vmem:[%s3355_s3] ss:$0 sm:$0xff] }
 0x145   : > { %v3134_v29 = vpop.f32.mrf.mxu0  ;;  %v3136_v39 = vpop.f32.mrf.mxu1 }
 0x146   : > { %3372 = vst [vmem:[#allocation17_spill] sm:$0xff] %v3134_v29  ;;  %v2412_v29 = vadd.f32 %v2411_v18, %v2410_v16  ;;  %v1309_v21 = vadd.f32 %v2403_v10, %v3038_v14  ;;  %v2415_v16 = vadd.f32 %v2414_v24, %v2413_v22  ;;  %v2424_v24 = vadd.f32 %v2423_v43, %v2422_v41 }
 0x147   : > { %v3138_v27 = vpop.f32.mrf.mxu0  ;;  %v3140_v33 = vpop.f32.mrf.mxu1  ;;  %v2418_v41 = vadd.f32 %v3094_v30, %v3092_v28 }
 0x148   : > { %3373 = vst [vmem:[#allocation18_spill] sm:$0xff] %v3138_v27  ;;  %v3156_v27 = vld [vmem:[%s3354_s2] ss:$0 sm:$0xff]  ;;  %v1338_v30 = vadd.f32 %v2424_v24, %v3068_v56 }
 0x149   : > { %v3142_v3 = vpop.f32.mrf.mxu0  ;;  %v3144_v15 = vpop.f32.mrf.mxu1 }
 0x14a   : > { %3374 = vst [vmem:[#allocation19_spill] sm:$0xff] %v3142_v3 }
 0x14b   : > { %v3146_v61 = vpop.f32.mrf.mxu0  ;;  %v3148_v9 = vpop.f32.mrf.mxu1 }
 0x14c   : > { %3375 = vst [vmem:[#allocation20_spill] sm:$0xff] %v3146_v61 }
 0x14d   : > { %v3151_v59 = vpop.f32.mrf.mxu1  ;;  %v2530_v54 = vpop.f32.mrf.mxu0 }
 0x14e   : > { %v1467_v53 = vadd.f32 %v2530_v54, %v1306_v1 }
 0x14f   : > { %v3160_v3 = vpop.f32.mrf.mxu1  ;;  %v1458_v61 = vpop.f32.mrf.mxu0 }
 0x150   : > { %v1594_v58 = vmul.f32 %v3156_v27, %v1467_v53  ;;  %v1459_v8 = vadd.f32 %v1458_v61, %v3062_v48  ;;  %v1301_v61 = vadd.f32 %v2397_v55, %v3030_v2  ;;  %v1322_v53 = vadd.f32 %v2412_v29, %v3050_v32 }
 0x151   : > { %v3170_v31 = vpop.f32.mrf.mxu1  ;;  %v2531_v54 = vpop.f32.mrf.mxu0  ;;  %v1314_v2 = vadd.f32 %v2406_v47, %v3042_v20  ;;  %v1325_v29 = vadd.f32 %v2415_v16, %v3054_v38  ;;  %v1317_v47 = vadd.f32 %v2409_v60, %v3046_v26 }
 0x152   : > { %3376 = vst [vmem:[#allocation21_spill] sm:$0xff] %v3170_v31  ;;  %v1470_v50 = vadd.f32 %v2531_v54, %v1309_v21  ;;  %v1592_v18 = vmul.f32 %v3156_v27, %v1459_v8  ;;  %v1633_v48 = vadd.f32 %v3168_v62, %v1594_v58 }
 0x153   : > { %v3175_v1 = vpop.f32.mrf.mxu1  ;;  %v1461_v14 = vpop.f32.mrf.mxu0 }
 0x154   : > { %v1595_v10 = vmul.f32 %v3156_v27, %v1470_v50  ;;  %v1462_v36 = vadd.f32 %v1461_v14, %v1301_v61  ;;  %v1631_v55 = vadd.f32 %v3168_v62, %v1592_v18  ;;  %v1665_v21 = vmax.f32 %v1633_v48, 0.0 }
 0x155   : > { %v3181_v34 = vpop.f32.mrf.mxu1  ;;  %v2534_v31 = vpop.f32.mrf.mxu0  ;;  %v2427_v50 = vadd.f32 %v3116_v52, %v3112_v46  ;;  %v2421_v52 = vadd.f32 %v3104_v37, %v3100_v35 }
 0x156   : > { %v1634_v4 = vadd.f32 %v3168_v62, %v1595_v10  ;;  %v1483_v22 = vadd.f32 %v2534_v31, %v1322_v53  ;;  %v1593_v58 = vmul.f32 %v3156_v27, %v1462_v36  ;;  %v1663_v16 = vmax.f32 %v1631_v55, 0.0 }
 0x157   : > { %v3190_v8 = vpop.f32.mrf.mxu1  ;;  %v1474_v32 = vpop.f32.mrf.mxu0  ;;  %v2436_v55 = vadd.f32 %v3140_v33, %v3136_v39 }
 0x158   : > { %v1666_v54 = vmax.f32 %v1634_v4, 0.0  ;;  %v1598_v7 = vmul.f32 %v3156_v27, %v1483_v22  ;;  %v1475_v11 = vadd.f32 %v1474_v32, %v1314_v2  ;;  %v1632_v20 = vadd.f32 %v3168_v62, %v1593_v58 }
 0x159   : > { %v3200_v31 = vpop.f32.mrf.mxu1  ;;  %v2535_v36 = vpop.f32.mrf.mxu0  ;;  %v1330_v2 = vadd.f32 %v2418_v41, %v3058_v44  ;;  %v2324_v44 = vadd.f32 %v3086_v17, %v3084_v13  ;;  %v2439_v41 = vadd.f32 %v3148_v9, %v3144_v15 }
 0x15a   : > { %v2177_v38 = vpack.c.bf16 %v1666_v54, %v1665_v21  ;;  %v1486_v43 = vadd.f32 %v2535_v36, %v1325_v29  ;;  %v1664_v18 = vmax.f32 %v1632_v20, 0.0  ;;  %v1596_v61 = vmul.f32 %v3156_v27, %v1475_v11 }
 0x15b   : > { %v3208_v14 = vpop.f32.mrf.mxu1  ;;  %v1477_v48 = vpop.f32.mrf.mxu0  ;;  %v1637_v10 = vadd.f32 %v3168_v62, %v1598_v7  ;;  %v1341_v29 = vadd.f32 %v2427_v50, %v3070_v63  ;;  %v2430_v11 = vadd.f32 %v3124_v0, %v3120_v57  ;;  %v1333_v63 = vadd.f32 %v2421_v52, %v3066_v51 }
 0x15c   : > { %2249 = vst [vmem:[%s3197_s24 + $0x8] sm:$0xff] %v2177_v38   ;;  %v1599_v28 = vmul.f32 %v3156_v27, %v1486_v43  ;;  %v2172_v53 = vpack.c.bf16 %v1664_v18, %v1663_v16  ;;  %v1478_v26 = vadd.f32 %v1477_v48, %v1317_v47  ;;  %v1635_v58 = vadd.f32 %v3168_v62, %v1596_v61 }
 0x15d   : > { %v3214_v60 = vpop.f32.mrf.mxu1  ;;  %v2538_v46 = vpop.f32.mrf.mxu0  ;;  %v1669_v21 = vmax.f32 %v1637_v10, 0.0  ;;  %v1354_v0 = vadd.f32 %v2436_v55, %v2324_v44  ;;  %v2327_v51 = vadd.f32 %v3090_v23, %v3088_v19  ;;  %v2433_v61 = vadd.f32 %v3132_v25, %v3128_v6 }
 0x15e   : > { %v1638_v4 = vadd.f32 %v3168_v62, %v1599_v28  ;;  %v1499_v22 = vadd.f32 %v2538_v46, %v1338_v30  ;;  %2173 = vst [vmem:[%s3197_s24] sm:$0xff] %v2172_v53   ;;  %v1597_v56 = vmul.f32 %v3156_v27, %v1478_v26  ;;  %v1667_v38 = vmax.f32 %v1635_v58, 0.0 }
 0x15f   : > { %v3225_v24 = vpop.f32.mrf.mxu1  ;;  %v1490_v32 = vpop.f32.mrf.mxu0  ;;  %v1346_v28 = vadd.f32 %v2430_v11, %v3076_v5  ;;  %v2448_v30 = vadd.f32 %v3190_v8, %v3181_v34  ;;  %v1357_v46 = vadd.f32 %v2439_v41, %v2327_v51  ;;  %v2336_v5 = vadd.f32 %v3108_v42, %v3106_v40  ;;  %v3378_v11 = vld [vmem:[#allocation11_spill] sm:$0xff] }
 0x160   : > { %v1670_v35 = vmax.f32 %v1638_v4, 0.0  ;;  %v1602_v37 = vmul.f32 %v3156_v27, %v1499_v22  ;;  %v1491_v54 = vadd.f32 %v1490_v32, %v1330_v2  ;;  %v1636_v33 = vadd.f32 %v3168_v62, %v1597_v56 }
 0x161   : > { %v3232_v39 = vpop.f32.mrf.mxu1  ;;  %v2539_v7 = vpop.f32.mrf.mxu0  ;;  %v2442_v2 = vadd.f32 %v3160_v3, %v3151_v59  ;;  %v1349_v56 = vadd.f32 %v2433_v61, %v3082_v12  ;;  %v2451_v32 = vadd.f32 %v3208_v14, %v3200_v31  ;;  %v1370_v3 = vadd.f32 %v2448_v30, %v2336_v5  ;;  %v3377_v12 = vld [vmem:[#allocation21_spill] sm:$0xff] }
 0x162   : > { %v2187_v20 = vpack.c.bf16 %v1670_v35, %v1669_v21  ;;  %v1502_v36 = vadd.f32 %v2539_v7, %v1341_v29  ;;  %v1668_v43 = vmax.f32 %v1636_v33, 0.0  ;;  %v1600_v47 = vmul.f32 %v3156_v27, %v1491_v54  ;;  %v3383_v5 = vld [vmem:[#allocation13_spill] sm:$0xff] }
 0x163   : > { %v3240_v13 = vpop.f32.mrf.mxu1  ;;  %v1493_v17 = vpop.f32.mrf.mxu0  ;;  %v1641_v50 = vadd.f32 %v3168_v62, %v1602_v37  ;;  %v2339_v59 = vadd.f32 %v3114_v49, %v3110_v45  ;;  %v2445_v44 = vadd.f32 %v3175_v1, %v3377_v12  ;;  %v2454_v30 = vadd.f32 %v3225_v24, %v3214_v60  ;;  %v3385_v60 = vld [vmem:[#allocation15_spill] sm:$0xff]  ;;  %v3386_v24 = vld [vmem:[#allocation16_spill] sm:$0xff] }
 0x164   : > { %2251 = vst [vmem:[%s3197_s24 + $0x18] sm:$0xff] %v2187_v20   ;;  %v1603_v57 = vmul.f32 %v3156_v27, %v1502_v36  ;;  %v2182_v16 = vpack.c.bf16 %v1668_v43, %v1667_v38  ;;  %v1494_v18 = vadd.f32 %v1493_v17, %v1333_v63  ;;  %v1639_v53 = vadd.f32 %v3168_v62, %v1600_v47  ;;  %v3379_v20 = vld [vmem:[#allocation12_spill] sm:$0xff]  ;;  %v3380_v38 = vld [vmem:[#allocation10_spill] sm:$0xff] }
 0x165   : > { %v2458_v9 = vpop.f32.mrf.mxu1  ;;  %v2542_v15 = vpop.f32.mrf.mxu0  ;;  %v1673_v52 = vmax.f32 %v1641_v50, 0.0  ;;  %v2333_v36 = vadd.f32 %v3379_v20, %v3378_v11  ;;  %v1362_v43 = vadd.f32 %v2442_v2, %v3380_v38  ;;  %v1373_v50 = vadd.f32 %v2451_v32, %v2339_v59 }
 0x166   : > { %v1642_v48 = vadd.f32 %v3168_v62, %v1603_v57  ;;  %v1515_v10 = vadd.f32 %v2542_v15, %v1354_v0  ;;  %2250 = vst [vmem:[%s3197_s24 + $0x10] sm:$0xff] %v2182_v16   ;;  %v1601_v19 = vmul.f32 %v3156_v27, %v1494_v18  ;;  %v1671_v29 = vmax.f32 %v1639_v53, 0.0  ;;  %v3381_v18 = vld [vmem:[#allocation17_spill] sm:$0xff]  ;;  %v3382_v15 = vld [vmem:[#allocation18_spill] sm:$0xff] }
 0x167   : > { %v2459_v23 = vpop.f32.mrf.mxu1  ;;  %v1506_v26 = vpop.f32.mrf.mxu0  ;;  %v2348_v61 = vadd.f32 %v3382_v15, %v3381_v18  ;;  %v3389_v15 = vld [vmem:[#allocation4_spill] sm:$0xff] }
 0x168   : > { %v1674_v4 = vmax.f32 %v1642_v48, 0.0  ;;  %v1606_v6 = vmul.f32 %v3156_v27, %v1515_v10  ;;  %v1507_v25 = vadd.f32 %v1506_v26, %v1346_v28  ;;  %v1640_v22 = vadd.f32 %v3168_v62, %v1601_v19 }
 0x169   : > { %v2461_v34 = vpop.f32.mrf.mxu1  ;;  %v2543_v8 = vpop.f32.mrf.mxu0  ;;  %v2460_v47 = vadd.f32 %v2459_v23, %v2458_v9  ;;  %v1365_v28 = vadd.f32 %v2445_v44, %v2333_v36 }
 0x16a   : > { %v2197_v55 = vpack.c.bf16 %v1674_v4, %v1673_v52  ;;  %v1518_v58 = vadd.f32 %v2543_v8, %v1357_v46  ;;  %v1672_v21 = vmax.f32 %v1640_v22, 0.0  ;;  %v1604_v35 = vmul.f32 %v3156_v27, %v1507_v25  ;;  %v3384_v22 = vld [vmem:[#allocation14_spill] sm:$0xff] }
 0x16b   : > { %v2462_v37 = vpop.f32.mrf.mxu1  ;;  %v1509_v40 = vpop.f32.mrf.mxu0  ;;  %v1645_v42 = vadd.f32 %v3168_v62, %v1606_v6  ;;  %v2342_v8 = vadd.f32 %v3384_v22, %v3383_v5 }
 0x16c   : > { %2253 = vst [vmem:[%s3197_s24 + $0x28] sm:$0xff] %v2197_v55   ;;  %v1607_v54 = vmul.f32 %v3156_v27, %v1518_v58  ;;  %v2192_v31 = vpack.c.bf16 %v1672_v21, %v1671_v29  ;;  %v1510_v14 = vadd.f32 %v1509_v40, %v1349_v56  ;;  %v1643_v17 = vadd.f32 %v3168_v62, %v1604_v35  ;;  %v3387_v58 = vld [vmem:[#allocation19_spill] sm:$0xff]  ;;  %v3388_v56 = vld [vmem:[#allocation20_spill] sm:$0xff] }
 0x16d   : > { %v2464_v33 = vpop.f32.mrf.mxu1  ;;  %v2546_v7 = vpop.f32.mrf.mxu0  ;;  %v1677_v57 = vmax.f32 %v1645_v42, 0.0  ;;  %v2463_v19 = vadd.f32 %v2462_v37, %v2461_v34  ;;  %v1386_v55 = vadd.f32 %v2460_v47, %v2348_v61  ;;  %v2345_v34 = vadd.f32 %v3386_v24, %v3385_v60 }
 0x16e   : > { %v1646_v63 = vadd.f32 %v3168_v62, %v1607_v54  ;;  %v1531_v41 = vadd.f32 %v2546_v7, %v1370_v3  ;;  %2252 = vst [vmem:[%s3197_s24 + $0x20] sm:$0xff] %v2192_v31   ;;  %v1605_v45 = vmul.f32 %v3156_v27, %v1510_v14  ;;  %v1675_v26 = vmax.f32 %v1643_v17, 0.0 }
 0x16f   : > { %v2465_v49 = vpop.f32.mrf.mxu1  ;;  %v1522_v1 = vpop.f32.mrf.mxu0  ;;  %v2351_v32 = vadd.f32 %v3388_v56, %v3387_v58  ;;  %v2457_v40 = vadd.f32 %v3240_v13, %v3232_v39  ;;  %v1378_v3 = vadd.f32 %v2454_v30, %v2342_v8 }
 0x170   : > { %v1678_v0 = vmax.f32 %v1646_v63, 0.0  ;;  %v1610_v51 = vmul.f32 %v3156_v27, %v1531_v41  ;;  %v1523_v16 = vadd.f32 %v1522_v1, %v1362_v43  ;;  %v1644_v48 = vadd.f32 %v3168_v62, %v1605_v45 }
 0x171   : > { %v2467_v10 = vpop.f32.mrf.mxu1  ;;  %v2547_v9 = vpop.f32.mrf.mxu0  ;;  %v1389_v7 = vadd.f32 %v2463_v19, %v2351_v32  ;;  %v2466_v38 = vadd.f32 %v2465_v49, %v2464_v33  ;;  %v1381_v17 = vadd.f32 %v2457_v40, %v2345_v34 }
 0x172   : > { %v2207_v53 = vpack.c.bf16 %v1678_v0, %v1677_v57  ;;  %v1534_v23 = vadd.f32 %v2547_v9, %v1373_v50  ;;  %v1676_v46 = vmax.f32 %v1644_v48, 0.0  ;;  %v1649_v52 = vadd.f32 %v3168_v62, %v1610_v51 }
 0x173   : > { %v1608_v4 = vmul.f32 %v3156_v27, %v1523_v16  ;;  %v2468_v6 = vpop.f32.mrf.mxu1  ;;  %v1525_v25 = vpop.f32.mrf.mxu0 }
 0x174   : > { %2255 = vst [vmem:[%s3197_s24 + $0x38] sm:$0xff] %v2207_v53   ;;  %v1611_v2 = vmul.f32 %v3156_v27, %v1534_v23  ;;  %v2202_v29 = vpack.c.bf16 %v1676_v46, %v1675_v26  ;;  %v1526_v21 = vadd.f32 %v1525_v25, %v1365_v28  ;;  %v1681_v59 = vmax.f32 %v1649_v52, 0.0  ;;  %v3390_v53 = vld [vmem:[#allocation2_spill] sm:$0xff] }
 0x175   : > { %v2470_v35 = vpop.f32.mrf.mxu1  ;;  %v2550_v37 = vpop.f32.mrf.mxu0  ;;  %v1647_v12 = vadd.f32 %v3168_v62, %v1608_v4  ;;  %v1394_v19 = vadd.f32 %v2466_v38, %v3390_v53  ;;  %v2469_v23 = vadd.f32 %v2468_v6, %v2467_v10 }
 0x176   : > { %v1650_v42 = vadd.f32 %v3168_v62, %v1611_v2  ;;  %v1547_v54 = vadd.f32 %v2550_v37, %v1386_v55  ;;  %2254 = vst [vmem:[%s3197_s24 + $0x30] sm:$0xff] %v2202_v29   ;;  %v1609_v44 = vmul.f32 %v3156_v27, %v1526_v21  ;;  %v3391_v2 = vld [vmem:[#allocation5_spill] sm:$0xff] }
 0x177   : > { %v2471_v31 = vpop.f32.mrf.mxu1  ;;  %v1538_v14 = vpop.f32.mrf.mxu0  ;;  %v1679_v45 = vmax.f32 %v1647_v12, 0.0 }
 0x178   : > { %v1682_v11 = vmax.f32 %v1650_v42, 0.0  ;;  %v1614_v20 = vmul.f32 %v3156_v27, %v1547_v54  ;;  %v2472_v36 = vadd.f32 %v2471_v31, %v2470_v35  ;;  %v1539_v63 = vadd.f32 %v1538_v14, %v1378_v3  ;;  %v3392_v35 = vld [vmem:[#allocation3_spill] sm:$0xff] }
 0x179   : > { %v1648_v39 = vadd.f32 %v3168_v62, %v1609_v44  ;;  %v2473_v13 = vpop.f32.mrf.mxu1  ;;  %v2551_v41 = vpop.f32.mrf.mxu0  ;;  %v1397_v37 = vadd.f32 %v2469_v23, %v3392_v35 }
 0x17a   : > { %v2217_v43 = vpack.c.bf16 %v1682_v11, %v1681_v59  ;;  %v1550_v47 = vadd.f32 %v2551_v41, %v1389_v7  ;;  %v1653_v50 = vadd.f32 %v3168_v62, %v1614_v20  ;;  %v1612_v57 = vmul.f32 %v3156_v27, %v1539_v63  ;;  %v3393_v7 = vld [vmem:[#allocation6_spill] sm:$0xff] }
 0x17b   : > { %v1680_v1 = vmax.f32 %v1648_v39, 0.0  ;;  %v2474_v0 = vpop.f32.mrf.mxu1  ;;  %v1541_v51 = vpop.f32.mrf.mxu0  ;;  %v1402_v61 = vadd.f32 %v2472_v36, %v3389_v15 }
 0x17c   : > { %2257 = vst [vmem:[%s3197_s24 + $0x48] sm:$0xff] %v2217_v43   ;;  %v1615_v16 = vmul.f32 %v3156_v27, %v1550_v47  ;;  %v2475_v18 = vadd.f32 %v2474_v0, %v2473_v13  ;;  %v1542_v33 = vadd.f32 %v1541_v51, %v1381_v17  ;;  %v1685_v26 = vmax.f32 %v1653_v50, 0.0  ;;  %v3394_v50 = vld [vmem:[#allocation8_spill] sm:$0xff]  ;;  %v3395_v51 = vld [vmem:[#allocation7_spill] sm:$0xff] }
 0x17d   : > { %v2212_v48 = vpack.c.bf16 %v1680_v1, %v1679_v45  ;;  %v2476_v49 = vpop.f32.mrf.mxu1  ;;  %v2554_v9 = vpop.f32.mrf.mxu0  ;;  %v1651_v46 = vadd.f32 %v3168_v62, %v1612_v57 }
 0x17e   : > { %v1654_v28 = vadd.f32 %v3168_v62, %v1615_v16  ;;  %v1563_v30 = vadd.f32 %v2554_v9, %v1402_v61  ;;  %v1613_v52 = vmul.f32 %v3156_v27, %v1542_v33  ;;  %v1405_v55 = vadd.f32 %v2475_v18, %v3391_v2 }
 0x17f   : > { %2256 = vst [vmem:[%s3197_s24 + $0x40] sm:$0xff] %v2212_v48   ;;  %v2477_v4 = vpop.f32.mrf.mxu1  ;;  %v1554_v25 = vpop.f32.mrf.mxu0  ;;  %v1683_v56 = vmax.f32 %v1651_v46, 0.0 }
 0x180   : > { %v1686_v5 = vmax.f32 %v1654_v28, 0.0  ;;  %v1618_v22 = vmul.f32 %v3156_v27, %v1563_v30  ;;  %v1555_v8 = vadd.f32 %v1554_v25, %v1394_v19  ;;  %v1652_v60 = vadd.f32 %v3168_v62, %v1613_v52  ;;  %v3396_v19 = vld [vmem:[#allocation9_spill] sm:$0xff] }
 0x181   : > { %v2479_v24 = vpop.f32.mrf.mxu1  ;;  %v2555_v34 = vpop.f32.mrf.mxu0  ;;  %v2478_v6 = vadd.f32 %v2477_v4, %v2476_v49 }
 0x182   : > { %v2227_v10 = vpack.c.bf16 %v1686_v5, %v1685_v26  ;;  %v1566_v58 = vadd.f32 %v2555_v34, %v1405_v55  ;;  %v1684_v32 = vmax.f32 %v1652_v60, 0.0  ;;  %v1616_v29 = vmul.f32 %v3156_v27, %v1555_v8 }
 0x183   : > { %v2480_v21 = vpop.f32.mrf.mxu1  ;;  %v1557_v40 = vpop.f32.mrf.mxu0  ;;  %v1657_v42 = vadd.f32 %v3168_v62, %v1618_v22  ;;  %v1410_v11 = vadd.f32 %v2478_v6, %v3393_v7 }
 0x184   : > { %2259 = vst [vmem:[%s3197_s24 + $0x58] sm:$0xff] %v2227_v10   ;;  %v1619_v54 = vmul.f32 %v3156_v27, %v1566_v58  ;;  %v2222_v3 = vpack.c.bf16 %v1684_v32, %v1683_v56  ;;  %v1558_v59 = vadd.f32 %v1557_v40, %v1397_v37  ;;  %v2481_v14 = vadd.f32 %v2480_v21, %v2479_v24 }
 0x185   : > { %v2482_v12 = vpop.f32.mrf.mxu1  ;;  %v2558_v44 = vpop.f32.mrf.mxu0  ;;  %v1655_v20 = vadd.f32 %v3168_v62, %v1616_v29  ;;  %v1689_v13 = vmax.f32 %v1657_v42, 0.0 }
 0x186   : > { %v1658_v31 = vadd.f32 %v3168_v62, %v1619_v54  ;;  %2258 = vst [vmem:[%s3197_s24 + $0x50] sm:$0xff] %v2222_v3   ;;  %v1617_v36 = vmul.f32 %v3156_v27, %v1558_v59  ;;  %v1413_v16 = vadd.f32 %v2481_v14, %v3395_v51 }
 0x187   : > { %v2483_v63 = vpop.f32.mrf.mxu1  ;;  %v1570_v39 = vpop.f32.mrf.mxu0  ;;  %v1687_v18 = vmax.f32 %v1655_v20, 0.0 }
 0x188   : > { %v1690_v41 = vmax.f32 %v1658_v31, 0.0  ;;  %v2484_v38 = vadd.f32 %v2483_v63, %v2482_v12  ;;  %v1571_v43 = vadd.f32 %v1570_v39, %v1410_v11  ;;  %v1656_v47 = vadd.f32 %v3168_v62, %v1617_v36 }
 0x189   : > { %v2485_v17 = vpop.f32.mrf.mxu1  ;;  %v2559_v45 = vpop.f32.mrf.mxu0 }
 0x18a   : > { %v2237_v1 = vpack.c.bf16 %v1690_v41, %v1689_v13  ;;  %v1418_v57 = vadd.f32 %v2484_v38, %v3394_v50  ;;  %v1620_v0 = vmul.f32 %v3156_v27, %v1571_v43  ;;  %v1688_v15 = vmax.f32 %v1656_v47, 0.0 }
 0x18b   : > { %v2486_v61 = vpop.f32.mrf.mxu1  ;;  %v1573_v48 = vpop.f32.mrf.mxu0 }
 0x18c   : > { %2261 = vst [vmem:[%s3197_s24 + $0x68] sm:$0xff] %v2237_v1   ;;  %v1579_v33 = vadd.f32 %v2558_v44, %v1418_v57  ;;  %v2487_v49 = vadd.f32 %v2486_v61, %v2485_v17  ;;  %v1574_v9 = vadd.f32 %v1573_v48, %v1413_v16  ;;  %v2232_v28 = vpack.c.bf16 %v1688_v15, %v1687_v18 }
 0x18d   : > { %v1659_v53 = vadd.f32 %v3168_v62, %v1620_v0 }
 0x18e   : > { %v1622_v30 = vmul.f32 %v3156_v27, %v1579_v33  ;;  %v1421_v23 = vadd.f32 %v2487_v49, %v3396_v19  ;;  %v1621_v26 = vmul.f32 %v3156_v27, %v1574_v9  ;;  %2260 = vst [vmem:[%s3197_s24 + $0x60] sm:$0xff] %v2232_v28  }
 0x18f   : > { %v1691_v25 = vmax.f32 %v1659_v53, 0.0 }
 0x190   : > { %v1582_v46 = vadd.f32 %v2559_v45, %v1421_v23  ;;  %v1660_v52 = vadd.f32 %v3168_v62, %v1621_v26  ;;  %v1661_v4 = vadd.f32 %v3168_v62, %v1622_v30 }
 0x192   : > { %v1623_v5 = vmul.f32 %v3156_v27, %v1582_v46  ;;  %v1692_v22 = vmax.f32 %v1660_v52, 0.0  ;;  %v1693_v55 = vmax.f32 %v1661_v4, 0.0 }
 0x194   : > { %v1662_v8 = vadd.f32 %v3168_v62, %v1623_v5  ;;  %v2242_v2 = vpack.c.bf16 %v1692_v22, %v1691_v25 }
 0x196   : > { %v1694_v60 = vmax.f32 %v1662_v8, 0.0  ;;  %2262 = vst [vmem:[%s3197_s24 + $0x70] sm:$0xff] %v2242_v2  }
 0x198   : > { %v2247_v24 = vpack.c.bf16 %v1694_v60, %v1693_v55 }
 0x19a   : > { %2263 = vst [vmem:[%s3197_s24 + $0x78] sm:$0xff] %v2247_v24  }
 0x19b PF: > { %s14_s17 = sadd.s32 1, %s2775_s17   ;;  %s3397_s15 = smov %s2771_s16 }
 0x19c   : > { %p11_p5 = scmp.ge.s32.totalorder %s14_s17, 9   ;;  %s3398_s16 = smov %s3400_s18 }
 0x19e   :  { %13 = sbr.rel (!%p11_p5) target bundleno = 2 (0x2), region = 75 }

// kernel: two_step_vgg_forward.9
= control target key start
LH: loop header
LB: loop body
LE: loop exit
PB: predicated region body
PF: predicated region fallthrough
CT: control target
= control target key end

     0   :  { %s2802_s15 = smov 0   ;;  %s2804_s16 = smov 0   ;;  %s3352_s0 = inlined_call_operand.vmem [shape: bf16[1536,640], index: 0, kind: input, shape index: {}]   ;;  %s3353_s1 = inlined_call_operand.vmem [shape: bf16[640,128], index: 1, kind: input, shape index: {}]   ;;  %s3354_s2 = inlined_call_operand.vmem [shape: f32[1,128], index: 2, kind: input, shape index: {}]   ;;  %s3355_s3 = inlined_call_operand.vmem [shape: f32[1,128], index: 3, kind: input, shape index: {}]   ;;  %s3356_s4 = inlined_call_operand.vmem [shape: bf16[1536,128], index: 4, kind: output, shape index: {}]  }
   0x1   :  { %s2806_s17 = smov 0  }
   0x2 LB: > { %s26_s18 = sadd.s32 1, %s2771_s16  ;;  %p1976_p0 = scmp.ge.s32.totalorder %s2775_s17, 1  ;;  %s2775_s17 = sphi %s2806_s17, %s14_s17   ;;  %s2771_s16 = sphi %s2804_s16, %s3398_s16   ;;  %s2767_s15 = sphi %s2802_s15, %s3397_s15  }
   0x3   : > { %p28_p1 = scmp.ge.s32.totalorder %s26_s18, 6  ;;  %p203_p2 = scmp.lt.s32.totalorder %s2775_s17, 7 }
   0x5   : > { %s3400_s18 = smov (%p28_p1, %s26_s18), 0  ;;  %p204_p3 = pnand %p1976_p0, %p203_p2 }
   0x7   : > { %207 = sbr.rel (%p204_p3) target bundleno = 411 (0x19b), region = 36 }
   0xc   : > { %v2601_v0 = vld [vmem:[%s3353_s1 + $0x78] sm:$0xff]   ;;  %s1977_s21 = sshll.u32 %s2767_s15, 5  ;;  %v2603_v2 = vld [vmem:[%s3353_s1 + $0x70] sm:$0xff]   ;;  %v2605_v4 = vld [vmem:[%s3353_s1 + $0x68] sm:$0xff]  }
   0xd   : > { %v2602_v1 = vld [vmem:[%s3353_s1 + $0x38] sm:$0xff]   ;;  %2264 = vmatprep.subr.bf16.mxu0 %v2601_v0  ;;  %2560 = vmatprep.subr.bf16.mxu1 %v2601_v0  ;;  %p244_p4 = scmp.lt.s32.totalorder %s1977_s21, 191  ;;  %v2604_v3 = vld [vmem:[%s3353_s1 + $0x30] sm:$0xff]   ;;  %v2606_v5 = vld [vmem:[%s3353_s1 + $0x28] sm:$0xff]  }
   0xe   : > { %2265 = vmatpush3.bf16.msra.mxu0 %v2602_v1  ;;  %2568 = vmatpush3.bf16.msra.mxu1 %v2602_v1  ;;  %v2607_v6 = vld [vmem:[%s3353_s1 + $0x60] sm:$0xff]   ;;  %v2609_v8 = vld [vmem:[%s3353_s1 + $0x58] sm:$0xff]   ;;  %v2611_v10 = vld [vmem:[%s3353_s1 + $0x50] sm:$0xff]  }
   0xf   : > { %2266 = vmatprep.subr.bf16.mxu0 %v2603_v2  ;;  %2561 = vmatprep.subr.bf16.mxu1 %v2603_v2  ;;  %s3402_s21 = smov (!%p244_p4, %s1977_s21), 191  ;;  %v2608_v7 = vld [vmem:[%s3353_s1 + $0x20] sm:$0xff]   ;;  %v2610_v9 = vld [vmem:[%s3353_s1 + $0x18] sm:$0xff]   ;;  %v2612_v13 = vld [vmem:[%s3353_s1 + $0x10] sm:$0xff]  }
  0x10   : > { %s2576_s8 = smul.u32 20, %s3402_s21  ;;  %v2613_v14 = vld [vmem:[%s3353_s1 + $0x48] sm:$0xff]   ;;  %v2615_v16 = vld [vmem:[%s3353_s1 + $0x40] sm:$0xff]   ;;  %v2623_v18 = vld [vmem:[%s3353_s1 + $0xf8] sm:$0xff]   ;;  %s1980_s22 = sshll.u32 %s3402_s21, 2 }
  0x11   : > { %v2614_v15 = vld [vmem:[%s3353_s1 + $0x8] sm:$0xff]   ;;  %v2616_v17 = vld [vmem:[%s3353_s1] sm:$0xff]   ;;  %v2626_v19 = vld [vmem:[%s3353_s1 + $0x138] sm:$0xff]   ;;  %s3197_s24 = scalar_lea.vmem %s3356_s4, %s1980_s22 }
  0x12   : > { %2267 = vmatpush3.bf16.msra.mxu0 %v2604_v3  ;;  %2569 = vmatpush3.bf16.msra.mxu1 %v2604_v3  ;;  %s2853_s15 = scalar_lea.vmem %s3352_s0, %s2576_s8  ;;  %v2624_v22 = vld [vmem:[%s3353_s1 + $0xb8] sm:$0xff]   ;;  %v2625_v23 = vld [vmem:[%s3353_s1 + $0xf0] sm:$0xff]   ;;  %v2634_v29 = vld [vmem:[%s3353_s1 + $0xe8] sm:$0xff]  }
  0x13   : > { %2268 = vmatprep.subr.bf16.mxu0 %v2605_v4  ;;  %2562 = vmatprep.subr.bf16.mxu1 %v2605_v4  ;;  %v2619_v11 = vld [vmem:[%s2853_s15 + $0x4] ss:$20 sps:$4 sm:$0xff]   ;;  %v2617_v20 = vld [vmem:[%s2853_s15] ss:$20 sps:$4 sm:$0xff]   ;;  %v2632_v28 = vld [vmem:[%s2853_s15 + $0x28] ss:$20 sps:$4 sm:$0xff]  }
  0x14   : > { %v2622_v12 = vld [vmem:[%s2853_s15 + $0x1e4] ss:$20 sps:$4 sm:$0xff]   ;;  %1134 = vmatprep.mubr.bf16.mxu0 %v2619_v11  ;;  %v2620_v21 = vld [vmem:[%s2853_s15 + $0x1e0] ss:$20 sps:$4 sm:$0xff]   ;;  %v2633_v30 = vld [vmem:[%s2853_s15 + $0x208] ss:$20 sps:$4 sm:$0xff]  }
  0x15   : > { %1230 = vmatprep.mubr.bf16.mxu1 %v2622_v12  ;;  %v2628_v24 = vld [vmem:[%s2853_s15 + $0x2c] ss:$20 sps:$4 sm:$0xff]   ;;  %v2645_v26 = vld [vmem:[%s3353_s1 + $0x130] sm:$0xff]   ;;  %v2644_v36 = vld [vmem:[%s3353_s1 + $0xd8] sm:$0xff]  }
  0x16   : > { %2269 = vmatpush3.bf16.msra.mxu0 %v2606_v5  ;;  %2570 = vmatpush3.bf16.msra.mxu1 %v2606_v5  ;;  %v2630_v25 = vld [vmem:[%s2853_s15 + $0x20c] ss:$20 sps:$4 sm:$0xff]   ;;  %v2627_v27 = vld [vmem:[%s3353_s1 + $0xb0] sm:$0xff]   ;;  %v2646_v40 = vld [vmem:[%s3353_s1 + $0x98] sm:$0xff]  }
  0x17   : > { %2270 = vmatprep.subr.bf16.mxu0 %v2607_v6  ;;  %2563 = vmatprep.subr.bf16.mxu1 %v2607_v6  ;;  %v2635_v31 = vld [vmem:[%s3353_s1 + $0xa8] sm:$0xff]   ;;  %v2636_v33 = vld [vmem:[%s3353_s1 + $0xe0] sm:$0xff]   ;;  %v2647_v41 = vld [vmem:[%s3353_s1 + $0xd0] sm:$0xff]  }
  0x18   : > { %v2638_v32 = vld [vmem:[%s2853_s15 + $0x54] ss:$20 sps:$4 sm:$0xff]   ;;  %v2637_v35 = vld [vmem:[%s3353_s1 + $0xa0] sm:$0xff]   ;;  %v2649_v42 = vld [vmem:[%s2853_s15 + $0x7c] ss:$20 sps:$4 sm:$0xff]  }
  0x19   : > { %v2640_v34 = vld [vmem:[%s2853_s15 + $0x234] ss:$20 sps:$4 sm:$0xff]   ;;  %v2642_v37 = vld [vmem:[%s2853_s15 + $0x50] ss:$20 sps:$4 sm:$0xff]   ;;  %v2653_v46 = vld [vmem:[%s2853_s15 + $0x78] ss:$20 sps:$4 sm:$0xff]  }
  0x1a   : > { %2271 = vmatpush3.bf16.msra.mxu0 %v2608_v7  ;;  %2571 = vmatpush3.bf16.msra.mxu1 %v2608_v7  ;;  %v2658_v38 = vld [vmem:[%s3353_s1 + $0x128] sm:$0xff]   ;;  %v2643_v39 = vld [vmem:[%s2853_s15 + $0x230] ss:$20 sps:$4 sm:$0xff]   ;;  %v2679_v52 = vld [vmem:[%s3353_s1 + $0x118] sm:$0xff]  }
  0x1b   : > { %2272 = vmatprep.subr.bf16.mxu0 %v2609_v8  ;;  %2564 = vmatprep.subr.bf16.mxu1 %v2609_v8  ;;  %v2651_v43 = vld [vmem:[%s2853_s15 + $0x25c] ss:$20 sps:$4 sm:$0xff]   ;;  %v2672_v45 = vld [vmem:[%s3353_s1 + $0x120] sm:$0xff]   ;;  %v2654_v47 = vld [vmem:[%s2853_s15 + $0x258] ss:$20 sps:$4 sm:$0xff]  }
  0x1c   : > { %v2648_v44 = vld [vmem:[%s3353_s1 + $0x90] sm:$0xff]   ;;  %v2655_v48 = vld [vmem:[%s3353_s1 + $0xc8] sm:$0xff]   ;;  %v2657_v50 = vld [vmem:[%s3353_s1 + $0xc0] sm:$0xff]  }
  0x1d   : > { %v2656_v49 = vld [vmem:[%s3353_s1 + $0x88] sm:$0xff]   ;;  %v2660_v51 = vld [vmem:[%s2853_s15 + $0xa4] ss:$20 sps:$4 sm:$0xff]   ;;  %v2665_v56 = vld [vmem:[%s2853_s15 + $0xa0] ss:$20 sps:$4 sm:$0xff]  }
  0x1e   : > { %2273 = vmatpush3.bf16.msra.mxu0 %v2610_v9  ;;  %2572 = vmatpush3.bf16.msra.mxu1 %v2610_v9  ;;  %v2664_v53 = vld [vmem:[%s2853_s15 + $0xc] ss:$20 sps:$4 sm:$0xff]   ;;  %v2662_v55 = vld [vmem:[%s2853_s15 + $0x8] ss:$20 sps:$4 sm:$0xff]   ;;  %v2692_v57 = vld [vmem:[%s3353_s1 + $0x110] sm:$0xff]  }
  0x1f   : > { %2274 = vmatprep.subr.bf16.mxu0 %v2611_v10  ;;  %2565 = vmatprep.subr.bf16.mxu1 %v2611_v10  ;;  %v2659_v54 = vld [vmem:[%s3353_s1 + $0x80] sm:$0xff]   ;;  %v2668_v59 = vld [vmem:[%s2853_s15 + $0x34] ss:$20 sps:$4 sm:$0xff]   ;;  %v2675_v0 = vld [vmem:[%s2853_s15 + $0x5c] ss:$20 sps:$4 sm:$0xff]  }
  0x20   : > { %v2666_v58 = vld [vmem:[%s2853_s15 + $0xcc] ss:$20 sps:$4 sm:$0xff]   ;;  %v2670_v61 = vld [vmem:[%s2853_s15 + $0xc8] ss:$20 sps:$4 sm:$0xff]   ;;  %v2671_v62 = vld [vmem:[%s2853_s15 + $0x30] ss:$20 sps:$4 sm:$0xff]  }
  0x21   : > { %v2699_v60 = vld [vmem:[%s3353_s1 + $0x108] sm:$0xff]   ;;  %v2712_v1 = vld [vmem:[%s3353_s1 + $0x100] sm:$0xff]   ;;  %v2680_v4 = vld [vmem:[%s2853_s15 + $0x11c] ss:$20 sps:$4 sm:$0xff]  }
  0x22   : > { %2275 = vmatpush3.bf16.msra.mxu0 %v2612_v13  ;;  %2573 = vmatpush3.bf16.msra.mxu1 %v2612_v13  ;;  %v2673_v63 = vld [vmem:[%s2853_s15 + $0xf4] ss:$20 sps:$4 sm:$0xff]   ;;  %v2677_v2 = vld [vmem:[%s2853_s15 + $0xf0] ss:$20 sps:$4 sm:$0xff]   ;;  %v2678_v3 = vld [vmem:[%s2853_s15 + $0x58] ss:$20 sps:$4 sm:$0xff]  }
  0x23   : > { %2276 = vmatprep.subr.bf16.mxu0 %v2613_v14  ;;  %2566 = vmatprep.subr.bf16.mxu1 %v2613_v14  ;;  %v2682_v5 = vld [vmem:[%s2853_s15 + $0x84] ss:$20 sps:$4 sm:$0xff]   ;;  %v2685_v7 = vld [vmem:[%s2853_s15 + $0x80] ss:$20 sps:$4 sm:$0xff]   ;;  %v2691_v11 = vld [vmem:[%s2853_s15 + $0xa8] ss:$20 sps:$4 sm:$0xff]  }
  0x24   : > { %v2684_v6 = vld [vmem:[%s2853_s15 + $0x118] ss:$20 sps:$4 sm:$0xff]   ;;  %v2690_v10 = vld [vmem:[%s2853_s15 + $0x140] ss:$20 sps:$4 sm:$0xff]   ;;  %v2697_v14 = vld [vmem:[%s2853_s15 + $0x168] ss:$20 sps:$4 sm:$0xff]  }
  0x25   : > { %v2686_v8 = vld [vmem:[%s2853_s15 + $0x144] ss:$20 sps:$4 sm:$0xff]   ;;  %v2688_v9 = vld [vmem:[%s2853_s15 + $0xac] ss:$20 sps:$4 sm:$0xff]   ;;  %v2695_v13 = vld [vmem:[%s2853_s15 + $0xd4] ss:$20 sps:$4 sm:$0xff]  }
  0x26   : > { %2277 = vmatpush3.bf16.msra.mxu0 %v2614_v15  ;;  %2574 = vmatpush3.bf16.msra.mxu1 %v2614_v15  ;;  %v2693_v12 = vld [vmem:[%s2853_s15 + $0x16c] ss:$20 sps:$4 sm:$0xff]   ;;  %v2698_v15 = vld [vmem:[%s2853_s15 + $0xd0] ss:$20 sps:$4 sm:$0xff]  }
  0x27   : > { %2278 = vmatprep.subr.bf16.mxu0 %v2615_v16  ;;  %2567 = vmatprep.subr.bf16.mxu1 %v2615_v16  ;;  %v2700_v16 = vld [vmem:[%s2853_s15 + $0x194] ss:$20 sps:$4 sm:$0xff]  }
  0x2a   : > { %2279 = vmatpush3.bf16.msra.mxu0 %v2616_v17  ;;  %2575 = vmatpush3.bf16.msra.mxu1 %v2616_v17  ;;  %v2702_v17 = vld [vmem:[%s2853_s15 + $0xfc] ss:$20 sps:$4 sm:$0xff]  }
  0x2b   : > { %2376 = vmatprep.subr.bf16.mxu1 %v2623_v18  ;;  %2512 = vmatprep.subr.bf16.mxu0 %v2626_v19  ;;  %v2704_v18 = vld [vmem:[%s2853_s15 + $0x190] ss:$20 sps:$4 sm:$0xff]  }
  0x2d   : > { %1135 = vmatmul.mubr.bf16.vlgmr.msra.gmra.mxu0 %v2617_v20  ;;  %1231 = vmatmul.mubr.bf16.vlgmr.msra.gmra.mxu1 %v2620_v21  ;;  %v2706_v20 = vld [vmem:[%s2853_s15 + $0x1bc] ss:$20 sps:$4 sm:$0xff]   ;;  %v2708_v21 = vld [vmem:[%s2853_s15 + $0x124] ss:$20 sps:$4 sm:$0xff]  }
  0x2e   : > { %2377 = vmatpush3.bf16.msra.mxu1 %v2624_v22  ;;  %2513 = vmatpush3.bf16.msra.mxu0 %v2626_v19  ;;  %v2705_v19 = vld [vmem:[%s2853_s15 + $0xf8] ss:$20 sps:$4 sm:$0xff]  }
  0x2f   : > { %2378 = vmatprep.subr.bf16.mxu1 %v2625_v23  ;;  %1142 = vmatprep.mubr.bf16.mxu0 %v2628_v24  ;;  %v2710_v22 = vld [vmem:[%s2853_s15 + $0x1b8] ss:$20 sps:$4 sm:$0xff]   ;;  %v2711_v23 = vld [vmem:[%s2853_s15 + $0x120] ss:$20 sps:$4 sm:$0xff]  }
  0x30   : > { %1238 = vmatprep.mubr.bf16.mxu1 %v2630_v25  ;;  %2514 = vmatprep.subr.bf16.mxu0 %v2645_v26  ;;  %v2713_v24 = vld [vmem:[%s2853_s15 + $0x14c] ss:$20 sps:$4 sm:$0xff]   ;;  %v2715_v25 = vld [vmem:[%s2853_s15 + $0x10] ss:$20 sps:$4 sm:$0xff]  }
  0x32   : > { %2379 = vmatpush3.bf16.msra.mxu1 %v2627_v27  ;;  %2515 = vmatpush3.bf16.msra.mxu0 %v2645_v26  ;;  %v2716_v26 = vld [vmem:[%s2853_s15 + $0x148] ss:$20 sps:$4 sm:$0xff]   ;;  %v2717_v27 = vld [vmem:[%s2853_s15 + $0x38] ss:$20 sps:$4 sm:$0xff]  }
  0x33   : > { %2380 = vmatprep.subr.bf16.mxu1 %v2634_v29  ;;  %2516 = vmatprep.subr.bf16.mxu0 %v2658_v38  ;;  %v2720_v29 = vld [vmem:[%s2853_s15 + $0x60] ss:$20 sps:$4 sm:$0xff]  }
  0x35   : > { %1143 = vmatmul.mubr.bf16.gmra.mxu0 %v2632_v28  ;;  %1239 = vmatmul.mubr.bf16.gmra.mxu1 %v2633_v30  ;;  %v2718_v28 = vld [vmem:[%s2853_s15 + $0x174] ss:$20 sps:$4 sm:$0xff]   ;;  %v2721_v30 = vld [vmem:[%s2853_s15 + $0x170] ss:$20 sps:$4 sm:$0xff]  }
  0x36   : > { %2381 = vmatpush3.bf16.msra.mxu1 %v2635_v31  ;;  %1150 = vmatprep.mubr.bf16.mxu0 %v2638_v32  ;;  %v2722_v31 = vld [vmem:[%s2853_s15 + $0x88] ss:$20 sps:$4 sm:$0xff]  }
  0x37   : > { %2382 = vmatprep.subr.bf16.mxu1 %v2636_v33  ;;  %1246 = vmatprep.mubr.bf16.mxu1 %v2640_v34  ;;  %v2723_v32 = vld [vmem:[%s2853_s15 + $0x19c] ss:$20 sps:$4 sm:$0xff]   ;;  %v2726_v34 = vld [vmem:[%s2853_s15 + $0x198] ss:$20 sps:$4 sm:$0xff]  }
  0x38   : > { %2517 = vmatpush3.bf16.msra.mxu0 %v2658_v38  ;;  %v2725_v33 = vld [vmem:[%s2853_s15 + $0xb0] ss:$20 sps:$4 sm:$0xff]   ;;  %v2731_v38 = vld [vmem:[%s2853_s15 + $0x1c0] ss:$20 sps:$4 sm:$0xff]  }
  0x39   : > { %2518 = vmatprep.subr.bf16.mxu0 %v2672_v45 }
  0x3a   : > { %2383 = vmatpush3.bf16.msra.mxu1 %v2637_v35  ;;  %v2727_v35 = vld [vmem:[%s2853_s15 + $0xd8] ss:$20 sps:$4 sm:$0xff]  }
  0x3b   : > { %2384 = vmatprep.subr.bf16.mxu1 %v2644_v36  ;;  %v2728_v36 = vld [vmem:[%s2853_s15 + $0x1c4] ss:$20 sps:$4 sm:$0xff]  }
  0x3c   : > { %2519 = vmatpush3.bf16.msra.mxu0 %v2672_v45  ;;  %v2740_v45 = vld [vmem:[%s2853_s15 + $0x1a0] ss:$20 sps:$4 sm:$0xff]  }
  0x3d   : > { %1151 = vmatmul.mubr.bf16.gmra.mxu0 %v2642_v37  ;;  %1247 = vmatmul.mubr.bf16.gmra.mxu1 %v2643_v39  ;;  %v2730_v37 = vld [vmem:[%s2853_s15 + $0x100] ss:$20 sps:$4 sm:$0xff]   ;;  %v2732_v39 = vld [vmem:[%s2853_s15 + $0x128] ss:$20 sps:$4 sm:$0xff]  }
  0x3e   : > { %2385 = vmatpush3.bf16.msra.mxu1 %v2646_v40  ;;  %1158 = vmatprep.mubr.bf16.mxu0 %v2649_v42  ;;  %v2733_v40 = vld [vmem:[%s2853_s15 + $0x1ec] ss:$20 sps:$4 sm:$0xff]   ;;  %v2736_v42 = vld [vmem:[%s2853_s15 + $0x1e8] ss:$20 sps:$4 sm:$0xff]  }
  0x3f   : > { %2386 = vmatprep.subr.bf16.mxu1 %v2647_v41  ;;  %1254 = vmatprep.mubr.bf16.mxu1 %v2651_v43  ;;  %v2735_v41 = vld [vmem:[%s2853_s15 + $0x150] ss:$20 sps:$4 sm:$0xff]   ;;  %v2737_v43 = vld [vmem:[%s2853_s15 + $0x178] ss:$20 sps:$4 sm:$0xff]  }
  0x40   : > { %2520 = vmatprep.subr.bf16.mxu0 %v2679_v52 }
  0x41   : > { %2521 = vmatpush3.bf16.msra.mxu0 %v2679_v52  ;;  %v2748_v52 = vld [vmem:[%s2853_s15 + $0x264] ss:$20 sps:$4 sm:$0xff]  }
  0x42   : > { %2387 = vmatpush3.bf16.msra.mxu1 %v2648_v44  ;;  %2522 = vmatprep.subr.bf16.mxu0 %v2692_v57  ;;  %v2738_v44 = vld [vmem:[%s2853_s15 + $0x214] ss:$20 sps:$4 sm:$0xff]  }
  0x43   : > { %2388 = vmatprep.subr.bf16.mxu1 %v2655_v48  ;;  %v2743_v48 = vld [vmem:[%s2853_s15 + $0x23c] ss:$20 sps:$4 sm:$0xff]  }
  0x45   : > { %1159 = vmatmul.mubr.bf16.gmra.mxu0 %v2653_v46  ;;  %1255 = vmatmul.mubr.bf16.gmra.mxu1 %v2654_v47  ;;  %v2741_v46 = vld [vmem:[%s2853_s15 + $0x210] ss:$20 sps:$4 sm:$0xff]   ;;  %v2742_v47 = vld [vmem:[%s2853_s15 + $0x1c8] ss:$20 sps:$4 sm:$0xff]  }
  0x46   : > { %2389 = vmatpush3.bf16.msra.mxu1 %v2656_v49  ;;  %1166 = vmatprep.mubr.bf16.mxu0 %v2660_v51  ;;  %v2745_v49 = vld [vmem:[%s2853_s15 + $0x1f0] ss:$20 sps:$4 sm:$0xff]   ;;  %v2747_v51 = vld [vmem:[%s2853_s15 + $0x218] ss:$20 sps:$4 sm:$0xff]  }
  0x47   : > { %2390 = vmatprep.subr.bf16.mxu1 %v2657_v50  ;;  %1295 = vmatprep.mubr.bf16.mxu1 %v2664_v53  ;;  %v2746_v50 = vld [vmem:[%s2853_s15 + $0x238] ss:$20 sps:$4 sm:$0xff]   ;;  %v2750_v53 = vld [vmem:[%s2853_s15 + $0x240] ss:$20 sps:$4 sm:$0xff]  }
  0x48   : > { %2523 = vmatpush3.bf16.msra.mxu0 %v2692_v57 }
  0x49   : > { %2524 = vmatprep.subr.bf16.mxu0 %v2699_v60 }
  0x4a   : > { %2391 = vmatpush3.bf16.msra.mxu1 %v2659_v54  ;;  %v2751_v54 = vld [vmem:[%s2853_s15 + $0x260] ss:$20 sps:$4 sm:$0xff]  }
  0x4c   : > { %2525 = vmatpush3.bf16.msra.mxu0 %v2699_v60 }
  0x4d   : > { %1167 = vmatmul.mubr.bf16.gmra.mxu0 %v2665_v56  ;;  %1296 = vmatmul.mubr.bf16.vlgmr.msra.gmra.mxu1 %v2662_v55  ;;  %v2752_v55 = vld [vmem:[%s2853_s15 + $0x268] ss:$20 sps:$4 sm:$0xff]  }
  0x4e   : > { %1174 = vmatprep.mubr.bf16.mxu0 %v2666_v58  ;;  %1303 = vmatprep.mubr.bf16.mxu1 %v2668_v59 }
  0x4f   : > { %2526 = vmatprep.subr.bf16.mxu0 %v2712_v1 }
  0x50   : > { %2527 = vmatpush3.bf16.msra.mxu0 %v2712_v1 }
  0x55   : > { %1175 = vmatmul.mubr.bf16.gmra.mxu0 %v2670_v61  ;;  %1304 = vmatmul.mubr.bf16.gmra.mxu1 %v2671_v62 }
  0x56   : > { %1182 = vmatprep.mubr.bf16.mxu0 %v2673_v63  ;;  %1311 = vmatprep.mubr.bf16.mxu1 %v2675_v0 }
  0x5d   : > { %1183 = vmatmul.mubr.bf16.gmra.mxu0 %v2677_v2  ;;  %1312 = vmatmul.mubr.bf16.gmra.mxu1 %v2678_v3 }
  0x5e   : > { %1190 = vmatprep.mubr.bf16.mxu0 %v2680_v4  ;;  %1319 = vmatprep.mubr.bf16.mxu1 %v2682_v5 }
  0x65   : > { %1191 = vmatmul.mubr.bf16.gmra.mxu0 %v2684_v6  ;;  %1320 = vmatmul.mubr.bf16.gmra.mxu1 %v2685_v7 }
  0x66   : > { %1198 = vmatprep.mubr.bf16.mxu0 %v2686_v8  ;;  %1327 = vmatprep.mubr.bf16.mxu1 %v2688_v9 }
  0x6d   : > { %1199 = vmatmul.mubr.bf16.gmra.mxu0 %v2690_v10  ;;  %1328 = vmatmul.mubr.bf16.gmra.mxu1 %v2691_v11 }
  0x6e   : > { %1206 = vmatprep.mubr.bf16.mxu0 %v2693_v12  ;;  %1335 = vmatprep.mubr.bf16.mxu1 %v2695_v13 }
  0x75   : > { %1207 = vmatmul.mubr.bf16.gmra.mxu0 %v2697_v14  ;;  %1336 = vmatmul.mubr.bf16.gmra.mxu1 %v2698_v15 }
  0x76   : > { %1214 = vmatprep.mubr.bf16.mxu0 %v2700_v16  ;;  %1343 = vmatprep.mubr.bf16.mxu1 %v2702_v17 }
  0x7d   : > { %1215 = vmatmul.mubr.bf16.gmra.mxu0 %v2704_v18  ;;  %1344 = vmatmul.mubr.bf16.gmra.mxu1 %v2705_v19 }
  0x7e   : > { %1222 = vmatprep.mubr.bf16.mxu0 %v2706_v20  ;;  %1351 = vmatprep.mubr.bf16.mxu1 %v2708_v21 }
  0x85   : > { %1223 = vmatmul.mubr.bf16.gmra.mxu0 %v2710_v22  ;;  %1352 = vmatmul.mubr.bf16.gmra.mxu1 %v2711_v23 }
  0x86   : > { %1359 = vmatprep.mubr.bf16.mxu1 %v2713_v24  ;;  %2528 = vmatprep.mubr.bf16.mxu0 %v2715_v25 }
  0x8d   : > { %1360 = vmatmul.mubr.bf16.gmra.mxu1 %v2716_v26  ;;  %2529 = vmatmul.mubr.bf16.vlgmr.msra.gmra.mxu0 %v2717_v27 }
  0x8e   : > { %1367 = vmatprep.mubr.bf16.mxu1 %v2718_v28  ;;  %2532 = vmatprep.mubr.bf16.mxu0 %v2720_v29 }
  0x95   : > { %1368 = vmatmul.mubr.bf16.gmra.mxu1 %v2721_v30  ;;  %2533 = vmatmul.mubr.bf16.gmra.mxu0 %v2722_v31 }
  0x96   : > { %1375 = vmatprep.mubr.bf16.mxu1 %v2723_v32  ;;  %2536 = vmatprep.mubr.bf16.mxu0 %v2725_v33 }
  0x9d   : > { %1376 = vmatmul.mubr.bf16.gmra.mxu1 %v2726_v34  ;;  %2537 = vmatmul.mubr.bf16.gmra.mxu0 %v2727_v35 }
  0x9e   : > { %1383 = vmatprep.mubr.bf16.mxu1 %v2728_v36  ;;  %2540 = vmatprep.mubr.bf16.mxu0 %v2730_v37 }
  0xa5   : > { %1384 = vmatmul.mubr.bf16.gmra.mxu1 %v2731_v38  ;;  %2541 = vmatmul.mubr.bf16.gmra.mxu0 %v2732_v39 }
  0xa6   : > { %1391 = vmatprep.mubr.bf16.mxu1 %v2733_v40  ;;  %2544 = vmatprep.mubr.bf16.mxu0 %v2735_v41 }
  0xad   : > { %1392 = vmatmul.mubr.bf16.gmra.mxu1 %v2736_v42  ;;  %2545 = vmatmul.mubr.bf16.gmra.mxu0 %v2737_v43 }
  0xae   : > { %1399 = vmatprep.mubr.bf16.mxu1 %v2738_v44  ;;  %2548 = vmatprep.mubr.bf16.mxu0 %v2740_v45 }
  0xb5   : > { %1400 = vmatmul.mubr.bf16.gmra.mxu1 %v2741_v46  ;;  %2549 = vmatmul.mubr.bf16.gmra.mxu0 %v2742_v47 }
  0xb6   : > { %1407 = vmatprep.mubr.bf16.mxu1 %v2743_v48  ;;  %2552 = vmatprep.mubr.bf16.mxu0 %v2745_v49 }
  0xbd   : > { %1408 = vmatmul.mubr.bf16.gmra.mxu1 %v2746_v50  ;;  %2553 = vmatmul.mubr.bf16.gmra.mxu0 %v2747_v51 }
  0xbe   : > { %1415 = vmatprep.mubr.bf16.mxu1 %v2748_v52  ;;  %2556 = vmatprep.mubr.bf16.mxu0 %v2750_v53 }
  0xc5   : > { %1416 = vmatmul.mubr.bf16.gmra.mxu1 %v2751_v54  ;;  %2557 = vmatmul.mubr.bf16.gmra.mxu0 %v2752_v55 }
  0xed   : > { %v2280_v56 = vpop.f32.mrf.mxu0  ;;  %v2352_v57 = vpop.f32.mrf.mxu1 }
  0xef   : > { %v2281_v58 = vpop.f32.mrf.mxu0  ;;  %v2353_v59 = vpop.f32.mrf.mxu1 }
  0xf0   : > { %v2282_v60 = vadd.f32 %v2281_v58, %v2280_v56  ;;  %v3028_v61 = vadd.f32 %v2353_v59, %v2352_v57 }
  0xf1   : > { %v2283_v62 = vpop.f32.mrf.mxu0  ;;  %v2355_v63 = vpop.f32.mrf.mxu1 }
  0xf2   : > { %3357 = vst [vmem:[#allocation2_spill] sm:$0xff] %v3028_v61 }
  0xf3   : > { %v2284_v0 = vpop.f32.mrf.mxu0  ;;  %v2356_v1 = vpop.f32.mrf.mxu1 }
  0xf4   : > { %v3030_v2 = vadd.f32 %v2284_v0, %v2283_v62  ;;  %v3032_v3 = vadd.f32 %v2356_v1, %v2355_v63 }
  0xf5   : > { %v2286_v4 = vpop.f32.mrf.mxu0  ;;  %v2358_v5 = vpop.f32.mrf.mxu1 }
  0xf6   : > { %3358 = vst [vmem:[#allocation3_spill] sm:$0xff] %v3032_v3 }
  0xf7   : > { %v2287_v6 = vpop.f32.mrf.mxu0  ;;  %v2359_v7 = vpop.f32.mrf.mxu1 }
  0xf8   : > { %v3034_v8 = vadd.f32 %v2287_v6, %v2286_v4  ;;  %v3036_v9 = vadd.f32 %v2359_v7, %v2358_v5 }
  0xf9   : > { %v2289_v10 = vpop.f32.mrf.mxu0  ;;  %v2361_v11 = vpop.f32.mrf.mxu1 }
  0xfa   : > { %3359 = vst [vmem:[#allocation4_spill] sm:$0xff] %v3036_v9 }
  0xfb   : > { %v2290_v12 = vpop.f32.mrf.mxu0  ;;  %v2362_v13 = vpop.f32.mrf.mxu1 }
  0xfc   : > { %v3038_v14 = vadd.f32 %v2290_v12, %v2289_v10  ;;  %v3040_v15 = vadd.f32 %v2362_v13, %v2361_v11 }
  0xfd   : > { %v2292_v16 = vpop.f32.mrf.mxu0  ;;  %v2364_v17 = vpop.f32.mrf.mxu1 }
  0xfe   : > { %3360 = vst [vmem:[#allocation5_spill] sm:$0xff] %v3040_v15 }
  0xff   : > { %v2293_v18 = vpop.f32.mrf.mxu0  ;;  %v2365_v19 = vpop.f32.mrf.mxu1 }
 0x100   : > { %v3042_v20 = vadd.f32 %v2293_v18, %v2292_v16  ;;  %v3044_v21 = vadd.f32 %v2365_v19, %v2364_v17 }
 0x101   : > { %v2295_v22 = vpop.f32.mrf.mxu0  ;;  %v2367_v23 = vpop.f32.mrf.mxu1 }
 0x102   : > { %3361 = vst [vmem:[#allocation6_spill] sm:$0xff] %v3044_v21 }
 0x103   : > { %v2296_v24 = vpop.f32.mrf.mxu0  ;;  %v2368_v25 = vpop.f32.mrf.mxu1 }
 0x104   : > { %v3046_v26 = vadd.f32 %v2296_v24, %v2295_v22  ;;  %v3048_v27 = vadd.f32 %v2368_v25, %v2367_v23 }
 0x105   : > { %v2298_v28 = vpop.f32.mrf.mxu0  ;;  %v2370_v29 = vpop.f32.mrf.mxu1 }
 0x106   : > { %3362 = vst [vmem:[#allocation7_spill] sm:$0xff] %v3048_v27 }
 0x107   : > { %v2299_v30 = vpop.f32.mrf.mxu0  ;;  %v2371_v31 = vpop.f32.mrf.mxu1 }
 0x108   : > { %v3050_v32 = vadd.f32 %v2299_v30, %v2298_v28  ;;  %v3052_v33 = vadd.f32 %v2371_v31, %v2370_v29 }
 0x109   : > { %v2301_v34 = vpop.f32.mrf.mxu0  ;;  %v2373_v35 = vpop.f32.mrf.mxu1 }
 0x10a   : > { %3363 = vst [vmem:[#allocation8_spill] sm:$0xff] %v3052_v33 }
 0x10b   : > { %v2302_v36 = vpop.f32.mrf.mxu0  ;;  %v2374_v37 = vpop.f32.mrf.mxu1 }
 0x10c   : > { %v3054_v38 = vadd.f32 %v2302_v36, %v2301_v34  ;;  %v3056_v39 = vadd.f32 %v2374_v37, %v2373_v35 }
 0x10d   : > { %v2304_v40 = vpop.f32.mrf.mxu0  ;;  %v2392_v41 = vpop.f32.mrf.mxu1 }
 0x10e   : > { %3364 = vst [vmem:[#allocation9_spill] sm:$0xff] %v3056_v39 }
 0x10f   : > { %v2305_v42 = vpop.f32.mrf.mxu0  ;;  %v2393_v43 = vpop.f32.mrf.mxu1 }
 0x110   : > { %v3058_v44 = vadd.f32 %v2305_v42, %v2304_v40  ;;  %v2394_v45 = vadd.f32 %v2393_v43, %v2392_v41 }
 0x111   : > { %v2307_v46 = vpop.f32.mrf.mxu0  ;;  %v3060_v47 = vpop.f32.mrf.mxu1 }
 0x112   : > { %v3062_v48 = vadd.f32 %v2394_v45, %v2282_v60 }
 0x113   : > { %v2308_v49 = vpop.f32.mrf.mxu0  ;;  %v3064_v50 = vpop.f32.mrf.mxu1 }
 0x114   : > { %v3066_v51 = vadd.f32 %v2308_v49, %v2307_v46 }
 0x115   : > { %v2310_v52 = vpop.f32.mrf.mxu0  ;;  %v2398_v53 = vpop.f32.mrf.mxu1 }
 0x117   : > { %v2311_v54 = vpop.f32.mrf.mxu0  ;;  %v2399_v55 = vpop.f32.mrf.mxu1 }
 0x118   : > { %v3068_v56 = vadd.f32 %v2311_v54, %v2310_v52  ;;  %v2400_v21 = vadd.f32 %v2399_v55, %v2398_v53  ;;  %v2397_v55 = vadd.f32 %v3064_v50, %v3060_v47 }
 0x119   : > { %v2313_v57 = vpop.f32.mrf.mxu0  ;;  %v2401_v58 = vpop.f32.mrf.mxu1 }
 0x11b   : > { %v2314_v59 = vpop.f32.mrf.mxu0  ;;  %v2402_v62 = vpop.f32.mrf.mxu1 }
 0x11c   : > { %v3070_v63 = vadd.f32 %v2314_v59, %v2313_v57 }
 0x11d   : > { %v2316_v0 = vpop.f32.mrf.mxu0  ;;  %v3072_v60 = vpop.f32.mrf.mxu1 }
 0x11f   : > { %v2317_v1 = vpop.f32.mrf.mxu0  ;;  %v3074_v4 = vpop.f32.mrf.mxu1 }
 0x120   : > { %v3076_v5 = vadd.f32 %v2317_v1, %v2316_v0  ;;  %v2406_v47 = vadd.f32 %v3074_v4, %v3072_v60 }
 0x121   : > { %v2319_v6 = vpop.f32.mrf.mxu0  ;;  %v3078_v7 = vpop.f32.mrf.mxu1 }
 0x123   : > { %v2320_v10 = vpop.f32.mrf.mxu0  ;;  %v3080_v11 = vpop.f32.mrf.mxu1 }
 0x124   : > { %v3082_v12 = vadd.f32 %v2320_v10, %v2319_v6  ;;  %v2409_v60 = vadd.f32 %v3080_v11, %v3078_v7 }
 0x125   : > { %v3084_v13 = vpop.f32.mrf.mxu0  ;;  %v2410_v16 = vpop.f32.mrf.mxu1 }
 0x127   : > { %v3086_v17 = vpop.f32.mrf.mxu0  ;;  %v2411_v18 = vpop.f32.mrf.mxu1 }
 0x129   : > { %v3088_v19 = vpop.f32.mrf.mxu0  ;;  %v2413_v22 = vpop.f32.mrf.mxu1 }
 0x12b   : > { %v3090_v23 = vpop.f32.mrf.mxu0  ;;  %v2414_v24 = vpop.f32.mrf.mxu1 }
 0x12d   : > { %v2328_v25 = vpop.f32.mrf.mxu0  ;;  %v3092_v28 = vpop.f32.mrf.mxu1 }
 0x12f   : > { %v2329_v29 = vpop.f32.mrf.mxu0  ;;  %v3094_v30 = vpop.f32.mrf.mxu1 }
 0x130   : > { %v3096_v31 = vadd.f32 %v2329_v29, %v2328_v25 }
 0x131   : > { %v3098_v34 = vpop.f32.mrf.mxu0  ;;  %v3100_v35 = vpop.f32.mrf.mxu1 }
 0x132   : > { %3365 = vst [vmem:[#allocation10_spill] sm:$0xff] %v3096_v31  ;;  %3366 = vst [vmem:[#allocation11_spill] sm:$0xff] %v3098_v34 }
 0x133   : > { %v3102_v36 = vpop.f32.mrf.mxu0  ;;  %v3104_v37 = vpop.f32.mrf.mxu1 }
 0x134   : > { %3367 = vst [vmem:[#allocation12_spill] sm:$0xff] %v3102_v36 }
 0x135   : > { %v3106_v40 = vpop.f32.mrf.mxu0  ;;  %v2422_v41 = vpop.f32.mrf.mxu1 }
 0x137   : > { %v3108_v42 = vpop.f32.mrf.mxu0  ;;  %v2423_v43 = vpop.f32.mrf.mxu1 }
 0x139   : > { %v3110_v45 = vpop.f32.mrf.mxu0  ;;  %v3112_v46 = vpop.f32.mrf.mxu1 }
 0x13b   : > { %v3114_v49 = vpop.f32.mrf.mxu0  ;;  %v3116_v52 = vpop.f32.mrf.mxu1 }
 0x13d   : > { %v3118_v54 = vpop.f32.mrf.mxu0  ;;  %v3120_v57 = vpop.f32.mrf.mxu1 }
 0x13e   : > { %3368 = vst [vmem:[#allocation13_spill] sm:$0xff] %v3118_v54 }
 0x13f   : > { %v3122_v59 = vpop.f32.mrf.mxu0  ;;  %v3124_v0 = vpop.f32.mrf.mxu1 }
 0x140   : > { %3369 = vst [vmem:[#allocation14_spill] sm:$0xff] %v3122_v59 }
 0x141   : > { %v3126_v1 = vpop.f32.mrf.mxu0  ;;  %v3128_v6 = vpop.f32.mrf.mxu1 }
 0x142   : > { %3370 = vst [vmem:[#allocation15_spill] sm:$0xff] %v3126_v1  ;;  %v1306_v1 = vadd.f32 %v2400_v21, %v3034_v8 }
 0x143   : > { %v3130_v10 = vpop.f32.mrf.mxu0  ;;  %v3132_v25 = vpop.f32.mrf.mxu1 }
 0x144   : > { %3371 = vst [vmem:[#allocation16_spill] sm:$0xff] %v3130_v10  ;;  %v2403_v10 = vadd.f32 %v2402_v62, %v2401_v58  ;;  %v3168_v62 = vld [vmem:[%s3355_s3] ss:$0 sm:$0xff] }
 0x145   : > { %v3134_v29 = vpop.f32.mrf.mxu0  ;;  %v3136_v39 = vpop.f32.mrf.mxu1 }
 0x146   : > { %3372 = vst [vmem:[#allocation17_spill] sm:$0xff] %v3134_v29  ;;  %v2412_v29 = vadd.f32 %v2411_v18, %v2410_v16  ;;  %v1309_v21 = vadd.f32 %v2403_v10, %v3038_v14  ;;  %v2415_v16 = vadd.f32 %v2414_v24, %v2413_v22  ;;  %v2424_v24 = vadd.f32 %v2423_v43, %v2422_v41 }
 0x147   : > { %v3138_v27 = vpop.f32.mrf.mxu0  ;;  %v3140_v33 = vpop.f32.mrf.mxu1  ;;  %v2418_v41 = vadd.f32 %v3094_v30, %v3092_v28 }
 0x148   : > { %3373 = vst [vmem:[#allocation18_spill] sm:$0xff] %v3138_v27  ;;  %v3156_v27 = vld [vmem:[%s3354_s2] ss:$0 sm:$0xff]  ;;  %v1338_v30 = vadd.f32 %v2424_v24, %v3068_v56 }
 0x149   : > { %v3142_v3 = vpop.f32.mrf.mxu0  ;;  %v3144_v15 = vpop.f32.mrf.mxu1 }
 0x14a   : > { %3374 = vst [vmem:[#allocation19_spill] sm:$0xff] %v3142_v3 }
 0x14b   : > { %v3146_v61 = vpop.f32.mrf.mxu0  ;;  %v3148_v9 = vpop.f32.mrf.mxu1 }
 0x14c   : > { %3375 = vst [vmem:[#allocation20_spill] sm:$0xff] %v3146_v61 }
 0x14d   : > { %v3151_v59 = vpop.f32.mrf.mxu1  ;;  %v2530_v54 = vpop.f32.mrf.mxu0 }
 0x14e   : > { %v1467_v53 = vadd.f32 %v2530_v54, %v1306_v1 }
 0x14f   : > { %v3160_v3 = vpop.f32.mrf.mxu1  ;;  %v1458_v61 = vpop.f32.mrf.mxu0 }
 0x150   : > { %v1594_v58 = vmul.f32 %v3156_v27, %v1467_v53  ;;  %v1459_v8 = vadd.f32 %v1458_v61, %v3062_v48  ;;  %v1301_v61 = vadd.f32 %v2397_v55, %v3030_v2  ;;  %v1322_v53 = vadd.f32 %v2412_v29, %v3050_v32 }
 0x151   : > { %v3170_v31 = vpop.f32.mrf.mxu1  ;;  %v2531_v54 = vpop.f32.mrf.mxu0  ;;  %v1314_v2 = vadd.f32 %v2406_v47, %v3042_v20  ;;  %v1325_v29 = vadd.f32 %v2415_v16, %v3054_v38  ;;  %v1317_v47 = vadd.f32 %v2409_v60, %v3046_v26 }
 0x152   : > { %3376 = vst [vmem:[#allocation21_spill] sm:$0xff] %v3170_v31  ;;  %v1470_v50 = vadd.f32 %v2531_v54, %v1309_v21  ;;  %v1592_v18 = vmul.f32 %v3156_v27, %v1459_v8  ;;  %v1633_v48 = vadd.f32 %v3168_v62, %v1594_v58 }
 0x153   : > { %v3175_v1 = vpop.f32.mrf.mxu1  ;;  %v1461_v14 = vpop.f32.mrf.mxu0 }
 0x154   : > { %v1595_v10 = vmul.f32 %v3156_v27, %v1470_v50  ;;  %v1462_v36 = vadd.f32 %v1461_v14, %v1301_v61  ;;  %v1631_v55 = vadd.f32 %v3168_v62, %v1592_v18  ;;  %v1665_v21 = vmax.f32 %v1633_v48, 0.0 }
 0x155   : > { %v3181_v34 = vpop.f32.mrf.mxu1  ;;  %v2534_v31 = vpop.f32.mrf.mxu0  ;;  %v2427_v50 = vadd.f32 %v3116_v52, %v3112_v46  ;;  %v2421_v52 = vadd.f32 %v3104_v37, %v3100_v35 }
 0x156   : > { %v1634_v4 = vadd.f32 %v3168_v62, %v1595_v10  ;;  %v1483_v22 = vadd.f32 %v2534_v31, %v1322_v53  ;;  %v1593_v58 = vmul.f32 %v3156_v27, %v1462_v36  ;;  %v1663_v16 = vmax.f32 %v1631_v55, 0.0 }
 0x157   : > { %v3190_v8 = vpop.f32.mrf.mxu1  ;;  %v1474_v32 = vpop.f32.mrf.mxu0  ;;  %v2436_v55 = vadd.f32 %v3140_v33, %v3136_v39 }
 0x158   : > { %v1666_v54 = vmax.f32 %v1634_v4, 0.0  ;;  %v1598_v7 = vmul.f32 %v3156_v27, %v1483_v22  ;;  %v1475_v11 = vadd.f32 %v1474_v32, %v1314_v2  ;;  %v1632_v20 = vadd.f32 %v3168_v62, %v1593_v58 }
 0x159   : > { %v3200_v31 = vpop.f32.mrf.mxu1  ;;  %v2535_v36 = vpop.f32.mrf.mxu0  ;;  %v1330_v2 = vadd.f32 %v2418_v41, %v3058_v44  ;;  %v2324_v44 = vadd.f32 %v3086_v17, %v3084_v13  ;;  %v2439_v41 = vadd.f32 %v3148_v9, %v3144_v15 }
 0x15a   : > { %v2177_v38 = vpack.c.bf16 %v1666_v54, %v1665_v21  ;;  %v1486_v43 = vadd.f32 %v2535_v36, %v1325_v29  ;;  %v1664_v18 = vmax.f32 %v1632_v20, 0.0  ;;  %v1596_v61 = vmul.f32 %v3156_v27, %v1475_v11 }
 0x15b   : > { %v3208_v14 = vpop.f32.mrf.mxu1  ;;  %v1477_v48 = vpop.f32.mrf.mxu0  ;;  %v1637_v10 = vadd.f32 %v3168_v62, %v1598_v7  ;;  %v1341_v29 = vadd.f32 %v2427_v50, %v3070_v63  ;;  %v2430_v11 = vadd.f32 %v3124_v0, %v3120_v57  ;;  %v1333_v63 = vadd.f32 %v2421_v52, %v3066_v51 }
 0x15c   : > { %2249 = vst [vmem:[%s3197_s24 + $0x8] sm:$0xff] %v2177_v38   ;;  %v1599_v28 = vmul.f32 %v3156_v27, %v1486_v43  ;;  %v2172_v53 = vpack.c.bf16 %v1664_v18, %v1663_v16  ;;  %v1478_v26 = vadd.f32 %v1477_v48, %v1317_v47  ;;  %v1635_v58 = vadd.f32 %v3168_v62, %v1596_v61 }
 0x15d   : > { %v3214_v60 = vpop.f32.mrf.mxu1  ;;  %v2538_v46 = vpop.f32.mrf.mxu0  ;;  %v1669_v21 = vmax.f32 %v1637_v10, 0.0  ;;  %v1354_v0 = vadd.f32 %v2436_v55, %v2324_v44  ;;  %v2327_v51 = vadd.f32 %v3090_v23, %v3088_v19  ;;  %v2433_v61 = vadd.f32 %v3132_v25, %v3128_v6 }
 0x15e   : > { %v1638_v4 = vadd.f32 %v3168_v62, %v1599_v28  ;;  %v1499_v22 = vadd.f32 %v2538_v46, %v1338_v30  ;;  %2173 = vst [vmem:[%s3197_s24] sm:$0xff] %v2172_v53   ;;  %v1597_v56 = vmul.f32 %v3156_v27, %v1478_v26  ;;  %v1667_v38 = vmax.f32 %v1635_v58, 0.0 }
 0x15f   : > { %v3225_v24 = vpop.f32.mrf.mxu1  ;;  %v1490_v32 = vpop.f32.mrf.mxu0  ;;  %v1346_v28 = vadd.f32 %v2430_v11, %v3076_v5  ;;  %v2448_v30 = vadd.f32 %v3190_v8, %v3181_v34  ;;  %v1357_v46 = vadd.f32 %v2439_v41, %v2327_v51  ;;  %v2336_v5 = vadd.f32 %v3108_v42, %v3106_v40  ;;  %v3378_v11 = vld [vmem:[#allocation11_spill] sm:$0xff] }
 0x160   : > { %v1670_v35 = vmax.f32 %v1638_v4, 0.0  ;;  %v1602_v37 = vmul.f32 %v3156_v27, %v1499_v22  ;;  %v1491_v54 = vadd.f32 %v1490_v32, %v1330_v2  ;;  %v1636_v33 = vadd.f32 %v3168_v62, %v1597_v56 }
 0x161   : > { %v3232_v39 = vpop.f32.mrf.mxu1  ;;  %v2539_v7 = vpop.f32.mrf.mxu0  ;;  %v2442_v2 = vadd.f32 %v3160_v3, %v3151_v59  ;;  %v1349_v56 = vadd.f32 %v2433_v61, %v3082_v12  ;;  %v2451_v32 = vadd.f32 %v3208_v14, %v3200_v31  ;;  %v1370_v3 = vadd.f32 %v2448_v30, %v2336_v5  ;;  %v3377_v12 = vld [vmem:[#allocation21_spill] sm:$0xff] }
 0x162   : > { %v2187_v20 = vpack.c.bf16 %v1670_v35, %v1669_v21  ;;  %v1502_v36 = vadd.f32 %v2539_v7, %v1341_v29  ;;  %v1668_v43 = vmax.f32 %v1636_v33, 0.0  ;;  %v1600_v47 = vmul.f32 %v3156_v27, %v1491_v54  ;;  %v3383_v5 = vld [vmem:[#allocation13_spill] sm:$0xff] }
 0x163   : > { %v3240_v13 = vpop.f32.mrf.mxu1  ;;  %v1493_v17 = vpop.f32.mrf.mxu0  ;;  %v1641_v50 = vadd.f32 %v3168_v62, %v1602_v37  ;;  %v2339_v59 = vadd.f32 %v3114_v49, %v3110_v45  ;;  %v2445_v44 = vadd.f32 %v3175_v1, %v3377_v12  ;;  %v2454_v30 = vadd.f32 %v3225_v24, %v3214_v60  ;;  %v3385_v60 = vld [vmem:[#allocation15_spill] sm:$0xff]  ;;  %v3386_v24 = vld [vmem:[#allocation16_spill] sm:$0xff] }
 0x164   : > { %2251 = vst [vmem:[%s3197_s24 + $0x18] sm:$0xff] %v2187_v20   ;;  %v1603_v57 = vmul.f32 %v3156_v27, %v1502_v36  ;;  %v2182_v16 = vpack.c.bf16 %v1668_v43, %v1667_v38  ;;  %v1494_v18 = vadd.f32 %v1493_v17, %v1333_v63  ;;  %v1639_v53 = vadd.f32 %v3168_v62, %v1600_v47  ;;  %v3379_v20 = vld [vmem:[#allocation12_spill] sm:$0xff]  ;;  %v3380_v38 = vld [vmem:[#allocation10_spill] sm:$0xff] }
 0x165   : > { %v2458_v9 = vpop.f32.mrf.mxu1  ;;  %v2542_v15 = vpop.f32.mrf.mxu0  ;;  %v1673_v52 = vmax.f32 %v1641_v50, 0.0  ;;  %v2333_v36 = vadd.f32 %v3379_v20, %v3378_v11  ;;  %v1362_v43 = vadd.f32 %v2442_v2, %v3380_v38  ;;  %v1373_v50 = vadd.f32 %v2451_v32, %v2339_v59 }
 0x166   : > { %v1642_v48 = vadd.f32 %v3168_v62, %v1603_v57  ;;  %v1515_v10 = vadd.f32 %v2542_v15, %v1354_v0  ;;  %2250 = vst [vmem:[%s3197_s24 + $0x10] sm:$0xff] %v2182_v16   ;;  %v1601_v19 = vmul.f32 %v3156_v27, %v1494_v18  ;;  %v1671_v29 = vmax.f32 %v1639_v53, 0.0  ;;  %v3381_v18 = vld [vmem:[#allocation17_spill] sm:$0xff]  ;;  %v3382_v15 = vld [vmem:[#allocation18_spill] sm:$0xff] }
 0x167   : > { %v2459_v23 = vpop.f32.mrf.mxu1  ;;  %v1506_v26 = vpop.f32.mrf.mxu0  ;;  %v2348_v61 = vadd.f32 %v3382_v15, %v3381_v18  ;;  %v3389_v15 = vld [vmem:[#allocation4_spill] sm:$0xff] }
 0x168   : > { %v1674_v4 = vmax.f32 %v1642_v48, 0.0  ;;  %v1606_v6 = vmul.f32 %v3156_v27, %v1515_v10  ;;  %v1507_v25 = vadd.f32 %v1506_v26, %v1346_v28  ;;  %v1640_v22 = vadd.f32 %v3168_v62, %v1601_v19 }
 0x169   : > { %v2461_v34 = vpop.f32.mrf.mxu1  ;;  %v2543_v8 = vpop.f32.mrf.mxu0  ;;  %v2460_v47 = vadd.f32 %v2459_v23, %v2458_v9  ;;  %v1365_v28 = vadd.f32 %v2445_v44, %v2333_v36 }
 0x16a   : > { %v2197_v55 = vpack.c.bf16 %v1674_v4, %v1673_v52  ;;  %v1518_v58 = vadd.f32 %v2543_v8, %v1357_v46  ;;  %v1672_v21 = vmax.f32 %v1640_v22, 0.0  ;;  %v1604_v35 = vmul.f32 %v3156_v27, %v1507_v25  ;;  %v3384_v22 = vld [vmem:[#allocation14_spill] sm:$0xff] }
 0x16b   : > { %v2462_v37 = vpop.f32.mrf.mxu1  ;;  %v1509_v40 = vpop.f32.mrf.mxu0  ;;  %v1645_v42 = vadd.f32 %v3168_v62, %v1606_v6  ;;  %v2342_v8 = vadd.f32 %v3384_v22, %v3383_v5 }
 0x16c   : > { %2253 = vst [vmem:[%s3197_s24 + $0x28] sm:$0xff] %v2197_v55   ;;  %v1607_v54 = vmul.f32 %v3156_v27, %v1518_v58  ;;  %v2192_v31 = vpack.c.bf16 %v1672_v21, %v1671_v29  ;;  %v1510_v14 = vadd.f32 %v1509_v40, %v1349_v56  ;;  %v1643_v17 = vadd.f32 %v3168_v62, %v1604_v35  ;;  %v3387_v58 = vld [vmem:[#allocation19_spill] sm:$0xff]  ;;  %v3388_v56 = vld [vmem:[#allocation20_spill] sm:$0xff] }
 0x16d   : > { %v2464_v33 = vpop.f32.mrf.mxu1  ;;  %v2546_v7 = vpop.f32.mrf.mxu0  ;;  %v1677_v57 = vmax.f32 %v1645_v42, 0.0  ;;  %v2463_v19 = vadd.f32 %v2462_v37, %v2461_v34  ;;  %v1386_v55 = vadd.f32 %v2460_v47, %v2348_v61  ;;  %v2345_v34 = vadd.f32 %v3386_v24, %v3385_v60 }
 0x16e   : > { %v1646_v63 = vadd.f32 %v3168_v62, %v1607_v54  ;;  %v1531_v41 = vadd.f32 %v2546_v7, %v1370_v3  ;;  %2252 = vst [vmem:[%s3197_s24 + $0x20] sm:$0xff] %v2192_v31   ;;  %v1605_v45 = vmul.f32 %v3156_v27, %v1510_v14  ;;  %v1675_v26 = vmax.f32 %v1643_v17, 0.0 }
 0x16f   : > { %v2465_v49 = vpop.f32.mrf.mxu1  ;;  %v1522_v1 = vpop.f32.mrf.mxu0  ;;  %v2351_v32 = vadd.f32 %v3388_v56, %v3387_v58  ;;  %v2457_v40 = vadd.f32 %v3240_v13, %v3232_v39  ;;  %v1378_v3 = vadd.f32 %v2454_v30, %v2342_v8 }
 0x170   : > { %v1678_v0 = vmax.f32 %v1646_v63, 0.0  ;;  %v1610_v51 = vmul.f32 %v3156_v27, %v1531_v41  ;;  %v1523_v16 = vadd.f32 %v1522_v1, %v1362_v43  ;;  %v1644_v48 = vadd.f32 %v3168_v62, %v1605_v45 }
 0x171   : > { %v2467_v10 = vpop.f32.mrf.mxu1  ;;  %v2547_v9 = vpop.f32.mrf.mxu0  ;;  %v1389_v7 = vadd.f32 %v2463_v19, %v2351_v32  ;;  %v2466_v38 = vadd.f32 %v2465_v49, %v2464_v33  ;;  %v1381_v17 = vadd.f32 %v2457_v40, %v2345_v34 }
 0x172   : > { %v2207_v53 = vpack.c.bf16 %v1678_v0, %v1677_v57  ;;  %v1534_v23 = vadd.f32 %v2547_v9, %v1373_v50  ;;  %v1676_v46 = vmax.f32 %v1644_v48, 0.0  ;;  %v1649_v52 = vadd.f32 %v3168_v62, %v1610_v51 }
 0x173   : > { %v1608_v4 = vmul.f32 %v3156_v27, %v1523_v16  ;;  %v2468_v6 = vpop.f32.mrf.mxu1  ;;  %v1525_v25 = vpop.f32.mrf.mxu0 }
 0x174   : > { %2255 = vst [vmem:[%s3197_s24 + $0x38] sm:$0xff] %v2207_v53   ;;  %v1611_v2 = vmul.f32 %v3156_v27, %v1534_v23  ;;  %v2202_v29 = vpack.c.bf16 %v1676_v46, %v1675_v26  ;;  %v1526_v21 = vadd.f32 %v1525_v25, %v1365_v28  ;;  %v1681_v59 = vmax.f32 %v1649_v52, 0.0  ;;  %v3390_v53 = vld [vmem:[#allocation2_spill] sm:$0xff] }
 0x175   : > { %v2470_v35 = vpop.f32.mrf.mxu1  ;;  %v2550_v37 = vpop.f32.mrf.mxu0  ;;  %v1647_v12 = vadd.f32 %v3168_v62, %v1608_v4  ;;  %v1394_v19 = vadd.f32 %v2466_v38, %v3390_v53  ;;  %v2469_v23 = vadd.f32 %v2468_v6, %v2467_v10 }
 0x176   : > { %v1650_v42 = vadd.f32 %v3168_v62, %v1611_v2  ;;  %v1547_v54 = vadd.f32 %v2550_v37, %v1386_v55  ;;  %2254 = vst [vmem:[%s3197_s24 + $0x30] sm:$0xff] %v2202_v29   ;;  %v1609_v44 = vmul.f32 %v3156_v27, %v1526_v21  ;;  %v3391_v2 = vld [vmem:[#allocation5_spill] sm:$0xff] }
 0x177   : > { %v2471_v31 = vpop.f32.mrf.mxu1  ;;  %v1538_v14 = vpop.f32.mrf.mxu0  ;;  %v1679_v45 = vmax.f32 %v1647_v12, 0.0 }
 0x178   : > { %v1682_v11 = vmax.f32 %v1650_v42, 0.0  ;;  %v1614_v20 = vmul.f32 %v3156_v27, %v1547_v54  ;;  %v2472_v36 = vadd.f32 %v2471_v31, %v2470_v35  ;;  %v1539_v63 = vadd.f32 %v1538_v14, %v1378_v3  ;;  %v3392_v35 = vld [vmem:[#allocation3_spill] sm:$0xff] }
 0x179   : > { %v1648_v39 = vadd.f32 %v3168_v62, %v1609_v44  ;;  %v2473_v13 = vpop.f32.mrf.mxu1  ;;  %v2551_v41 = vpop.f32.mrf.mxu0  ;;  %v1397_v37 = vadd.f32 %v2469_v23, %v3392_v35 }
 0x17a   : > { %v2217_v43 = vpack.c.bf16 %v1682_v11, %v1681_v59  ;;  %v1550_v47 = vadd.f32 %v2551_v41, %v1389_v7  ;;  %v1653_v50 = vadd.f32 %v3168_v62, %v1614_v20  ;;  %v1612_v57 = vmul.f32 %v3156_v27, %v1539_v63  ;;  %v3393_v7 = vld [vmem:[#allocation6_spill] sm:$0xff] }
 0x17b   : > { %v1680_v1 = vmax.f32 %v1648_v39, 0.0  ;;  %v2474_v0 = vpop.f32.mrf.mxu1  ;;  %v1541_v51 = vpop.f32.mrf.mxu0  ;;  %v1402_v61 = vadd.f32 %v2472_v36, %v3389_v15 }
 0x17c   : > { %2257 = vst [vmem:[%s3197_s24 + $0x48] sm:$0xff] %v2217_v43   ;;  %v1615_v16 = vmul.f32 %v3156_v27, %v1550_v47  ;;  %v2475_v18 = vadd.f32 %v2474_v0, %v2473_v13  ;;  %v1542_v33 = vadd.f32 %v1541_v51, %v1381_v17  ;;  %v1685_v26 = vmax.f32 %v1653_v50, 0.0  ;;  %v3394_v50 = vld [vmem:[#allocation8_spill] sm:$0xff]  ;;  %v3395_v51 = vld [vmem:[#allocation7_spill] sm:$0xff] }
 0x17d   : > { %v2212_v48 = vpack.c.bf16 %v1680_v1, %v1679_v45  ;;  %v2476_v49 = vpop.f32.mrf.mxu1  ;;  %v2554_v9 = vpop.f32.mrf.mxu0  ;;  %v1651_v46 = vadd.f32 %v3168_v62, %v1612_v57 }
 0x17e   : > { %v1654_v28 = vadd.f32 %v3168_v62, %v1615_v16  ;;  %v1563_v30 = vadd.f32 %v2554_v9, %v1402_v61  ;;  %v1613_v52 = vmul.f32 %v3156_v27, %v1542_v33  ;;  %v1405_v55 = vadd.f32 %v2475_v18, %v3391_v2 }
 0x17f   : > { %2256 = vst [vmem:[%s3197_s24 + $0x40] sm:$0xff] %v2212_v48   ;;  %v2477_v4 = vpop.f32.mrf.mxu1  ;;  %v1554_v25 = vpop.f32.mrf.mxu0  ;;  %v1683_v56 = vmax.f32 %v1651_v46, 0.0 }
 0x180   : > { %v1686_v5 = vmax.f32 %v1654_v28, 0.0  ;;  %v1618_v22 = vmul.f32 %v3156_v27, %v1563_v30  ;;  %v1555_v8 = vadd.f32 %v1554_v25, %v1394_v19  ;;  %v1652_v60 = vadd.f32 %v3168_v62, %v1613_v52  ;;  %v3396_v19 = vld [vmem:[#allocation9_spill] sm:$0xff] }
 0x181   : > { %v2479_v24 = vpop.f32.mrf.mxu1  ;;  %v2555_v34 = vpop.f32.mrf.mxu0  ;;  %v2478_v6 = vadd.f32 %v2477_v4, %v2476_v49 }
 0x182   : > { %v2227_v10 = vpack.c.bf16 %v1686_v5, %v1685_v26  ;;  %v1566_v58 = vadd.f32 %v2555_v34, %v1405_v55  ;;  %v1684_v32 = vmax.f32 %v1652_v60, 0.0  ;;  %v1616_v29 = vmul.f32 %v3156_v27, %v1555_v8 }
 0x183   : > { %v2480_v21 = vpop.f32.mrf.mxu1  ;;  %v1557_v40 = vpop.f32.mrf.mxu0  ;;  %v1657_v42 = vadd.f32 %v3168_v62, %v1618_v22  ;;  %v1410_v11 = vadd.f32 %v2478_v6, %v3393_v7 }
 0x184   : > { %2259 = vst [vmem:[%s3197_s24 + $0x58] sm:$0xff] %v2227_v10   ;;  %v1619_v54 = vmul.f32 %v3156_v27, %v1566_v58  ;;  %v2222_v3 = vpack.c.bf16 %v1684_v32, %v1683_v56  ;;  %v1558_v59 = vadd.f32 %v1557_v40, %v1397_v37  ;;  %v2481_v14 = vadd.f32 %v2480_v21, %v2479_v24 }
 0x185   : > { %v2482_v12 = vpop.f32.mrf.mxu1  ;;  %v2558_v44 = vpop.f32.mrf.mxu0  ;;  %v1655_v20 = vadd.f32 %v3168_v62, %v1616_v29  ;;  %v1689_v13 = vmax.f32 %v1657_v42, 0.0 }
 0x186   : > { %v1658_v31 = vadd.f32 %v3168_v62, %v1619_v54  ;;  %2258 = vst [vmem:[%s3197_s24 + $0x50] sm:$0xff] %v2222_v3   ;;  %v1617_v36 = vmul.f32 %v3156_v27, %v1558_v59  ;;  %v1413_v16 = vadd.f32 %v2481_v14, %v3395_v51 }
 0x187   : > { %v2483_v63 = vpop.f32.mrf.mxu1  ;;  %v1570_v39 = vpop.f32.mrf.mxu0  ;;  %v1687_v18 = vmax.f32 %v1655_v20, 0.0 }
 0x188   : > { %v1690_v41 = vmax.f32 %v1658_v31, 0.0  ;;  %v2484_v38 = vadd.f32 %v2483_v63, %v2482_v12  ;;  %v1571_v43 = vadd.f32 %v1570_v39, %v1410_v11  ;;  %v1656_v47 = vadd.f32 %v3168_v62, %v1617_v36 }
 0x189   : > { %v2485_v17 = vpop.f32.mrf.mxu1  ;;  %v2559_v45 = vpop.f32.mrf.mxu0 }
 0x18a   : > { %v2237_v1 = vpack.c.bf16 %v1690_v41, %v1689_v13  ;;  %v1418_v57 = vadd.f32 %v2484_v38, %v3394_v50  ;;  %v1620_v0 = vmul.f32 %v3156_v27, %v1571_v43  ;;  %v1688_v15 = vmax.f32 %v1656_v47, 0.0 }
 0x18b   : > { %v2486_v61 = vpop.f32.mrf.mxu1  ;;  %v1573_v48 = vpop.f32.mrf.mxu0 }
 0x18c   : > { %2261 = vst [vmem:[%s3197_s24 + $0x68] sm:$0xff] %v2237_v1   ;;  %v1579_v33 = vadd.f32 %v2558_v44, %v1418_v57  ;;  %v2487_v49 = vadd.f32 %v2486_v61, %v2485_v17  ;;  %v1574_v9 = vadd.f32 %v1573_v48, %v1413_v16  ;;  %v2232_v28 = vpack.c.bf16 %v1688_v15, %v1687_v18 }
 0x18d   : > { %v1659_v53 = vadd.f32 %v3168_v62, %v1620_v0 }
 0x18e   : > { %v1622_v30 = vmul.f32 %v3156_v27, %v1579_v33  ;;  %v1421_v23 = vadd.f32 %v2487_v49, %v3396_v19  ;;  %v1621_v26 = vmul.f32 %v3156_v27, %v1574_v9  ;;  %2260 = vst [vmem:[%s3197_s24 + $0x60] sm:$0xff] %v2232_v28  }
 0x18f   : > { %v1691_v25 = vmax.f32 %v1659_v53, 0.0 }
 0x190   : > { %v1582_v46 = vadd.f32 %v2559_v45, %v1421_v23  ;;  %v1660_v52 = vadd.f32 %v3168_v62, %v1621_v26  ;;  %v1661_v4 = vadd.f32 %v3168_v62, %v1622_v30 }
 0x192   : > { %v1623_v5 = vmul.f32 %v3156_v27, %v1582_v46  ;;  %v1692_v22 = vmax.f32 %v1660_v52, 0.0  ;;  %v1693_v55 = vmax.f32 %v1661_v4, 0.0 }
 0x194   : > { %v1662_v8 = vadd.f32 %v3168_v62, %v1623_v5  ;;  %v2242_v2 = vpack.c.bf16 %v1692_v22, %v1691_v25 }
 0x196   : > { %v1694_v60 = vmax.f32 %v1662_v8, 0.0  ;;  %2262 = vst [vmem:[%s3197_s24 + $0x70] sm:$0xff] %v2242_v2  }
 0x198   : > { %v2247_v24 = vpack.c.bf16 %v1694_v60, %v1693_v55 }
 0x19a   : > { %2263 = vst [vmem:[%s3197_s24 + $0x78] sm:$0xff] %v2247_v24  }
 0x19b PF: > { %s14_s17 = sadd.s32 1, %s2775_s17   ;;  %s3397_s15 = smov %s2771_s16 }
 0x19c   : > { %p11_p5 = scmp.ge.s32.totalorder %s14_s17, 8   ;;  %s3398_s16 = smov %s3400_s18 }
 0x19e   :  { %13 = sbr.rel (!%p11_p5) target bundleno = 2 (0x2), region = 75 }

// kernel: two_step_vgg_forward.10
= control target key start
LH: loop header
LB: loop body
LE: loop exit
PB: predicated region body
PF: predicated region fallthrough
CT: control target
= control target key end

     0   :  { %s4212_s15 = smov 0   ;;  %s4214_s16 = smov 0   ;;  %s5120_s0 = inlined_call_operand.vmem [shape: bf16[1280,1152], index: 0, kind: input, shape index: {}]   ;;  %s5121_s1 = inlined_call_operand.vmem [shape: bf16[1152,128], index: 1, kind: input, shape index: {}]   ;;  %s5122_s2 = inlined_call_operand.vmem [shape: f32[1,128], index: 2, kind: input, shape index: {}]   ;;  %s5123_s3 = inlined_call_operand.vmem [shape: f32[1,128], index: 3, kind: input, shape index: {}]   ;;  %s5124_s4 = inlined_call_operand.vmem [shape: bf16[1280,128], index: 4, kind: output, shape index: {}]  }
   0x1   :  { %s4216_s17 = smov 0  }
   0x2 LB: > { %s26_s18 = sadd.s32 1, %s4181_s16  ;;  %p2938_p0 = scmp.ge.s32.totalorder %s4185_s17, 1  ;;  %s4185_s17 = sphi %s4216_s17, %s14_s17   ;;  %s4181_s16 = sphi %s4214_s16, %s5146_s16   ;;  %s4177_s15 = sphi %s4212_s15, %s5145_s15  }
   0x3   : > { %p28_p1 = scmp.ge.s32.totalorder %s26_s18, 5  ;;  %p203_p2 = scmp.lt.s32.totalorder %s4185_s17, 6 }
   0x5   : > { %s5148_s18 = smov (%p28_p1, %s26_s18), 0  ;;  %p204_p3 = pnand %p2938_p0, %p203_p2 }
   0x7   : > { %207 = sbr.rel (%p204_p3) target bundleno = 539 (0x21b), region = 36 }
   0xc   : > { %v3883_v0 = vld [vmem:[%s5121_s1 + $0x78] sm:$0xff]   ;;  %s2939_s21 = sshll.u32 %s4177_s15, 5  ;;  %v3885_v2 = vld [vmem:[%s5121_s1 + $0x70] sm:$0xff]   ;;  %v3887_v4 = vld [vmem:[%s5121_s1 + $0x68] sm:$0xff]  }
   0xd   : > { %v3884_v1 = vld [vmem:[%s5121_s1 + $0x38] sm:$0xff]   ;;  %3322 = vmatprep.subr.bf16.mxu0 %v3883_v0  ;;  %3842 = vmatprep.subr.bf16.mxu1 %v3883_v0  ;;  %p244_p4 = scmp.lt.s32.totalorder %s2939_s21, 159  ;;  %v3886_v3 = vld [vmem:[%s5121_s1 + $0x30] sm:$0xff]   ;;  %v3888_v5 = vld [vmem:[%s5121_s1 + $0x28] sm:$0xff]  }
   0xe   : > { %3323 = vmatpush3.bf16.msra.mxu0 %v3884_v1  ;;  %3850 = vmatpush3.bf16.msra.mxu1 %v3884_v1  ;;  %v3889_v6 = vld [vmem:[%s5121_s1 + $0x60] sm:$0xff]   ;;  %v3891_v8 = vld [vmem:[%s5121_s1 + $0x58] sm:$0xff]   ;;  %v3893_v10 = vld [vmem:[%s5121_s1 + $0x50] sm:$0xff]  }
   0xf   : > { %3324 = vmatprep.subr.bf16.mxu0 %v3885_v2  ;;  %3843 = vmatprep.subr.bf16.mxu1 %v3885_v2  ;;  %s5150_s21 = smov (!%p244_p4, %s2939_s21), 159  ;;  %v3890_v7 = vld [vmem:[%s5121_s1 + $0x20] sm:$0xff]   ;;  %v3892_v9 = vld [vmem:[%s5121_s1 + $0x18] sm:$0xff]   ;;  %v3894_v13 = vld [vmem:[%s5121_s1 + $0x10] sm:$0xff]  }
  0x10   : > { %s3858_s8 = smul.u32 36, %s5150_s21  ;;  %v3895_v14 = vld [vmem:[%s5121_s1 + $0x48] sm:$0xff]   ;;  %v3897_v16 = vld [vmem:[%s5121_s1 + $0x40] sm:$0xff]   ;;  %v3905_v18 = vld [vmem:[%s5121_s1 + $0xf8] sm:$0xff]   ;;  %s2942_s23 = sshll.u32 %s5150_s21, 2 }
  0x11   : > { %v3896_v15 = vld [vmem:[%s5121_s1 + $0x8] sm:$0xff]   ;;  %v3898_v17 = vld [vmem:[%s5121_s1] sm:$0xff]   ;;  %v3908_v21 = vld [vmem:[%s5121_s1 + $0x178] sm:$0xff]   ;;  %s4974_s25 = scalar_lea.vmem %s5124_s4, %s2942_s23 }
  0x12   : > { %3325 = vmatpush3.bf16.msra.mxu0 %v3886_v3  ;;  %3851 = vmatpush3.bf16.msra.mxu1 %v3886_v3  ;;  %s4263_s15 = scalar_lea.vmem %s5120_s0, %s3858_s8  ;;  %v3906_v22 = vld [vmem:[%s5121_s1 + $0xb8] sm:$0xff]   ;;  %v3907_v23 = vld [vmem:[%s5121_s1 + $0xf0] sm:$0xff]   ;;  %v3917_v31 = vld [vmem:[%s5121_s1 + $0xe8] sm:$0xff]  }
  0x13   : > { %3326 = vmatprep.subr.bf16.mxu0 %v3887_v4  ;;  %3844 = vmatprep.subr.bf16.mxu1 %v3887_v4  ;;  %v3901_v11 = vld [vmem:[%s4263_s15 + $0x4] ss:$36 sps:$4 sm:$0xff]   ;;  %v3910_v24 = vld [vmem:[%s5121_s1 + $0x138] sm:$0xff]   ;;  %v3911_v25 = vld [vmem:[%s4263_s15 + $0x4c] ss:$36 sps:$4 sm:$0xff]  }
  0x14   : > { %v3904_v12 = vld [vmem:[%s4263_s15 + $0x364] ss:$36 sps:$4 sm:$0xff]   ;;  %1774 = vmatprep.mubr.bf16.mxu0 %v3901_v11  ;;  %v3913_v26 = vld [vmem:[%s4263_s15 + $0x3ac] ss:$36 sps:$4 sm:$0xff]   ;;  %v3921_v35 = vld [vmem:[%s4263_s15 + $0x94] ss:$36 sps:$4 sm:$0xff]  }
  0x15   : > { %1870 = vmatprep.mubr.bf16.mxu1 %v3904_v12  ;;  %v3899_v19 = vld [vmem:[%s4263_s15] ss:$36 sps:$4 sm:$0xff]   ;;  %v3909_v27 = vld [vmem:[%s5121_s1 + $0xb0] sm:$0xff]   ;;  %v3915_v29 = vld [vmem:[%s4263_s15 + $0x48] ss:$36 sps:$4 sm:$0xff]  }
  0x16   : > { %3327 = vmatpush3.bf16.msra.mxu0 %v3888_v5  ;;  %3852 = vmatpush3.bf16.msra.mxu1 %v3888_v5  ;;  %v3902_v20 = vld [vmem:[%s4263_s15 + $0x360] ss:$36 sps:$4 sm:$0xff]   ;;  %v3928_v28 = vld [vmem:[%s5121_s1 + $0x170] sm:$0xff]   ;;  %v3916_v30 = vld [vmem:[%s4263_s15 + $0x3a8] ss:$36 sps:$4 sm:$0xff]  }
  0x17   : > { %3328 = vmatprep.subr.bf16.mxu0 %v3889_v6  ;;  %3845 = vmatprep.subr.bf16.mxu1 %v3889_v6  ;;  %v3918_v32 = vld [vmem:[%s5121_s1 + $0xa8] sm:$0xff]   ;;  %v3930_v33 = vld [vmem:[%s5121_s1 + $0x130] sm:$0xff]   ;;  %v3919_v34 = vld [vmem:[%s5121_s1 + $0xe0] sm:$0xff]  }
  0x18   : > { %v3923_v36 = vld [vmem:[%s4263_s15 + $0x3f4] ss:$36 sps:$4 sm:$0xff]   ;;  %v3920_v37 = vld [vmem:[%s5121_s1 + $0xa0] sm:$0xff]   ;;  %v3942_v43 = vld [vmem:[%s5121_s1 + $0x168] sm:$0xff]  }
  0x19   : > { %v3925_v38 = vld [vmem:[%s4263_s15 + $0x90] ss:$36 sps:$4 sm:$0xff]   ;;  %v3927_v40 = vld [vmem:[%s5121_s1 + $0xd8] sm:$0xff]   ;;  %v3944_v46 = vld [vmem:[%s5121_s1 + $0x128] sm:$0xff]  }
  0x1a   : > { %3329 = vmatpush3.bf16.msra.mxu0 %v3890_v7  ;;  %3853 = vmatpush3.bf16.msra.mxu1 %v3890_v7  ;;  %v3926_v39 = vld [vmem:[%s4263_s15 + $0x3f0] ss:$36 sps:$4 sm:$0xff]   ;;  %v3929_v41 = vld [vmem:[%s5121_s1 + $0x98] sm:$0xff]   ;;  %v3939_v48 = vld [vmem:[%s5121_s1 + $0xc8] sm:$0xff]  }
  0x1b   : > { %3330 = vmatprep.subr.bf16.mxu0 %v3891_v8  ;;  %3846 = vmatprep.subr.bf16.mxu1 %v3891_v8  ;;  %v3931_v42 = vld [vmem:[%s5121_s1 + $0xd0] sm:$0xff]   ;;  %v3933_v44 = vld [vmem:[%s4263_s15 + $0xdc] ss:$36 sps:$4 sm:$0xff]   ;;  %v3940_v51 = vld [vmem:[%s5121_s1 + $0x88] sm:$0xff]  }
  0x1c   : > { %v3935_v45 = vld [vmem:[%s4263_s15 + $0x43c] ss:$36 sps:$4 sm:$0xff]   ;;  %v3932_v47 = vld [vmem:[%s5121_s1 + $0x90] sm:$0xff]   ;;  %v3945_v53 = vld [vmem:[%s4263_s15 + $0x124] ss:$36 sps:$4 sm:$0xff]  }
  0x1d   : > { %v3937_v49 = vld [vmem:[%s4263_s15 + $0xd8] ss:$36 sps:$4 sm:$0xff]   ;;  %v3941_v52 = vld [vmem:[%s5121_s1 + $0xc0] sm:$0xff]   ;;  %v3949_v54 = vld [vmem:[%s4263_s15 + $0xc] ss:$36 sps:$4 sm:$0xff]  }
  0x1e   : > { %3331 = vmatpush3.bf16.msra.mxu0 %v3892_v9  ;;  %3854 = vmatpush3.bf16.msra.mxu1 %v3892_v9  ;;  %v3938_v50 = vld [vmem:[%s4263_s15 + $0x438] ss:$36 sps:$4 sm:$0xff]   ;;  %v3959_v55 = vld [vmem:[%s5121_s1 + $0x160] sm:$0xff]   ;;  %v3947_v58 = vld [vmem:[%s4263_s15 + $0x8] ss:$36 sps:$4 sm:$0xff]  }
  0x1f   : > { %3332 = vmatprep.subr.bf16.mxu0 %v3893_v10  ;;  %3847 = vmatprep.subr.bf16.mxu1 %v3893_v10  ;;  %v3960_v56 = vld [vmem:[%s5121_s1 + $0x120] sm:$0xff]   ;;  %v3951_v60 = vld [vmem:[%s5121_s1 + $0x1f8] sm:$0xff]   ;;  %v3953_v62 = vld [vmem:[%s4263_s15 + $0x16c] ss:$36 sps:$4 sm:$0xff]  }
  0x20   : > { %v3943_v57 = vld [vmem:[%s5121_s1 + $0x80] sm:$0xff]   ;;  %v3952_v61 = vld [vmem:[%s5121_s1 + $0x1b8] sm:$0xff]   ;;  %v3967_v1 = vld [vmem:[%s5121_s1 + $0x1f0] sm:$0xff]  }
  0x21   : > { %v3950_v59 = vld [vmem:[%s4263_s15 + $0x120] ss:$36 sps:$4 sm:$0xff]   ;;  %v3955_v63 = vld [vmem:[%s4263_s15 + $0x54] ss:$36 sps:$4 sm:$0xff]   ;;  %v3957_v4 = vld [vmem:[%s4263_s15 + $0x168] ss:$36 sps:$4 sm:$0xff]  }
  0x22   : > { %3333 = vmatpush3.bf16.msra.mxu0 %v3894_v13  ;;  %3855 = vmatpush3.bf16.msra.mxu1 %v3894_v13  ;;  %v3969_v0 = vld [vmem:[%s5121_s1 + $0x158] sm:$0xff]   ;;  %v3968_v3 = vld [vmem:[%s5121_s1 + $0x1b0] sm:$0xff]   ;;  %v3984_v9 = vld [vmem:[%s5121_s1 + $0x1e8] sm:$0xff]  }
  0x23   : > { %3334 = vmatprep.subr.bf16.mxu0 %v3895_v14  ;;  %3848 = vmatprep.subr.bf16.mxu1 %v3895_v14  ;;  %v3970_v2 = vld [vmem:[%s5121_s1 + $0x118] sm:$0xff]   ;;  %v3958_v5 = vld [vmem:[%s4263_s15 + $0x50] ss:$36 sps:$4 sm:$0xff]   ;;  %v3986_v11 = vld [vmem:[%s5121_s1 + $0x1a8] sm:$0xff]  }
  0x24   : > { %v3961_v6 = vld [vmem:[%s4263_s15 + $0x1b4] ss:$36 sps:$4 sm:$0xff]   ;;  %v3963_v7 = vld [vmem:[%s4263_s15 + $0x9c] ss:$36 sps:$4 sm:$0xff]  }
  0x25   : > { %v3983_v8 = vld [vmem:[%s5121_s1 + $0x150] sm:$0xff]   ;;  %v3966_v13 = vld [vmem:[%s4263_s15 + $0x98] ss:$36 sps:$4 sm:$0xff]  }
  0x26   : > { %3335 = vmatpush3.bf16.msra.mxu0 %v3896_v15  ;;  %3856 = vmatpush3.bf16.msra.mxu1 %v3896_v15  ;;  %v3985_v10 = vld [vmem:[%s5121_s1 + $0x110] sm:$0xff]   ;;  %v3971_v14 = vld [vmem:[%s4263_s15 + $0x1fc] ss:$36 sps:$4 sm:$0xff]   ;;  %v3993_v15 = vld [vmem:[%s5121_s1 + $0x148] sm:$0xff]  }
  0x27   : > { %3336 = vmatprep.subr.bf16.mxu0 %v3897_v16  ;;  %3849 = vmatprep.subr.bf16.mxu1 %v3897_v16  ;;  %v3965_v12 = vld [vmem:[%s4263_s15 + $0x1b0] ss:$36 sps:$4 sm:$0xff]   ;;  %v3994_v16 = vld [vmem:[%s5121_s1 + $0x108] sm:$0xff]  }
  0x2a   : > { %3337 = vmatpush3.bf16.msra.mxu0 %v3898_v17  ;;  %3857 = vmatpush3.bf16.msra.mxu1 %v3898_v17  ;;  %v3973_v17 = vld [vmem:[%s4263_s15 + $0xe4] ss:$36 sps:$4 sm:$0xff]  }
  0x2b   : > { %3434 = vmatprep.subr.bf16.mxu1 %v3905_v18  ;;  %3546 = vmatprep.subr.bf16.mxu0 %v3908_v21  ;;  %v4001_v18 = vld [vmem:[%s5121_s1 + $0x1e0] sm:$0xff]  }
  0x2c   : > { %v3976_v21 = vld [vmem:[%s4263_s15 + $0xe0] ss:$36 sps:$4 sm:$0xff]  }
  0x2d   : > { %1775 = vmatmul.mubr.bf16.vlgmr.msra.gmra.mxu0 %v3899_v19  ;;  %1871 = vmatmul.mubr.bf16.vlgmr.msra.gmra.mxu1 %v3902_v20  ;;  %v4002_v19 = vld [vmem:[%s5121_s1 + $0x1a0] sm:$0xff]   ;;  %v3975_v20 = vld [vmem:[%s4263_s15 + $0x1f8] ss:$36 sps:$4 sm:$0xff]  }
  0x2e   : > { %3435 = vmatpush3.bf16.msra.mxu1 %v3906_v22  ;;  %3547 = vmatpush3.bf16.msra.mxu0 %v3910_v24  ;;  %v3977_v22 = vld [vmem:[%s4263_s15 + $0x244] ss:$36 sps:$4 sm:$0xff]  }
  0x2f   : > { %3436 = vmatprep.subr.bf16.mxu1 %v3907_v23  ;;  %1782 = vmatprep.mubr.bf16.mxu0 %v3911_v25  ;;  %v3979_v23 = vld [vmem:[%s4263_s15 + $0x12c] ss:$36 sps:$4 sm:$0xff]   ;;  %v4009_v24 = vld [vmem:[%s5121_s1 + $0x140] sm:$0xff]  }
  0x30   : > { %1878 = vmatprep.mubr.bf16.mxu1 %v3913_v26  ;;  %3548 = vmatprep.subr.bf16.mxu0 %v3928_v28  ;;  %v4010_v25 = vld [vmem:[%s5121_s1 + $0x100] sm:$0xff]   ;;  %v4017_v26 = vld [vmem:[%s5121_s1 + $0x1d8] sm:$0xff]  }
  0x31   : > { %v4018_v28 = vld [vmem:[%s5121_s1 + $0x198] sm:$0xff]  }
  0x32   : > { %3437 = vmatpush3.bf16.msra.mxu1 %v3909_v27  ;;  %3549 = vmatpush3.bf16.msra.mxu0 %v3930_v33  ;;  %v3981_v27 = vld [vmem:[%s4263_s15 + $0x240] ss:$36 sps:$4 sm:$0xff]   ;;  %v4032_v33 = vld [vmem:[%s5121_s1 + $0x1d0] sm:$0xff]  }
  0x33   : > { %3438 = vmatprep.subr.bf16.mxu1 %v3917_v31  ;;  %3550 = vmatprep.subr.bf16.mxu0 %v3942_v43  ;;  %v3987_v31 = vld [vmem:[%s4263_s15 + $0x28c] ss:$36 sps:$4 sm:$0xff]   ;;  %v4003_v43 = vld [vmem:[%s4263_s15 + $0x31c] ss:$36 sps:$4 sm:$0xff]  }
  0x35   : > { %1783 = vmatmul.mubr.bf16.gmra.mxu0 %v3915_v29  ;;  %1879 = vmatmul.mubr.bf16.gmra.mxu1 %v3916_v30  ;;  %v4019_v29 = vld [vmem:[%s5121_s1 + $0x238] sm:$0xff]   ;;  %v3982_v30 = vld [vmem:[%s4263_s15 + $0x128] ss:$36 sps:$4 sm:$0xff]  }
  0x36   : > { %3439 = vmatpush3.bf16.msra.mxu1 %v3918_v32  ;;  %1790 = vmatprep.mubr.bf16.mxu0 %v3921_v35  ;;  %v3989_v32 = vld [vmem:[%s4263_s15 + $0x174] ss:$36 sps:$4 sm:$0xff]  }
  0x37   : > { %3440 = vmatprep.subr.bf16.mxu1 %v3919_v34  ;;  %1886 = vmatprep.mubr.bf16.mxu1 %v3923_v36  ;;  %v3991_v34 = vld [vmem:[%s4263_s15 + $0x288] ss:$36 sps:$4 sm:$0xff]   ;;  %v4033_v35 = vld [vmem:[%s5121_s1 + $0x190] sm:$0xff]  }
  0x38   : > { %3551 = vmatpush3.bf16.msra.mxu0 %v3944_v46  ;;  %v3992_v36 = vld [vmem:[%s4263_s15 + $0x170] ss:$36 sps:$4 sm:$0xff]   ;;  %v4008_v46 = vld [vmem:[%s4263_s15 + $0x200] ss:$36 sps:$4 sm:$0xff]  }
  0x39   : > { %3552 = vmatprep.subr.bf16.mxu0 %v3959_v55  ;;  %v4034_v55 = vld [vmem:[%s5121_s1 + $0x230] sm:$0xff]  }
  0x3a   : > { %3441 = vmatpush3.bf16.msra.mxu1 %v3920_v37  ;;  %v3995_v37 = vld [vmem:[%s4263_s15 + $0x2d4] ss:$36 sps:$4 sm:$0xff]  }
  0x3b   : > { %3442 = vmatprep.subr.bf16.mxu1 %v3927_v40  ;;  %v4000_v40 = vld [vmem:[%s4263_s15 + $0x1b8] ss:$36 sps:$4 sm:$0xff]  }
  0x3c   : > { %3553 = vmatpush3.bf16.msra.mxu0 %v3960_v56  ;;  %v4049_v56 = vld [vmem:[%s5121_s1 + $0x228] sm:$0xff]  }
  0x3d   : > { %1791 = vmatmul.mubr.bf16.gmra.mxu0 %v3925_v38  ;;  %1887 = vmatmul.mubr.bf16.gmra.mxu1 %v3926_v39  ;;  %v3997_v38 = vld [vmem:[%s4263_s15 + $0x1bc] ss:$36 sps:$4 sm:$0xff]   ;;  %v3999_v39 = vld [vmem:[%s4263_s15 + $0x2d0] ss:$36 sps:$4 sm:$0xff]  }
  0x3e   : > { %3443 = vmatpush3.bf16.msra.mxu1 %v3929_v41  ;;  %1798 = vmatprep.mubr.bf16.mxu0 %v3933_v44  ;;  %v4047_v41 = vld [vmem:[%s5121_s1 + $0x1c8] sm:$0xff]  }
  0x3f   : > { %3444 = vmatprep.subr.bf16.mxu1 %v3931_v42  ;;  %1894 = vmatprep.mubr.bf16.mxu1 %v3935_v45  ;;  %v4048_v42 = vld [vmem:[%s5121_s1 + $0x188] sm:$0xff]   ;;  %v4007_v45 = vld [vmem:[%s4263_s15 + $0x318] ss:$36 sps:$4 sm:$0xff]  }
  0x40   : > { %3554 = vmatprep.subr.bf16.mxu0 %v3969_v0  ;;  %v4005_v44 = vld [vmem:[%s4263_s15 + $0x204] ss:$36 sps:$4 sm:$0xff]  }
  0x41   : > { %3555 = vmatpush3.bf16.msra.mxu0 %v3970_v2  ;;  %v4031_v0 = vld [vmem:[%s4263_s15 + $0xa0] ss:$36 sps:$4 sm:$0xff]   ;;  %v4037_v2 = vld [vmem:[%s4263_s15 + $0xec] ss:$36 sps:$4 sm:$0xff]  }
  0x42   : > { %3445 = vmatpush3.bf16.msra.mxu1 %v3932_v47  ;;  %3556 = vmatprep.subr.bf16.mxu0 %v3983_v8  ;;  %v4062_v47 = vld [vmem:[%s5121_s1 + $0x1c0] sm:$0xff]   ;;  %v4043_v8 = vld [vmem:[%s4263_s15 + $0x134] ss:$36 sps:$4 sm:$0xff]  }
  0x43   : > { %3446 = vmatprep.subr.bf16.mxu1 %v3939_v48  ;;  %v4063_v48 = vld [vmem:[%s5121_s1 + $0x180] sm:$0xff]  }
  0x45   : > { %1799 = vmatmul.mubr.bf16.gmra.mxu0 %v3937_v49  ;;  %1895 = vmatmul.mubr.bf16.gmra.mxu1 %v3938_v50  ;;  %v4011_v49 = vld [vmem:[%s4263_s15 + $0x24c] ss:$36 sps:$4 sm:$0xff]   ;;  %v4015_v50 = vld [vmem:[%s4263_s15 + $0x14] ss:$36 sps:$4 sm:$0xff]  }
  0x46   : > { %3447 = vmatpush3.bf16.msra.mxu1 %v3940_v51  ;;  %1806 = vmatprep.mubr.bf16.mxu0 %v3945_v53  ;;  %v4013_v51 = vld [vmem:[%s4263_s15 + $0x10] ss:$36 sps:$4 sm:$0xff]  }
  0x47   : > { %3448 = vmatprep.subr.bf16.mxu1 %v3941_v52  ;;  %1935 = vmatprep.mubr.bf16.mxu1 %v3949_v54  ;;  %v4016_v52 = vld [vmem:[%s4263_s15 + $0x248] ss:$36 sps:$4 sm:$0xff]   ;;  %v4020_v53 = vld [vmem:[%s4263_s15 + $0x294] ss:$36 sps:$4 sm:$0xff]   ;;  %v4022_v54 = vld [vmem:[%s4263_s15 + $0x5c] ss:$36 sps:$4 sm:$0xff]  }
  0x48   : > { %3557 = vmatpush3.bf16.msra.mxu0 %v3985_v10  ;;  %v4045_v10 = vld [vmem:[%s4263_s15 + $0x368] ss:$36 sps:$4 sm:$0xff]  }
  0x49   : > { %3558 = vmatprep.subr.bf16.mxu0 %v3993_v15  ;;  %v4055_v15 = vld [vmem:[%s4263_s15 + $0x178] ss:$36 sps:$4 sm:$0xff]  }
  0x4a   : > { %3449 = vmatpush3.bf16.msra.mxu1 %v3943_v57  ;;  %v4024_v57 = vld [vmem:[%s4263_s15 + $0x290] ss:$36 sps:$4 sm:$0xff]  }
  0x4b   : > { %3658 = vmatprep.subr.bf16.mxu1 %v3951_v60  ;;  %v4028_v60 = vld [vmem:[%s4263_s15 + $0xa4] ss:$36 sps:$4 sm:$0xff]  }
  0x4c   : > { %3559 = vmatpush3.bf16.msra.mxu0 %v3994_v16  ;;  %v4056_v16 = vld [vmem:[%s4263_s15 + $0x3fc] ss:$36 sps:$4 sm:$0xff]  }
  0x4d   : > { %1807 = vmatmul.mubr.bf16.gmra.mxu0 %v3950_v59  ;;  %1936 = vmatmul.mubr.bf16.vlgmr.msra.gmra.mxu1 %v3947_v58  ;;  %v4025_v58 = vld [vmem:[%s4263_s15 + $0x58] ss:$36 sps:$4 sm:$0xff]  }
  0x4e   : > { %3659 = vmatpush3.bf16.msra.mxu1 %v3952_v61  ;;  %1814 = vmatprep.mubr.bf16.mxu0 %v3953_v62  ;;  %v4026_v59 = vld [vmem:[%s4263_s15 + $0x2dc] ss:$36 sps:$4 sm:$0xff]  }
  0x4f   : > { %1943 = vmatprep.mubr.bf16.mxu1 %v3955_v63  ;;  %3660 = vmatprep.subr.bf16.mxu1 %v3967_v1  ;;  %v4064_v61 = vld [vmem:[%s5121_s1 + $0x220] sm:$0xff]   ;;  %v4077_v62 = vld [vmem:[%s5121_s1 + $0x218] sm:$0xff]  }
  0x50   : > { %3560 = vmatprep.subr.bf16.mxu0 %v4009_v24  ;;  %v4030_v63 = vld [vmem:[%s4263_s15 + $0x2d8] ss:$36 sps:$4 sm:$0xff]   ;;  %v4035_v1 = vld [vmem:[%s4263_s15 + $0x324] ss:$36 sps:$4 sm:$0xff]  }
  0x51   : > { %3561 = vmatpush3.bf16.msra.mxu0 %v4010_v25  ;;  %v4071_v24 = vld [vmem:[%s4263_s15 + $0x254] ss:$36 sps:$4 sm:$0xff]   ;;  %v4075_v25 = vld [vmem:[%s4263_s15 + $0x1c] ss:$36 sps:$4 sm:$0xff]  }
  0x52   : > { %3661 = vmatpush3.bf16.msra.mxu1 %v3968_v3  ;;  %3794 = vmatprep.subr.bf16.mxu0 %v4019_v29  ;;  %v4090_v3 = vld [vmem:[%s5121_s1 + $0x210] sm:$0xff]  }
  0x53   : > { %3662 = vmatprep.subr.bf16.mxu1 %v3984_v9  ;;  %v4116_v9 = vld [vmem:[%s5121_s1 + $0x200] sm:$0xff]  }
  0x55   : > { %1815 = vmatmul.mubr.bf16.gmra.mxu0 %v3957_v4  ;;  %1944 = vmatmul.mubr.bf16.gmra.mxu1 %v3958_v5  ;;  %v4039_v4 = vld [vmem:[%s4263_s15 + $0x320] ss:$36 sps:$4 sm:$0xff]   ;;  %v4040_v5 = vld [vmem:[%s4263_s15 + $0xe8] ss:$36 sps:$4 sm:$0xff]  }
  0x56   : > { %1822 = vmatprep.mubr.bf16.mxu0 %v3961_v6  ;;  %1951 = vmatprep.mubr.bf16.mxu1 %v3963_v7  ;;  %v4103_v6 = vld [vmem:[%s5121_s1 + $0x208] sm:$0xff]  }
  0x57   : > { %3663 = vmatpush3.bf16.msra.mxu1 %v3986_v11  ;;  %v4041_v7 = vld [vmem:[%s4263_s15 + $0x36c] ss:$36 sps:$4 sm:$0xff]  }
  0x58   : > { %3664 = vmatprep.subr.bf16.mxu1 %v4001_v18  ;;  %v4046_v11 = vld [vmem:[%s4263_s15 + $0x130] ss:$36 sps:$4 sm:$0xff]   ;;  %v4060_v18 = vld [vmem:[%s4263_s15 + $0x3f8] ss:$36 sps:$4 sm:$0xff]  }
  0x5b   : > { %3665 = vmatpush3.bf16.msra.mxu1 %v4002_v19  ;;  %v4061_v19 = vld [vmem:[%s4263_s15 + $0x1c0] ss:$36 sps:$4 sm:$0xff]  }
  0x5c   : > { %3666 = vmatprep.subr.bf16.mxu1 %v4017_v26  ;;  %v4073_v26 = vld [vmem:[%s4263_s15 + $0x18] ss:$36 sps:$4 sm:$0xff]  }
  0x5d   : > { %1823 = vmatmul.mubr.bf16.gmra.mxu0 %v3965_v12  ;;  %1952 = vmatmul.mubr.bf16.gmra.mxu1 %v3966_v13  ;;  %v4050_v12 = vld [vmem:[%s4263_s15 + $0x3b4] ss:$36 sps:$4 sm:$0xff]   ;;  %v4052_v13 = vld [vmem:[%s4263_s15 + $0x17c] ss:$36 sps:$4 sm:$0xff]  }
  0x5e   : > { %1830 = vmatprep.mubr.bf16.mxu0 %v3971_v14  ;;  %1959 = vmatprep.mubr.bf16.mxu1 %v3973_v17  ;;  %v4054_v14 = vld [vmem:[%s4263_s15 + $0x3b0] ss:$36 sps:$4 sm:$0xff]   ;;  %v4058_v17 = vld [vmem:[%s4263_s15 + $0x1c4] ss:$36 sps:$4 sm:$0xff]  }
  0x5f   : > { %3667 = vmatpush3.bf16.msra.mxu1 %v4018_v28  ;;  %v4078_v28 = vld [vmem:[%s4263_s15 + $0x29c] ss:$36 sps:$4 sm:$0xff]  }
  0x60   : > { %3668 = vmatprep.subr.bf16.mxu1 %v4032_v33  ;;  %v4086_v33 = vld [vmem:[%s4263_s15 + $0xac] ss:$36 sps:$4 sm:$0xff]  }
  0x63   : > { %3669 = vmatpush3.bf16.msra.mxu1 %v4033_v35  ;;  %v4089_v35 = vld [vmem:[%s4263_s15 + $0xa8] ss:$36 sps:$4 sm:$0xff]  }
  0x64   : > { %3670 = vmatprep.subr.bf16.mxu1 %v4047_v41  ;;  %v4099_v41 = vld [vmem:[%s4263_s15 + $0x13c] ss:$36 sps:$4 sm:$0xff]  }
  0x65   : > { %1831 = vmatmul.mubr.bf16.gmra.mxu0 %v3975_v20  ;;  %1960 = vmatmul.mubr.bf16.gmra.mxu1 %v3976_v21  ;;  %v4065_v20 = vld [vmem:[%s4263_s15 + $0x444] ss:$36 sps:$4 sm:$0xff]   ;;  %v4067_v21 = vld [vmem:[%s4263_s15 + $0x20c] ss:$36 sps:$4 sm:$0xff]  }
  0x66   : > { %1838 = vmatprep.mubr.bf16.mxu0 %v3977_v22  ;;  %1967 = vmatprep.mubr.bf16.mxu1 %v3979_v23  ;;  %v4069_v22 = vld [vmem:[%s4263_s15 + $0x440] ss:$36 sps:$4 sm:$0xff]   ;;  %v4070_v23 = vld [vmem:[%s4263_s15 + $0x208] ss:$36 sps:$4 sm:$0xff]  }
  0x67   : > { %3671 = vmatpush3.bf16.msra.mxu1 %v4048_v42  ;;  %v4101_v42 = vld [vmem:[%s4263_s15 + $0x370] ss:$36 sps:$4 sm:$0xff]  }
  0x68   : > { %3672 = vmatprep.subr.bf16.mxu1 %v4062_v47 }
  0x6b   : > { %3673 = vmatpush3.bf16.msra.mxu1 %v4063_v48 }
  0x6d   : > { %1839 = vmatmul.mubr.bf16.gmra.mxu0 %v3981_v27  ;;  %1968 = vmatmul.mubr.bf16.gmra.mxu1 %v3982_v30  ;;  %v4076_v27 = vld [vmem:[%s4263_s15 + $0x250] ss:$36 sps:$4 sm:$0xff]   ;;  %v4082_v30 = vld [vmem:[%s4263_s15 + $0x298] ss:$36 sps:$4 sm:$0xff]  }
  0x6e   : > { %1846 = vmatprep.mubr.bf16.mxu0 %v3987_v31  ;;  %1975 = vmatprep.mubr.bf16.mxu1 %v3989_v32  ;;  %v4083_v31 = vld [vmem:[%s4263_s15 + $0x60] ss:$36 sps:$4 sm:$0xff]  }
  0x6f   : > { %v4084_v32 = vld [vmem:[%s4263_s15 + $0x2e4] ss:$36 sps:$4 sm:$0xff]  }
  0x75   : > { %1847 = vmatmul.mubr.bf16.gmra.mxu0 %v3991_v34  ;;  %1976 = vmatmul.mubr.bf16.gmra.mxu1 %v3992_v36  ;;  %v4088_v34 = vld [vmem:[%s4263_s15 + $0x2e0] ss:$36 sps:$4 sm:$0xff]   ;;  %v4091_v36 = vld [vmem:[%s4263_s15 + $0x32c] ss:$36 sps:$4 sm:$0xff]  }
  0x76   : > { %1854 = vmatprep.mubr.bf16.mxu0 %v3995_v37  ;;  %1983 = vmatprep.mubr.bf16.mxu1 %v3997_v38  ;;  %v4093_v37 = vld [vmem:[%s4263_s15 + $0xf4] ss:$36 sps:$4 sm:$0xff]   ;;  %v4095_v38 = vld [vmem:[%s4263_s15 + $0x328] ss:$36 sps:$4 sm:$0xff]  }
  0x7d   : > { %1855 = vmatmul.mubr.bf16.gmra.mxu0 %v3999_v39  ;;  %1984 = vmatmul.mubr.bf16.gmra.mxu1 %v4000_v40  ;;  %v4096_v39 = vld [vmem:[%s4263_s15 + $0xf0] ss:$36 sps:$4 sm:$0xff]  }
  0x7e   : > { %1862 = vmatprep.mubr.bf16.mxu0 %v4003_v43  ;;  %1991 = vmatprep.mubr.bf16.mxu1 %v4005_v44  ;;  %v4097_v40 = vld [vmem:[%s4263_s15 + $0x374] ss:$36 sps:$4 sm:$0xff]   ;;  %v4104_v44 = vld [vmem:[%s4263_s15 + $0x3bc] ss:$36 sps:$4 sm:$0xff]  }
  0x7f   : > { %v4102_v43 = vld [vmem:[%s4263_s15 + $0x138] ss:$36 sps:$4 sm:$0xff]  }
  0x85   : > { %1863 = vmatmul.mubr.bf16.gmra.mxu0 %v4007_v45  ;;  %1992 = vmatmul.mubr.bf16.gmra.mxu1 %v4008_v46  ;;  %v4106_v45 = vld [vmem:[%s4263_s15 + $0x184] ss:$36 sps:$4 sm:$0xff]  }
  0x86   : > { %1999 = vmatprep.mubr.bf16.mxu1 %v4011_v49  ;;  %2096 = vmatprep.mubr.bf16.mxu0 %v4015_v50 }
  0x8d   : > { %2000 = vmatmul.mubr.bf16.gmra.mxu1 %v4016_v52  ;;  %2097 = vmatmul.mubr.bf16.vlgmr.msra.gmra.mxu0 %v4013_v51 }
  0x8e   : > { %3795 = vmatpush3.bf16.msra.mxu0 %v4019_v29  ;;  %2007 = vmatprep.mubr.bf16.mxu1 %v4020_v53  ;;  %v4080_v29 = vld [vmem:[%s4263_s15 + $0x64] ss:$36 sps:$4 sm:$0xff]  }
  0x8f   : > { %2104 = vmatprep.mubr.bf16.mxu0 %v4022_v54  ;;  %3796 = vmatprep.subr.bf16.mxu0 %v4034_v55  ;;  %v4108_v54 = vld [vmem:[%s4263_s15 + $0x3b8] ss:$36 sps:$4 sm:$0xff]  }
  0x92   : > { %3797 = vmatpush3.bf16.msra.mxu0 %v4034_v55  ;;  %v4109_v55 = vld [vmem:[%s4263_s15 + $0x180] ss:$36 sps:$4 sm:$0xff]  }
  0x93   : > { %3798 = vmatprep.subr.bf16.mxu0 %v4049_v56 }
  0x95   : > { %2008 = vmatmul.mubr.bf16.gmra.mxu1 %v4024_v57  ;;  %2105 = vmatmul.mubr.bf16.gmra.mxu0 %v4025_v58  ;;  %v4112_v57 = vld [vmem:[%s4263_s15 + $0x1cc] ss:$36 sps:$4 sm:$0xff]  }
  0x96   : > { %2015 = vmatprep.mubr.bf16.mxu1 %v4026_v59  ;;  %2112 = vmatprep.mubr.bf16.mxu0 %v4028_v60 }
  0x97   : > { %3799 = vmatpush3.bf16.msra.mxu0 %v4049_v56  ;;  %v4110_v56 = vld [vmem:[%s4263_s15 + $0x404] ss:$36 sps:$4 sm:$0xff]  }
  0x98   : > { %3800 = vmatprep.subr.bf16.mxu0 %v4064_v61 }
  0x9b   : > { %3801 = vmatpush3.bf16.msra.mxu0 %v4064_v61 }
  0x9c   : > { %3802 = vmatprep.subr.bf16.mxu0 %v4077_v62 }
  0x9d   : > { %2016 = vmatmul.mubr.bf16.gmra.mxu1 %v4030_v63  ;;  %2113 = vmatmul.mubr.bf16.gmra.mxu0 %v4031_v0 }
  0x9e   : > { %2023 = vmatprep.mubr.bf16.mxu1 %v4035_v1  ;;  %2120 = vmatprep.mubr.bf16.mxu0 %v4037_v2 }
  0x9f   : > { %3803 = vmatpush3.bf16.msra.mxu0 %v4077_v62 }
  0xa0   : > { %3804 = vmatprep.subr.bf16.mxu0 %v4090_v3 }
  0xa3   : > { %3805 = vmatpush3.bf16.msra.mxu0 %v4090_v3 }
  0xa4   : > { %3806 = vmatprep.subr.bf16.mxu0 %v4103_v6 }
  0xa5   : > { %2024 = vmatmul.mubr.bf16.gmra.mxu1 %v4039_v4  ;;  %2121 = vmatmul.mubr.bf16.gmra.mxu0 %v4040_v5 }
  0xa6   : > { %2031 = vmatprep.mubr.bf16.mxu1 %v4041_v7  ;;  %2128 = vmatprep.mubr.bf16.mxu0 %v4043_v8  ;;  %v4115_v7 = vld [vmem:[%s4263_s15 + $0x1c8] ss:$36 sps:$4 sm:$0xff]  }
  0xa7   : > { %3807 = vmatpush3.bf16.msra.mxu0 %v4103_v6  ;;  %v4114_v6 = vld [vmem:[%s4263_s15 + $0x400] ss:$36 sps:$4 sm:$0xff]   ;;  %v4117_v8 = vld [vmem:[%s4263_s15 + $0x44c] ss:$36 sps:$4 sm:$0xff]  }
  0xa8   : > { %3808 = vmatprep.subr.bf16.mxu0 %v4116_v9 }
  0xab   : > { %3809 = vmatpush3.bf16.msra.mxu0 %v4116_v9  ;;  %v4119_v9 = vld [vmem:[%s4263_s15 + $0x214] ss:$36 sps:$4 sm:$0xff]  }
  0xad   : > { %2032 = vmatmul.mubr.bf16.gmra.mxu1 %v4045_v10  ;;  %2129 = vmatmul.mubr.bf16.gmra.mxu0 %v4046_v11 }
  0xae   : > { %2039 = vmatprep.mubr.bf16.mxu1 %v4050_v12  ;;  %2136 = vmatprep.mubr.bf16.mxu0 %v4052_v13 }
  0xb5   : > { %2040 = vmatmul.mubr.bf16.gmra.mxu1 %v4054_v14  ;;  %2137 = vmatmul.mubr.bf16.gmra.mxu0 %v4055_v15 }
  0xb6   : > { %2047 = vmatprep.mubr.bf16.mxu1 %v4056_v16  ;;  %2144 = vmatprep.mubr.bf16.mxu0 %v4058_v17 }
  0xbd   : > { %2048 = vmatmul.mubr.bf16.gmra.mxu1 %v4060_v18  ;;  %2145 = vmatmul.mubr.bf16.gmra.mxu0 %v4061_v19 }
  0xbe   : > { %2055 = vmatprep.mubr.bf16.mxu1 %v4065_v20  ;;  %2152 = vmatprep.mubr.bf16.mxu0 %v4067_v21 }
  0xc5   : > { %2056 = vmatmul.mubr.bf16.gmra.mxu1 %v4069_v22  ;;  %2153 = vmatmul.mubr.bf16.gmra.mxu0 %v4070_v23  ;;  %v4121_v22 = vld [vmem:[%s4263_s15 + $0x448] ss:$36 sps:$4 sm:$0xff]   ;;  %v4122_v23 = vld [vmem:[%s4263_s15 + $0x210] ss:$36 sps:$4 sm:$0xff]  }
  0xc6   : > { %2160 = vmatprep.mubr.bf16.mxu0 %v4071_v24  ;;  %2257 = vmatprep.mubr.bf16.mxu1 %v4075_v25  ;;  %v4125_v24 = vld [vmem:[%s4263_s15 + $0x25c] ss:$36 sps:$4 sm:$0xff]  }
  0xc7   : > { %v4126_v25 = vld [vmem:[%s4263_s15 + $0x20] ss:$36 sps:$4 sm:$0xff]  }
  0xcd   : > { %2161 = vmatmul.mubr.bf16.gmra.mxu0 %v4076_v27  ;;  %2258 = vmatmul.mubr.bf16.vlgmr.msra.gmra.mxu1 %v4073_v26 }
  0xce   : > { %2168 = vmatprep.mubr.bf16.mxu0 %v4078_v28  ;;  %2265 = vmatprep.mubr.bf16.mxu1 %v4080_v29 }
  0xd5   : > { %2169 = vmatmul.mubr.bf16.gmra.mxu0 %v4082_v30  ;;  %2266 = vmatmul.mubr.bf16.gmra.mxu1 %v4083_v31 }
  0xd6   : > { %2176 = vmatprep.mubr.bf16.mxu0 %v4084_v32  ;;  %2273 = vmatprep.mubr.bf16.mxu1 %v4086_v33 }
  0xdd   : > { %2177 = vmatmul.mubr.bf16.gmra.mxu0 %v4088_v34  ;;  %2274 = vmatmul.mubr.bf16.gmra.mxu1 %v4089_v35 }
  0xde   : > { %2184 = vmatprep.mubr.bf16.mxu0 %v4091_v36  ;;  %2281 = vmatprep.mubr.bf16.mxu1 %v4093_v37 }
  0xe5   : > { %2185 = vmatmul.mubr.bf16.gmra.mxu0 %v4095_v38  ;;  %2282 = vmatmul.mubr.bf16.gmra.mxu1 %v4096_v39  ;;  %v4123_v38 = vld [vmem:[%s4263_s15 + $0x258] ss:$36 sps:$4 sm:$0xff]   ;;  %v4127_v39 = vld [vmem:[%s4263_s15 + $0x68] ss:$36 sps:$4 sm:$0xff]  }
  0xe6   : > { %2192 = vmatprep.mubr.bf16.mxu0 %v4097_v40  ;;  %2289 = vmatprep.mubr.bf16.mxu1 %v4099_v41  ;;  %v4130_v40 = vld [vmem:[%s4263_s15 + $0x2a4] ss:$36 sps:$4 sm:$0xff]   ;;  %v4131_v41 = vld [vmem:[%s4263_s15 + $0xb0] ss:$36 sps:$4 sm:$0xff]  }
  0xed   : > { %v3338_v46 = vpop.f32.mrf.mxu0  ;;  %v3410_v47 = vpop.f32.mrf.mxu1  ;;  %2193 = vmatmul.mubr.bf16.gmra.mxu0 %v4101_v42  ;;  %2290 = vmatmul.mubr.bf16.gmra.mxu1 %v4102_v43 }
  0xee   : > { %2200 = vmatprep.mubr.bf16.mxu0 %v4104_v44  ;;  %2297 = vmatprep.mubr.bf16.mxu1 %v4106_v45 }
  0xef   : > { %v3339_v48 = vpop.f32.mrf.mxu0  ;;  %v3411_v49 = vpop.f32.mrf.mxu1 }
  0xf0   : > { %v4556_v50 = vadd.f32 %v3339_v48, %v3338_v46  ;;  %v4558_v51 = vadd.f32 %v3411_v49, %v3410_v47 }
  0xf1   : > { %v3341_v52 = vpop.f32.mrf.mxu0  ;;  %v3413_v53 = vpop.f32.mrf.mxu1 }
  0xf3   : > { %v3342_v58 = vpop.f32.mrf.mxu0  ;;  %v3414_v59 = vpop.f32.mrf.mxu1 }
  0xf4   : > { %v4564_v60 = vadd.f32 %v3342_v58, %v3341_v52  ;;  %v4566_v61 = vadd.f32 %v3414_v59, %v3413_v53  ;;  %v4135_v59 = vld [vmem:[%s4263_s15 + $0x2ec] ss:$36 sps:$4 sm:$0xff]  }
  0xf5   : > { %v3344_v62 = vpop.f32.mrf.mxu0  ;;  %v3416_v63 = vpop.f32.mrf.mxu1  ;;  %2201 = vmatmul.mubr.bf16.gmra.mxu0 %v4108_v54  ;;  %2298 = vmatmul.mubr.bf16.gmra.mxu1 %v4109_v55 }
  0xf6   : > { %2208 = vmatprep.mubr.bf16.mxu0 %v4110_v56  ;;  %2305 = vmatprep.mubr.bf16.mxu1 %v4112_v57  ;;  %v4128_v56 = vld [vmem:[%s4263_s15 + $0x2a0] ss:$36 sps:$4 sm:$0xff]   ;;  %v4132_v57 = vld [vmem:[%s4263_s15 + $0xf8] ss:$36 sps:$4 sm:$0xff]  }
  0xf7   : > { %v3345_v0 = vpop.f32.mrf.mxu0  ;;  %v3417_v1 = vpop.f32.mrf.mxu1 }
  0xf8   : > { %v4568_v2 = vadd.f32 %v3345_v0, %v3344_v62  ;;  %v4570_v3 = vadd.f32 %v3417_v1, %v3416_v63  ;;  %v4136_v62 = vld [vmem:[%s4263_s15 + $0x140] ss:$36 sps:$4 sm:$0xff]  }
  0xf9   : > { %v3347_v4 = vpop.f32.mrf.mxu0  ;;  %v3419_v5 = vpop.f32.mrf.mxu1 }
  0xfb   : > { %v3348_v10 = vpop.f32.mrf.mxu0  ;;  %v3420_v11 = vpop.f32.mrf.mxu1 }
  0xfc   : > { %v4576_v12 = vadd.f32 %v3348_v10, %v3347_v4  ;;  %v4578_v13 = vadd.f32 %v3420_v11, %v3419_v5 }
  0xfd   : > { %v3350_v14 = vpop.f32.mrf.mxu0  ;;  %v3422_v15 = vpop.f32.mrf.mxu1  ;;  %2209 = vmatmul.mubr.bf16.gmra.mxu0 %v4114_v6  ;;  %2306 = vmatmul.mubr.bf16.gmra.mxu1 %v4115_v7 }
  0xfe   : > { %2216 = vmatprep.mubr.bf16.mxu0 %v4117_v8  ;;  %2313 = vmatprep.mubr.bf16.mxu1 %v4119_v9 }
  0xff   : > { %v3351_v16 = vpop.f32.mrf.mxu0  ;;  %v3423_v17 = vpop.f32.mrf.mxu1 }
 0x100   : > { %v4580_v18 = vadd.f32 %v3351_v16, %v3350_v14  ;;  %v4582_v19 = vadd.f32 %v3423_v17, %v3422_v15  ;;  %v4133_v15 = vld [vmem:[%s4263_s15 + $0x2e8] ss:$36 sps:$4 sm:$0xff]  }
 0x101   : > { %v3353_v20 = vpop.f32.mrf.mxu0  ;;  %v3425_v21 = vpop.f32.mrf.mxu1  ;;  %v4137_v16 = vld [vmem:[%s4263_s15 + $0x188] ss:$36 sps:$4 sm:$0xff]  }
 0x103   : > { %v3354_v26 = vpop.f32.mrf.mxu0  ;;  %v3426_v27 = vpop.f32.mrf.mxu1 }
 0x104   : > { %v4588_v28 = vadd.f32 %v3354_v26, %v3353_v20  ;;  %v4590_v29 = vadd.f32 %v3426_v27, %v3425_v21  ;;  %v4140_v20 = vld [vmem:[%s4263_s15 + $0x334] ss:$36 sps:$4 sm:$0xff]  }
 0x105   : > { %v3356_v30 = vpop.f32.mrf.mxu0  ;;  %v3428_v31 = vpop.f32.mrf.mxu1  ;;  %2217 = vmatmul.mubr.bf16.gmra.mxu0 %v4121_v22  ;;  %2314 = vmatmul.mubr.bf16.gmra.mxu1 %v4122_v23  ;;  %v4141_v21 = vld [vmem:[%s4263_s15 + $0x1d0] ss:$36 sps:$4 sm:$0xff]  }
 0x106   : > { %2321 = vmatprep.mubr.bf16.mxu1 %v4125_v24  ;;  %3810 = vmatprep.mubr.bf16.mxu0 %v4126_v25 }
 0x107   : > { %v3357_v32 = vpop.f32.mrf.mxu0  ;;  %v3429_v33 = vpop.f32.mrf.mxu1 }
 0x108   : > { %v4592_v34 = vadd.f32 %v3357_v32, %v3356_v30  ;;  %v4594_v35 = vadd.f32 %v3429_v33, %v3428_v31 }
 0x109   : > { %v3359_v36 = vpop.f32.mrf.mxu0  ;;  %v3431_v37 = vpop.f32.mrf.mxu1 }
 0x10b   : > { %v3360_v42 = vpop.f32.mrf.mxu0  ;;  %v3432_v43 = vpop.f32.mrf.mxu1 }
 0x10c   : > { %v4600_v44 = vadd.f32 %v3360_v42, %v3359_v36  ;;  %v4602_v45 = vadd.f32 %v3432_v43, %v3431_v37  ;;  %v4138_v37 = vld [vmem:[%s4263_s15 + $0x330] ss:$36 sps:$4 sm:$0xff]  }
 0x10d   : > { %v3362_v46 = vpop.f32.mrf.mxu0  ;;  %v3450_v47 = vpop.f32.mrf.mxu1  ;;  %2322 = vmatmul.mubr.bf16.gmra.mxu1 %v4123_v38  ;;  %3811 = vmatmul.mubr.bf16.vlgmr.msra.gmra.mxu0 %v4127_v39  ;;  %v4142_v38 = vld [vmem:[%s4263_s15 + $0x218] ss:$36 sps:$4 sm:$0xff]  }
 0x10e   : > { %2329 = vmatprep.mubr.bf16.mxu1 %v4130_v40  ;;  %3814 = vmatprep.mubr.bf16.mxu0 %v4131_v41  ;;  %v4145_v40 = vld [vmem:[%s4263_s15 + $0x37c] ss:$36 sps:$4 sm:$0xff]  }
 0x10f   : > { %v3363_v48 = vpop.f32.mrf.mxu0  ;;  %v3451_v49 = vpop.f32.mrf.mxu1  ;;  %v4146_v41 = vld [vmem:[%s4263_s15 + $0x260] ss:$36 sps:$4 sm:$0xff]  }
 0x110   : > { %v4604_v52 = vadd.f32 %v3363_v48, %v3362_v46  ;;  %v3452_v53 = vadd.f32 %v3451_v49, %v3450_v47 }
 0x111   : > { %v3365_v54 = vpop.f32.mrf.mxu0  ;;  %v3453_v55 = vpop.f32.mrf.mxu1 }
 0x112   : > { %v4609_v58 = vadd.f32 %v3452_v53, %v4556_v50 }
 0x113   : > { %v3366_v63 = vpop.f32.mrf.mxu0  ;;  %v3454_v0 = vpop.f32.mrf.mxu1 }
 0x114   : > { %v4613_v1 = vadd.f32 %v3366_v63, %v3365_v54  ;;  %v3455_v4 = vadd.f32 %v3454_v0, %v3453_v55  ;;  %v4150_v0 = vld [vmem:[%s4263_s15 + $0x3c4] ss:$36 sps:$4 sm:$0xff]  }
 0x115   : > { %v3368_v5 = vpop.f32.mrf.mxu0  ;;  %v3456_v6 = vpop.f32.mrf.mxu1  ;;  %2330 = vmatmul.mubr.bf16.gmra.mxu1 %v4128_v56  ;;  %3815 = vmatmul.mubr.bf16.gmra.mxu0 %v4132_v57 }
 0x116   : > { %v4616_v7 = vadd.f32 %v3455_v4, %v4564_v60  ;;  %2337 = vmatprep.mubr.bf16.mxu1 %v4135_v59  ;;  %3818 = vmatprep.mubr.bf16.mxu0 %v4136_v62  ;;  %v4143_v59 = vld [vmem:[%s4263_s15 + $0x378] ss:$36 sps:$4 sm:$0xff]   ;;  %v4147_v62 = vld [vmem:[%s4263_s15 + $0x2a8] ss:$36 sps:$4 sm:$0xff]   ;;  %v4151_v4 = vld [vmem:[%s4263_s15 + $0x2f0] ss:$36 sps:$4 sm:$0xff]  }
 0x117   : > { %v3369_v50 = vpop.f32.mrf.mxu0  ;;  %v3457_v8 = vpop.f32.mrf.mxu1 }
 0x118   : > { %v4618_v9 = vadd.f32 %v3369_v50, %v3368_v5  ;;  %v3458_v10 = vadd.f32 %v3457_v8, %v3456_v6 }
 0x119   : > { %v3371_v11 = vpop.f32.mrf.mxu0  ;;  %v3459_v14 = vpop.f32.mrf.mxu1 }
 0x11a   : > { %v4623_v17 = vadd.f32 %v3458_v10, %v4568_v2 }
 0x11b   : > { %v3372_v22 = vpop.f32.mrf.mxu0  ;;  %v3460_v23 = vpop.f32.mrf.mxu1 }
 0x11c   : > { %v4627_v60 = vadd.f32 %v3372_v22, %v3371_v11  ;;  %v3461_v24 = vadd.f32 %v3460_v23, %v3459_v14  ;;  %v4148_v22 = vld [vmem:[%s4263_s15 + $0x3c0] ss:$36 sps:$4 sm:$0xff]   ;;  %v4152_v23 = vld [vmem:[%s4263_s15 + $0x338] ss:$36 sps:$4 sm:$0xff]  }
 0x11d   : > { %v3374_v25 = vpop.f32.mrf.mxu0  ;;  %v3462_v26 = vpop.f32.mrf.mxu1  ;;  %2338 = vmatmul.mubr.bf16.gmra.mxu1 %v4133_v15  ;;  %3819 = vmatmul.mubr.bf16.gmra.mxu0 %v4137_v16 }
 0x11e   : > { %v4630_v27 = vadd.f32 %v3461_v24, %v4576_v12  ;;  %2345 = vmatprep.mubr.bf16.mxu1 %v4140_v20  ;;  %3822 = vmatprep.mubr.bf16.mxu0 %v4141_v21 }
 0x11f   : > { %v3375_v2 = vpop.f32.mrf.mxu0  ;;  %v3463_v30 = vpop.f32.mrf.mxu1 }
 0x120   : > { %v4632_v31 = vadd.f32 %v3375_v2, %v3374_v25  ;;  %v3464_v32 = vadd.f32 %v3463_v30, %v3462_v26  ;;  %v4155_v25 = vld [vmem:[%s4263_s15 + $0x40c] ss:$36 sps:$4 sm:$0xff]   ;;  %v4156_v26 = vld [vmem:[%s4263_s15 + $0x380] ss:$36 sps:$4 sm:$0xff]  }
 0x121   : > { %v3377_v33 = vpop.f32.mrf.mxu0  ;;  %v3465_v36 = vpop.f32.mrf.mxu1 }
 0x122   : > { %v4637_v39 = vadd.f32 %v3464_v32, %v4580_v18 }
 0x123   : > { %v3378_v42 = vpop.f32.mrf.mxu0  ;;  %v3466_v43 = vpop.f32.mrf.mxu1 }
 0x124   : > { %v4641_v12 = vadd.f32 %v3378_v42, %v3377_v33  ;;  %v3467_v46 = vadd.f32 %v3466_v43, %v3465_v36 }
 0x125   : > { %v3380_v47 = vpop.f32.mrf.mxu0  ;;  %v3468_v48 = vpop.f32.mrf.mxu1  ;;  %2346 = vmatmul.mubr.bf16.gmra.mxu1 %v4138_v37  ;;  %3823 = vmatmul.mubr.bf16.gmra.mxu0 %v4142_v38 }
 0x126   : > { %v4644_v49 = vadd.f32 %v3467_v46, %v4588_v28  ;;  %2353 = vmatprep.mubr.bf16.mxu1 %v4145_v40  ;;  %3826 = vmatprep.mubr.bf16.mxu0 %v4146_v41  ;;  %v4153_v46 = vld [vmem:[%s4263_s15 + $0x408] ss:$36 sps:$4 sm:$0xff]  }
 0x127   : > { %v3381_v18 = vpop.f32.mrf.mxu0  ;;  %v3469_v53 = vpop.f32.mrf.mxu1 }
 0x128   : > { %v4646_v54 = vadd.f32 %v3381_v18, %v3380_v47  ;;  %v3470_v55 = vadd.f32 %v3469_v53, %v3468_v48  ;;  %v4157_v47 = vld [vmem:[%s4263_s15 + $0x3c8] ss:$36 sps:$4 sm:$0xff]   ;;  %v4160_v18 = vld [vmem:[%s4263_s15 + $0x454] ss:$36 sps:$4 sm:$0xff]  }
 0x129   : > { %v3383_v56 = vpop.f32.mrf.mxu0  ;;  %v3471_v57 = vpop.f32.mrf.mxu1  ;;  %v4161_v53 = vld [vmem:[%s4263_s15 + $0x410] ss:$36 sps:$4 sm:$0xff]  }
 0x12a   : > { %v4651_v63 = vadd.f32 %v3470_v55, %v4592_v34 }
 0x12b   : > { %v3384_v5 = vpop.f32.mrf.mxu0  ;;  %v3472_v6 = vpop.f32.mrf.mxu1 }
 0x12c   : > { %v4655_v28 = vadd.f32 %v3384_v5, %v3383_v56  ;;  %v3473_v50 = vadd.f32 %v3472_v6, %v3471_v57 }
 0x12d   : > { %v3386_v8 = vpop.f32.mrf.mxu0  ;;  %v3474_v10 = vpop.f32.mrf.mxu1  ;;  %2354 = vmatmul.mubr.bf16.gmra.mxu1 %v4143_v59  ;;  %3827 = vmatmul.mubr.bf16.gmra.mxu0 %v4147_v62 }
 0x12e   : > { %v4658_v11 = vadd.f32 %v3473_v50, %v4600_v44  ;;  %2361 = vmatprep.mubr.bf16.mxu1 %v4150_v0  ;;  %3830 = vmatprep.mubr.bf16.mxu0 %v4151_v4 }
 0x12f   : > { %v3387_v34 = vpop.f32.mrf.mxu0  ;;  %v3475_v14 = vpop.f32.mrf.mxu1 }
 0x130   : > { %v4660_v15 = vadd.f32 %v3387_v34, %v3386_v8  ;;  %v3476_v16 = vadd.f32 %v3475_v14, %v3474_v10  ;;  %v4158_v10 = vld [vmem:[%s4263_s15 + $0x450] ss:$36 sps:$4 sm:$0xff]   ;;  %v4162_v34 = vld [vmem:[%s4263_s15 + $0x458] ss:$36 sps:$4 sm:$0xff]  }
 0x131   : > { %v3389_v20 = vpop.f32.mrf.mxu0  ;;  %v3477_v21 = vpop.f32.mrf.mxu1 }
 0x132   : > { %v4665_v24 = vadd.f32 %v3476_v16, %v4604_v52 }
 0x133   : > { %v3390_v2 = vpop.f32.mrf.mxu0  ;;  %v3478_v30 = vpop.f32.mrf.mxu1 }
 0x134   : > { %v4669_v44 = vadd.f32 %v3390_v2, %v3389_v20  ;;  %v3479_v32 = vadd.f32 %v3478_v30, %v3477_v21 }
 0x135   : > { %v3392_v33 = vpop.f32.mrf.mxu0  ;;  %v3480_v36 = vpop.f32.mrf.mxu1  ;;  %2362 = vmatmul.mubr.bf16.gmra.mxu1 %v4148_v22  ;;  %3831 = vmatmul.mubr.bf16.gmra.mxu0 %v4152_v23 }
 0x136   : > { %v4672_v37 = vadd.f32 %v3479_v32, %v4613_v1  ;;  %2369 = vmatprep.mubr.bf16.mxu1 %v4155_v25  ;;  %3834 = vmatprep.mubr.bf16.mxu0 %v4156_v26 }
 0x137   : > { %v3393_v52 = vpop.f32.mrf.mxu0  ;;  %v3481_v38 = vpop.f32.mrf.mxu1 }
 0x138   : > { %v4674_v40 = vadd.f32 %v3393_v52, %v3392_v33  ;;  %v3482_v41 = vadd.f32 %v3481_v38, %v3480_v36 }
 0x139   : > { %v3395_v42 = vpop.f32.mrf.mxu0  ;;  %v3483_v43 = vpop.f32.mrf.mxu1 }
 0x13a   : > { %v4679_v48 = vadd.f32 %v3482_v41, %v4618_v9 }
 0x13b   : > { %v3396_v55 = vpop.f32.mrf.mxu0  ;;  %v3484_v56 = vpop.f32.mrf.mxu1 }
 0x13c   : > { %v4683_v1 = vadd.f32 %v3396_v55, %v3395_v42  ;;  %v3485_v57 = vadd.f32 %v3484_v56, %v3483_v43 }
 0x13d   : > { %v3398_v59 = vpop.f32.mrf.mxu0  ;;  %v3486_v62 = vpop.f32.mrf.mxu1  ;;  %2370 = vmatmul.mubr.bf16.gmra.mxu1 %v4153_v46  ;;  %3835 = vmatmul.mubr.bf16.gmra.mxu0 %v4157_v47 }
 0x13e   : > { %v4686_v0 = vadd.f32 %v3485_v57, %v4627_v60  ;;  %2377 = vmatprep.mubr.bf16.mxu1 %v4160_v18  ;;  %3838 = vmatprep.mubr.bf16.mxu0 %v4161_v53 }
 0x13f   : > { %v3399_v9 = vpop.f32.mrf.mxu0  ;;  %v3487_v4 = vpop.f32.mrf.mxu1 }
 0x140   : > { %v4688_v5 = vadd.f32 %v3399_v9, %v3398_v59  ;;  %v3488_v6 = vadd.f32 %v3487_v4, %v3486_v62 }
 0x141   : > { %v3401_v50 = vpop.f32.mrf.mxu0  ;;  %v3489_v8 = vpop.f32.mrf.mxu1 }
 0x142   : > { %v4693_v14 = vadd.f32 %v3488_v6, %v4632_v31 }
 0x143   : > { %v3402_v16 = vpop.f32.mrf.mxu0  ;;  %v3490_v20 = vpop.f32.mrf.mxu1 }
 0x144   : > { %v4695_v21 = vadd.f32 %v3402_v16, %v3401_v50  ;;  %v3491_v60 = vadd.f32 %v3490_v20, %v3489_v8 }
 0x145   : > { %v3404_v22 = vpop.f32.mrf.mxu0  ;;  %v3492_v23 = vpop.f32.mrf.mxu1  ;;  %2378 = vmatmul.mubr.bf16.gmra.mxu1 %v4158_v10  ;;  %3839 = vmatmul.mubr.bf16.gmra.mxu0 %v4162_v34 }
 0x146   : > { %v4698_v25 = vadd.f32 %v3491_v60, %v4641_v12 }
 0x147   : > { %v3405_v26 = vpop.f32.mrf.mxu0  ;;  %v3493_v2 = vpop.f32.mrf.mxu1 }
 0x148   : > { %v4700_v30 = vadd.f32 %v3405_v26, %v3404_v22  ;;  %v3494_v32 = vadd.f32 %v3493_v2, %v3492_v23 }
 0x149   : > { %v3407_v33 = vpop.f32.mrf.mxu0  ;;  %v3495_v31 = vpop.f32.mrf.mxu1 }
 0x14a   : > { %v4703_v36 = vadd.f32 %v3494_v32, %v4646_v54 }
 0x14b   : > { %v3408_v52 = vpop.f32.mrf.mxu0  ;;  %v3496_v38 = vpop.f32.mrf.mxu1 }
 0x14c   : > { %v4705_v41 = vadd.f32 %v3408_v52, %v3407_v33  ;;  %v3497_v42 = vadd.f32 %v3496_v38, %v3495_v31 }
 0x14d   : > { %v3498_v43 = vpop.f32.mrf.mxu1  ;;  %v3562_v46 = vpop.f32.mrf.mxu0 }
 0x14e   : > { %v4708_v12 = vadd.f32 %v3497_v42, %v4655_v28 }
 0x14f   : > { %v3499_v47 = vpop.f32.mrf.mxu1  ;;  %v3563_v18 = vpop.f32.mrf.mxu0 }
 0x150   : > { %v3500_v53 = vadd.f32 %v3499_v47, %v3498_v43  ;;  %v3564_v55 = vadd.f32 %v3563_v18, %v3562_v46 }
 0x151   : > { %v3501_v56 = vpop.f32.mrf.mxu1  ;;  %v3565_v57 = vpop.f32.mrf.mxu0 }
 0x152   : > { %v4711_v59 = vadd.f32 %v3500_v53, %v4660_v15  ;;  %v4714_v54 = vadd.f32 %v3564_v55, %v4609_v58 }
 0x153   : > { %v3502_v62 = vpop.f32.mrf.mxu1  ;;  %v3566_v9 = vpop.f32.mrf.mxu0 }
 0x154   : > { %v3503_v4 = vadd.f32 %v3502_v62, %v3501_v56  ;;  %v3567_v6 = vadd.f32 %v3566_v9, %v3565_v57 }
 0x155   : > { %v3504_v50 = vpop.f32.mrf.mxu1  ;;  %v3568_v8 = vpop.f32.mrf.mxu0 }
 0x156   : > { %v4717_v28 = vadd.f32 %v3503_v4, %v4669_v44  ;;  %v4720_v10 = vadd.f32 %v3567_v6, %v4616_v7 }
 0x157   : > { %v3505_v34 = vpop.f32.mrf.mxu1  ;;  %v3569_v16 = vpop.f32.mrf.mxu0 }
 0x158   : > { %v3506_v20 = vadd.f32 %v3505_v34, %v3504_v50  ;;  %v3570_v15 = vadd.f32 %v3569_v16, %v3568_v8 }
 0x159   : > { %v3507_v60 = vpop.f32.mrf.mxu1  ;;  %v3571_v22 = vpop.f32.mrf.mxu0 }
 0x15a   : > { %v4723_v58 = vadd.f32 %v3506_v20, %v4674_v40  ;;  %v4726_v23 = vadd.f32 %v3570_v15, %v4623_v17 }
 0x15b   : > { %v3508_v26 = vpop.f32.mrf.mxu1  ;;  %v3572_v2 = vpop.f32.mrf.mxu0 }
 0x15c   : > { %v3509_v32 = vadd.f32 %v3508_v26, %v3507_v60  ;;  %v3573_v44 = vadd.f32 %v3572_v2, %v3571_v22 }
 0x15d   : > { %v3510_v33 = vpop.f32.mrf.mxu1  ;;  %v3574_v31 = vpop.f32.mrf.mxu0 }
 0x15e   : > { %v4729_v7 = vadd.f32 %v3509_v32, %v4683_v1  ;;  %v4732_v52 = vadd.f32 %v3573_v44, %v4630_v27 }
 0x15f   : > { %v3511_v38 = vpop.f32.mrf.mxu1  ;;  %v3575_v42 = vpop.f32.mrf.mxu0 }
 0x160   : > { %v3512_v43 = vadd.f32 %v3511_v38, %v3510_v33  ;;  %v3576_v40 = vadd.f32 %v3575_v42, %v3574_v31 }
 0x161   : > { %v3513_v46 = vpop.f32.mrf.mxu1  ;;  %v3577_v47 = vpop.f32.mrf.mxu0 }
 0x162   : > { %v4735_v17 = vadd.f32 %v3512_v43, %v4688_v5  ;;  %v4738_v18 = vadd.f32 %v3576_v40, %v4637_v39 }
 0x163   : > { %v3514_v53 = vpop.f32.mrf.mxu1  ;;  %v3578_v55 = vpop.f32.mrf.mxu0 }
 0x164   : > { %v3515_v56 = vadd.f32 %v3514_v53, %v3513_v46  ;;  %v3579_v1 = vadd.f32 %v3578_v55, %v3577_v47 }
 0x165   : > { %v3516_v57 = vpop.f32.mrf.mxu1  ;;  %v3580_v62 = vpop.f32.mrf.mxu0 }
 0x166   : > { %v4741_v27 = vadd.f32 %v3515_v56, %v4695_v21  ;;  %v4744_v9 = vadd.f32 %v3579_v1, %v4644_v49 }
 0x167   : > { %v3517_v4 = vpop.f32.mrf.mxu1  ;;  %v3581_v6 = vpop.f32.mrf.mxu0 }
 0x168   : > { %v3518_v50 = vadd.f32 %v3517_v4, %v3516_v57  ;;  %v3582_v5 = vadd.f32 %v3581_v6, %v3580_v62 }
 0x169   : > { %v3519_v8 = vpop.f32.mrf.mxu1  ;;  %v3583_v34 = vpop.f32.mrf.mxu0 }
 0x16a   : > { %v4747_v39 = vadd.f32 %v3518_v50, %v4700_v30  ;;  %v4750_v16 = vadd.f32 %v3582_v5, %v4651_v63 }
 0x16b   : > { %v3520_v20 = vpop.f32.mrf.mxu1  ;;  %v3584_v15 = vpop.f32.mrf.mxu0 }
 0x16c   : > { %v3521_v60 = vadd.f32 %v3520_v20, %v3519_v8  ;;  %v3585_v21 = vadd.f32 %v3584_v15, %v3583_v34 }
 0x16d   : > { %v3522_v22 = vpop.f32.mrf.mxu1  ;;  %v3586_v26 = vpop.f32.mrf.mxu0 }
 0x16e   : > { %v4753_v49 = vadd.f32 %v3521_v60, %v4705_v41  ;;  %v4756_v2 = vadd.f32 %v3585_v21, %v4658_v11 }
 0x16f   : > { %v3523_v32 = vpop.f32.mrf.mxu1  ;;  %v3587_v44 = vpop.f32.mrf.mxu0 }
 0x170   : > { %v3524_v33 = vadd.f32 %v3523_v32, %v3522_v22  ;;  %v3588_v30 = vadd.f32 %v3587_v44, %v3586_v26 }
 0x171   : > { %v3525_v31 = vpop.f32.mrf.mxu1  ;;  %v3589_v38 = vpop.f32.mrf.mxu0 }
 0x172   : > { %v4759_v63 = vadd.f32 %v3524_v33, %v4558_v51  ;;  %v4762_v42 = vadd.f32 %v3588_v30, %v4665_v24 }
 0x173   : > { %v3526_v43 = vpop.f32.mrf.mxu1  ;;  %v3590_v40 = vpop.f32.mrf.mxu0 }
 0x174   : > { %v3527_v46 = vadd.f32 %v3526_v43, %v3525_v31  ;;  %v3591_v41 = vadd.f32 %v3590_v40, %v3589_v38 }
 0x175   : > { %v3528_v47 = vpop.f32.mrf.mxu1  ;;  %v3592_v53 = vpop.f32.mrf.mxu0 }
 0x176   : > { %v4765_v11 = vadd.f32 %v3527_v46, %v4566_v61  ;;  %v4768_v55 = vadd.f32 %v3591_v41, %v4672_v37 }
 0x177   : > { %v3529_v56 = vpop.f32.mrf.mxu1  ;;  %v3593_v1 = vpop.f32.mrf.mxu0 }
 0x178   : > { %v3530_v57 = vadd.f32 %v3529_v56, %v3528_v47  ;;  %v3594_v51 = vadd.f32 %v3593_v1, %v3592_v53 }
 0x179   : > { %v3531_v62 = vpop.f32.mrf.mxu1  ;;  %v3595_v4 = vpop.f32.mrf.mxu0 }
 0x17a   : > { %v4771_v24 = vadd.f32 %v3530_v57, %v4570_v3  ;;  %v4774_v6 = vadd.f32 %v3594_v51, %v4679_v48 }
 0x17b   : > { %v3532_v50 = vpop.f32.mrf.mxu1  ;;  %v3596_v5 = vpop.f32.mrf.mxu0 }
 0x17c   : > { %v3533_v8 = vadd.f32 %v3532_v50, %v3531_v62  ;;  %v3597_v61 = vadd.f32 %v3596_v5, %v3595_v4 }
 0x17d   : > { %v3534_v34 = vpop.f32.mrf.mxu1  ;;  %v3598_v20 = vpop.f32.mrf.mxu0 }
 0x17e   : > { %v4777_v37 = vadd.f32 %v3533_v8, %v4578_v13  ;;  %v4780_v15 = vadd.f32 %v3597_v61, %v4686_v0 }
 0x17f   : > { %v3535_v60 = vpop.f32.mrf.mxu1  ;;  %v3599_v21 = vpop.f32.mrf.mxu0 }
 0x180   : > { %v3536_v22 = vadd.f32 %v3535_v60, %v3534_v34  ;;  %v3600_v3 = vadd.f32 %v3599_v21, %v3598_v20 }
 0x181   : > { %v3537_v26 = vpop.f32.mrf.mxu1  ;;  %v3601_v32 = vpop.f32.mrf.mxu0 }
 0x182   : > { %v4783_v48 = vadd.f32 %v3536_v22, %v4582_v19  ;;  %v4786_v44 = vadd.f32 %v3600_v3, %v4693_v14 }
 0x183   : > { %v3538_v33 = vpop.f32.mrf.mxu1  ;;  %v3602_v30 = vpop.f32.mrf.mxu0 }
 0x184   : > { %v3539_v31 = vadd.f32 %v3538_v33, %v3537_v26  ;;  %v3603_v13 = vadd.f32 %v3602_v30, %v3601_v32 }
 0x185   : > { %v3540_v38 = vpop.f32.mrf.mxu1  ;;  %v3604_v43 = vpop.f32.mrf.mxu0 }
 0x186   : > { %v4789_v0 = vadd.f32 %v3539_v31, %v4590_v29  ;;  %v4792_v40 = vadd.f32 %v3603_v13, %v4698_v25 }
 0x187   : > { %v3541_v46 = vpop.f32.mrf.mxu1  ;;  %v3605_v41 = vpop.f32.mrf.mxu0 }
 0x188   : > { %v3542_v47 = vadd.f32 %v3541_v46, %v3540_v38  ;;  %v3606_v19 = vadd.f32 %v3605_v41, %v3604_v43 }
 0x189   : > { %v3543_v53 = vpop.f32.mrf.mxu1  ;;  %v3607_v56 = vpop.f32.mrf.mxu0 }
 0x18a   : > { %v4795_v14 = vadd.f32 %v3542_v47, %v4594_v35  ;;  %v4798_v1 = vadd.f32 %v3606_v19, %v4703_v36 }
 0x18b   : > { %v3544_v57 = vpop.f32.mrf.mxu1  ;;  %v3608_v51 = vpop.f32.mrf.mxu0 }
 0x18c   : > { %v3545_v62 = vadd.f32 %v3544_v57, %v3543_v53  ;;  %v3609_v29 = vadd.f32 %v3608_v51, %v3607_v56 }
 0x18d   : > { %v3610_v4 = vpop.f32.mrf.mxu0  ;;  %v3674_v50 = vpop.f32.mrf.mxu1 }
 0x18e   : > { %v4801_v25 = vadd.f32 %v3545_v62, %v4602_v45  ;;  %v4804_v5 = vadd.f32 %v3609_v29, %v4708_v12 }
 0x18f   : > { %v3611_v8 = vpop.f32.mrf.mxu0  ;;  %v3675_v61 = vpop.f32.mrf.mxu1 }
 0x190   : > { %v3612_v34 = vadd.f32 %v3611_v8, %v3610_v4  ;;  %v3676_v35 = vadd.f32 %v3675_v61, %v3674_v50 }
 0x191   : > { %v3613_v20 = vpop.f32.mrf.mxu0  ;;  %v4806_v60 = vpop.f32.mrf.mxu1 }
 0x192   : > { %v4809_v36 = vadd.f32 %v3612_v34, %v4711_v59  ;;  %v4812_v21 = vadd.f32 %v3676_v35, %v4714_v54 }
 0x193   : > { %v3614_v22 = vpop.f32.mrf.mxu0  ;;  %v4814_v3 = vpop.f32.mrf.mxu1 }
 0x194   : > { %v3615_v45 = vadd.f32 %v3614_v22, %v3613_v20 }
 0x195   : > { %v3616_v26 = vpop.f32.mrf.mxu0  ;;  %v4816_v12 = vpop.f32.mrf.mxu1 }
 0x196   : > { %v4819_v32 = vadd.f32 %v3615_v45, %v4717_v28 }
 0x197   : > { %v3617_v33 = vpop.f32.mrf.mxu0  ;;  %v4821_v30 = vpop.f32.mrf.mxu1 }
 0x198   : > { %v3618_v31 = vadd.f32 %v3617_v33, %v3616_v26 }
 0x199   : > { %v3619_v13 = vpop.f32.mrf.mxu0  ;;  %v4823_v59 = vpop.f32.mrf.mxu1 }
 0x19a   : > { %v4826_v54 = vadd.f32 %v3618_v31, %v4723_v58 }
 0x19b   : > { %v3620_v38 = vpop.f32.mrf.mxu0  ;;  %v4828_v43 = vpop.f32.mrf.mxu1 }
 0x19c   : > { %v3621_v46 = vadd.f32 %v3620_v38, %v3619_v13 }
 0x19d   : > { %v3622_v41 = vpop.f32.mrf.mxu0  ;;  %v4830_v47 = vpop.f32.mrf.mxu1 }
 0x19e   : > { %v4833_v28 = vadd.f32 %v3621_v46, %v4729_v7 }
 0x19f   : > { %v3623_v19 = vpop.f32.mrf.mxu0  ;;  %v4835_v53 = vpop.f32.mrf.mxu1 }
 0x1a0   : > { %v3624_v56 = vadd.f32 %v3623_v19, %v3622_v41 }
 0x1a1   : > { %v3625_v57 = vpop.f32.mrf.mxu0  ;;  %v4837_v51 = vpop.f32.mrf.mxu1 }
 0x1a2   : > { %v4840_v58 = vadd.f32 %v3624_v56, %v4735_v17 }
 0x1a3   : > { %v3626_v62 = vpop.f32.mrf.mxu0  ;;  %v4842_v29 = vpop.f32.mrf.mxu1 }
 0x1a4   : > { %5125 = vst [vmem:[#allocation2_spill] sm:$0xff] %v4840_v58  ;;  %v3627_v4 = vadd.f32 %v3626_v62, %v3625_v57 }
 0x1a5   : > { %v3628_v50 = vpop.f32.mrf.mxu0  ;;  %v4844_v8 = vpop.f32.mrf.mxu1 }
 0x1a6   : > { %v4847_v7 = vadd.f32 %v3627_v4, %v4741_v27 }
 0x1a7   : > { %v3629_v61 = vpop.f32.mrf.mxu0  ;;  %v4849_v34 = vpop.f32.mrf.mxu1 }
 0x1a8   : > { %5126 = vst [vmem:[#allocation3_spill] sm:$0xff] %v4847_v7  ;;  %v3630_v35 = vadd.f32 %v3629_v61, %v3628_v50 }
 0x1a9   : > { %v3631_v20 = vpop.f32.mrf.mxu0  ;;  %v4851_v22 = vpop.f32.mrf.mxu1 }
 0x1aa   : > { %v4854_v17 = vadd.f32 %v3630_v35, %v4747_v39 }
 0x1ab   : > { %v3632_v45 = vpop.f32.mrf.mxu0  ;;  %v4856_v26 = vpop.f32.mrf.mxu1 }
 0x1ac   : > { %5127 = vst [vmem:[#allocation4_spill] sm:$0xff] %v4854_v17  ;;  %v3633_v33 = vadd.f32 %v3632_v45, %v3631_v20 }
 0x1ad   : > { %v3634_v31 = vpop.f32.mrf.mxu0  ;;  %v4858_v13 = vpop.f32.mrf.mxu1 }
 0x1ae   : > { %v4861_v27 = vadd.f32 %v3633_v33, %v4753_v49 }
 0x1af   : > { %v3635_v38 = vpop.f32.mrf.mxu0  ;;  %v4863_v46 = vpop.f32.mrf.mxu1 }
 0x1b0   : > { %5128 = vst [vmem:[#allocation5_spill] sm:$0xff] %v4861_v27  ;;  %v3636_v41 = vadd.f32 %v3635_v38, %v3634_v31 }
 0x1b1   : > { %v3637_v19 = vpop.f32.mrf.mxu0  ;;  %v4865_v56 = vpop.f32.mrf.mxu1 }
 0x1b2   : > { %v4868_v39 = vadd.f32 %v3636_v41, %v4759_v63 }
 0x1b3   : > { %v3638_v57 = vpop.f32.mrf.mxu0  ;;  %v4870_v62 = vpop.f32.mrf.mxu1 }
 0x1b4   : > { %5129 = vst [vmem:[#allocation6_spill] sm:$0xff] %v4868_v39  ;;  %v3639_v4 = vadd.f32 %v3638_v57, %v3637_v19 }
 0x1b5   : > { %v3640_v50 = vpop.f32.mrf.mxu0  ;;  %v4872_v61 = vpop.f32.mrf.mxu1 }
 0x1b6   : > { %v4875_v49 = vadd.f32 %v3639_v4, %v4765_v11 }
 0x1b7   : > { %v3641_v35 = vpop.f32.mrf.mxu0  ;;  %v4877_v20 = vpop.f32.mrf.mxu1 }
 0x1b8   : > { %5130 = vst [vmem:[#allocation7_spill] sm:$0xff] %v4875_v49  ;;  %v3642_v45 = vadd.f32 %v3641_v35, %v3640_v50 }
 0x1b9   : > { %v3643_v33 = vpop.f32.mrf.mxu0  ;;  %v4879_v31 = vpop.f32.mrf.mxu1 }
 0x1ba   : > { %v4882_v63 = vadd.f32 %v3642_v45, %v4771_v24 }
 0x1bb   : > { %v3644_v38 = vpop.f32.mrf.mxu0  ;;  %v4884_v41 = vpop.f32.mrf.mxu1 }
 0x1bc   : > { %5131 = vst [vmem:[#allocation8_spill] sm:$0xff] %v4882_v63  ;;  %v3645_v19 = vadd.f32 %v3644_v38, %v3643_v33 }
 0x1bd   : > { %v3646_v57 = vpop.f32.mrf.mxu0  ;;  %v4886_v39 = vpop.f32.mrf.mxu1 }
 0x1be   : > { %v4889_v11 = vadd.f32 %v3645_v19, %v4777_v37 }
 0x1bf   : > { %v3647_v4 = vpop.f32.mrf.mxu0  ;;  %v4891_v49 = vpop.f32.mrf.mxu1 }
 0x1c0   : > { %5132 = vst [vmem:[#allocation9_spill] sm:$0xff] %v4889_v11  ;;  %v3648_v50 = vadd.f32 %v3647_v4, %v3646_v57  ;;  %v3682_v57 = vadd.f32 %v4821_v30, %v4816_v12  ;;  %v4924_v12 = vld [vmem:[%s5122_s2] ss:$0 sm:$0xff] }
 0x1c1   : > { %v3649_v35 = vpop.f32.mrf.mxu0  ;;  %v4893_v7 = vpop.f32.mrf.mxu1 }
 0x1c2   : > { %v4896_v24 = vadd.f32 %v3648_v50, %v4783_v48 }
 0x1c3   : > { %v3650_v45 = vpop.f32.mrf.mxu0  ;;  %v4898_v63 = vpop.f32.mrf.mxu1 }
 0x1c4   : > { %5133 = vst [vmem:[#allocation10_spill] sm:$0xff] %v4896_v24  ;;  %v3651_v33 = vadd.f32 %v3650_v45, %v3649_v35 }
 0x1c5   : > { %v3652_v38 = vpop.f32.mrf.mxu0  ;;  %v4900_v27 = vpop.f32.mrf.mxu1 }
 0x1c6   : > { %v4903_v37 = vadd.f32 %v3651_v33, %v4789_v0  ;;  %v3685_v0 = vadd.f32 %v4828_v43, %v4823_v59 }
 0x1c7   : > { %v3653_v19 = vpop.f32.mrf.mxu0  ;;  %v4905_v11 = vpop.f32.mrf.mxu1 }
 0x1c8   : > { %5134 = vst [vmem:[#allocation11_spill] sm:$0xff] %v4903_v37  ;;  %v3654_v4 = vadd.f32 %v3653_v19, %v3652_v38  ;;  %v2268_v37 = vadd.f32 %v3682_v57, %v4726_v23  ;;  %v3679_v38 = vadd.f32 %v4814_v3, %v4806_v60  ;;  %v3694_v23 = vadd.f32 %v4849_v34, %v4844_v8 }
 0x1c9   : > { %v3655_v58 = vpop.f32.mrf.mxu0  ;;  %v4909_v48 = vpop.f32.mrf.mxu1  ;;  %v2271_v57 = vadd.f32 %v3685_v0, %v4732_v52  ;;  %v3688_v3 = vadd.f32 %v4835_v53, %v4830_v47  ;;  %v3697_v8 = vadd.f32 %v4856_v26, %v4851_v22  ;;  %v3691_v53 = vadd.f32 %v4842_v29, %v4837_v51 }
 0x1ca   : > { %v4912_v50 = vadd.f32 %v3654_v4, %v4795_v14  ;;  %v2263_v52 = vadd.f32 %v3679_v38, %v4720_v10  ;;  %v3706_v38 = vadd.f32 %v4877_v20, %v4872_v61 }
 0x1cb   : > { %v3656_v35 = vpop.f32.mrf.mxu0  ;;  %v4914_v45 = vpop.f32.mrf.mxu1  ;;  %v2276_v10 = vadd.f32 %v3688_v3, %v4738_v18  ;;  %v3700_v3 = vadd.f32 %v4863_v46, %v4858_v13 }
 0x1cc   : > { %v3657_v33 = vadd.f32 %v3656_v35, %v3655_v58  ;;  %v2300_v46 = vadd.f32 %v3706_v38, %v4774_v6 }
 0x1cd   : > { %v4919_v24 = vpop.f32.mrf.mxu1  ;;  %v3812_v17 = vpop.f32.mrf.mxu0 }
 0x1ce   : > { %v4927_v14 = vadd.f32 %v3657_v33, %v4801_v25  ;;  %v2429_v30 = vadd.f32 %v3812_v17, %v2268_v37  ;;  %v4941_v25 = vld [vmem:[%s5123_s3] ss:$0 sm:$0xff]  ;;  %v2284_v33 = vadd.f32 %v3694_v23, %v4750_v16 }
 0x1cf   : > { %v4931_v19 = vpop.f32.mrf.mxu1  ;;  %v2420_v59 = vpop.f32.mrf.mxu0 }
 0x1d0   : > { %v2556_v43 = vmul.f32 %v4924_v12, %v2429_v30  ;;  %v2421_v58 = vadd.f32 %v2420_v59, %v4812_v21 }
 0x1d1   : > { %v4943_v17 = vpop.f32.mrf.mxu1  ;;  %v3813_v60 = vpop.f32.mrf.mxu0 }
 0x1d2   : > { %v2432_v37 = vadd.f32 %v3813_v60, %v2271_v57  ;;  %v2554_v21 = vmul.f32 %v4924_v12, %v2421_v58  ;;  %v2595_v35 = vadd.f32 %v4941_v25, %v2556_v43  ;;  %v2287_v57 = vadd.f32 %v3697_v8, %v4756_v2 }
 0x1d3   : > { %v4950_v34 = vpop.f32.mrf.mxu1  ;;  %v2423_v4 = vpop.f32.mrf.mxu0 }
 0x1d4   : > { %v2557_v0 = vmul.f32 %v4924_v12, %v2432_v37  ;;  %v2424_v30 = vadd.f32 %v2423_v4, %v2263_v52  ;;  %v2593_v43 = vadd.f32 %v4941_v25, %v2554_v21  ;;  %v2627_v60 = vmax.f32 %v2595_v35, 0.0 }
 0x1d5   : > { %v4956_v59 = vpop.f32.mrf.mxu1  ;;  %v3816_v47 = vpop.f32.mrf.mxu0  ;;  %v2279_v21 = vadd.f32 %v3691_v53, %v4744_v9  ;;  %v3709_v52 = vadd.f32 %v4884_v41, %v4879_v31  ;;  %v3703_v41 = vadd.f32 %v4870_v62, %v4865_v56 }
 0x1d6   : > { %v2596_v22 = vadd.f32 %v4941_v25, %v2557_v0  ;;  %v2445_v26 = vadd.f32 %v3816_v47, %v2284_v33  ;;  %v2555_v16 = vmul.f32 %v4924_v12, %v2424_v30  ;;  %v2625_v4 = vmax.f32 %v2593_v43, 0.0 }
 0x1d7   : > { %v4967_v23 = vpop.f32.mrf.mxu1  ;;  %v2436_v58 = vpop.f32.mrf.mxu0  ;;  %v2292_v43 = vadd.f32 %v3700_v3, %v4762_v42  ;;  %v2295_v3 = vadd.f32 %v3703_v41, %v4768_v55 }
 0x1d8   : > { %v2628_v51 = vmax.f32 %v2596_v22, 0.0  ;;  %v2560_v29 = vmul.f32 %v4924_v12, %v2445_v26  ;;  %v2437_v37 = vadd.f32 %v2436_v58, %v2276_v10  ;;  %v2594_v18 = vadd.f32 %v4941_v25, %v2555_v16 }
 0x1d9   : > { %v4977_v61 = vpop.f32.mrf.mxu1  ;;  %v3817_v20 = vpop.f32.mrf.mxu0  ;;  %v3718_v16 = vadd.f32 %v4905_v11, %v4900_v27  ;;  %v3712_v11 = vadd.f32 %v4891_v49, %v4886_v39 }
 0x1da   : > { %v3235_v2 = vpack.c.bf16 %v2628_v51, %v2627_v60  ;;  %v2448_v8 = vadd.f32 %v3817_v20, %v2287_v57  ;;  %v2626_v35 = vmax.f32 %v2594_v18, 0.0  ;;  %v2558_v0 = vmul.f32 %v4924_v12, %v2437_v37 }
 0x1db   : > { %v4985_v33 = vpop.f32.mrf.mxu1  ;;  %v2439_v30 = vpop.f32.mrf.mxu0  ;;  %v2599_v47 = vadd.f32 %v4941_v25, %v2560_v29  ;;  %v2303_v60 = vadd.f32 %v3709_v52, %v4780_v15  ;;  %v3721_v15 = vadd.f32 %v4914_v45, %v4909_v48  ;;  %v2316_v49 = vadd.f32 %v3718_v16, %v4798_v1 }
 0x1dc   : > { %3307 = vst [vmem:[%s4974_s25 + $0x8] sm:$0xff] %v3235_v2   ;;  %v2561_v13 = vmul.f32 %v4924_v12, %v2448_v8  ;;  %v3230_v22 = vpack.c.bf16 %v2626_v35, %v2625_v4  ;;  %v2440_v9 = vadd.f32 %v2439_v30, %v2279_v21  ;;  %v2597_v58 = vadd.f32 %v4941_v25, %v2558_v0 }
 0x1dd   : > { %v4991_v53 = vpop.f32.mrf.mxu1  ;;  %v3820_v31 = vpop.f32.mrf.mxu0  ;;  %v2631_v51 = vmax.f32 %v2599_v47, 0.0  ;;  %v3715_v48 = vadd.f32 %v4898_v63, %v4893_v7 }
 0x1de   : > { %v2600_v26 = vadd.f32 %v4941_v25, %v2561_v13  ;;  %v2461_v10 = vadd.f32 %v3820_v31, %v2300_v46  ;;  %3231 = vst [vmem:[%s4974_s25] sm:$0xff] %v3230_v22   ;;  %v2559_v6 = vmul.f32 %v4924_v12, %v2440_v9  ;;  %v2629_v2 = vmax.f32 %v2597_v58, 0.0 }
 0x1df   : > { %v5002_v38 = vpop.f32.mrf.mxu1  ;;  %v2452_v57 = vpop.f32.mrf.mxu0  ;;  %v2308_v46 = vadd.f32 %v3712_v11, %v4786_v44  ;;  %v3730_v22 = vadd.f32 %v4967_v23, %v4956_v59  ;;  %v3724_v59 = vadd.f32 %v4931_v19, %v4919_v24 }
 0x1e0   : > { %v2632_v56 = vmax.f32 %v2600_v26, 0.0  ;;  %v2564_v62 = vmul.f32 %v4924_v12, %v2461_v10  ;;  %v2453_v29 = vadd.f32 %v2452_v57, %v2292_v43  ;;  %v2598_v42 = vadd.f32 %v4941_v25, %v2559_v6 }
 0x1e1   : > { %v5007_v37 = vpop.f32.mrf.mxu1  ;;  %v3821_v27 = vpop.f32.mrf.mxu0  ;;  %v2319_v26 = vadd.f32 %v3721_v15, %v4804_v5  ;;  %v2311_v57 = vadd.f32 %v3715_v48, %v4792_v40  ;;  %v3733_v5 = vadd.f32 %v4985_v33, %v4977_v61  ;;  %v2332_v24 = vadd.f32 %v3730_v22, %v4826_v54 }
 0x1e2   : > { %v3245_v18 = vpack.c.bf16 %v2632_v56, %v2631_v51  ;;  %v2464_v20 = vadd.f32 %v3821_v27, %v2303_v60  ;;  %v2630_v8 = vmax.f32 %v2598_v42, 0.0  ;;  %v2562_v21 = vmul.f32 %v4924_v12, %v2453_v29 }
 0x1e3   : > { %v5015_v52 = vpop.f32.mrf.mxu1  ;;  %v2455_v4 = vpop.f32.mrf.mxu0  ;;  %v2603_v35 = vadd.f32 %v4941_v25, %v2564_v62  ;;  %v3727_v40 = vadd.f32 %v4950_v34, %v4943_v17 }
 0x1e4   : > { %3309 = vst [vmem:[%s4974_s25 + $0x18] sm:$0xff] %v3245_v18   ;;  %v2565_v39 = vmul.f32 %v4924_v12, %v2464_v20  ;;  %v3240_v0 = vpack.c.bf16 %v2630_v8, %v2629_v2  ;;  %v2456_v55 = vadd.f32 %v2455_v4, %v2295_v3  ;;  %v2601_v9 = vadd.f32 %v4941_v25, %v2562_v21 }
 0x1e5   : > { %v3740_v30 = vpop.f32.mrf.mxu1  ;;  %v3824_v47 = vpop.f32.mrf.mxu0  ;;  %v2635_v10 = vmax.f32 %v2603_v35, 0.0  ;;  %v2324_v3 = vadd.f32 %v3724_v59, %v4809_v36  ;;  %v2335_v4 = vadd.f32 %v3733_v5, %v4833_v28  ;;  %v5137_v5 = vld [vmem:[#allocation5_spill] sm:$0xff] }
 0x1e6   : > { %v2604_v45 = vadd.f32 %v4941_v25, %v2565_v39  ;;  %v2477_v13 = vadd.f32 %v3824_v47, %v2316_v49  ;;  %3308 = vst [vmem:[%s4974_s25 + $0x10] sm:$0xff] %v3240_v0   ;;  %v2563_v1 = vmul.f32 %v4924_v12, %v2456_v55  ;;  %v2633_v60 = vmax.f32 %v2601_v9, 0.0 }
 0x1e7   : > { %v3741_v31 = vpop.f32.mrf.mxu1  ;;  %v2468_v41 = vpop.f32.mrf.mxu0  ;;  %v2327_v55 = vadd.f32 %v3727_v40, %v4819_v32 }
 0x1e8   : > { %v2636_v43 = vmax.f32 %v2604_v45, 0.0  ;;  %v2568_v7 = vmul.f32 %v4924_v12, %v2477_v13  ;;  %v2469_v63 = vadd.f32 %v2468_v41, %v2308_v46  ;;  %v2602_v44 = vadd.f32 %v4941_v25, %v2563_v1  ;;  %v5135_v41 = vld [vmem:[#allocation4_spill] sm:$0xff] }
 0x1e9   : > { %v3743_v16 = vpop.f32.mrf.mxu1  ;;  %v3825_v58 = vpop.f32.mrf.mxu0  ;;  %v3742_v15 = vadd.f32 %v3741_v31, %v3740_v30  ;;  %v3736_v30 = vadd.f32 %v5002_v38, %v4991_v53 }
 0x1ea   : > { %v3255_v23 = vpack.c.bf16 %v2636_v43, %v2635_v10  ;;  %v2480_v6 = vadd.f32 %v3825_v58, %v2319_v26  ;;  %v2634_v51 = vmax.f32 %v2602_v44, 0.0  ;;  %v2566_v56 = vmul.f32 %v4924_v12, %v2469_v63  ;;  %v5136_v44 = vld [vmem:[#allocation2_spill] sm:$0xff] }
 0x1eb   : > { %v3744_v62 = vpop.f32.mrf.mxu1  ;;  %v2471_v29 = vpop.f32.mrf.mxu0  ;;  %v2607_v42 = vadd.f32 %v4941_v25, %v2568_v7  ;;  %v2348_v32 = vadd.f32 %v3742_v15, %v5135_v41  ;;  %v3739_v43 = vadd.f32 %v5015_v52, %v5007_v37 }
 0x1ec   : > { %3311 = vst [vmem:[%s4974_s25 + $0x28] sm:$0xff] %v3255_v23   ;;  %v2569_v27 = vmul.f32 %v4924_v12, %v2480_v6  ;;  %v3250_v19 = vpack.c.bf16 %v2634_v51, %v2633_v60  ;;  %v2472_v11 = vadd.f32 %v2471_v29, %v2311_v57  ;;  %v2605_v2 = vadd.f32 %v4941_v25, %v2566_v56 }
 0x1ed   : > { %v3746_v61 = vpop.f32.mrf.mxu1  ;;  %v3828_v33 = vpop.f32.mrf.mxu0  ;;  %v2639_v17 = vmax.f32 %v2607_v42, 0.0  ;;  %v3745_v48 = vadd.f32 %v3744_v62, %v3743_v16  ;;  %v2340_v16 = vadd.f32 %v3736_v30, %v5136_v44  ;;  %v5142_v44 = vld [vmem:[#allocation7_spill] sm:$0xff] }
 0x1ee   : > { %v2608_v18 = vadd.f32 %v4941_v25, %v2569_v27  ;;  %v2493_v20 = vadd.f32 %v3828_v33, %v2332_v24  ;;  %3310 = vst [vmem:[%s4974_s25 + $0x20] sm:$0xff] %v3250_v19   ;;  %v2567_v8 = vmul.f32 %v4924_v12, %v2472_v11  ;;  %v2637_v13 = vmax.f32 %v2605_v2, 0.0  ;;  %v5138_v19 = vld [vmem:[#allocation3_spill] sm:$0xff] }
 0x1ef   : > { %v3747_v21 = vpop.f32.mrf.mxu1  ;;  %v2484_v54 = vpop.f32.mrf.mxu0  ;;  %v2351_v60 = vadd.f32 %v3745_v48, %v5137_v5  ;;  %v2343_v11 = vadd.f32 %v3739_v43, %v5138_v19 }
 0x1f0   : > { %v2640_v34 = vmax.f32 %v2608_v18, 0.0  ;;  %v2572_v35 = vmul.f32 %v4924_v12, %v2493_v20  ;;  %v2485_v39 = vadd.f32 %v2484_v54, %v2324_v3  ;;  %v2606_v49 = vadd.f32 %v4941_v25, %v2567_v8 }
 0x1f1   : > { %v3749_v0 = vpop.f32.mrf.mxu1  ;;  %v3829_v36 = vpop.f32.mrf.mxu0  ;;  %v3748_v27 = vadd.f32 %v3747_v21, %v3746_v61 }
 0x1f2   : > { %v3265_v47 = vpack.c.bf16 %v2640_v34, %v2639_v17  ;;  %v2496_v45 = vadd.f32 %v3829_v36, %v2335_v4  ;;  %v2638_v28 = vmax.f32 %v2606_v49, 0.0  ;;  %v2611_v46 = vadd.f32 %v4941_v25, %v2572_v35  ;;  %v5139_v4 = vld [vmem:[#allocation8_spill] sm:$0xff]  ;;  %v5140_v36 = vld [vmem:[#allocation6_spill] sm:$0xff] }
 0x1f3   : > { %v2570_v22 = vmul.f32 %v4924_v12, %v2485_v39  ;;  %v3750_v9 = vpop.f32.mrf.mxu1  ;;  %v2487_v1 = vpop.f32.mrf.mxu0 }
 0x1f4   : > { %3313 = vst [vmem:[%s4974_s25 + $0x38] sm:$0xff] %v3265_v47   ;;  %v2573_v31 = vmul.f32 %v4924_v12, %v2496_v45  ;;  %v3260_v26 = vpack.c.bf16 %v2638_v28, %v2637_v13  ;;  %v2488_v10 = vadd.f32 %v2487_v1, %v2327_v55  ;;  %v2643_v58 = vmax.f32 %v2611_v46, 0.0 }
 0x1f5   : > { %v3752_v53 = vpop.f32.mrf.mxu1  ;;  %v3832_v38 = vpop.f32.mrf.mxu0  ;;  %v2609_v59 = vadd.f32 %v4941_v25, %v2570_v22  ;;  %v2356_v55 = vadd.f32 %v3748_v27, %v5140_v36  ;;  %v3751_v30 = vadd.f32 %v3750_v9, %v3749_v0 }
 0x1f6   : > { %v2612_v7 = vadd.f32 %v4941_v25, %v2573_v31  ;;  %v2509_v63 = vadd.f32 %v3832_v38, %v2348_v32  ;;  %3312 = vst [vmem:[%s4974_s25 + $0x30] sm:$0xff] %v3260_v26   ;;  %v2571_v23 = vmul.f32 %v4924_v12, %v2488_v10  ;;  %v5141_v31 = vld [vmem:[#allocation9_spill] sm:$0xff] }
 0x1f7   : > { %v3753_v6 = vpop.f32.mrf.mxu1  ;;  %v2500_v57 = vpop.f32.mrf.mxu0  ;;  %v2641_v33 = vmax.f32 %v2609_v59, 0.0 }
 0x1f8   : > { %v2644_v51 = vmax.f32 %v2612_v7, 0.0  ;;  %v2576_v56 = vmul.f32 %v4924_v12, %v2509_v63  ;;  %v3754_v37 = vadd.f32 %v3753_v6, %v3752_v53  ;;  %v2501_v52 = vadd.f32 %v2500_v57, %v2340_v16 }
 0x1f9   : > { %v2610_v62 = vadd.f32 %v4941_v25, %v2571_v23  ;;  %v3755_v29 = vpop.f32.mrf.mxu1  ;;  %v3833_v42 = vpop.f32.mrf.mxu0  ;;  %v2359_v16 = vadd.f32 %v3751_v30, %v5142_v44 }
 0x1fa   : > { %v3275_v24 = vpack.c.bf16 %v2644_v51, %v2643_v58  ;;  %v2512_v40 = vadd.f32 %v3833_v42, %v2351_v60  ;;  %v2615_v20 = vadd.f32 %v4941_v25, %v2576_v56  ;;  %v2574_v3 = vmul.f32 %v4924_v12, %v2501_v52 }
 0x1fb   : > { %v2642_v18 = vmax.f32 %v2610_v62, 0.0  ;;  %v3756_v15 = vpop.f32.mrf.mxu1  ;;  %v2503_v2 = vpop.f32.mrf.mxu0  ;;  %v2364_v17 = vadd.f32 %v3754_v37, %v5139_v4  ;;  %v5143_v37 = vld [vmem:[#allocation10_spill] sm:$0xff] }
 0x1fc   : > { %3315 = vst [vmem:[%s4974_s25 + $0x48] sm:$0xff] %v3275_v24   ;;  %v2577_v8 = vmul.f32 %v4924_v12, %v2512_v40  ;;  %v3757_v54 = vadd.f32 %v3756_v15, %v3755_v29  ;;  %v2504_v21 = vadd.f32 %v2503_v2, %v2343_v11  ;;  %v2647_v47 = vmax.f32 %v2615_v20, 0.0 }
 0x1fd   : > { %v3270_v61 = vpack.c.bf16 %v2642_v18, %v2641_v33  ;;  %v3758_v34 = vpop.f32.mrf.mxu1  ;;  %v3836_v35 = vpop.f32.mrf.mxu0  ;;  %v2613_v48 = vadd.f32 %v4941_v25, %v2574_v3 }
 0x1fe   : > { %v2616_v39 = vadd.f32 %v4941_v25, %v2577_v8  ;;  %v2525_v49 = vadd.f32 %v3836_v35, %v2364_v17  ;;  %v2575_v45 = vmul.f32 %v4924_v12, %v2504_v21  ;;  %v2367_v41 = vadd.f32 %v3757_v54, %v5141_v31  ;;  %v5144_v8 = vld [vmem:[#allocation11_spill] sm:$0xff] }
 0x1ff   : > { %3314 = vst [vmem:[%s4974_s25 + $0x40] sm:$0xff] %v3270_v61   ;;  %v3759_v13 = vpop.f32.mrf.mxu1  ;;  %v2516_v28 = vpop.f32.mrf.mxu0  ;;  %v2645_v38 = vmax.f32 %v2613_v48, 0.0 }
 0x200   : > { %v2648_v46 = vmax.f32 %v2616_v39, 0.0  ;;  %v2580_v22 = vmul.f32 %v4924_v12, %v2525_v49  ;;  %v2517_v1 = vadd.f32 %v2516_v28, %v2356_v55  ;;  %v2614_v32 = vadd.f32 %v4941_v25, %v2575_v45 }
 0x201   : > { %v3761_v26 = vpop.f32.mrf.mxu1  ;;  %v3837_v10 = vpop.f32.mrf.mxu0  ;;  %v3760_v9 = vadd.f32 %v3759_v13, %v3758_v34 }
 0x202   : > { %v3285_v0 = vpack.c.bf16 %v2648_v46, %v2647_v47  ;;  %v2528_v53 = vadd.f32 %v3837_v10, %v2367_v41  ;;  %v2646_v43 = vmax.f32 %v2614_v32, 0.0  ;;  %v2578_v7 = vmul.f32 %v4924_v12, %v2517_v1 }
 0x203   : > { %v3762_v63 = vpop.f32.mrf.mxu1  ;;  %v2519_v58 = vpop.f32.mrf.mxu0  ;;  %v2619_v59 = vadd.f32 %v4941_v25, %v2580_v22  ;;  %v2372_v52 = vadd.f32 %v3760_v9, %v5143_v37 }
 0x204   : > { %3317 = vst [vmem:[%s4974_s25 + $0x58] sm:$0xff] %v3285_v0   ;;  %v2581_v23 = vmul.f32 %v4924_v12, %v2528_v53  ;;  %v3280_v6 = vpack.c.bf16 %v2646_v43, %v2645_v38  ;;  %v2520_v57 = vadd.f32 %v2519_v58, %v2359_v16  ;;  %v3763_v56 = vadd.f32 %v3762_v63, %v3761_v26 }
 0x205   : > { %v3764_v5 = vpop.f32.mrf.mxu1  ;;  %v3840_v60 = vpop.f32.mrf.mxu0  ;;  %v2617_v62 = vadd.f32 %v4941_v25, %v2578_v7  ;;  %v2651_v24 = vmax.f32 %v2619_v59, 0.0 }
 0x206   : > { %v2620_v51 = vadd.f32 %v4941_v25, %v2581_v23  ;;  %3316 = vst [vmem:[%s4974_s25 + $0x50] sm:$0xff] %v3280_v6   ;;  %v2579_v29 = vmul.f32 %v4924_v12, %v2520_v57  ;;  %v2375_v54 = vadd.f32 %v3763_v56, %v5144_v8 }
 0x207   : > { %v3765_v42 = vpop.f32.mrf.mxu1  ;;  %v2532_v27 = vpop.f32.mrf.mxu0  ;;  %v2649_v4 = vmax.f32 %v2617_v62, 0.0 }
 0x208   : > { %v2652_v40 = vmax.f32 %v2620_v51, 0.0  ;;  %v3766_v19 = vadd.f32 %v3765_v42, %v3764_v5  ;;  %v2533_v11 = vadd.f32 %v2532_v27, %v2372_v52  ;;  %v2618_v33 = vadd.f32 %v4941_v25, %v2579_v29 }
 0x209   : > { %v3767_v18 = vpop.f32.mrf.mxu1  ;;  %v3841_v20 = vpop.f32.mrf.mxu0 }
 0x20a   : > { %v3295_v3 = vpack.c.bf16 %v2652_v40, %v2651_v24  ;;  %v2380_v15 = vadd.f32 %v3766_v19, %v4912_v50  ;;  %v2582_v2 = vmul.f32 %v4924_v12, %v2533_v11  ;;  %v2650_v17 = vmax.f32 %v2618_v33, 0.0 }
 0x20b   : > { %v3768_v61 = vpop.f32.mrf.mxu1  ;;  %v2535_v21 = vpop.f32.mrf.mxu0 }
 0x20c   : > { %3319 = vst [vmem:[%s4974_s25 + $0x68] sm:$0xff] %v3295_v3   ;;  %v2541_v34 = vadd.f32 %v3840_v60, %v2380_v15  ;;  %v3769_v35 = vadd.f32 %v3768_v61, %v3767_v18  ;;  %v2536_v39 = vadd.f32 %v2535_v21, %v2375_v54  ;;  %v3290_v49 = vpack.c.bf16 %v2650_v17, %v2649_v4 }
 0x20d   : > { %v2621_v55 = vadd.f32 %v4941_v25, %v2582_v2 }
 0x20e   : > { %v2584_v36 = vmul.f32 %v4924_v12, %v2541_v34  ;;  %v2383_v50 = vadd.f32 %v3769_v35, %v4927_v14  ;;  %v2583_v30 = vmul.f32 %v4924_v12, %v2536_v39  ;;  %3318 = vst [vmem:[%s4974_s25 + $0x60] sm:$0xff] %v3290_v49  }
 0x20f   : > { %v2653_v13 = vmax.f32 %v2621_v55, 0.0 }
 0x210   : > { %v2544_v47 = vadd.f32 %v3841_v20, %v2383_v50  ;;  %v2622_v48 = vadd.f32 %v4941_v25, %v2583_v30  ;;  %v2623_v45 = vadd.f32 %v4941_v25, %v2584_v36 }
 0x212   : > { %v2585_v28 = vmul.f32 %v4924_v12, %v2544_v47  ;;  %v2654_v46 = vmax.f32 %v2622_v48, 0.0  ;;  %v2655_v31 = vmax.f32 %v2623_v45, 0.0 }
 0x214   : > { %v2624_v22 = vadd.f32 %v4941_v25, %v2585_v28  ;;  %v3300_v1 = vpack.c.bf16 %v2654_v46, %v2653_v13 }
 0x216   : > { %v2656_v41 = vmax.f32 %v2624_v22, 0.0  ;;  %3320 = vst [vmem:[%s4974_s25 + $0x70] sm:$0xff] %v3300_v1  }
 0x218   : > { %v3305_v32 = vpack.c.bf16 %v2656_v41, %v2655_v31 }
 0x21a   : > { %3321 = vst [vmem:[%s4974_s25 + $0x78] sm:$0xff] %v3305_v32  }
 0x21b PF: > { %s14_s17 = sadd.s32 1, %s4185_s17   ;;  %s5145_s15 = smov %s4181_s16 }
 0x21c   : > { %p11_p5 = scmp.ge.s32.totalorder %s14_s17, 7   ;;  %s5146_s16 = smov %s5148_s18 }
 0x21e   :  { %13 = sbr.rel (!%p11_p5) target bundleno = 2 (0x2), region = 75 }

// kernel: two_step_vgg_forward.12
= control target key start
LH: loop header
LB: loop body
LE: loop exit
PB: predicated region body
PF: predicated region fallthrough
CT: control target
= control target key end

     0   :  { %s1814_s1 = inlined_call_operand.vmem [shape: bf16[512,512], index: 1, kind: input, shape index: {}]   ;;  %s1815_s0 = inlined_call_operand.vmem [shape: bf16[8,512], index: 0, kind: input, shape index: {}]   ;;  %s1816_s2 = inlined_call_operand.vmem [shape: f32[1,512], index: 2, kind: input, shape index: {}]   ;;  %s1817_s3 = inlined_call_operand.vmem [shape: f32[1,512], index: 3, kind: input, shape index: {}]   ;;  %s1818_s4 = inlined_call_operand.vmem [shape: bf16[8,512], index: 4, kind: output, shape index: {}]  }
   0x1   :  { %v1179_v0 = vld [vmem:[%s1814_s1 + $0xe4] ss:$16 sps:$4 sm:$0xff]   ;;  %v1183_v2 = vld [vmem:[%s1814_s1 + $0xe0] ss:$16 sps:$4 sm:$0xff]   ;;  %v18_v48 = vld [vmem:[%s1815_s0 + $0x8] sm:$0xff] }
   0x2   :  { %v1181_v1 = vld [vmem:[%s1814_s1 + $0x2e4] ss:$16 sps:$4 sm:$0xff]   ;;  %801 = vmatprep.subr.bf16.mxu0 %v1179_v0  ;;  %v1184_v3 = vld [vmem:[%s1814_s1 + $0x2e0] ss:$16 sps:$4 sm:$0xff]   ;;  %v1046_v51 = vcombine.high %v18_v48, %v18_v48 }
   0x3   :  { %842 = vmatprep.subr.bf16.mxu1 %v1181_v1  ;;  %v1185_v4 = vld [vmem:[%s1814_s1 + $0xc4] ss:$16 sps:$4 sm:$0xff]   ;;  %802 = vmatpush1.bf16.msra.mxu0 %v1183_v2  ;;  %v1189_v6 = vld [vmem:[%s1814_s1 + $0xc0] ss:$16 sps:$4 sm:$0xff]  }
   0x4   :  { %843 = vmatpush1.bf16.msra.mxu1 %v1184_v3  ;;  %v1187_v5 = vld [vmem:[%s1814_s1 + $0x2c4] ss:$16 sps:$4 sm:$0xff]   ;;  %803 = vmatprep.subr.bf16.mxu0 %v1185_v4  ;;  %v1190_v7 = vld [vmem:[%s1814_s1 + $0x2c0] ss:$16 sps:$4 sm:$0xff]   ;;  %v1281_v4 = vld [vmem:[%s1814_s1 + $0xec] ss:$16 sps:$4 sm:$0xff]  }
   0x5   :  { %844 = vmatprep.subr.bf16.mxu1 %v1187_v5  ;;  %v1191_v8 = vld [vmem:[%s1814_s1 + $0xa4] ss:$16 sps:$4 sm:$0xff]   ;;  %v1195_v10 = vld [vmem:[%s1814_s1 + $0xa0] ss:$16 sps:$4 sm:$0xff]   ;;  %874 = vmatprep.mubr.bf16.mxu1 %v1046_v51  ;;  %v1284_v5 = vld [vmem:[%s1814_s1 + $0x2ec] ss:$16 sps:$4 sm:$0xff]  }
   0x6   :  { %v1193_v9 = vld [vmem:[%s1814_s1 + $0x2a4] ss:$16 sps:$4 sm:$0xff]   ;;  %v1196_v11 = vld [vmem:[%s1814_s1 + $0x2a0] ss:$16 sps:$4 sm:$0xff]  }
   0x7   :  { %804 = vmatpush1.bf16.msra.mxu0 %v1189_v6  ;;  %v1197_v12 = vld [vmem:[%s1814_s1 + $0x84] ss:$16 sps:$4 sm:$0xff]   ;;  %v1201_v14 = vld [vmem:[%s1814_s1 + $0x80] ss:$16 sps:$4 sm:$0xff]  }
   0x8   :  { %845 = vmatpush1.bf16.msra.mxu1 %v1190_v7  ;;  %805 = vmatprep.subr.bf16.mxu0 %v1191_v8  ;;  %v1199_v13 = vld [vmem:[%s1814_s1 + $0x284] ss:$16 sps:$4 sm:$0xff]   ;;  %v1202_v15 = vld [vmem:[%s1814_s1 + $0x280] ss:$16 sps:$4 sm:$0xff]   ;;  %v1609_v7 = vcombine.low %v18_v48, %v18_v48  ;;  %v1279_v8 = vld [vmem:[%s1814_s1 + $0xe8] ss:$16 sps:$4 sm:$0xff]  }
   0x9   :  { %846 = vmatprep.subr.bf16.mxu1 %v1193_v9  ;;  %v1203_v16 = vld [vmem:[%s1814_s1 + $0x64] ss:$16 sps:$4 sm:$0xff]   ;;  %v1207_v18 = vld [vmem:[%s1814_s1 + $0x60] ss:$16 sps:$4 sm:$0xff]   ;;  %v1282_v9 = vld [vmem:[%s1814_s1 + $0x2e8] ss:$16 sps:$4 sm:$0xff]  }
   0xa   :  { %v1205_v17 = vld [vmem:[%s1814_s1 + $0x264] ss:$16 sps:$4 sm:$0xff]   ;;  %v1208_v19 = vld [vmem:[%s1814_s1 + $0x260] ss:$16 sps:$4 sm:$0xff]   ;;  %v1339_v48 = vld [vmem:[%s1814_s1 + $0x1a8] ss:$16 sps:$4 sm:$0xff]  }
   0xb   :  { %806 = vmatpush1.bf16.msra.mxu0 %v1195_v10  ;;  %v1209_v20 = vld [vmem:[%s1814_s1 + $0x44] ss:$16 sps:$4 sm:$0xff]   ;;  %v1213_v22 = vld [vmem:[%s1814_s1 + $0x40] ss:$16 sps:$4 sm:$0xff]   ;;  %v1287_v10 = vld [vmem:[%s1814_s1 + $0xcc] ss:$16 sps:$4 sm:$0xff]  }
   0xc   :  { %847 = vmatpush1.bf16.msra.mxu1 %v1196_v11  ;;  %807 = vmatprep.subr.bf16.mxu0 %v1197_v12  ;;  %v1211_v21 = vld [vmem:[%s1814_s1 + $0x244] ss:$16 sps:$4 sm:$0xff]   ;;  %v1214_v23 = vld [vmem:[%s1814_s1 + $0x240] ss:$16 sps:$4 sm:$0xff]   ;;  %v1290_v11 = vld [vmem:[%s1814_s1 + $0x2cc] ss:$16 sps:$4 sm:$0xff]  }
   0xd   :  { %848 = vmatprep.subr.bf16.mxu1 %v1199_v13  ;;  %v1215_v24 = vld [vmem:[%s1814_s1 + $0x24] ss:$16 sps:$4 sm:$0xff]   ;;  %v1219_v26 = vld [vmem:[%s1814_s1 + $0x20] ss:$16 sps:$4 sm:$0xff]   ;;  %v1285_v12 = vld [vmem:[%s1814_s1 + $0xc8] ss:$16 sps:$4 sm:$0xff]  }
   0xe   :  { %v1217_v25 = vld [vmem:[%s1814_s1 + $0x224] ss:$16 sps:$4 sm:$0xff]   ;;  %v1220_v27 = vld [vmem:[%s1814_s1 + $0x220] ss:$16 sps:$4 sm:$0xff]   ;;  %v1288_v13 = vld [vmem:[%s1814_s1 + $0x2c8] ss:$16 sps:$4 sm:$0xff]  }
   0xf   :  { %808 = vmatpush1.bf16.msra.mxu0 %v1201_v14  ;;  %v1221_v28 = vld [vmem:[%s1814_s1 + $0x4] ss:$16 sps:$4 sm:$0xff]   ;;  %v1225_v30 = vld [vmem:[%s1814_s1] ss:$16 sps:$4 sm:$0xff]   ;;  %v1293_v14 = vld [vmem:[%s1814_s1 + $0xac] ss:$16 sps:$4 sm:$0xff]  }
  0x10   :  { %849 = vmatpush1.bf16.msra.mxu1 %v1202_v15  ;;  %809 = vmatprep.subr.bf16.mxu0 %v1203_v16  ;;  %v1223_v29 = vld [vmem:[%s1814_s1 + $0x204] ss:$16 sps:$4 sm:$0xff]   ;;  %v1226_v31 = vld [vmem:[%s1814_s1 + $0x200] ss:$16 sps:$4 sm:$0xff]   ;;  %v1296_v15 = vld [vmem:[%s1814_s1 + $0x2ac] ss:$16 sps:$4 sm:$0xff]  }
  0x11   :  { %850 = vmatprep.subr.bf16.mxu1 %v1205_v17  ;;  %v1227_v32 = vld [vmem:[%s1814_s1 + $0x1e4] ss:$16 sps:$4 sm:$0xff]   ;;  %v1231_v34 = vld [vmem:[%s1814_s1 + $0x1e0] ss:$16 sps:$4 sm:$0xff]   ;;  %v1291_v16 = vld [vmem:[%s1814_s1 + $0xa8] ss:$16 sps:$4 sm:$0xff]  }
  0x12   :  { %v1229_v33 = vld [vmem:[%s1814_s1 + $0x3e4] ss:$16 sps:$4 sm:$0xff]   ;;  %v1232_v35 = vld [vmem:[%s1814_s1 + $0x3e0] ss:$16 sps:$4 sm:$0xff]   ;;  %v1294_v17 = vld [vmem:[%s1814_s1 + $0x2a8] ss:$16 sps:$4 sm:$0xff]  }
  0x13   :  { %810 = vmatpush1.bf16.msra.mxu0 %v1207_v18  ;;  %v1233_v36 = vld [vmem:[%s1814_s1 + $0x1c4] ss:$16 sps:$4 sm:$0xff]   ;;  %v1237_v38 = vld [vmem:[%s1814_s1 + $0x1c0] ss:$16 sps:$4 sm:$0xff]   ;;  %v1299_v18 = vld [vmem:[%s1814_s1 + $0x8c] ss:$16 sps:$4 sm:$0xff]  }
  0x14   :  { %851 = vmatpush1.bf16.msra.mxu1 %v1208_v19  ;;  %811 = vmatprep.subr.bf16.mxu0 %v1209_v20  ;;  %v1235_v37 = vld [vmem:[%s1814_s1 + $0x3c4] ss:$16 sps:$4 sm:$0xff]   ;;  %v1238_v39 = vld [vmem:[%s1814_s1 + $0x3c0] ss:$16 sps:$4 sm:$0xff]   ;;  %v1302_v19 = vld [vmem:[%s1814_s1 + $0x28c] ss:$16 sps:$4 sm:$0xff]  }
  0x15   :  { %852 = vmatprep.subr.bf16.mxu1 %v1211_v21  ;;  %v1239_v40 = vld [vmem:[%s1814_s1 + $0x1a4] ss:$16 sps:$4 sm:$0xff]   ;;  %v1243_v42 = vld [vmem:[%s1814_s1 + $0x1a0] ss:$16 sps:$4 sm:$0xff]   ;;  %v1297_v20 = vld [vmem:[%s1814_s1 + $0x88] ss:$16 sps:$4 sm:$0xff]  }
  0x16   :  { %v1241_v41 = vld [vmem:[%s1814_s1 + $0x3a4] ss:$16 sps:$4 sm:$0xff]   ;;  %v1244_v43 = vld [vmem:[%s1814_s1 + $0x3a0] ss:$16 sps:$4 sm:$0xff]   ;;  %v1300_v21 = vld [vmem:[%s1814_s1 + $0x288] ss:$16 sps:$4 sm:$0xff]  }
  0x17   :  { %812 = vmatpush1.bf16.msra.mxu0 %v1213_v22  ;;  %v1245_v44 = vld [vmem:[%s1814_s1 + $0x184] ss:$16 sps:$4 sm:$0xff]   ;;  %v1249_v49 = vld [vmem:[%s1814_s1 + $0x180] ss:$16 sps:$4 sm:$0xff]   ;;  %v1305_v22 = vld [vmem:[%s1814_s1 + $0x6c] ss:$16 sps:$4 sm:$0xff]  }
  0x18   :  { %853 = vmatpush1.bf16.msra.mxu1 %v1214_v23  ;;  %813 = vmatprep.subr.bf16.mxu0 %v1215_v24  ;;  %v1247_v45 = vld [vmem:[%s1814_s1 + $0x384] ss:$16 sps:$4 sm:$0xff]   ;;  %v1250_v50 = vld [vmem:[%s1814_s1 + $0x380] ss:$16 sps:$4 sm:$0xff]   ;;  %v1308_v23 = vld [vmem:[%s1814_s1 + $0x26c] ss:$16 sps:$4 sm:$0xff]  }
  0x19   :  { %854 = vmatprep.subr.bf16.mxu1 %v1217_v25  ;;  %v17_v46 = vld [vmem:[%s1815_s0] sm:$0xff]  ;;  %v1303_v24 = vld [vmem:[%s1814_s1 + $0x68] ss:$16 sps:$4 sm:$0xff]  }
  0x1a   :  { %v1541_v47 = vcombine.high %v17_v46, %v17_v46  ;;  %v1251_v52 = vld [vmem:[%s1814_s1 + $0x164] ss:$16 sps:$4 sm:$0xff]   ;;  %v1255_v54 = vld [vmem:[%s1814_s1 + $0x160] ss:$16 sps:$4 sm:$0xff]   ;;  %v1607_v6 = vcombine.low %v17_v46, %v17_v46  ;;  %v1306_v25 = vld [vmem:[%s1814_s1 + $0x268] ss:$16 sps:$4 sm:$0xff]  }
  0x1b   :  { %814 = vmatpush1.bf16.msra.mxu0 %v1219_v26  ;;  %v1253_v53 = vld [vmem:[%s1814_s1 + $0x364] ss:$16 sps:$4 sm:$0xff]   ;;  %v1256_v55 = vld [vmem:[%s1814_s1 + $0x360] ss:$16 sps:$4 sm:$0xff]   ;;  %v1311_v26 = vld [vmem:[%s1814_s1 + $0x4c] ss:$16 sps:$4 sm:$0xff]  }
  0x1c   :  { %855 = vmatpush1.bf16.msra.mxu1 %v1220_v27  ;;  %815 = vmatprep.subr.bf16.mxu0 %v1221_v28  ;;  %v1257_v56 = vld [vmem:[%s1814_s1 + $0x144] ss:$16 sps:$4 sm:$0xff]   ;;  %v1261_v58 = vld [vmem:[%s1814_s1 + $0x140] ss:$16 sps:$4 sm:$0xff]   ;;  %v1314_v27 = vld [vmem:[%s1814_s1 + $0x24c] ss:$16 sps:$4 sm:$0xff]  }
  0x1d   :  { %856 = vmatprep.subr.bf16.mxu1 %v1223_v29  ;;  %833 = vmatprep.mubr.bf16.mxu0 %v1541_v47  ;;  %v1259_v57 = vld [vmem:[%s1814_s1 + $0x344] ss:$16 sps:$4 sm:$0xff]   ;;  %v1262_v59 = vld [vmem:[%s1814_s1 + $0x340] ss:$16 sps:$4 sm:$0xff]   ;;  %v1309_v28 = vld [vmem:[%s1814_s1 + $0x48] ss:$16 sps:$4 sm:$0xff]  }
  0x1e   :  { %v1263_v60 = vld [vmem:[%s1814_s1 + $0x124] ss:$16 sps:$4 sm:$0xff]   ;;  %v1267_v62 = vld [vmem:[%s1814_s1 + $0x120] ss:$16 sps:$4 sm:$0xff]   ;;  %v1312_v29 = vld [vmem:[%s1814_s1 + $0x248] ss:$16 sps:$4 sm:$0xff]  }
  0x1f   :  { %816 = vmatpush1.bf16.msra.mxu0 %v1225_v30  ;;  %v1265_v61 = vld [vmem:[%s1814_s1 + $0x324] ss:$16 sps:$4 sm:$0xff]   ;;  %v1268_v63 = vld [vmem:[%s1814_s1 + $0x320] ss:$16 sps:$4 sm:$0xff]   ;;  %v1317_v30 = vld [vmem:[%s1814_s1 + $0x2c] ss:$16 sps:$4 sm:$0xff]  }
  0x20   :  { %857 = vmatpush1.bf16.msra.mxu1 %v1226_v31  ;;  %817 = vmatprep.subr.bf16.mxu0 %v1227_v32  ;;  %v1269_v0 = vld [vmem:[%s1814_s1 + $0x104] ss:$16 sps:$4 sm:$0xff]   ;;  %v1273_v2 = vld [vmem:[%s1814_s1 + $0x100] ss:$16 sps:$4 sm:$0xff]   ;;  %v1320_v31 = vld [vmem:[%s1814_s1 + $0x22c] ss:$16 sps:$4 sm:$0xff]  }
  0x21   :  { %858 = vmatprep.subr.bf16.mxu1 %v1229_v33  ;;  %v1271_v1 = vld [vmem:[%s1814_s1 + $0x304] ss:$16 sps:$4 sm:$0xff]   ;;  %v1274_v3 = vld [vmem:[%s1814_s1 + $0x300] ss:$16 sps:$4 sm:$0xff]   ;;  %v1315_v32 = vld [vmem:[%s1814_s1 + $0x28] ss:$16 sps:$4 sm:$0xff]  }
  0x22   :  { %v1318_v33 = vld [vmem:[%s1814_s1 + $0x228] ss:$16 sps:$4 sm:$0xff]   ;;  %v1341_v46 = vld [vmem:[%s1814_s1 + $0x1ac] ss:$16 sps:$4 sm:$0xff]  }
  0x23   :  { %818 = vmatpush2.bf16.msra.mxu0 %v1231_v34  ;;  %v1323_v34 = vld [vmem:[%s1814_s1 + $0xc] ss:$16 sps:$4 sm:$0xff]  }
  0x24   :  { %859 = vmatpush2.bf16.msra.mxu1 %v1232_v35  ;;  %819 = vmatprep.subr.bf16.mxu0 %v1233_v36  ;;  %v1326_v35 = vld [vmem:[%s1814_s1 + $0x20c] ss:$16 sps:$4 sm:$0xff]   ;;  %v1321_v36 = vld [vmem:[%s1814_s1 + $0x8] ss:$16 sps:$4 sm:$0xff]  }
  0x25   :  { %860 = vmatprep.subr.bf16.mxu1 %v1235_v37  ;;  %v1324_v37 = vld [vmem:[%s1814_s1 + $0x208] ss:$16 sps:$4 sm:$0xff]  }
  0x27   :  { %820 = vmatpush2.bf16.msra.mxu0 %v1237_v38  ;;  %v1329_v38 = vld [vmem:[%s1814_s1 + $0x1ec] ss:$16 sps:$4 sm:$0xff]  }
  0x28   :  { %861 = vmatpush2.bf16.msra.mxu1 %v1238_v39  ;;  %821 = vmatprep.subr.bf16.mxu0 %v1239_v40  ;;  %v1332_v39 = vld [vmem:[%s1814_s1 + $0x3ec] ss:$16 sps:$4 sm:$0xff]   ;;  %v1327_v40 = vld [vmem:[%s1814_s1 + $0x1e8] ss:$16 sps:$4 sm:$0xff]  }
  0x29   :  { %862 = vmatprep.subr.bf16.mxu1 %v1241_v41  ;;  %v1330_v41 = vld [vmem:[%s1814_s1 + $0x3e8] ss:$16 sps:$4 sm:$0xff]  }
  0x2b   :  { %822 = vmatpush2.bf16.msra.mxu0 %v1243_v42  ;;  %v1335_v42 = vld [vmem:[%s1814_s1 + $0x1cc] ss:$16 sps:$4 sm:$0xff]  }
  0x2c   :  { %863 = vmatpush2.bf16.msra.mxu1 %v1244_v43  ;;  %823 = vmatprep.subr.bf16.mxu0 %v1245_v44  ;;  %v1338_v43 = vld [vmem:[%s1814_s1 + $0x3cc] ss:$16 sps:$4 sm:$0xff]   ;;  %v1333_v44 = vld [vmem:[%s1814_s1 + $0x1c8] ss:$16 sps:$4 sm:$0xff]  }
  0x2d   :  { %864 = vmatprep.subr.bf16.mxu1 %v1247_v45  ;;  %v1336_v45 = vld [vmem:[%s1814_s1 + $0x3c8] ss:$16 sps:$4 sm:$0xff]  }
  0x2f   :  { %824 = vmatpush2.bf16.msra.mxu0 %v1249_v49  ;;  %v1342_v49 = vld [vmem:[%s1814_s1 + $0x3a8] ss:$16 sps:$4 sm:$0xff]  }
  0x30   :  { %865 = vmatpush2.bf16.msra.mxu1 %v1250_v50  ;;  %825 = vmatprep.subr.bf16.mxu0 %v1251_v52  ;;  %v1347_v50 = vld [vmem:[%s1814_s1 + $0x18c] ss:$16 sps:$4 sm:$0xff]   ;;  %v1345_v52 = vld [vmem:[%s1814_s1 + $0x188] ss:$16 sps:$4 sm:$0xff]  }
  0x31   :  { %866 = vmatprep.subr.bf16.mxu1 %v1253_v53  ;;  %v1348_v53 = vld [vmem:[%s1814_s1 + $0x388] ss:$16 sps:$4 sm:$0xff]  }
  0x33   :  { %826 = vmatpush2.bf16.msra.mxu0 %v1255_v54  ;;  %v1353_v54 = vld [vmem:[%s1814_s1 + $0x16c] ss:$16 sps:$4 sm:$0xff]  }
  0x34   :  { %867 = vmatpush2.bf16.msra.mxu1 %v1256_v55  ;;  %827 = vmatprep.subr.bf16.mxu0 %v1257_v56  ;;  %v1356_v55 = vld [vmem:[%s1814_s1 + $0x36c] ss:$16 sps:$4 sm:$0xff]   ;;  %v1351_v56 = vld [vmem:[%s1814_s1 + $0x168] ss:$16 sps:$4 sm:$0xff]  }
  0x35   :  { %868 = vmatprep.subr.bf16.mxu1 %v1259_v57  ;;  %v1354_v57 = vld [vmem:[%s1814_s1 + $0x368] ss:$16 sps:$4 sm:$0xff]  }
  0x37   :  { %828 = vmatpush2.bf16.msra.mxu0 %v1261_v58  ;;  %v1359_v58 = vld [vmem:[%s1814_s1 + $0x14c] ss:$16 sps:$4 sm:$0xff]  }
  0x38   :  { %869 = vmatpush2.bf16.msra.mxu1 %v1262_v59  ;;  %829 = vmatprep.subr.bf16.mxu0 %v1263_v60  ;;  %v1362_v59 = vld [vmem:[%s1814_s1 + $0x34c] ss:$16 sps:$4 sm:$0xff]   ;;  %v1357_v60 = vld [vmem:[%s1814_s1 + $0x148] ss:$16 sps:$4 sm:$0xff]  }
  0x39   :  { %870 = vmatprep.subr.bf16.mxu1 %v1265_v61  ;;  %v1360_v61 = vld [vmem:[%s1814_s1 + $0x348] ss:$16 sps:$4 sm:$0xff]  }
  0x3b   :  { %830 = vmatpush2.bf16.msra.mxu0 %v1267_v62  ;;  %v1365_v62 = vld [vmem:[%s1814_s1 + $0x12c] ss:$16 sps:$4 sm:$0xff]  }
  0x3c   :  { %871 = vmatpush2.bf16.msra.mxu1 %v1268_v63  ;;  %831 = vmatprep.subr.bf16.mxu0 %v1269_v0  ;;  %v1368_v63 = vld [vmem:[%s1814_s1 + $0x32c] ss:$16 sps:$4 sm:$0xff]   ;;  %v1363_v0 = vld [vmem:[%s1814_s1 + $0x128] ss:$16 sps:$4 sm:$0xff]  }
  0x3d   :  { %872 = vmatprep.subr.bf16.mxu1 %v1271_v1  ;;  %v1366_v1 = vld [vmem:[%s1814_s1 + $0x328] ss:$16 sps:$4 sm:$0xff]  }
  0x3f   :  { %832 = vmatpush2.bf16.msra.mxu0 %v1273_v2  ;;  %v1371_v2 = vld [vmem:[%s1814_s1 + $0x10c] ss:$16 sps:$4 sm:$0xff]  }
  0x40   :  { %873 = vmatpush2.bf16.msra.mxu1 %v1274_v3  ;;  %883 = vmatprep.subr.bf16.mxu0 %v1281_v4  ;;  %v1374_v3 = vld [vmem:[%s1814_s1 + $0x30c] ss:$16 sps:$4 sm:$0xff]   ;;  %v1369_v4 = vld [vmem:[%s1814_s1 + $0x108] ss:$16 sps:$4 sm:$0xff]  }
  0x41   :  { %924 = vmatprep.subr.bf16.mxu1 %v1284_v5  ;;  %v1372_v5 = vld [vmem:[%s1814_s1 + $0x308] ss:$16 sps:$4 sm:$0xff]  }
  0x42   :  { %834 = vmatmul.mubr.bf16.vlgmr.msra.gmra.mxu0 %v1607_v6 }
  0x43   :  { %875 = vmatmul.mubr.bf16.vlgmr.msra.gmra.mxu1 %v1609_v7  ;;  %884 = vmatpush1.bf16.msra.mxu0 %v1279_v8  ;;  %v967_v8 = vlaneseq }
  0x44   :  { %925 = vmatpush1.bf16.msra.mxu1 %v1282_v9  ;;  %885 = vmatprep.subr.bf16.mxu0 %v1287_v10 }
  0x45   :  { %926 = vmatprep.subr.bf16.mxu1 %v1290_v11  ;;  %915 = vmatprep.mubr.bf16.mxu0 %v1541_v47  ;;  %v1344_v47 = vld [vmem:[%s1814_s1 + $0x3ac] ss:$16 sps:$4 sm:$0xff]   ;;  %v968_v9 = vshrl.u32 %v967_v8, 7  ;;  %v965_v11 = vld [vmem:[%s1816_s2] sm:$0xf] }
  0x46   :  { %956 = vmatprep.mubr.bf16.mxu1 %v1046_v51  ;;  %v1350_v51 = vld [vmem:[%s1814_s1 + $0x38c] ss:$16 sps:$4 sm:$0xff]  }
  0x47   :  { %886 = vmatpush1.bf16.msra.mxu0 %v1285_v12  ;;  %v977_v10 = vsub.s32 2, %v968_v9 }
  0x48   :  { %927 = vmatpush1.bf16.msra.mxu1 %v1288_v13  ;;  %887 = vmatprep.subr.bf16.mxu0 %v1293_v14  ;;  %v981_v13 = vsub.s32 3, %v968_v9  ;;  %v991_v14 = vld [vmem:[%s1817_s3] sm:$0xf] }
  0x49   :  { %928 = vmatprep.subr.bf16.mxu1 %v1296_v15  ;;  %v978_v12 = vrot.slane %v965_v11, %v977_v10  ;;  %v1004_v15 = vrot.slane %v991_v14, %v977_v10 }
  0x4b   :  { %888 = vmatpush1.bf16.msra.mxu0 %v1291_v16  ;;  %v982_v16 = vrot.slane %v965_v11, %v981_v13 }
  0x4c   :  { %929 = vmatpush1.bf16.msra.mxu1 %v1294_v17  ;;  %889 = vmatprep.subr.bf16.mxu0 %v1299_v18  ;;  %v1008_v17 = vrot.slane %v991_v14, %v981_v13  ;;  %v969_v18 = vsub.s32 0, %v968_v9 }
  0x4d   :  { %930 = vmatprep.subr.bf16.mxu1 %v1302_v19 }
  0x4e   :  { %v970_v19 = vrot.slane %v965_v11, %v969_v18 }
  0x4f   :  { %890 = vmatpush1.bf16.msra.mxu0 %v1297_v20 }
  0x50   :  { %931 = vmatpush1.bf16.msra.mxu1 %v1300_v21  ;;  %891 = vmatprep.subr.bf16.mxu0 %v1305_v22  ;;  %v996_v22 = vrot.slane %v991_v14, %v969_v18 }
  0x51   :  { %932 = vmatprep.subr.bf16.mxu1 %v1308_v23 }
  0x53   :  { %892 = vmatpush1.bf16.msra.mxu0 %v1303_v24 }
  0x54   :  { %933 = vmatpush1.bf16.msra.mxu1 %v1306_v25  ;;  %893 = vmatprep.subr.bf16.mxu0 %v1311_v26 }
  0x55   :  { %934 = vmatprep.subr.bf16.mxu1 %v1314_v27 }
  0x57   :  { %894 = vmatpush1.bf16.msra.mxu0 %v1309_v28 }
  0x58   :  { %935 = vmatpush1.bf16.msra.mxu1 %v1312_v29  ;;  %895 = vmatprep.subr.bf16.mxu0 %v1317_v30 }
  0x59   :  { %936 = vmatprep.subr.bf16.mxu1 %v1320_v31 }
  0x5b   :  { %896 = vmatpush1.bf16.msra.mxu0 %v1315_v32 }
  0x5c   :  { %937 = vmatpush1.bf16.msra.mxu1 %v1318_v33  ;;  %897 = vmatprep.subr.bf16.mxu0 %v1323_v34 }
  0x5d   :  { %938 = vmatprep.subr.bf16.mxu1 %v1326_v35 }
  0x5f   :  { %898 = vmatpush1.bf16.msra.mxu0 %v1321_v36 }
  0x60   :  { %939 = vmatpush1.bf16.msra.mxu1 %v1324_v37  ;;  %899 = vmatprep.subr.bf16.mxu0 %v1329_v38 }
  0x61   :  { %940 = vmatprep.subr.bf16.mxu1 %v1332_v39 }
  0x63   :  { %900 = vmatpush2.bf16.msra.mxu0 %v1327_v40 }
  0x64   :  { %941 = vmatpush2.bf16.msra.mxu1 %v1330_v41  ;;  %901 = vmatprep.subr.bf16.mxu0 %v1335_v42 }
  0x65   :  { %942 = vmatprep.subr.bf16.mxu1 %v1338_v43 }
  0x67   :  { %902 = vmatpush2.bf16.msra.mxu0 %v1333_v44 }
  0x68   :  { %943 = vmatpush2.bf16.msra.mxu1 %v1336_v45  ;;  %903 = vmatprep.subr.bf16.mxu0 %v1341_v46 }
  0x69   :  { %944 = vmatprep.subr.bf16.mxu1 %v1344_v47 }
  0x6b   :  { %904 = vmatpush2.bf16.msra.mxu0 %v1339_v48 }
  0x6c   :  { %945 = vmatpush2.bf16.msra.mxu1 %v1342_v49  ;;  %905 = vmatprep.subr.bf16.mxu0 %v1347_v50 }
  0x6d   :  { %946 = vmatprep.subr.bf16.mxu1 %v1350_v51 }
  0x6f   :  { %906 = vmatpush2.bf16.msra.mxu0 %v1345_v52 }
  0x70   :  { %947 = vmatpush2.bf16.msra.mxu1 %v1348_v53  ;;  %907 = vmatprep.subr.bf16.mxu0 %v1353_v54 }
  0x71   :  { %948 = vmatprep.subr.bf16.mxu1 %v1356_v55 }
  0x73   :  { %908 = vmatpush2.bf16.msra.mxu0 %v1351_v56 }
  0x74   :  { %949 = vmatpush2.bf16.msra.mxu1 %v1354_v57  ;;  %909 = vmatprep.subr.bf16.mxu0 %v1359_v58 }
  0x75   :  { %950 = vmatprep.subr.bf16.mxu1 %v1362_v59 }
  0x77   :  { %910 = vmatpush2.bf16.msra.mxu0 %v1357_v60 }
  0x78   :  { %951 = vmatpush2.bf16.msra.mxu1 %v1360_v61  ;;  %911 = vmatprep.subr.bf16.mxu0 %v1365_v62 }
  0x79   :  { %952 = vmatprep.subr.bf16.mxu1 %v1368_v63 }
  0x7b   :  { %912 = vmatpush2.bf16.msra.mxu0 %v1363_v0 }
  0x7c   :  { %953 = vmatpush2.bf16.msra.mxu1 %v1366_v1  ;;  %913 = vmatprep.subr.bf16.mxu0 %v1371_v2 }
  0x7d   :  { %954 = vmatprep.subr.bf16.mxu1 %v1374_v3 }
  0x7f   :  { %914 = vmatpush2.bf16.msra.mxu0 %v1369_v4 }
  0x80   :  { %955 = vmatpush2.bf16.msra.mxu1 %v1372_v5 }
  0x82   :  { %916 = vmatmul.mubr.bf16.vlgmr.msra.gmra.mxu0 %v1607_v6  ;;  %v973_v6 = vsub.s32 1, %v968_v9 }
  0x83   :  { %957 = vmatmul.mubr.bf16.vlgmr.msra.gmra.mxu1 %v1609_v7 }
  0x84   :  { %v974_v23 = vrot.slane %v965_v11, %v973_v6  ;;  %v1000_v28 = vrot.slane %v991_v14, %v973_v6 }
 0x102   :  { %v835_v7 = vpop.f32.mrf.mxu0 }
 0x103   :  { %v876_v20 = vpop.f32.mrf.mxu1 }
 0x104   :  { %v877_v21 = vadd.f32 %v876_v20, %v835_v7  ;;  %v837_v24 = vpop.f32.mrf.mxu0 }
 0x105   :  { %v878_v25 = vpop.f32.mrf.mxu1 }
 0x106   :  { %v987_v26 = vmul.f32 %v970_v19, %v877_v21  ;;  %v879_v27 = vadd.f32 %v878_v25, %v837_v24  ;;  %v839_v29 = vpop.f32.mrf.mxu0 }
 0x107   :  { %v880_v30 = vpop.f32.mrf.mxu1 }
 0x108   :  { %v1013_v31 = vadd.f32 %v996_v22, %v987_v26  ;;  %v988_v32 = vmul.f32 %v974_v23, %v879_v27  ;;  %v840_v33 = vpop.f32.mrf.mxu0 }
 0x109   :  { %v881_v34 = vpop.f32.mrf.mxu1 }
 0x10a   :  { %v1017_v35 = vmax.f32 %v1013_v31, 0.0  ;;  %v1014_v36 = vadd.f32 %v1000_v28, %v988_v32 }
 0x10c   :  { %v1018_v37 = vmax.f32 %v1014_v36, 0.0 }
 0x10e   :  { %v1177_v38 = vpack.c.bf16 %v1018_v37, %v1017_v35 }
 0x110   :  { %1037 = vst [vmem:[%s1818_s4] sm:$0xff] %v1177_v38 }
 0x142   :  { %v917_v39 = vpop.f32.mrf.mxu0 }
 0x143   :  { %v958_v40 = vpop.f32.mrf.mxu1 }
 0x144   :  { %v959_v41 = vadd.f32 %v958_v40, %v917_v39  ;;  %v919_v42 = vpop.f32.mrf.mxu0 }
 0x145   :  { %v960_v43 = vpop.f32.mrf.mxu1 }
 0x146   :  { %v989_v44 = vmul.f32 %v978_v12, %v959_v41  ;;  %v961_v45 = vadd.f32 %v960_v43, %v919_v42  ;;  %v921_v46 = vpop.f32.mrf.mxu0 }
 0x147   :  { %v962_v47 = vpop.f32.mrf.mxu1 }
 0x148   :  { %v1015_v48 = vadd.f32 %v1004_v15, %v989_v44  ;;  %v990_v49 = vmul.f32 %v982_v16, %v961_v45  ;;  %v922_v50 = vpop.f32.mrf.mxu0 }
 0x149   :  { %v963_v51 = vpop.f32.mrf.mxu1 }
 0x14a   :  { %v1016_v52 = vadd.f32 %v1008_v17, %v990_v49  ;;  %v1019_v53 = vmax.f32 %v1015_v48, 0.0 }
 0x14c   :  { %v1020_v54 = vmax.f32 %v1016_v52, 0.0 }
 0x14e   :  { %v1178_v55 = vpack.c.bf16 %v1020_v54, %v1019_v53 }
 0x150   :  { %1038 = vst [vmem:[%s1818_s4 + $0x8] sm:$0xff] %v1178_v55 }

// kernel: two_step_vgg_forward.13
= control target key start
LH: loop header
LB: loop body
LE: loop exit
PB: predicated region body
PF: predicated region fallthrough
CT: control target
= control target key end

     0   :  { %s645_s1 = inlined_call_operand.vmem [shape: bf16[512,128], index: 1, kind: input, shape index: {}]   ;;  %s646_s0 = inlined_call_operand.vmem [shape: bf16[8,512], index: 0, kind: input, shape index: {}]   ;;  %s647_s2 = inlined_call_operand.vmem [shape: f32[1,128], index: 2, kind: input, shape index: {}]   ;;  %s648_s3 = inlined_call_operand.vmem [shape: f32[1,128], index: 3, kind: input, shape index: {}]   ;;  %s649_s4 = inlined_call_operand.vmem [shape: f32[8,128], index: 4, kind: output, shape index: {}]  }
   0x1   :  { %v473_v0 = vld [vmem:[%s645_s1 + $0x78] sm:$0xff]   ;;  %v477_v4 = vld [vmem:[%s645_s1 + $0x70] sm:$0xff]   ;;  %v481_v8 = vld [vmem:[%s645_s1 + $0x68] sm:$0xff]  }
   0x2   :  { %v474_v1 = vld [vmem:[%s645_s1 + $0xf8] sm:$0xff]   ;;  %429 = vmatprep.subr.bf16.mxu0 %v473_v0  ;;  %v478_v5 = vld [vmem:[%s645_s1 + $0xf0] sm:$0xff]   ;;  %v482_v9 = vld [vmem:[%s645_s1 + $0xe8] sm:$0xff]  }
   0x3   :  { %v475_v2 = vld [vmem:[%s645_s1 + $0x38] sm:$0xff]   ;;  %451 = vmatprep.subr.bf16.mxu1 %v474_v1  ;;  %v479_v6 = vld [vmem:[%s645_s1 + $0x30] sm:$0xff]   ;;  %v483_v10 = vld [vmem:[%s645_s1 + $0x28] sm:$0xff]  }
   0x4   :  { %v476_v3 = vld [vmem:[%s645_s1 + $0xb8] sm:$0xff]   ;;  %430 = vmatpush3.bf16.msra.mxu0 %v475_v2  ;;  %v480_v7 = vld [vmem:[%s645_s1 + $0xb0] sm:$0xff]   ;;  %v484_v11 = vld [vmem:[%s645_s1 + $0xa8] sm:$0xff]  }
   0x5   :  { %452 = vmatpush3.bf16.msra.mxu1 %v476_v3  ;;  %431 = vmatprep.subr.bf16.mxu0 %v477_v4  ;;  %v485_v12 = vld [vmem:[%s645_s1 + $0x60] sm:$0xff]   ;;  %v489_v16 = vld [vmem:[%s645_s1 + $0x58] sm:$0xff]   ;;  %v493_v20 = vld [vmem:[%s645_s1 + $0x50] sm:$0xff]  }
   0x6   :  { %453 = vmatprep.subr.bf16.mxu1 %v478_v5  ;;  %v486_v13 = vld [vmem:[%s645_s1 + $0xe0] sm:$0xff]   ;;  %v490_v17 = vld [vmem:[%s645_s1 + $0xd8] sm:$0xff]   ;;  %v494_v21 = vld [vmem:[%s645_s1 + $0xd0] sm:$0xff]  }
   0x7   :  { %v487_v14 = vld [vmem:[%s645_s1 + $0x20] sm:$0xff]   ;;  %v491_v18 = vld [vmem:[%s645_s1 + $0x18] sm:$0xff]   ;;  %v495_v22 = vld [vmem:[%s645_s1 + $0x10] sm:$0xff]  }
   0x8   :  { %432 = vmatpush3.bf16.msra.mxu0 %v479_v6  ;;  %v488_v15 = vld [vmem:[%s645_s1 + $0xa0] sm:$0xff]   ;;  %v492_v19 = vld [vmem:[%s645_s1 + $0x98] sm:$0xff]   ;;  %v496_v23 = vld [vmem:[%s645_s1 + $0x90] sm:$0xff]  }
   0x9   :  { %454 = vmatpush3.bf16.msra.mxu1 %v480_v7  ;;  %433 = vmatprep.subr.bf16.mxu0 %v481_v8  ;;  %v497_v24 = vld [vmem:[%s645_s1 + $0x48] sm:$0xff]   ;;  %v501_v28 = vld [vmem:[%s645_s1 + $0x40] sm:$0xff]  }
   0xa   :  { %455 = vmatprep.subr.bf16.mxu1 %v482_v9  ;;  %v498_v25 = vld [vmem:[%s645_s1 + $0xc8] sm:$0xff]   ;;  %v502_v29 = vld [vmem:[%s645_s1 + $0xc0] sm:$0xff]  }
   0xb   :  { %v499_v26 = vld [vmem:[%s645_s1 + $0x8] sm:$0xff]   ;;  %v503_v30 = vld [vmem:[%s645_s1] sm:$0xff]  }
   0xc   :  { %434 = vmatpush3.bf16.msra.mxu0 %v483_v10  ;;  %v500_v27 = vld [vmem:[%s645_s1 + $0x88] sm:$0xff]   ;;  %v504_v31 = vld [vmem:[%s645_s1 + $0x80] sm:$0xff]  }
   0xd   :  { %456 = vmatpush3.bf16.msra.mxu1 %v484_v11  ;;  %435 = vmatprep.subr.bf16.mxu0 %v485_v12  ;;  %v18_v32 = vld [vmem:[%s646_s0] sm:$0xff]  ;;  %v19_v33 = vld [vmem:[%s646_s0 + $0x8] sm:$0xff] }
   0xe   :  { %457 = vmatprep.subr.bf16.mxu1 %v486_v13  ;;  %v391_v34 = vcombine.low %v18_v32, %v18_v32  ;;  %v392_v35 = vcombine.high %v18_v32, %v18_v32  ;;  %v393_v36 = vcombine.low %v19_v33, %v19_v33  ;;  %v394_v37 = vcombine.high %v19_v33, %v19_v33  ;;  %v427_v44 = vld [vmem:[%s647_s2] ss:$0 sm:$0xff] }
   0xf   :  { %v428_v48 = vld [vmem:[%s648_s3] ss:$0 sm:$0xff] }
  0x10   :  { %436 = vmatpush3.bf16.msra.mxu0 %v487_v14  ;;  %322 = vmatprep.mubr.bf16.mxu0 %v392_v35 }
  0x11   :  { %458 = vmatpush3.bf16.msra.mxu1 %v488_v15  ;;  %437 = vmatprep.subr.bf16.mxu0 %v489_v16 }
  0x12   :  { %459 = vmatprep.subr.bf16.mxu1 %v490_v17  ;;  %362 = vmatprep.mubr.bf16.mxu1 %v394_v37 }
  0x14   :  { %438 = vmatpush3.bf16.msra.mxu0 %v491_v18 }
  0x15   :  { %460 = vmatpush3.bf16.msra.mxu1 %v492_v19  ;;  %439 = vmatprep.subr.bf16.mxu0 %v493_v20 }
  0x16   :  { %461 = vmatprep.subr.bf16.mxu1 %v494_v21 }
  0x18   :  { %440 = vmatpush3.bf16.msra.mxu0 %v495_v22 }
  0x19   :  { %462 = vmatpush3.bf16.msra.mxu1 %v496_v23  ;;  %441 = vmatprep.subr.bf16.mxu0 %v497_v24 }
  0x1a   :  { %463 = vmatprep.subr.bf16.mxu1 %v498_v25 }
  0x1c   :  { %442 = vmatpush3.bf16.msra.mxu0 %v499_v26 }
  0x1d   :  { %464 = vmatpush3.bf16.msra.mxu1 %v500_v27  ;;  %443 = vmatprep.subr.bf16.mxu0 %v501_v28 }
  0x1e   :  { %465 = vmatprep.subr.bf16.mxu1 %v502_v29 }
  0x20   :  { %444 = vmatpush3.bf16.msra.mxu0 %v503_v30 }
  0x21   :  { %466 = vmatpush3.bf16.msra.mxu1 %v504_v31 }
  0x23   :  { %323 = vmatmul.mubr.bf16.vlgmr.msra.gmra.mxu0 %v391_v34 }
  0x24   :  { %363 = vmatmul.mubr.bf16.vlgmr.msra.gmra.mxu1 %v393_v36 }
  0xe3   :  { %v445_v38 = vpop.f32.mrf.mxu0 }
  0xe4   :  { %v467_v39 = vpop.f32.mrf.mxu1 }
  0xe5   :  { %v446_v40 = vpop.f32.mrf.mxu0 }
  0xe6   :  { %v468_v41 = vpop.f32.mrf.mxu1  ;;  %v447_v42 = vadd.f32 %v446_v40, %v445_v38 }
  0xe7   :  { %v469_v43 = vadd.f32 %v468_v41, %v467_v39  ;;  %v448_v45 = vpop.f32.mrf.mxu0 }
  0xe8   :  { %v470_v46 = vpop.f32.mrf.mxu1 }
  0xe9   :  { %v365_v47 = vadd.f32 %v469_v43, %v447_v42  ;;  %v449_v49 = vpop.f32.mrf.mxu0 }
  0xea   :  { %v471_v50 = vpop.f32.mrf.mxu1 }
  0xeb   :  { %v377_v51 = vmul.f32 %v427_v44, %v365_v47 }
  0xed   :  { %v385_v52 = vadd.f32 %v428_v48, %v377_v51 }
  0xef   :  { %386 = vst [vmem:[%s649_s4] sm:$0xff] %v385_v52 }

// kernel: two_step_vgg_forward.11
= control target key start
LH: loop header
LB: loop body
LE: loop exit
PB: predicated region body
PF: predicated region fallthrough
CT: control target
= control target key end

     0   :  { %s10859_s15 = smov 0   ;;  %s10861_s16 = smov 0   ;;  %s12238_s0 = inlined_call_operand.vmem [shape: bf16[8,73728], index: 0, kind: input, shape index: {}]   ;;  %s12239_s1 = inlined_call_operand.vmem [shape: bf16[73728,512], index: 1, kind: input, shape index: {}]   ;;  %s12240_s2 = inlined_call_operand.vmem [shape: f32[1,512], index: 2, kind: input, shape index: {}]   ;;  %s12241_s3 = inlined_call_operand.vmem [shape: f32[1,512], index: 3, kind: input, shape index: {}]   ;;  %s12242_s4 = inlined_call_operand.vmem [shape: bf16[8,512], index: 4, kind: output, shape index: {}]  }
   0x1   :  { %s10863_s17 = smov 0  }
   0x2 LB: > { %s26_s18 = sadd.s32 1, %s10827_s16  ;;  %p8143_p0 = scmp.ge.s32.totalorder %s10831_s17, 1  ;;  %s10831_s17 = sphi %s10863_s17, %s14_s17   ;;  %s10827_s16 = sphi %s10861_s16, %s12244_s16   ;;  %s10823_s15 = sphi %s10859_s15, %s12243_s15  }
   0x3   : > { %p27_p1 = scmp.ge.s32.totalorder %s26_s18, 18  ;;  %p229_p2 = scmp.lt.s32.totalorder %s10831_s17, 19 }
   0x5   : > { %s12246_s18 = smov (%p27_p1, %s26_s18), 0  ;;  %p230_p3 = pnand %p8143_p0, %p229_p2 }
   0x6   : > { %s8144_s19 = sshll.u32 (!%p230_p3), %s10823_s15, 5  ;;  %s8146_s20 = sshll.u32 (!%p230_p3), %s10823_s15, 9 }
   0x7   : > { %233 = sbr.rel (%p230_p3) target bundleno = 1268 (0x4f4), region = 36  ;;  %p284_p4 = scmp.lt.s32.totalorder (!%p230_p3), %s8144_s19, 575 }
   0x8   : > { %p293_p5 = scmp.lt.s32.totalorder (!%p230_p3), %s8146_s20, 9215  ;;  %p8149_p6 = scmp.ne.s32.totalorder (!%p230_p3), %s10823_s15, 0 }
   0xc   : > { %s12248_s19 = smov (!%p284_p4, %s8144_s19), 575  ;;  %s12250_s20 = smov (!%p293_p5, %s8146_s20), 9215 }
   0xd   : > { %s8145_s21 = sshll.u32 %s12248_s19, 2  ;;  %s9213_s25 = sshll.u32 %s12250_s20, 4 }
   0xe   : > { %s10884_s24 = scalar_lea.vmem %s12238_s0, %s8145_s21  ;;  %s10889_s28 = scalar_lea.vmem %s12239_s1, %s9213_s25 }
   0xf   : > { %326 = sbr.rel (%p8149_p6) target bundleno = 23 (0x17), region = 40 }
  0x14   : > { %v10833_v0 = vmov 0.0  }
  0x15   : > { %327 = vst [vmem:[#allocation2 + $0x10] sm:$0xff] %v10833_v0  ;;  %328 = vst [vmem:[#allocation2] sm:$0xff] %v10833_v0 }
  0x16   : > { %329 = vst [vmem:[#allocation2 + $0x18] sm:$0xff] %v10833_v0  ;;  %330 = vst [vmem:[#allocation2 + $0x8] sm:$0xff] %v10833_v0 }
  0x17 PF: > { %v9241_v1 = vld [vmem:[%s10889_s28 + $0xe4] ss:$16 sps:$4 sm:$0xff]   ;;  %v9245_v3 = vld [vmem:[%s10889_s28 + $0xe0] ss:$16 sps:$4 sm:$0xff]   ;;  %v336_v49 = vld [vmem:[%s10884_s24 + $0x8] sm:$0xff]  ;;  %p9206_p7 = scmp.ne.s32.totalorder %s10823_s15, 17 }
  0x18   : > { %v9243_v2 = vld [vmem:[%s10889_s28 + $0x2e4] ss:$16 sps:$4 sm:$0xff]   ;;  %6607 = vmatprep.subr.bf16.mxu0 %v9241_v1  ;;  %v9246_v4 = vld [vmem:[%s10889_s28 + $0x2e0] ss:$16 sps:$4 sm:$0xff]   ;;  %v10944_v52 = vcombine.high %v336_v49, %v336_v49 }
  0x19   : > { %6648 = vmatprep.subr.bf16.mxu1 %v9243_v2  ;;  %v9247_v5 = vld [vmem:[%s10889_s28 + $0xc4] ss:$16 sps:$4 sm:$0xff]   ;;  %6608 = vmatpush1.bf16.msra.mxu0 %v9245_v3  ;;  %v9251_v7 = vld [vmem:[%s10889_s28 + $0xc0] ss:$16 sps:$4 sm:$0xff]  }
  0x1a   : > { %6649 = vmatpush1.bf16.msra.mxu1 %v9246_v4  ;;  %v9249_v6 = vld [vmem:[%s10889_s28 + $0x2c4] ss:$16 sps:$4 sm:$0xff]   ;;  %6609 = vmatprep.subr.bf16.mxu0 %v9247_v5  ;;  %v9252_v8 = vld [vmem:[%s10889_s28 + $0x2c0] ss:$16 sps:$4 sm:$0xff]  }
  0x1b   : > { %6650 = vmatprep.subr.bf16.mxu1 %v9249_v6  ;;  %v9253_v9 = vld [vmem:[%s10889_s28 + $0xa4] ss:$16 sps:$4 sm:$0xff]   ;;  %v9257_v11 = vld [vmem:[%s10889_s28 + $0xa0] ss:$16 sps:$4 sm:$0xff]   ;;  %6680 = vmatprep.mubr.bf16.mxu1 %v10944_v52 }
  0x1c   : > { %v9255_v10 = vld [vmem:[%s10889_s28 + $0x2a4] ss:$16 sps:$4 sm:$0xff]   ;;  %v9258_v12 = vld [vmem:[%s10889_s28 + $0x2a0] ss:$16 sps:$4 sm:$0xff]  }
  0x1d   : > { %6610 = vmatpush1.bf16.msra.mxu0 %v9251_v7  ;;  %v9259_v13 = vld [vmem:[%s10889_s28 + $0x84] ss:$16 sps:$4 sm:$0xff]   ;;  %v9263_v15 = vld [vmem:[%s10889_s28 + $0x80] ss:$16 sps:$4 sm:$0xff]  }
  0x1e   : > { %6651 = vmatpush1.bf16.msra.mxu1 %v9252_v8  ;;  %6611 = vmatprep.subr.bf16.mxu0 %v9253_v9  ;;  %v9261_v14 = vld [vmem:[%s10889_s28 + $0x284] ss:$16 sps:$4 sm:$0xff]   ;;  %v9264_v16 = vld [vmem:[%s10889_s28 + $0x280] ss:$16 sps:$4 sm:$0xff]   ;;  %v10968_v8 = vcombine.low %v336_v49, %v336_v49 }
  0x1f   : > { %6652 = vmatprep.subr.bf16.mxu1 %v9255_v10  ;;  %v9265_v17 = vld [vmem:[%s10889_s28 + $0x64] ss:$16 sps:$4 sm:$0xff]   ;;  %v9269_v19 = vld [vmem:[%s10889_s28 + $0x60] ss:$16 sps:$4 sm:$0xff]  }
  0x20   : > { %v9267_v18 = vld [vmem:[%s10889_s28 + $0x264] ss:$16 sps:$4 sm:$0xff]   ;;  %v9270_v20 = vld [vmem:[%s10889_s28 + $0x260] ss:$16 sps:$4 sm:$0xff]  }
  0x21   : > { %6612 = vmatpush1.bf16.msra.mxu0 %v9257_v11  ;;  %v9271_v21 = vld [vmem:[%s10889_s28 + $0x44] ss:$16 sps:$4 sm:$0xff]   ;;  %v9275_v23 = vld [vmem:[%s10889_s28 + $0x40] ss:$16 sps:$4 sm:$0xff]  }
  0x22   : > { %6653 = vmatpush1.bf16.msra.mxu1 %v9258_v12  ;;  %6613 = vmatprep.subr.bf16.mxu0 %v9259_v13  ;;  %v9273_v22 = vld [vmem:[%s10889_s28 + $0x244] ss:$16 sps:$4 sm:$0xff]   ;;  %v9276_v24 = vld [vmem:[%s10889_s28 + $0x240] ss:$16 sps:$4 sm:$0xff]  }
  0x23   : > { %6654 = vmatprep.subr.bf16.mxu1 %v9261_v14  ;;  %v9277_v25 = vld [vmem:[%s10889_s28 + $0x24] ss:$16 sps:$4 sm:$0xff]   ;;  %v9281_v27 = vld [vmem:[%s10889_s28 + $0x20] ss:$16 sps:$4 sm:$0xff]  }
  0x24   : > { %v9279_v26 = vld [vmem:[%s10889_s28 + $0x224] ss:$16 sps:$4 sm:$0xff]   ;;  %v9282_v28 = vld [vmem:[%s10889_s28 + $0x220] ss:$16 sps:$4 sm:$0xff]  }
  0x25   : > { %6614 = vmatpush1.bf16.msra.mxu0 %v9263_v15  ;;  %v9283_v29 = vld [vmem:[%s10889_s28 + $0x4] ss:$16 sps:$4 sm:$0xff]   ;;  %v9287_v31 = vld [vmem:[%s10889_s28] ss:$16 sps:$4 sm:$0xff]  }
  0x26   : > { %6655 = vmatpush1.bf16.msra.mxu1 %v9264_v16  ;;  %6615 = vmatprep.subr.bf16.mxu0 %v9265_v17  ;;  %v9285_v30 = vld [vmem:[%s10889_s28 + $0x204] ss:$16 sps:$4 sm:$0xff]   ;;  %v9288_v32 = vld [vmem:[%s10889_s28 + $0x200] ss:$16 sps:$4 sm:$0xff]  }
  0x27   : > { %6656 = vmatprep.subr.bf16.mxu1 %v9267_v18  ;;  %v9289_v33 = vld [vmem:[%s10889_s28 + $0x1e4] ss:$16 sps:$4 sm:$0xff]   ;;  %v9293_v35 = vld [vmem:[%s10889_s28 + $0x1e0] ss:$16 sps:$4 sm:$0xff]  }
  0x28   : > { %v9291_v34 = vld [vmem:[%s10889_s28 + $0x3e4] ss:$16 sps:$4 sm:$0xff]   ;;  %v9294_v36 = vld [vmem:[%s10889_s28 + $0x3e0] ss:$16 sps:$4 sm:$0xff]  }
  0x29   : > { %6616 = vmatpush1.bf16.msra.mxu0 %v9269_v19  ;;  %v9295_v37 = vld [vmem:[%s10889_s28 + $0x1c4] ss:$16 sps:$4 sm:$0xff]   ;;  %v9299_v39 = vld [vmem:[%s10889_s28 + $0x1c0] ss:$16 sps:$4 sm:$0xff]  }
  0x2a   : > { %6657 = vmatpush1.bf16.msra.mxu1 %v9270_v20  ;;  %6617 = vmatprep.subr.bf16.mxu0 %v9271_v21  ;;  %v9297_v38 = vld [vmem:[%s10889_s28 + $0x3c4] ss:$16 sps:$4 sm:$0xff]   ;;  %v9300_v40 = vld [vmem:[%s10889_s28 + $0x3c0] ss:$16 sps:$4 sm:$0xff]  }
  0x2b   : > { %6658 = vmatprep.subr.bf16.mxu1 %v9273_v22  ;;  %v9301_v41 = vld [vmem:[%s10889_s28 + $0x1a4] ss:$16 sps:$4 sm:$0xff]   ;;  %v9305_v43 = vld [vmem:[%s10889_s28 + $0x1a0] ss:$16 sps:$4 sm:$0xff]  }
  0x2c   : > { %v9303_v42 = vld [vmem:[%s10889_s28 + $0x3a4] ss:$16 sps:$4 sm:$0xff]   ;;  %v9306_v44 = vld [vmem:[%s10889_s28 + $0x3a0] ss:$16 sps:$4 sm:$0xff]  }
  0x2d   : > { %6618 = vmatpush1.bf16.msra.mxu0 %v9275_v23  ;;  %v9307_v45 = vld [vmem:[%s10889_s28 + $0x184] ss:$16 sps:$4 sm:$0xff]   ;;  %v9311_v50 = vld [vmem:[%s10889_s28 + $0x180] ss:$16 sps:$4 sm:$0xff]  }
  0x2e   : > { %6659 = vmatpush1.bf16.msra.mxu1 %v9276_v24  ;;  %6619 = vmatprep.subr.bf16.mxu0 %v9277_v25  ;;  %v9309_v46 = vld [vmem:[%s10889_s28 + $0x384] ss:$16 sps:$4 sm:$0xff]   ;;  %v9312_v51 = vld [vmem:[%s10889_s28 + $0x380] ss:$16 sps:$4 sm:$0xff]  }
  0x2f   : > { %6660 = vmatprep.subr.bf16.mxu1 %v9279_v26  ;;  %v335_v47 = vld [vmem:[%s10884_s24] sm:$0xff] }
  0x30   : > { %v10939_v48 = vcombine.high %v335_v47, %v335_v47  ;;  %v9313_v53 = vld [vmem:[%s10889_s28 + $0x164] ss:$16 sps:$4 sm:$0xff]   ;;  %v9317_v55 = vld [vmem:[%s10889_s28 + $0x160] ss:$16 sps:$4 sm:$0xff]   ;;  %v10966_v7 = vcombine.low %v335_v47, %v335_v47 }
  0x31   : > { %6620 = vmatpush1.bf16.msra.mxu0 %v9281_v27  ;;  %v9315_v54 = vld [vmem:[%s10889_s28 + $0x364] ss:$16 sps:$4 sm:$0xff]   ;;  %v9318_v56 = vld [vmem:[%s10889_s28 + $0x360] ss:$16 sps:$4 sm:$0xff]  }
  0x32   : > { %6661 = vmatpush1.bf16.msra.mxu1 %v9282_v28  ;;  %6621 = vmatprep.subr.bf16.mxu0 %v9283_v29  ;;  %v9319_v57 = vld [vmem:[%s10889_s28 + $0x144] ss:$16 sps:$4 sm:$0xff]   ;;  %v9323_v59 = vld [vmem:[%s10889_s28 + $0x140] ss:$16 sps:$4 sm:$0xff]  }
  0x33   : > { %6662 = vmatprep.subr.bf16.mxu1 %v9285_v30  ;;  %6639 = vmatprep.mubr.bf16.mxu0 %v10939_v48  ;;  %v9321_v58 = vld [vmem:[%s10889_s28 + $0x344] ss:$16 sps:$4 sm:$0xff]   ;;  %v9324_v60 = vld [vmem:[%s10889_s28 + $0x340] ss:$16 sps:$4 sm:$0xff]  }
  0x34   : > { %v9325_v61 = vld [vmem:[%s10889_s28 + $0x124] ss:$16 sps:$4 sm:$0xff]   ;;  %v9329_v63 = vld [vmem:[%s10889_s28 + $0x120] ss:$16 sps:$4 sm:$0xff]  }
  0x35   : > { %6622 = vmatpush1.bf16.msra.mxu0 %v9287_v31  ;;  %v9327_v62 = vld [vmem:[%s10889_s28 + $0x324] ss:$16 sps:$4 sm:$0xff]   ;;  %v9330_v0 = vld [vmem:[%s10889_s28 + $0x320] ss:$16 sps:$4 sm:$0xff]  }
  0x36   : > { %6663 = vmatpush1.bf16.msra.mxu1 %v9288_v32  ;;  %6623 = vmatprep.subr.bf16.mxu0 %v9289_v33  ;;  %v9331_v1 = vld [vmem:[%s10889_s28 + $0x104] ss:$16 sps:$4 sm:$0xff]   ;;  %v9335_v3 = vld [vmem:[%s10889_s28 + $0x100] ss:$16 sps:$4 sm:$0xff]  }
  0x37   : > { %6664 = vmatprep.subr.bf16.mxu1 %v9291_v34  ;;  %v9333_v2 = vld [vmem:[%s10889_s28 + $0x304] ss:$16 sps:$4 sm:$0xff]   ;;  %v9336_v4 = vld [vmem:[%s10889_s28 + $0x300] ss:$16 sps:$4 sm:$0xff]   ;;  %v11000_v34 = vld [vmem:[%s10884_s24 + $0x18] sm:$0xff] }
  0x38   : > { %v9343_v5 = vld [vmem:[%s10889_s28 + $0x4e4] ss:$16 sps:$4 sm:$0xff]   ;;  %v9341_v9 = vld [vmem:[%s10889_s28 + $0x4e0] ss:$16 sps:$4 sm:$0xff]  }
  0x39   : > { %6624 = vmatpush2.bf16.msra.mxu0 %v9293_v35  ;;  %v9346_v6 = vld [vmem:[%s10889_s28 + $0x6e4] ss:$16 sps:$4 sm:$0xff]   ;;  %v9344_v10 = vld [vmem:[%s10889_s28 + $0x6e0] ss:$16 sps:$4 sm:$0xff]  }
  0x3a   : > { %6665 = vmatpush2.bf16.msra.mxu1 %v9294_v36  ;;  %6625 = vmatprep.subr.bf16.mxu0 %v9295_v37  ;;  %v9349_v11 = vld [vmem:[%s10889_s28 + $0x4c4] ss:$16 sps:$4 sm:$0xff]   ;;  %v9347_v13 = vld [vmem:[%s10889_s28 + $0x4c0] ss:$16 sps:$4 sm:$0xff]  }
  0x3b   : > { %6666 = vmatprep.subr.bf16.mxu1 %v9297_v38  ;;  %v9352_v12 = vld [vmem:[%s10889_s28 + $0x6c4] ss:$16 sps:$4 sm:$0xff]   ;;  %v9350_v14 = vld [vmem:[%s10889_s28 + $0x6c0] ss:$16 sps:$4 sm:$0xff]   ;;  %v11010_v38 = vcombine.high %v11000_v34, %v11000_v34 }
  0x3c   : > { %v9355_v15 = vld [vmem:[%s10889_s28 + $0x4a4] ss:$16 sps:$4 sm:$0xff]   ;;  %v9353_v17 = vld [vmem:[%s10889_s28 + $0x4a0] ss:$16 sps:$4 sm:$0xff]  }
  0x3d   : > { %6626 = vmatpush2.bf16.msra.mxu0 %v9299_v39  ;;  %v9358_v16 = vld [vmem:[%s10889_s28 + $0x6a4] ss:$16 sps:$4 sm:$0xff]   ;;  %v9356_v18 = vld [vmem:[%s10889_s28 + $0x6a0] ss:$16 sps:$4 sm:$0xff]  }
  0x3e   : > { %6667 = vmatpush2.bf16.msra.mxu1 %v9300_v40  ;;  %6627 = vmatprep.subr.bf16.mxu0 %v9301_v41  ;;  %v9361_v19 = vld [vmem:[%s10889_s28 + $0x484] ss:$16 sps:$4 sm:$0xff]   ;;  %v9359_v21 = vld [vmem:[%s10889_s28 + $0x480] ss:$16 sps:$4 sm:$0xff]  }
  0x3f   : > { %6668 = vmatprep.subr.bf16.mxu1 %v9303_v42  ;;  %v9364_v20 = vld [vmem:[%s10889_s28 + $0x684] ss:$16 sps:$4 sm:$0xff]   ;;  %v9362_v22 = vld [vmem:[%s10889_s28 + $0x680] ss:$16 sps:$4 sm:$0xff]  }
  0x40   : > { %v9367_v23 = vld [vmem:[%s10889_s28 + $0x464] ss:$16 sps:$4 sm:$0xff]   ;;  %v9365_v25 = vld [vmem:[%s10889_s28 + $0x460] ss:$16 sps:$4 sm:$0xff]  }
  0x41   : > { %6628 = vmatpush2.bf16.msra.mxu0 %v9305_v43  ;;  %v9370_v24 = vld [vmem:[%s10889_s28 + $0x664] ss:$16 sps:$4 sm:$0xff]   ;;  %v9368_v26 = vld [vmem:[%s10889_s28 + $0x660] ss:$16 sps:$4 sm:$0xff]  }
  0x42   : > { %6669 = vmatpush2.bf16.msra.mxu1 %v9306_v44  ;;  %6629 = vmatprep.subr.bf16.mxu0 %v9307_v45  ;;  %v9373_v27 = vld [vmem:[%s10889_s28 + $0x444] ss:$16 sps:$4 sm:$0xff]   ;;  %v9371_v29 = vld [vmem:[%s10889_s28 + $0x440] ss:$16 sps:$4 sm:$0xff]  }
  0x43   : > { %6670 = vmatprep.subr.bf16.mxu1 %v9309_v46  ;;  %v9376_v28 = vld [vmem:[%s10889_s28 + $0x644] ss:$16 sps:$4 sm:$0xff]   ;;  %v9374_v30 = vld [vmem:[%s10889_s28 + $0x640] ss:$16 sps:$4 sm:$0xff]  }
  0x44   : > { %v9379_v31 = vld [vmem:[%s10889_s28 + $0x424] ss:$16 sps:$4 sm:$0xff]   ;;  %v9377_v35 = vld [vmem:[%s10889_s28 + $0x420] ss:$16 sps:$4 sm:$0xff]  }
  0x45   : > { %6630 = vmatpush2.bf16.msra.mxu0 %v9311_v50  ;;  %v9382_v32 = vld [vmem:[%s10889_s28 + $0x624] ss:$16 sps:$4 sm:$0xff]   ;;  %v9380_v36 = vld [vmem:[%s10889_s28 + $0x620] ss:$16 sps:$4 sm:$0xff]  }
  0x46   : > { %6671 = vmatpush2.bf16.msra.mxu1 %v9312_v51  ;;  %6631 = vmatprep.subr.bf16.mxu0 %v9313_v53  ;;  %v10997_v33 = vld [vmem:[%s10884_s24 + $0x10] sm:$0xff] }
  0x47   : > { %6672 = vmatprep.subr.bf16.mxu1 %v9315_v54  ;;  %v11006_v37 = vcombine.high %v10997_v33, %v10997_v33  ;;  %v9385_v39 = vld [vmem:[%s10889_s28 + $0x404] ss:$16 sps:$4 sm:$0xff]   ;;  %v9383_v41 = vld [vmem:[%s10889_s28 + $0x400] ss:$16 sps:$4 sm:$0xff]  }
  0x48   : > { %v9388_v40 = vld [vmem:[%s10889_s28 + $0x604] ss:$16 sps:$4 sm:$0xff]   ;;  %v9386_v42 = vld [vmem:[%s10889_s28 + $0x600] ss:$16 sps:$4 sm:$0xff]  }
  0x49   : > { %6632 = vmatpush2.bf16.msra.mxu0 %v9317_v55  ;;  %v9391_v43 = vld [vmem:[%s10889_s28 + $0x5e4] ss:$16 sps:$4 sm:$0xff]   ;;  %v9389_v45 = vld [vmem:[%s10889_s28 + $0x5e0] ss:$16 sps:$4 sm:$0xff]  }
  0x4a   : > { %6673 = vmatpush2.bf16.msra.mxu1 %v9318_v56  ;;  %6633 = vmatprep.subr.bf16.mxu0 %v9319_v57  ;;  %v9394_v44 = vld [vmem:[%s10889_s28 + $0x7e4] ss:$16 sps:$4 sm:$0xff]   ;;  %v9392_v46 = vld [vmem:[%s10889_s28 + $0x7e0] ss:$16 sps:$4 sm:$0xff]  }
  0x4b   : > { %6674 = vmatprep.subr.bf16.mxu1 %v9321_v58  ;;  %v9397_v47 = vld [vmem:[%s10889_s28 + $0x5c4] ss:$16 sps:$4 sm:$0xff]   ;;  %v9395_v50 = vld [vmem:[%s10889_s28 + $0x5c0] ss:$16 sps:$4 sm:$0xff]  }
  0x4c   : > { %v9400_v49 = vld [vmem:[%s10889_s28 + $0x7c4] ss:$16 sps:$4 sm:$0xff]   ;;  %v9398_v51 = vld [vmem:[%s10889_s28 + $0x7c0] ss:$16 sps:$4 sm:$0xff]  }
  0x4d   : > { %6634 = vmatpush2.bf16.msra.mxu0 %v9323_v59  ;;  %v9403_v53 = vld [vmem:[%s10889_s28 + $0x5a4] ss:$16 sps:$4 sm:$0xff]   ;;  %v9401_v55 = vld [vmem:[%s10889_s28 + $0x5a0] ss:$16 sps:$4 sm:$0xff]  }
  0x4e   : > { %6675 = vmatpush2.bf16.msra.mxu1 %v9324_v60  ;;  %6635 = vmatprep.subr.bf16.mxu0 %v9325_v61  ;;  %v9406_v54 = vld [vmem:[%s10889_s28 + $0x7a4] ss:$16 sps:$4 sm:$0xff]   ;;  %v9404_v56 = vld [vmem:[%s10889_s28 + $0x7a0] ss:$16 sps:$4 sm:$0xff]  }
  0x4f   : > { %6676 = vmatprep.subr.bf16.mxu1 %v9327_v62  ;;  %v9409_v57 = vld [vmem:[%s10889_s28 + $0x584] ss:$16 sps:$4 sm:$0xff]   ;;  %v9407_v59 = vld [vmem:[%s10889_s28 + $0x580] ss:$16 sps:$4 sm:$0xff]  }
  0x50   : > { %v9412_v58 = vld [vmem:[%s10889_s28 + $0x784] ss:$16 sps:$4 sm:$0xff]   ;;  %v9410_v60 = vld [vmem:[%s10889_s28 + $0x780] ss:$16 sps:$4 sm:$0xff]  }
  0x51   : > { %6636 = vmatpush2.bf16.msra.mxu0 %v9329_v63  ;;  %v9415_v61 = vld [vmem:[%s10889_s28 + $0x564] ss:$16 sps:$4 sm:$0xff]   ;;  %v9413_v63 = vld [vmem:[%s10889_s28 + $0x560] ss:$16 sps:$4 sm:$0xff]  }
  0x52   : > { %6677 = vmatpush2.bf16.msra.mxu1 %v9330_v0  ;;  %6637 = vmatprep.subr.bf16.mxu0 %v9331_v1  ;;  %v9418_v62 = vld [vmem:[%s10889_s28 + $0x764] ss:$16 sps:$4 sm:$0xff]   ;;  %v9416_v0 = vld [vmem:[%s10889_s28 + $0x760] ss:$16 sps:$4 sm:$0xff]  }
  0x53   : > { %6678 = vmatprep.subr.bf16.mxu1 %v9333_v2  ;;  %v9421_v1 = vld [vmem:[%s10889_s28 + $0x544] ss:$16 sps:$4 sm:$0xff]  }
  0x54   : > { %v9424_v2 = vld [vmem:[%s10889_s28 + $0x744] ss:$16 sps:$4 sm:$0xff]  }
  0x55   : > { %6638 = vmatpush2.bf16.msra.mxu0 %v9335_v3  ;;  %v9419_v3 = vld [vmem:[%s10889_s28 + $0x540] ss:$16 sps:$4 sm:$0xff]  }
  0x56   : > { %6679 = vmatpush2.bf16.msra.mxu1 %v9336_v4  ;;  %6689 = vmatprep.subr.bf16.mxu0 %v9343_v5  ;;  %v9422_v4 = vld [vmem:[%s10889_s28 + $0x740] ss:$16 sps:$4 sm:$0xff]   ;;  %v9427_v5 = vld [vmem:[%s10889_s28 + $0x524] ss:$16 sps:$4 sm:$0xff]  }
  0x57   : > { %6730 = vmatprep.subr.bf16.mxu1 %v9346_v6  ;;  %v9430_v6 = vld [vmem:[%s10889_s28 + $0x724] ss:$16 sps:$4 sm:$0xff]  }
  0x58   : > { %6640 = vmatmul.mubr.bf16.vlgmr.msra.gmra.mxu0 %v10966_v7 }
  0x59   : > { %6681 = vmatmul.mubr.bf16.vlgmr.msra.gmra.mxu1 %v10968_v8  ;;  %6690 = vmatpush1.bf16.msra.mxu0 %v9341_v9  ;;  %v9425_v9 = vld [vmem:[%s10889_s28 + $0x520] ss:$16 sps:$4 sm:$0xff]  }
  0x5a   : > { %6731 = vmatpush1.bf16.msra.mxu1 %v9344_v10  ;;  %6691 = vmatprep.subr.bf16.mxu0 %v9349_v11  ;;  %v9428_v10 = vld [vmem:[%s10889_s28 + $0x720] ss:$16 sps:$4 sm:$0xff]   ;;  %v9433_v11 = vld [vmem:[%s10889_s28 + $0x504] ss:$16 sps:$4 sm:$0xff]  }
  0x5b   : > { %6732 = vmatprep.subr.bf16.mxu1 %v9352_v12  ;;  %6721 = vmatprep.mubr.bf16.mxu0 %v11006_v37  ;;  %v9436_v12 = vld [vmem:[%s10889_s28 + $0x704] ss:$16 sps:$4 sm:$0xff]  }
  0x5c   : > { %6762 = vmatprep.mubr.bf16.mxu1 %v11010_v38 }
  0x5d   : > { %6692 = vmatpush1.bf16.msra.mxu0 %v9347_v13  ;;  %v9431_v13 = vld [vmem:[%s10889_s28 + $0x500] ss:$16 sps:$4 sm:$0xff]  }
  0x5e   : > { %6733 = vmatpush1.bf16.msra.mxu1 %v9350_v14  ;;  %6693 = vmatprep.subr.bf16.mxu0 %v9355_v15  ;;  %v9434_v14 = vld [vmem:[%s10889_s28 + $0x700] ss:$16 sps:$4 sm:$0xff]   ;;  %v9443_v15 = vld [vmem:[%s10889_s28 + $0x8e4] ss:$16 sps:$4 sm:$0xff]  }
  0x5f   : > { %6734 = vmatprep.subr.bf16.mxu1 %v9358_v16  ;;  %v9446_v16 = vld [vmem:[%s10889_s28 + $0xae4] ss:$16 sps:$4 sm:$0xff]  }
  0x61   : > { %6694 = vmatpush1.bf16.msra.mxu0 %v9353_v17  ;;  %v11054_v17 = vcombine.low %v10997_v33, %v10997_v33  ;;  %v9461_v33 = vld [vmem:[%s10889_s28 + $0x884] ss:$16 sps:$4 sm:$0xff]  }
  0x62   : > { %6735 = vmatpush1.bf16.msra.mxu1 %v9356_v18  ;;  %6695 = vmatprep.subr.bf16.mxu0 %v9361_v19  ;;  %v11058_v18 = vcombine.low %v11000_v34, %v11000_v34  ;;  %v9441_v19 = vld [vmem:[%s10889_s28 + $0x8e0] ss:$16 sps:$4 sm:$0xff]   ;;  %v9464_v34 = vld [vmem:[%s10889_s28 + $0xa84] ss:$16 sps:$4 sm:$0xff]  }
  0x63   : > { %6736 = vmatprep.subr.bf16.mxu1 %v9364_v20  ;;  %v9444_v20 = vld [vmem:[%s10889_s28 + $0xae0] ss:$16 sps:$4 sm:$0xff]  }
  0x65   : > { %6696 = vmatpush1.bf16.msra.mxu0 %v9359_v21  ;;  %v9449_v21 = vld [vmem:[%s10889_s28 + $0x8c4] ss:$16 sps:$4 sm:$0xff]  }
  0x66   : > { %6737 = vmatpush1.bf16.msra.mxu1 %v9362_v22  ;;  %6697 = vmatprep.subr.bf16.mxu0 %v9367_v23  ;;  %v9452_v22 = vld [vmem:[%s10889_s28 + $0xac4] ss:$16 sps:$4 sm:$0xff]  }
  0x67   : > { %6738 = vmatprep.subr.bf16.mxu1 %v9370_v24  ;;  %v11065_v23 = vld [vmem:[%s10884_s24 + $0x20] sm:$0xff]  ;;  %v11068_v24 = vld [vmem:[%s10884_s24 + $0x28] sm:$0xff] }
  0x69   : > { %6698 = vmatpush1.bf16.msra.mxu0 %v9365_v25  ;;  %v11072_v25 = vcombine.high %v11065_v23, %v11065_v23 }
  0x6a   : > { %6739 = vmatpush1.bf16.msra.mxu1 %v9368_v26  ;;  %6699 = vmatprep.subr.bf16.mxu0 %v9373_v27  ;;  %v11076_v26 = vcombine.high %v11068_v24, %v11068_v24  ;;  %v9447_v27 = vld [vmem:[%s10889_s28 + $0x8c0] ss:$16 sps:$4 sm:$0xff]  }
  0x6b   : > { %6740 = vmatprep.subr.bf16.mxu1 %v9376_v28  ;;  %v9450_v28 = vld [vmem:[%s10889_s28 + $0xac0] ss:$16 sps:$4 sm:$0xff]  }
  0x6d   : > { %6700 = vmatpush1.bf16.msra.mxu0 %v9371_v29  ;;  %v9455_v29 = vld [vmem:[%s10889_s28 + $0x8a4] ss:$16 sps:$4 sm:$0xff]  }
  0x6e   : > { %6741 = vmatpush1.bf16.msra.mxu1 %v9374_v30  ;;  %6701 = vmatprep.subr.bf16.mxu0 %v9379_v31  ;;  %v9458_v30 = vld [vmem:[%s10889_s28 + $0xaa4] ss:$16 sps:$4 sm:$0xff]   ;;  %v9453_v31 = vld [vmem:[%s10889_s28 + $0x8a0] ss:$16 sps:$4 sm:$0xff]  }
  0x6f   : > { %6742 = vmatprep.subr.bf16.mxu1 %v9382_v32  ;;  %v9456_v32 = vld [vmem:[%s10889_s28 + $0xaa0] ss:$16 sps:$4 sm:$0xff]  }
  0x71   : > { %6702 = vmatpush1.bf16.msra.mxu0 %v9377_v35  ;;  %v9459_v35 = vld [vmem:[%s10889_s28 + $0x880] ss:$16 sps:$4 sm:$0xff]  }
  0x72   : > { %6743 = vmatpush1.bf16.msra.mxu1 %v9380_v36  ;;  %6703 = vmatprep.subr.bf16.mxu0 %v9385_v39  ;;  %v9462_v36 = vld [vmem:[%s10889_s28 + $0xa80] ss:$16 sps:$4 sm:$0xff]   ;;  %v9467_v39 = vld [vmem:[%s10889_s28 + $0x864] ss:$16 sps:$4 sm:$0xff]  }
  0x73   : > { %6744 = vmatprep.subr.bf16.mxu1 %v9388_v40  ;;  %v9470_v40 = vld [vmem:[%s10889_s28 + $0xa64] ss:$16 sps:$4 sm:$0xff]  }
  0x75   : > { %6704 = vmatpush1.bf16.msra.mxu0 %v9383_v41  ;;  %v9465_v41 = vld [vmem:[%s10889_s28 + $0x860] ss:$16 sps:$4 sm:$0xff]  }
  0x76   : > { %6745 = vmatpush1.bf16.msra.mxu1 %v9386_v42  ;;  %6705 = vmatprep.subr.bf16.mxu0 %v9391_v43  ;;  %v9468_v42 = vld [vmem:[%s10889_s28 + $0xa60] ss:$16 sps:$4 sm:$0xff]   ;;  %v9473_v43 = vld [vmem:[%s10889_s28 + $0x844] ss:$16 sps:$4 sm:$0xff]  }
  0x77   : > { %6746 = vmatprep.subr.bf16.mxu1 %v9394_v44  ;;  %v9476_v44 = vld [vmem:[%s10889_s28 + $0xa44] ss:$16 sps:$4 sm:$0xff]  }
  0x79   : > { %6706 = vmatpush2.bf16.msra.mxu0 %v9389_v45  ;;  %v9471_v45 = vld [vmem:[%s10889_s28 + $0x840] ss:$16 sps:$4 sm:$0xff]  }
  0x7a   : > { %6747 = vmatpush2.bf16.msra.mxu1 %v9392_v46  ;;  %6707 = vmatprep.subr.bf16.mxu0 %v9397_v47  ;;  %v9474_v46 = vld [vmem:[%s10889_s28 + $0xa40] ss:$16 sps:$4 sm:$0xff]   ;;  %v9479_v47 = vld [vmem:[%s10889_s28 + $0x824] ss:$16 sps:$4 sm:$0xff]  }
  0x7b   : > { %6748 = vmatprep.subr.bf16.mxu1 %v9400_v49  ;;  %v9482_v49 = vld [vmem:[%s10889_s28 + $0xa24] ss:$16 sps:$4 sm:$0xff]  }
  0x7d   : > { %6708 = vmatpush2.bf16.msra.mxu0 %v9395_v50  ;;  %v9477_v50 = vld [vmem:[%s10889_s28 + $0x820] ss:$16 sps:$4 sm:$0xff]  }
  0x7e   : > { %6749 = vmatpush2.bf16.msra.mxu1 %v9398_v51  ;;  %6709 = vmatprep.subr.bf16.mxu0 %v9403_v53  ;;  %v9480_v51 = vld [vmem:[%s10889_s28 + $0xa20] ss:$16 sps:$4 sm:$0xff]   ;;  %v9485_v53 = vld [vmem:[%s10889_s28 + $0x804] ss:$16 sps:$4 sm:$0xff]  }
  0x7f   : > { %6750 = vmatprep.subr.bf16.mxu1 %v9406_v54  ;;  %v9488_v54 = vld [vmem:[%s10889_s28 + $0xa04] ss:$16 sps:$4 sm:$0xff]  }
  0x81   : > { %6710 = vmatpush2.bf16.msra.mxu0 %v9401_v55  ;;  %v9483_v55 = vld [vmem:[%s10889_s28 + $0x800] ss:$16 sps:$4 sm:$0xff]  }
  0x82   : > { %6751 = vmatpush2.bf16.msra.mxu1 %v9404_v56  ;;  %6711 = vmatprep.subr.bf16.mxu0 %v9409_v57  ;;  %v9486_v56 = vld [vmem:[%s10889_s28 + $0xa00] ss:$16 sps:$4 sm:$0xff]   ;;  %v9491_v57 = vld [vmem:[%s10889_s28 + $0x9e4] ss:$16 sps:$4 sm:$0xff]  }
  0x83   : > { %6752 = vmatprep.subr.bf16.mxu1 %v9412_v58  ;;  %v9494_v58 = vld [vmem:[%s10889_s28 + $0xbe4] ss:$16 sps:$4 sm:$0xff]  }
  0x85   : > { %6712 = vmatpush2.bf16.msra.mxu0 %v9407_v59  ;;  %v9489_v59 = vld [vmem:[%s10889_s28 + $0x9e0] ss:$16 sps:$4 sm:$0xff]  }
  0x86   : > { %6753 = vmatpush2.bf16.msra.mxu1 %v9410_v60  ;;  %6713 = vmatprep.subr.bf16.mxu0 %v9415_v61  ;;  %v9492_v60 = vld [vmem:[%s10889_s28 + $0xbe0] ss:$16 sps:$4 sm:$0xff]   ;;  %v9497_v61 = vld [vmem:[%s10889_s28 + $0x9c4] ss:$16 sps:$4 sm:$0xff]  }
  0x87   : > { %6754 = vmatprep.subr.bf16.mxu1 %v9418_v62  ;;  %v9500_v62 = vld [vmem:[%s10889_s28 + $0xbc4] ss:$16 sps:$4 sm:$0xff]  }
  0x89   : > { %6714 = vmatpush2.bf16.msra.mxu0 %v9413_v63  ;;  %v9495_v63 = vld [vmem:[%s10889_s28 + $0x9c0] ss:$16 sps:$4 sm:$0xff]  }
  0x8a   : > { %6755 = vmatpush2.bf16.msra.mxu1 %v9416_v0  ;;  %6715 = vmatprep.subr.bf16.mxu0 %v9421_v1  ;;  %v9498_v0 = vld [vmem:[%s10889_s28 + $0xbc0] ss:$16 sps:$4 sm:$0xff]   ;;  %v9503_v1 = vld [vmem:[%s10889_s28 + $0x9a4] ss:$16 sps:$4 sm:$0xff]  }
  0x8b   : > { %6756 = vmatprep.subr.bf16.mxu1 %v9424_v2  ;;  %v9506_v2 = vld [vmem:[%s10889_s28 + $0xba4] ss:$16 sps:$4 sm:$0xff]  }
  0x8d   : > { %6716 = vmatpush2.bf16.msra.mxu0 %v9419_v3  ;;  %v9501_v3 = vld [vmem:[%s10889_s28 + $0x9a0] ss:$16 sps:$4 sm:$0xff]  }
  0x8e   : > { %6757 = vmatpush2.bf16.msra.mxu1 %v9422_v4  ;;  %6717 = vmatprep.subr.bf16.mxu0 %v9427_v5  ;;  %v9504_v4 = vld [vmem:[%s10889_s28 + $0xba0] ss:$16 sps:$4 sm:$0xff]   ;;  %v9509_v5 = vld [vmem:[%s10889_s28 + $0x984] ss:$16 sps:$4 sm:$0xff]  }
  0x8f   : > { %6758 = vmatprep.subr.bf16.mxu1 %v9430_v6  ;;  %v9512_v6 = vld [vmem:[%s10889_s28 + $0xb84] ss:$16 sps:$4 sm:$0xff]  }
  0x91   : > { %6718 = vmatpush2.bf16.msra.mxu0 %v9425_v9  ;;  %v9507_v9 = vld [vmem:[%s10889_s28 + $0x980] ss:$16 sps:$4 sm:$0xff]  }
  0x92   : > { %6759 = vmatpush2.bf16.msra.mxu1 %v9428_v10  ;;  %6719 = vmatprep.subr.bf16.mxu0 %v9433_v11  ;;  %v9510_v10 = vld [vmem:[%s10889_s28 + $0xb80] ss:$16 sps:$4 sm:$0xff]   ;;  %v9515_v11 = vld [vmem:[%s10889_s28 + $0x964] ss:$16 sps:$4 sm:$0xff]  }
  0x93   : > { %6760 = vmatprep.subr.bf16.mxu1 %v9436_v12  ;;  %v9518_v12 = vld [vmem:[%s10889_s28 + $0xb64] ss:$16 sps:$4 sm:$0xff]  }
  0x95   : > { %6720 = vmatpush2.bf16.msra.mxu0 %v9431_v13  ;;  %v9513_v13 = vld [vmem:[%s10889_s28 + $0x960] ss:$16 sps:$4 sm:$0xff]  }
  0x96   : > { %6761 = vmatpush2.bf16.msra.mxu1 %v9434_v14  ;;  %6771 = vmatprep.subr.bf16.mxu0 %v9443_v15  ;;  %v9516_v14 = vld [vmem:[%s10889_s28 + $0xb60] ss:$16 sps:$4 sm:$0xff]   ;;  %v9521_v15 = vld [vmem:[%s10889_s28 + $0x944] ss:$16 sps:$4 sm:$0xff]  }
  0x97   : > { %6812 = vmatprep.subr.bf16.mxu1 %v9446_v16  ;;  %v9524_v16 = vld [vmem:[%s10889_s28 + $0xb44] ss:$16 sps:$4 sm:$0xff]  }
  0x98   : > { %6722 = vmatmul.mubr.bf16.vlgmr.msra.gmra.mxu0 %v11054_v17 }
  0x99   : > { %6763 = vmatmul.mubr.bf16.vlgmr.msra.gmra.mxu1 %v11058_v18  ;;  %6772 = vmatpush1.bf16.msra.mxu0 %v9441_v19  ;;  %v9519_v19 = vld [vmem:[%s10889_s28 + $0x940] ss:$16 sps:$4 sm:$0xff]  }
  0x9a   : > { %6813 = vmatpush1.bf16.msra.mxu1 %v9444_v20  ;;  %6773 = vmatprep.subr.bf16.mxu0 %v9449_v21  ;;  %v9522_v20 = vld [vmem:[%s10889_s28 + $0xb40] ss:$16 sps:$4 sm:$0xff]   ;;  %v9527_v21 = vld [vmem:[%s10889_s28 + $0x924] ss:$16 sps:$4 sm:$0xff]  }
  0x9b   : > { %6814 = vmatprep.subr.bf16.mxu1 %v9452_v22  ;;  %6803 = vmatprep.mubr.bf16.mxu0 %v11072_v25  ;;  %v9530_v22 = vld [vmem:[%s10889_s28 + $0xb24] ss:$16 sps:$4 sm:$0xff]  }
  0x9c   : > { %6844 = vmatprep.mubr.bf16.mxu1 %v11076_v26 }
  0x9d   : > { %6774 = vmatpush1.bf16.msra.mxu0 %v9447_v27  ;;  %v9525_v27 = vld [vmem:[%s10889_s28 + $0x920] ss:$16 sps:$4 sm:$0xff]  }
  0x9e   : > { %6815 = vmatpush1.bf16.msra.mxu1 %v9450_v28  ;;  %6775 = vmatprep.subr.bf16.mxu0 %v9455_v29  ;;  %v9528_v28 = vld [vmem:[%s10889_s28 + $0xb20] ss:$16 sps:$4 sm:$0xff]   ;;  %v9533_v29 = vld [vmem:[%s10889_s28 + $0x904] ss:$16 sps:$4 sm:$0xff]  }
  0x9f   : > { %6816 = vmatprep.subr.bf16.mxu1 %v9458_v30  ;;  %v9536_v30 = vld [vmem:[%s10889_s28 + $0xb04] ss:$16 sps:$4 sm:$0xff]  }
  0xa1   : > { %6776 = vmatpush1.bf16.msra.mxu0 %v9453_v31  ;;  %v9531_v31 = vld [vmem:[%s10889_s28 + $0x900] ss:$16 sps:$4 sm:$0xff]  }
  0xa2   : > { %6817 = vmatpush1.bf16.msra.mxu1 %v9456_v32  ;;  %6777 = vmatprep.subr.bf16.mxu0 %v9461_v33  ;;  %v9534_v32 = vld [vmem:[%s10889_s28 + $0xb00] ss:$16 sps:$4 sm:$0xff]   ;;  %v9543_v33 = vld [vmem:[%s10889_s28 + $0xce4] ss:$16 sps:$4 sm:$0xff]  }
  0xa3   : > { %6818 = vmatprep.subr.bf16.mxu1 %v9464_v34  ;;  %v9546_v34 = vld [vmem:[%s10889_s28 + $0xee4] ss:$16 sps:$4 sm:$0xff]  }
  0xa5   : > { %6778 = vmatpush1.bf16.msra.mxu0 %v9459_v35  ;;  %v9541_v35 = vld [vmem:[%s10889_s28 + $0xce0] ss:$16 sps:$4 sm:$0xff]  }
  0xa6   : > { %6819 = vmatpush1.bf16.msra.mxu1 %v9462_v36  ;;  %6779 = vmatprep.subr.bf16.mxu0 %v9467_v39  ;;  %v9544_v36 = vld [vmem:[%s10889_s28 + $0xee0] ss:$16 sps:$4 sm:$0xff]   ;;  %v11146_v39 = vcombine.low %v11065_v23, %v11065_v23 }
  0xa7   : > { %6820 = vmatprep.subr.bf16.mxu1 %v9470_v40  ;;  %v11150_v40 = vcombine.low %v11068_v24, %v11068_v24 }
  0xa9   : > { %6780 = vmatpush1.bf16.msra.mxu0 %v9465_v41  ;;  %v11153_v41 = vld [vmem:[%s10884_s24 + $0x30] sm:$0xff] }
  0xaa   : > { %6821 = vmatpush1.bf16.msra.mxu1 %v9468_v42  ;;  %6781 = vmatprep.subr.bf16.mxu0 %v9473_v43  ;;  %v11156_v42 = vld [vmem:[%s10884_s24 + $0x38] sm:$0xff]  ;;  %v9549_v43 = vld [vmem:[%s10889_s28 + $0xcc4] ss:$16 sps:$4 sm:$0xff]   ;;  %v11162_v23 = vcombine.high %v11153_v41, %v11153_v41 }
  0xab   : > { %6822 = vmatprep.subr.bf16.mxu1 %v9476_v44  ;;  %v9552_v44 = vld [vmem:[%s10889_s28 + $0xec4] ss:$16 sps:$4 sm:$0xff]   ;;  %v11166_v24 = vcombine.high %v11156_v42, %v11156_v42 }
  0xad   : > { %6782 = vmatpush1.bf16.msra.mxu0 %v9471_v45  ;;  %v9547_v45 = vld [vmem:[%s10889_s28 + $0xcc0] ss:$16 sps:$4 sm:$0xff]  }
  0xae   : > { %6823 = vmatpush1.bf16.msra.mxu1 %v9474_v46  ;;  %6783 = vmatprep.subr.bf16.mxu0 %v9479_v47  ;;  %v9550_v46 = vld [vmem:[%s10889_s28 + $0xec0] ss:$16 sps:$4 sm:$0xff]   ;;  %v9555_v47 = vld [vmem:[%s10889_s28 + $0xca4] ss:$16 sps:$4 sm:$0xff]  }
  0xaf   : > { %6824 = vmatprep.subr.bf16.mxu1 %v9482_v49  ;;  %v9558_v49 = vld [vmem:[%s10889_s28 + $0xea4] ss:$16 sps:$4 sm:$0xff]  }
  0xb1   : > { %6784 = vmatpush1.bf16.msra.mxu0 %v9477_v50  ;;  %v9553_v50 = vld [vmem:[%s10889_s28 + $0xca0] ss:$16 sps:$4 sm:$0xff]  }
  0xb2   : > { %6825 = vmatpush1.bf16.msra.mxu1 %v9480_v51  ;;  %6785 = vmatprep.subr.bf16.mxu0 %v9485_v53  ;;  %v9556_v51 = vld [vmem:[%s10889_s28 + $0xea0] ss:$16 sps:$4 sm:$0xff]   ;;  %v9561_v53 = vld [vmem:[%s10889_s28 + $0xc84] ss:$16 sps:$4 sm:$0xff]  }
  0xb3   : > { %6826 = vmatprep.subr.bf16.mxu1 %v9488_v54  ;;  %v9564_v54 = vld [vmem:[%s10889_s28 + $0xe84] ss:$16 sps:$4 sm:$0xff]  }
  0xb5   : > { %6786 = vmatpush1.bf16.msra.mxu0 %v9483_v55  ;;  %v9559_v55 = vld [vmem:[%s10889_s28 + $0xc80] ss:$16 sps:$4 sm:$0xff]  }
  0xb6   : > { %6827 = vmatpush1.bf16.msra.mxu1 %v9486_v56  ;;  %6787 = vmatprep.subr.bf16.mxu0 %v9491_v57  ;;  %v9562_v56 = vld [vmem:[%s10889_s28 + $0xe80] ss:$16 sps:$4 sm:$0xff]   ;;  %v9567_v57 = vld [vmem:[%s10889_s28 + $0xc64] ss:$16 sps:$4 sm:$0xff]  }
  0xb7   : > { %6828 = vmatprep.subr.bf16.mxu1 %v9494_v58  ;;  %v9570_v58 = vld [vmem:[%s10889_s28 + $0xe64] ss:$16 sps:$4 sm:$0xff]  }
  0xb9   : > { %6788 = vmatpush2.bf16.msra.mxu0 %v9489_v59  ;;  %v9565_v59 = vld [vmem:[%s10889_s28 + $0xc60] ss:$16 sps:$4 sm:$0xff]  }
  0xba   : > { %6829 = vmatpush2.bf16.msra.mxu1 %v9492_v60  ;;  %6789 = vmatprep.subr.bf16.mxu0 %v9497_v61  ;;  %v9568_v60 = vld [vmem:[%s10889_s28 + $0xe60] ss:$16 sps:$4 sm:$0xff]   ;;  %v9573_v61 = vld [vmem:[%s10889_s28 + $0xc44] ss:$16 sps:$4 sm:$0xff]  }
  0xbb   : > { %6830 = vmatprep.subr.bf16.mxu1 %v9500_v62  ;;  %v9576_v62 = vld [vmem:[%s10889_s28 + $0xe44] ss:$16 sps:$4 sm:$0xff]  }
  0xbd   : > { %6790 = vmatpush2.bf16.msra.mxu0 %v9495_v63  ;;  %v9571_v63 = vld [vmem:[%s10889_s28 + $0xc40] ss:$16 sps:$4 sm:$0xff]  }
  0xbe   : > { %6831 = vmatpush2.bf16.msra.mxu1 %v9498_v0  ;;  %6791 = vmatprep.subr.bf16.mxu0 %v9503_v1  ;;  %v9574_v0 = vld [vmem:[%s10889_s28 + $0xe40] ss:$16 sps:$4 sm:$0xff]   ;;  %v9579_v1 = vld [vmem:[%s10889_s28 + $0xc24] ss:$16 sps:$4 sm:$0xff]  }
  0xbf   : > { %6832 = vmatprep.subr.bf16.mxu1 %v9506_v2  ;;  %v9582_v2 = vld [vmem:[%s10889_s28 + $0xe24] ss:$16 sps:$4 sm:$0xff]  }
  0xc1   : > { %6792 = vmatpush2.bf16.msra.mxu0 %v9501_v3  ;;  %v9577_v3 = vld [vmem:[%s10889_s28 + $0xc20] ss:$16 sps:$4 sm:$0xff]  }
  0xc2   : > { %6833 = vmatpush2.bf16.msra.mxu1 %v9504_v4  ;;  %6793 = vmatprep.subr.bf16.mxu0 %v9509_v5  ;;  %v9580_v4 = vld [vmem:[%s10889_s28 + $0xe20] ss:$16 sps:$4 sm:$0xff]   ;;  %v9585_v5 = vld [vmem:[%s10889_s28 + $0xc04] ss:$16 sps:$4 sm:$0xff]  }
  0xc3   : > { %6834 = vmatprep.subr.bf16.mxu1 %v9512_v6  ;;  %v9588_v6 = vld [vmem:[%s10889_s28 + $0xe04] ss:$16 sps:$4 sm:$0xff]  }
  0xc5   : > { %6794 = vmatpush2.bf16.msra.mxu0 %v9507_v9  ;;  %v9583_v9 = vld [vmem:[%s10889_s28 + $0xc00] ss:$16 sps:$4 sm:$0xff]  }
  0xc6   : > { %6835 = vmatpush2.bf16.msra.mxu1 %v9510_v10  ;;  %6795 = vmatprep.subr.bf16.mxu0 %v9515_v11  ;;  %v9586_v10 = vld [vmem:[%s10889_s28 + $0xe00] ss:$16 sps:$4 sm:$0xff]   ;;  %v9591_v11 = vld [vmem:[%s10889_s28 + $0xde4] ss:$16 sps:$4 sm:$0xff]  }
  0xc7   : > { %6836 = vmatprep.subr.bf16.mxu1 %v9518_v12  ;;  %v9594_v12 = vld [vmem:[%s10889_s28 + $0xfe4] ss:$16 sps:$4 sm:$0xff]  }
  0xc9   : > { %6796 = vmatpush2.bf16.msra.mxu0 %v9513_v13  ;;  %v9589_v13 = vld [vmem:[%s10889_s28 + $0xde0] ss:$16 sps:$4 sm:$0xff]  }
  0xca   : > { %6837 = vmatpush2.bf16.msra.mxu1 %v9516_v14  ;;  %6797 = vmatprep.subr.bf16.mxu0 %v9521_v15  ;;  %v9592_v14 = vld [vmem:[%s10889_s28 + $0xfe0] ss:$16 sps:$4 sm:$0xff]   ;;  %v9597_v15 = vld [vmem:[%s10889_s28 + $0xdc4] ss:$16 sps:$4 sm:$0xff]  }
  0xcb   : > { %6838 = vmatprep.subr.bf16.mxu1 %v9524_v16  ;;  %v9600_v16 = vld [vmem:[%s10889_s28 + $0xfc4] ss:$16 sps:$4 sm:$0xff]  }
  0xcd   : > { %6798 = vmatpush2.bf16.msra.mxu0 %v9519_v19  ;;  %v9595_v19 = vld [vmem:[%s10889_s28 + $0xdc0] ss:$16 sps:$4 sm:$0xff]  }
  0xce   : > { %6839 = vmatpush2.bf16.msra.mxu1 %v9522_v20  ;;  %6799 = vmatprep.subr.bf16.mxu0 %v9527_v21  ;;  %v9598_v20 = vld [vmem:[%s10889_s28 + $0xfc0] ss:$16 sps:$4 sm:$0xff]   ;;  %v9603_v21 = vld [vmem:[%s10889_s28 + $0xda4] ss:$16 sps:$4 sm:$0xff]  }
  0xcf   : > { %6840 = vmatprep.subr.bf16.mxu1 %v9530_v22  ;;  %v9606_v22 = vld [vmem:[%s10889_s28 + $0xfa4] ss:$16 sps:$4 sm:$0xff]  }
  0xd1   : > { %6800 = vmatpush2.bf16.msra.mxu0 %v9525_v27  ;;  %v9601_v27 = vld [vmem:[%s10889_s28 + $0xda0] ss:$16 sps:$4 sm:$0xff]  }
  0xd2   : > { %6841 = vmatpush2.bf16.msra.mxu1 %v9528_v28  ;;  %6801 = vmatprep.subr.bf16.mxu0 %v9533_v29  ;;  %v9604_v28 = vld [vmem:[%s10889_s28 + $0xfa0] ss:$16 sps:$4 sm:$0xff]   ;;  %v9609_v29 = vld [vmem:[%s10889_s28 + $0xd84] ss:$16 sps:$4 sm:$0xff]  }
  0xd3   : > { %6842 = vmatprep.subr.bf16.mxu1 %v9536_v30  ;;  %v9612_v30 = vld [vmem:[%s10889_s28 + $0xf84] ss:$16 sps:$4 sm:$0xff]  }
  0xd5   : > { %6802 = vmatpush2.bf16.msra.mxu0 %v9531_v31  ;;  %v9607_v31 = vld [vmem:[%s10889_s28 + $0xd80] ss:$16 sps:$4 sm:$0xff]  }
  0xd6   : > { %6843 = vmatpush2.bf16.msra.mxu1 %v9534_v32  ;;  %6853 = vmatprep.subr.bf16.mxu0 %v9543_v33  ;;  %v9610_v32 = vld [vmem:[%s10889_s28 + $0xf80] ss:$16 sps:$4 sm:$0xff]   ;;  %v9615_v33 = vld [vmem:[%s10889_s28 + $0xd64] ss:$16 sps:$4 sm:$0xff]  }
  0xd7   : > { %6894 = vmatprep.subr.bf16.mxu1 %v9546_v34  ;;  %v9618_v34 = vld [vmem:[%s10889_s28 + $0xf64] ss:$16 sps:$4 sm:$0xff]  }
  0xd8   : > { %6804 = vmatmul.mubr.bf16.vlgmr.msra.gmra.mxu0 %v11146_v39 }
  0xd9   : > { %6845 = vmatmul.mubr.bf16.vlgmr.msra.gmra.mxu1 %v11150_v40  ;;  %6854 = vmatpush1.bf16.msra.mxu0 %v9541_v35  ;;  %v9613_v35 = vld [vmem:[%s10889_s28 + $0xd60] ss:$16 sps:$4 sm:$0xff]  }
  0xda   : > { %6895 = vmatpush1.bf16.msra.mxu1 %v9544_v36  ;;  %6855 = vmatprep.subr.bf16.mxu0 %v9549_v43  ;;  %v9616_v36 = vld [vmem:[%s10889_s28 + $0xf60] ss:$16 sps:$4 sm:$0xff]   ;;  %v9621_v43 = vld [vmem:[%s10889_s28 + $0xd44] ss:$16 sps:$4 sm:$0xff]  }
  0xdb   : > { %6896 = vmatprep.subr.bf16.mxu1 %v9552_v44  ;;  %6885 = vmatprep.mubr.bf16.mxu0 %v11162_v23  ;;  %v9624_v44 = vld [vmem:[%s10889_s28 + $0xf44] ss:$16 sps:$4 sm:$0xff]  }
  0xdc   : > { %6926 = vmatprep.mubr.bf16.mxu1 %v11166_v24 }
  0xdd   : > { %6856 = vmatpush1.bf16.msra.mxu0 %v9547_v45  ;;  %v9619_v45 = vld [vmem:[%s10889_s28 + $0xd40] ss:$16 sps:$4 sm:$0xff]  }
  0xde   : > { %6897 = vmatpush1.bf16.msra.mxu1 %v9550_v46  ;;  %6857 = vmatprep.subr.bf16.mxu0 %v9555_v47  ;;  %v9622_v46 = vld [vmem:[%s10889_s28 + $0xf40] ss:$16 sps:$4 sm:$0xff]   ;;  %v9627_v47 = vld [vmem:[%s10889_s28 + $0xd24] ss:$16 sps:$4 sm:$0xff]  }
  0xdf   : > { %6898 = vmatprep.subr.bf16.mxu1 %v9558_v49  ;;  %v9630_v49 = vld [vmem:[%s10889_s28 + $0xf24] ss:$16 sps:$4 sm:$0xff]  }
  0xe1   : > { %6858 = vmatpush1.bf16.msra.mxu0 %v9553_v50  ;;  %v9625_v50 = vld [vmem:[%s10889_s28 + $0xd20] ss:$16 sps:$4 sm:$0xff]  }
  0xe2   : > { %6899 = vmatpush1.bf16.msra.mxu1 %v9556_v51  ;;  %6859 = vmatprep.subr.bf16.mxu0 %v9561_v53  ;;  %v9628_v51 = vld [vmem:[%s10889_s28 + $0xf20] ss:$16 sps:$4 sm:$0xff]   ;;  %v9633_v53 = vld [vmem:[%s10889_s28 + $0xd04] ss:$16 sps:$4 sm:$0xff]  }
  0xe3   : > { %6900 = vmatprep.subr.bf16.mxu1 %v9564_v54  ;;  %v9636_v54 = vld [vmem:[%s10889_s28 + $0xf04] ss:$16 sps:$4 sm:$0xff]  }
  0xe5   : > { %6860 = vmatpush1.bf16.msra.mxu0 %v9559_v55  ;;  %v9631_v55 = vld [vmem:[%s10889_s28 + $0xd00] ss:$16 sps:$4 sm:$0xff]  }
  0xe6   : > { %6901 = vmatpush1.bf16.msra.mxu1 %v9562_v56  ;;  %6861 = vmatprep.subr.bf16.mxu0 %v9567_v57  ;;  %v9634_v56 = vld [vmem:[%s10889_s28 + $0xf00] ss:$16 sps:$4 sm:$0xff]   ;;  %v9643_v57 = vld [vmem:[%s10889_s28 + $0x10e4] ss:$16 sps:$4 sm:$0xff]  }
  0xe7   : > { %6902 = vmatprep.subr.bf16.mxu1 %v9570_v58  ;;  %v9646_v58 = vld [vmem:[%s10889_s28 + $0x12e4] ss:$16 sps:$4 sm:$0xff]  }
  0xe9   : > { %6862 = vmatpush1.bf16.msra.mxu0 %v9565_v59  ;;  %v11233_v59 = vld [vmem:[%s10884_s24 + $0x40] sm:$0xff] }
  0xea   : > { %6903 = vmatpush1.bf16.msra.mxu1 %v9568_v60  ;;  %6863 = vmatprep.subr.bf16.mxu0 %v9573_v61  ;;  %v11237_v60 = vcombine.low %v11153_v41, %v11153_v41  ;;  %v11241_v61 = vcombine.low %v11156_v42, %v11156_v42  ;;  %v11252_v41 = vcombine.high %v11233_v59, %v11233_v59 }
  0xeb   : > { %6904 = vmatprep.subr.bf16.mxu1 %v9576_v62  ;;  %v11244_v62 = vld [vmem:[%s10884_s24 + $0x48] sm:$0xff] }
  0xec   : > { %v11256_v42 = vcombine.high %v11244_v62, %v11244_v62 }
  0xed   : > { %6864 = vmatpush1.bf16.msra.mxu0 %v9571_v63  ;;  %v9641_v63 = vld [vmem:[%s10889_s28 + $0x10e0] ss:$16 sps:$4 sm:$0xff]  }
  0xee   : > { %6905 = vmatpush1.bf16.msra.mxu1 %v9574_v0  ;;  %6865 = vmatprep.subr.bf16.mxu0 %v9579_v1  ;;  %v9644_v0 = vld [vmem:[%s10889_s28 + $0x12e0] ss:$16 sps:$4 sm:$0xff]   ;;  %v9649_v1 = vld [vmem:[%s10889_s28 + $0x10c4] ss:$16 sps:$4 sm:$0xff]  }
  0xef   : > { %6906 = vmatprep.subr.bf16.mxu1 %v9582_v2  ;;  %v9652_v2 = vld [vmem:[%s10889_s28 + $0x12c4] ss:$16 sps:$4 sm:$0xff]  }
  0xf1   : > { %6866 = vmatpush1.bf16.msra.mxu0 %v9577_v3 }
  0xf2   : > { %6907 = vmatpush1.bf16.msra.mxu1 %v9580_v4  ;;  %6867 = vmatprep.subr.bf16.mxu0 %v9585_v5  ;;  %v9647_v5 = vld [vmem:[%s10889_s28 + $0x10c0] ss:$16 sps:$4 sm:$0xff]  }
  0xf3   : > { %6908 = vmatprep.subr.bf16.mxu1 %v9588_v6  ;;  %v9650_v6 = vld [vmem:[%s10889_s28 + $0x12c0] ss:$16 sps:$4 sm:$0xff]  }
  0xf5   : > { %6868 = vmatpush1.bf16.msra.mxu0 %v9583_v9 }
  0xf6   : > { %6909 = vmatpush1.bf16.msra.mxu1 %v9586_v10  ;;  %6869 = vmatprep.subr.bf16.mxu0 %v9591_v11  ;;  %v9655_v10 = vld [vmem:[%s10889_s28 + $0x10a4] ss:$16 sps:$4 sm:$0xff]  }
  0xf7   : > { %6910 = vmatprep.subr.bf16.mxu1 %v9594_v12 }
  0xf9   : > { %6870 = vmatpush2.bf16.msra.mxu0 %v9589_v13  ;;  %v9658_v13 = vld [vmem:[%s10889_s28 + $0x12a4] ss:$16 sps:$4 sm:$0xff]  }
  0xfa   : > { %6911 = vmatpush2.bf16.msra.mxu1 %v9592_v14  ;;  %6871 = vmatprep.subr.bf16.mxu0 %v9597_v15 }
  0xfb   : > { %6912 = vmatprep.subr.bf16.mxu1 %v9600_v16 }
  0xfd   : > { %6872 = vmatpush2.bf16.msra.mxu0 %v9595_v19  ;;  %v9653_v19 = vld [vmem:[%s10889_s28 + $0x10a0] ss:$16 sps:$4 sm:$0xff]  }
  0xfe   : > { %6913 = vmatpush2.bf16.msra.mxu1 %v9598_v20  ;;  %6873 = vmatprep.subr.bf16.mxu0 %v9603_v21  ;;  %v9656_v20 = vld [vmem:[%s10889_s28 + $0x12a0] ss:$16 sps:$4 sm:$0xff]   ;;  %v9661_v21 = vld [vmem:[%s10889_s28 + $0x1084] ss:$16 sps:$4 sm:$0xff]  }
  0xff   : > { %6914 = vmatprep.subr.bf16.mxu1 %v9606_v22 }
 0x101   : > { %6874 = vmatpush2.bf16.msra.mxu0 %v9601_v27 }
 0x102   : > { %6915 = vmatpush2.bf16.msra.mxu1 %v9604_v28  ;;  %6875 = vmatprep.subr.bf16.mxu0 %v9609_v29  ;;  %v9664_v28 = vld [vmem:[%s10889_s28 + $0x1284] ss:$16 sps:$4 sm:$0xff]   ;;  %v9659_v29 = vld [vmem:[%s10889_s28 + $0x1080] ss:$16 sps:$4 sm:$0xff]  }
 0x103   : > { %6916 = vmatprep.subr.bf16.mxu1 %v9612_v30  ;;  %v9662_v30 = vld [vmem:[%s10889_s28 + $0x1280] ss:$16 sps:$4 sm:$0xff]  }
 0x105   : > { %6876 = vmatpush2.bf16.msra.mxu0 %v9607_v31  ;;  %v9667_v31 = vld [vmem:[%s10889_s28 + $0x1064] ss:$16 sps:$4 sm:$0xff]  }
 0x106   : > { %6917 = vmatpush2.bf16.msra.mxu1 %v9610_v32  ;;  %6877 = vmatprep.subr.bf16.mxu0 %v9615_v33  ;;  %v9670_v32 = vld [vmem:[%s10889_s28 + $0x1264] ss:$16 sps:$4 sm:$0xff]   ;;  %v9665_v33 = vld [vmem:[%s10889_s28 + $0x1060] ss:$16 sps:$4 sm:$0xff]  }
 0x107   : > { %6918 = vmatprep.subr.bf16.mxu1 %v9618_v34  ;;  %v9668_v34 = vld [vmem:[%s10889_s28 + $0x1260] ss:$16 sps:$4 sm:$0xff]  }
 0x109   : > { %6878 = vmatpush2.bf16.msra.mxu0 %v9613_v35  ;;  %v9673_v35 = vld [vmem:[%s10889_s28 + $0x1044] ss:$16 sps:$4 sm:$0xff]  }
 0x10a   : > { %6919 = vmatpush2.bf16.msra.mxu1 %v9616_v36  ;;  %6879 = vmatprep.subr.bf16.mxu0 %v9621_v43  ;;  %v9676_v36 = vld [vmem:[%s10889_s28 + $0x1244] ss:$16 sps:$4 sm:$0xff]   ;;  %v9671_v43 = vld [vmem:[%s10889_s28 + $0x1040] ss:$16 sps:$4 sm:$0xff]  }
 0x10b   : > { %6920 = vmatprep.subr.bf16.mxu1 %v9624_v44  ;;  %v9674_v44 = vld [vmem:[%s10889_s28 + $0x1240] ss:$16 sps:$4 sm:$0xff]  }
 0x10d   : > { %6880 = vmatpush2.bf16.msra.mxu0 %v9619_v45  ;;  %v9679_v45 = vld [vmem:[%s10889_s28 + $0x1024] ss:$16 sps:$4 sm:$0xff]  }
 0x10e   : > { %6921 = vmatpush2.bf16.msra.mxu1 %v9622_v46  ;;  %6881 = vmatprep.subr.bf16.mxu0 %v9627_v47  ;;  %v9682_v46 = vld [vmem:[%s10889_s28 + $0x1224] ss:$16 sps:$4 sm:$0xff]   ;;  %v9677_v47 = vld [vmem:[%s10889_s28 + $0x1020] ss:$16 sps:$4 sm:$0xff]  }
 0x10f   : > { %6922 = vmatprep.subr.bf16.mxu1 %v9630_v49  ;;  %v9680_v49 = vld [vmem:[%s10889_s28 + $0x1220] ss:$16 sps:$4 sm:$0xff]  }
 0x111   : > { %6882 = vmatpush2.bf16.msra.mxu0 %v9625_v50  ;;  %v9685_v50 = vld [vmem:[%s10889_s28 + $0x1004] ss:$16 sps:$4 sm:$0xff]  }
 0x112   : > { %6923 = vmatpush2.bf16.msra.mxu1 %v9628_v51  ;;  %6883 = vmatprep.subr.bf16.mxu0 %v9633_v53  ;;  %v9688_v51 = vld [vmem:[%s10889_s28 + $0x1204] ss:$16 sps:$4 sm:$0xff]   ;;  %v9683_v53 = vld [vmem:[%s10889_s28 + $0x1000] ss:$16 sps:$4 sm:$0xff]  }
 0x113   : > { %6924 = vmatprep.subr.bf16.mxu1 %v9636_v54  ;;  %v9686_v54 = vld [vmem:[%s10889_s28 + $0x1200] ss:$16 sps:$4 sm:$0xff]  }
 0x115   : > { %6884 = vmatpush2.bf16.msra.mxu0 %v9631_v55  ;;  %v9691_v55 = vld [vmem:[%s10889_s28 + $0x11e4] ss:$16 sps:$4 sm:$0xff]  }
 0x116   : > { %6925 = vmatpush2.bf16.msra.mxu1 %v9634_v56  ;;  %6935 = vmatprep.subr.bf16.mxu0 %v9643_v57  ;;  %v9694_v56 = vld [vmem:[%s10889_s28 + $0x13e4] ss:$16 sps:$4 sm:$0xff]   ;;  %v9689_v57 = vld [vmem:[%s10889_s28 + $0x11e0] ss:$16 sps:$4 sm:$0xff]  }
 0x117   : > { %6976 = vmatprep.subr.bf16.mxu1 %v9646_v58  ;;  %v9692_v58 = vld [vmem:[%s10889_s28 + $0x13e0] ss:$16 sps:$4 sm:$0xff]  }
 0x118   : > { %v6641_v3 = vpop.f32.mrf.mxu0  ;;  %6886 = vmatmul.mubr.bf16.vlgmr.msra.gmra.mxu0 %v11237_v60 }
 0x119   : > { %v6682_v4 = vpop.f32.mrf.mxu1  ;;  %6927 = vmatmul.mubr.bf16.vlgmr.msra.gmra.mxu1 %v11241_v61  ;;  %6936 = vmatpush1.bf16.msra.mxu0 %v9641_v63  ;;  %v9697_v63 = vld [vmem:[%s10889_s28 + $0x11c4] ss:$16 sps:$4 sm:$0xff]  }
 0x11a   : > { %v11262_v9 = vadd.f32 %v6682_v4, %v6641_v3  ;;  %6977 = vmatpush1.bf16.msra.mxu1 %v9644_v0  ;;  %v6643_v11 = vpop.f32.mrf.mxu0  ;;  %6937 = vmatprep.subr.bf16.mxu0 %v9649_v1  ;;  %v9700_v0 = vld [vmem:[%s10889_s28 + $0x13c4] ss:$16 sps:$4 sm:$0xff]   ;;  %v9695_v1 = vld [vmem:[%s10889_s28 + $0x11c0] ss:$16 sps:$4 sm:$0xff]  }
 0x11b   : > { %v6684_v12 = vpop.f32.mrf.mxu1  ;;  %6978 = vmatprep.subr.bf16.mxu1 %v9652_v2  ;;  %6967 = vmatprep.mubr.bf16.mxu0 %v11252_v41  ;;  %v9698_v2 = vld [vmem:[%s10889_s28 + $0x13c0] ss:$16 sps:$4 sm:$0xff]   ;;  %v9703_v3 = vld [vmem:[%s10889_s28 + $0x11a4] ss:$16 sps:$4 sm:$0xff]  }
 0x11c   : > { %v11266_v14 = vadd.f32 %v6684_v12, %v6643_v11  ;;  %7008 = vmatprep.mubr.bf16.mxu1 %v11256_v42  ;;  %v6645_v15 = vpop.f32.mrf.mxu0  ;;  %v9706_v4 = vld [vmem:[%s10889_s28 + $0x13a4] ss:$16 sps:$4 sm:$0xff]   ;;  %v9707_v12 = vld [vmem:[%s10889_s28 + $0x1180] ss:$16 sps:$4 sm:$0xff]  }
 0x11d   : > { %v6686_v16 = vpop.f32.mrf.mxu1  ;;  %6938 = vmatpush1.bf16.msra.mxu0 %v9647_v5  ;;  %v9701_v5 = vld [vmem:[%s10889_s28 + $0x11a0] ss:$16 sps:$4 sm:$0xff]   ;;  %v9712_v11 = vld [vmem:[%s10889_s28 + $0x1384] ss:$16 sps:$4 sm:$0xff]  }
 0x11e   : > { %6979 = vmatpush1.bf16.msra.mxu1 %v9650_v6  ;;  %v6646_v22 = vpop.f32.mrf.mxu0  ;;  %6939 = vmatprep.subr.bf16.mxu0 %v9655_v10  ;;  %v9704_v6 = vld [vmem:[%s10889_s28 + $0x13a0] ss:$16 sps:$4 sm:$0xff]   ;;  %v9709_v10 = vld [vmem:[%s10889_s28 + $0x1184] ss:$16 sps:$4 sm:$0xff]  }
 0x11f   : > { %v6687_v27 = vpop.f32.mrf.mxu1  ;;  %6980 = vmatprep.subr.bf16.mxu1 %v9658_v13  ;;  %v9710_v13 = vld [vmem:[%s10889_s28 + $0x1380] ss:$16 sps:$4 sm:$0xff]   ;;  %v9715_v15 = vld [vmem:[%s10889_s28 + $0x1164] ss:$16 sps:$4 sm:$0xff]  }
 0x120   : > { %v9718_v16 = vld [vmem:[%s10889_s28 + $0x1364] ss:$16 sps:$4 sm:$0xff]   ;;  %v9719_v27 = vld [vmem:[%s10889_s28 + $0x1140] ss:$16 sps:$4 sm:$0xff]  }
 0x121   : > { %6940 = vmatpush1.bf16.msra.mxu0 %v9653_v19  ;;  %v9713_v19 = vld [vmem:[%s10889_s28 + $0x1160] ss:$16 sps:$4 sm:$0xff]   ;;  %v9724_v22 = vld [vmem:[%s10889_s28 + $0x1344] ss:$16 sps:$4 sm:$0xff]  }
 0x122   : > { %6981 = vmatpush1.bf16.msra.mxu1 %v9656_v20  ;;  %6941 = vmatprep.subr.bf16.mxu0 %v9661_v21  ;;  %v9716_v20 = vld [vmem:[%s10889_s28 + $0x1360] ss:$16 sps:$4 sm:$0xff]   ;;  %v9721_v21 = vld [vmem:[%s10889_s28 + $0x1144] ss:$16 sps:$4 sm:$0xff]  }
 0x123   : > { %6982 = vmatprep.subr.bf16.mxu1 %v9664_v28  ;;  %v9722_v28 = vld [vmem:[%s10889_s28 + $0x1340] ss:$16 sps:$4 sm:$0xff]  }
 0x125   : > { %6942 = vmatpush1.bf16.msra.mxu0 %v9659_v29  ;;  %v9727_v29 = vld [vmem:[%s10889_s28 + $0x1124] ss:$16 sps:$4 sm:$0xff]  }
 0x126   : > { %6983 = vmatpush1.bf16.msra.mxu1 %v9662_v30  ;;  %6943 = vmatprep.subr.bf16.mxu0 %v9667_v31  ;;  %v9730_v30 = vld [vmem:[%s10889_s28 + $0x1324] ss:$16 sps:$4 sm:$0xff]   ;;  %v9725_v31 = vld [vmem:[%s10889_s28 + $0x1120] ss:$16 sps:$4 sm:$0xff]  }
 0x127   : > { %6984 = vmatprep.subr.bf16.mxu1 %v9670_v32  ;;  %v9728_v32 = vld [vmem:[%s10889_s28 + $0x1320] ss:$16 sps:$4 sm:$0xff]  }
 0x129   : > { %6944 = vmatpush1.bf16.msra.mxu0 %v9665_v33  ;;  %v9733_v33 = vld [vmem:[%s10889_s28 + $0x1104] ss:$16 sps:$4 sm:$0xff]  }
 0x12a   : > { %6985 = vmatpush1.bf16.msra.mxu1 %v9668_v34  ;;  %6945 = vmatprep.subr.bf16.mxu0 %v9673_v35  ;;  %v9736_v34 = vld [vmem:[%s10889_s28 + $0x1304] ss:$16 sps:$4 sm:$0xff]   ;;  %v9731_v35 = vld [vmem:[%s10889_s28 + $0x1100] ss:$16 sps:$4 sm:$0xff]  }
 0x12b   : > { %6986 = vmatprep.subr.bf16.mxu1 %v9676_v36  ;;  %v9734_v36 = vld [vmem:[%s10889_s28 + $0x1300] ss:$16 sps:$4 sm:$0xff]  }
 0x12d   : > { %6946 = vmatpush1.bf16.msra.mxu0 %v9671_v43  ;;  %v9743_v43 = vld [vmem:[%s10889_s28 + $0x14e4] ss:$16 sps:$4 sm:$0xff]  }
 0x12e   : > { %6987 = vmatpush1.bf16.msra.mxu1 %v9674_v44  ;;  %6947 = vmatprep.subr.bf16.mxu0 %v9679_v45  ;;  %v9746_v44 = vld [vmem:[%s10889_s28 + $0x16e4] ss:$16 sps:$4 sm:$0xff]   ;;  %v9741_v45 = vld [vmem:[%s10889_s28 + $0x14e0] ss:$16 sps:$4 sm:$0xff]  }
 0x12f   : > { %6988 = vmatprep.subr.bf16.mxu1 %v9682_v46  ;;  %v9744_v46 = vld [vmem:[%s10889_s28 + $0x16e0] ss:$16 sps:$4 sm:$0xff]  }
 0x131   : > { %6948 = vmatpush1.bf16.msra.mxu0 %v9677_v47  ;;  %v11330_v47 = vcombine.low %v11233_v59, %v11233_v59 }
 0x132   : > { %6989 = vmatpush1.bf16.msra.mxu1 %v9680_v49  ;;  %6949 = vmatprep.subr.bf16.mxu0 %v9685_v50  ;;  %v11334_v49 = vcombine.low %v11244_v62, %v11244_v62  ;;  %v11337_v50 = vld [vmem:[%s10884_s24 + $0x50] sm:$0xff] }
 0x133   : > { %6990 = vmatprep.subr.bf16.mxu1 %v9688_v51  ;;  %v11340_v51 = vld [vmem:[%s10884_s24 + $0x58] sm:$0xff]  ;;  %v11348_v59 = vcombine.high %v11337_v50, %v11337_v50 }
 0x134   : > { %v11352_v62 = vcombine.high %v11340_v51, %v11340_v51 }
 0x135   : > { %6950 = vmatpush1.bf16.msra.mxu0 %v9683_v53  ;;  %v9749_v53 = vld [vmem:[%s10889_s28 + $0x14c4] ss:$16 sps:$4 sm:$0xff]  }
 0x136   : > { %6991 = vmatpush1.bf16.msra.mxu1 %v9686_v54  ;;  %6951 = vmatprep.subr.bf16.mxu0 %v9691_v55  ;;  %v9752_v54 = vld [vmem:[%s10889_s28 + $0x16c4] ss:$16 sps:$4 sm:$0xff]   ;;  %v9747_v55 = vld [vmem:[%s10889_s28 + $0x14c0] ss:$16 sps:$4 sm:$0xff]  }
 0x137   : > { %6992 = vmatprep.subr.bf16.mxu1 %v9694_v56  ;;  %v9750_v56 = vld [vmem:[%s10889_s28 + $0x16c0] ss:$16 sps:$4 sm:$0xff]  }
 0x139   : > { %6952 = vmatpush2.bf16.msra.mxu0 %v9689_v57 }
 0x13a   : > { %6993 = vmatpush2.bf16.msra.mxu1 %v9692_v58  ;;  %6953 = vmatprep.subr.bf16.mxu0 %v9697_v63 }
 0x13b   : > { %6994 = vmatprep.subr.bf16.mxu1 %v9700_v0 }
 0x13d   : > { %6954 = vmatpush2.bf16.msra.mxu0 %v9695_v1 }
 0x13e   : > { %6995 = vmatpush2.bf16.msra.mxu1 %v9698_v2  ;;  %6955 = vmatprep.subr.bf16.mxu0 %v9703_v3  ;;  %v9755_v2 = vld [vmem:[%s10889_s28 + $0x14a4] ss:$16 sps:$4 sm:$0xff]  }
 0x13f   : > { %6996 = vmatprep.subr.bf16.mxu1 %v9706_v4  ;;  %v9758_v3 = vld [vmem:[%s10889_s28 + $0x16a4] ss:$16 sps:$4 sm:$0xff]  }
 0x141   : > { %6956 = vmatpush2.bf16.msra.mxu0 %v9701_v5 }
 0x142   : > { %6997 = vmatpush2.bf16.msra.mxu1 %v9704_v6  ;;  %6957 = vmatprep.subr.bf16.mxu0 %v9709_v10  ;;  %v9753_v6 = vld [vmem:[%s10889_s28 + $0x14a0] ss:$16 sps:$4 sm:$0xff]  }
 0x143   : > { %6998 = vmatprep.subr.bf16.mxu1 %v9712_v11  ;;  %v9756_v10 = vld [vmem:[%s10889_s28 + $0x16a0] ss:$16 sps:$4 sm:$0xff]  }
 0x145   : > { %6958 = vmatpush2.bf16.msra.mxu0 %v9707_v12 }
 0x146   : > { %6999 = vmatpush2.bf16.msra.mxu1 %v9710_v13  ;;  %6959 = vmatprep.subr.bf16.mxu0 %v9715_v15 }
 0x147   : > { %7000 = vmatprep.subr.bf16.mxu1 %v9718_v16  ;;  %v9764_v16 = vld [vmem:[%s10889_s28 + $0x1684] ss:$16 sps:$4 sm:$0xff]  }
 0x149   : > { %6960 = vmatpush2.bf16.msra.mxu0 %v9713_v19  ;;  %v9759_v19 = vld [vmem:[%s10889_s28 + $0x1480] ss:$16 sps:$4 sm:$0xff]  }
 0x14a   : > { %7001 = vmatpush2.bf16.msra.mxu1 %v9716_v20  ;;  %6961 = vmatprep.subr.bf16.mxu0 %v9721_v21  ;;  %v9762_v20 = vld [vmem:[%s10889_s28 + $0x1680] ss:$16 sps:$4 sm:$0xff]   ;;  %v9767_v21 = vld [vmem:[%s10889_s28 + $0x1464] ss:$16 sps:$4 sm:$0xff]  }
 0x14b   : > { %7002 = vmatprep.subr.bf16.mxu1 %v9724_v22  ;;  %v9770_v22 = vld [vmem:[%s10889_s28 + $0x1664] ss:$16 sps:$4 sm:$0xff]  }
 0x14d   : > { %6962 = vmatpush2.bf16.msra.mxu0 %v9719_v27  ;;  %v9765_v27 = vld [vmem:[%s10889_s28 + $0x1460] ss:$16 sps:$4 sm:$0xff]  }
 0x14e   : > { %7003 = vmatpush2.bf16.msra.mxu1 %v9722_v28  ;;  %6963 = vmatprep.subr.bf16.mxu0 %v9727_v29  ;;  %v9768_v28 = vld [vmem:[%s10889_s28 + $0x1660] ss:$16 sps:$4 sm:$0xff]   ;;  %v9773_v29 = vld [vmem:[%s10889_s28 + $0x1444] ss:$16 sps:$4 sm:$0xff]  }
 0x14f   : > { %7004 = vmatprep.subr.bf16.mxu1 %v9730_v30  ;;  %v9776_v30 = vld [vmem:[%s10889_s28 + $0x1644] ss:$16 sps:$4 sm:$0xff]  }
 0x151   : > { %6964 = vmatpush2.bf16.msra.mxu0 %v9725_v31  ;;  %v9771_v31 = vld [vmem:[%s10889_s28 + $0x1440] ss:$16 sps:$4 sm:$0xff]  }
 0x152   : > { %7005 = vmatpush2.bf16.msra.mxu1 %v9728_v32  ;;  %6965 = vmatprep.subr.bf16.mxu0 %v9733_v33  ;;  %v9774_v32 = vld [vmem:[%s10889_s28 + $0x1640] ss:$16 sps:$4 sm:$0xff]   ;;  %v9779_v33 = vld [vmem:[%s10889_s28 + $0x1424] ss:$16 sps:$4 sm:$0xff]  }
 0x153   : > { %7006 = vmatprep.subr.bf16.mxu1 %v9736_v34  ;;  %v9782_v34 = vld [vmem:[%s10889_s28 + $0x1624] ss:$16 sps:$4 sm:$0xff]  }
 0x155   : > { %6966 = vmatpush2.bf16.msra.mxu0 %v9731_v35  ;;  %v9777_v35 = vld [vmem:[%s10889_s28 + $0x1420] ss:$16 sps:$4 sm:$0xff]  }
 0x156   : > { %7007 = vmatpush2.bf16.msra.mxu1 %v9734_v36  ;;  %7017 = vmatprep.subr.bf16.mxu0 %v9743_v43  ;;  %v9780_v36 = vld [vmem:[%s10889_s28 + $0x1620] ss:$16 sps:$4 sm:$0xff]   ;;  %v9785_v43 = vld [vmem:[%s10889_s28 + $0x1404] ss:$16 sps:$4 sm:$0xff]  }
 0x157   : > { %7058 = vmatprep.subr.bf16.mxu1 %v9746_v44  ;;  %v9788_v44 = vld [vmem:[%s10889_s28 + $0x1604] ss:$16 sps:$4 sm:$0xff]  }
 0x158   : > { %v6723_v57 = vpop.f32.mrf.mxu0  ;;  %6968 = vmatmul.mubr.bf16.vlgmr.msra.gmra.mxu0 %v11330_v47 }
 0x159   : > { %v6764_v58 = vpop.f32.mrf.mxu1  ;;  %7009 = vmatmul.mubr.bf16.vlgmr.msra.gmra.mxu1 %v11334_v49  ;;  %v6724_v63 = vadd.f32 %v6723_v57, %v11262_v9  ;;  %7018 = vmatpush1.bf16.msra.mxu0 %v9741_v45  ;;  %v9783_v45 = vld [vmem:[%s10889_s28 + $0x1400] ss:$16 sps:$4 sm:$0xff]   ;;  %v9797_v57 = vld [vmem:[%s10889_s28 + $0x15c4] ss:$16 sps:$4 sm:$0xff]  }
 0x15a   : > { %7059 = vmatpush1.bf16.msra.mxu1 %v9744_v46  ;;  %v6725_v0 = vpop.f32.mrf.mxu0  ;;  %7019 = vmatprep.subr.bf16.mxu0 %v9749_v53  ;;  %v9786_v46 = vld [vmem:[%s10889_s28 + $0x1600] ss:$16 sps:$4 sm:$0xff]   ;;  %v9791_v53 = vld [vmem:[%s10889_s28 + $0x15e4] ss:$16 sps:$4 sm:$0xff]  }
 0x15b   : > { %v6766_v1 = vpop.f32.mrf.mxu1  ;;  %7060 = vmatprep.subr.bf16.mxu1 %v9752_v54  ;;  %v11359_v4 = vadd.f32 %v6764_v58, %v6724_v63  ;;  %v6726_v5 = vadd.f32 %v6725_v0, %v11266_v14  ;;  %7049 = vmatprep.mubr.bf16.mxu0 %v11348_v59  ;;  %v9761_v14 = vld [vmem:[%s10889_s28 + $0x1484] ss:$16 sps:$4 sm:$0xff]   ;;  %v9795_v63 = vld [vmem:[%s10889_s28 + $0x15c0] ss:$16 sps:$4 sm:$0xff]  }
 0x15c   : > { %7090 = vmatprep.mubr.bf16.mxu1 %v11352_v62  ;;  %v6727_v9 = vpop.f32.mrf.mxu0  ;;  %v9794_v54 = vld [vmem:[%s10889_s28 + $0x17e4] ss:$16 sps:$4 sm:$0xff]   ;;  %v9798_v0 = vld [vmem:[%s10889_s28 + $0x17c0] ss:$16 sps:$4 sm:$0xff]  }
 0x15d   : > { %v6768_v11 = vpop.f32.mrf.mxu1  ;;  %v11366_v12 = vadd.f32 %v6766_v1, %v6726_v5  ;;  %7020 = vmatpush1.bf16.msra.mxu0 %v9747_v55  ;;  %v9789_v55 = vld [vmem:[%s10889_s28 + $0x15e0] ss:$16 sps:$4 sm:$0xff]   ;;  %v9800_v58 = vld [vmem:[%s10889_s28 + $0x17c4] ss:$16 sps:$4 sm:$0xff]  }
 0x15e   : > { %7061 = vmatpush1.bf16.msra.mxu1 %v9750_v56  ;;  %v6728_v13 = vpop.f32.mrf.mxu0  ;;  %7021 = vmatprep.subr.bf16.mxu0 %v9755_v2  ;;  %v9792_v56 = vld [vmem:[%s10889_s28 + $0x17e0] ss:$16 sps:$4 sm:$0xff]   ;;  %v9803_v1 = vld [vmem:[%s10889_s28 + $0x15a4] ss:$16 sps:$4 sm:$0xff]  }
 0x15f   : > { %v6769_v15 = vpop.f32.mrf.mxu1  ;;  %7062 = vmatprep.subr.bf16.mxu1 %v9758_v3  ;;  %v9806_v2 = vld [vmem:[%s10889_s28 + $0x17a4] ss:$16 sps:$4 sm:$0xff]   ;;  %v9801_v3 = vld [vmem:[%s10889_s28 + $0x15a0] ss:$16 sps:$4 sm:$0xff]  }
 0x160   : > { %v9804_v5 = vld [vmem:[%s10889_s28 + $0x17a0] ss:$16 sps:$4 sm:$0xff]   ;;  %v9815_v13 = vld [vmem:[%s10889_s28 + $0x1564] ss:$16 sps:$4 sm:$0xff]  }
 0x161   : > { %7022 = vmatpush1.bf16.msra.mxu0 %v9753_v6  ;;  %v9809_v6 = vld [vmem:[%s10889_s28 + $0x1584] ss:$16 sps:$4 sm:$0xff]   ;;  %v9807_v9 = vld [vmem:[%s10889_s28 + $0x1580] ss:$16 sps:$4 sm:$0xff]  }
 0x162   : > { %7063 = vmatpush1.bf16.msra.mxu1 %v9756_v10  ;;  %7023 = vmatprep.subr.bf16.mxu0 %v9761_v14  ;;  %v9812_v10 = vld [vmem:[%s10889_s28 + $0x1784] ss:$16 sps:$4 sm:$0xff]   ;;  %v9810_v11 = vld [vmem:[%s10889_s28 + $0x1780] ss:$16 sps:$4 sm:$0xff]  }
 0x163   : > { %7064 = vmatprep.subr.bf16.mxu1 %v9764_v16  ;;  %v9818_v15 = vld [vmem:[%s10889_s28 + $0x1764] ss:$16 sps:$4 sm:$0xff]   ;;  %v9813_v14 = vld [vmem:[%s10889_s28 + $0x1560] ss:$16 sps:$4 sm:$0xff]  }
 0x164   : > { %v9816_v16 = vld [vmem:[%s10889_s28 + $0x1760] ss:$16 sps:$4 sm:$0xff]  }
 0x165   : > { %7024 = vmatpush1.bf16.msra.mxu0 %v9759_v19  ;;  %v9821_v19 = vld [vmem:[%s10889_s28 + $0x1544] ss:$16 sps:$4 sm:$0xff]  }
 0x166   : > { %7065 = vmatpush1.bf16.msra.mxu1 %v9762_v20  ;;  %7025 = vmatprep.subr.bf16.mxu0 %v9767_v21  ;;  %v9824_v20 = vld [vmem:[%s10889_s28 + $0x1744] ss:$16 sps:$4 sm:$0xff]   ;;  %v9819_v21 = vld [vmem:[%s10889_s28 + $0x1540] ss:$16 sps:$4 sm:$0xff]  }
 0x167   : > { %7066 = vmatprep.subr.bf16.mxu1 %v9770_v22  ;;  %v9822_v22 = vld [vmem:[%s10889_s28 + $0x1740] ss:$16 sps:$4 sm:$0xff]  }
 0x169   : > { %7026 = vmatpush1.bf16.msra.mxu0 %v9765_v27  ;;  %v9827_v27 = vld [vmem:[%s10889_s28 + $0x1524] ss:$16 sps:$4 sm:$0xff]  }
 0x16a   : > { %7067 = vmatpush1.bf16.msra.mxu1 %v9768_v28  ;;  %7027 = vmatprep.subr.bf16.mxu0 %v9773_v29  ;;  %v9830_v28 = vld [vmem:[%s10889_s28 + $0x1724] ss:$16 sps:$4 sm:$0xff]   ;;  %v9825_v29 = vld [vmem:[%s10889_s28 + $0x1520] ss:$16 sps:$4 sm:$0xff]  }
 0x16b   : > { %7068 = vmatprep.subr.bf16.mxu1 %v9776_v30  ;;  %v9828_v30 = vld [vmem:[%s10889_s28 + $0x1720] ss:$16 sps:$4 sm:$0xff]  }
 0x16d   : > { %7028 = vmatpush1.bf16.msra.mxu0 %v9771_v31  ;;  %v9833_v31 = vld [vmem:[%s10889_s28 + $0x1504] ss:$16 sps:$4 sm:$0xff]  }
 0x16e   : > { %7069 = vmatpush1.bf16.msra.mxu1 %v9774_v32  ;;  %7029 = vmatprep.subr.bf16.mxu0 %v9779_v33  ;;  %v9836_v32 = vld [vmem:[%s10889_s28 + $0x1704] ss:$16 sps:$4 sm:$0xff]   ;;  %v9831_v33 = vld [vmem:[%s10889_s28 + $0x1500] ss:$16 sps:$4 sm:$0xff]  }
 0x16f   : > { %7070 = vmatprep.subr.bf16.mxu1 %v9782_v34  ;;  %v9834_v34 = vld [vmem:[%s10889_s28 + $0x1700] ss:$16 sps:$4 sm:$0xff]  }
 0x171   : > { %7030 = vmatpush1.bf16.msra.mxu0 %v9777_v35  ;;  %v9843_v35 = vld [vmem:[%s10889_s28 + $0x18e4] ss:$16 sps:$4 sm:$0xff]  }
 0x172   : > { %7071 = vmatpush1.bf16.msra.mxu1 %v9780_v36  ;;  %7031 = vmatprep.subr.bf16.mxu0 %v9785_v43  ;;  %v9846_v36 = vld [vmem:[%s10889_s28 + $0x1ae4] ss:$16 sps:$4 sm:$0xff]   ;;  %v9841_v43 = vld [vmem:[%s10889_s28 + $0x18e0] ss:$16 sps:$4 sm:$0xff]  }
 0x173   : > { %7072 = vmatprep.subr.bf16.mxu1 %v9788_v44  ;;  %v9844_v44 = vld [vmem:[%s10889_s28 + $0x1ae0] ss:$16 sps:$4 sm:$0xff]  }
 0x175   : > { %7032 = vmatpush1.bf16.msra.mxu0 %v9783_v45  ;;  %v11426_v45 = vcombine.low %v11337_v50, %v11337_v50 }
 0x176   : > { %7073 = vmatpush1.bf16.msra.mxu1 %v9786_v46  ;;  %7033 = vmatprep.subr.bf16.mxu0 %v9791_v53  ;;  %v11430_v46 = vcombine.low %v11340_v51, %v11340_v51  ;;  %v11433_v53 = vld [vmem:[%s10884_s24 + $0x60] sm:$0xff] }
 0x177   : > { %7074 = vmatprep.subr.bf16.mxu1 %v9794_v54  ;;  %v11436_v54 = vld [vmem:[%s10884_s24 + $0x68] sm:$0xff]  ;;  %v11444_v50 = vcombine.high %v11433_v53, %v11433_v53 }
 0x178   : > { %v11448_v51 = vcombine.high %v11436_v54, %v11436_v54 }
 0x179   : > { %7034 = vmatpush2.bf16.msra.mxu0 %v9789_v55  ;;  %v9849_v55 = vld [vmem:[%s10889_s28 + $0x18c4] ss:$16 sps:$4 sm:$0xff]  }
 0x17a   : > { %7075 = vmatpush2.bf16.msra.mxu1 %v9792_v56  ;;  %7035 = vmatprep.subr.bf16.mxu0 %v9797_v57  ;;  %v9852_v56 = vld [vmem:[%s10889_s28 + $0x1ac4] ss:$16 sps:$4 sm:$0xff]   ;;  %v9847_v57 = vld [vmem:[%s10889_s28 + $0x18c0] ss:$16 sps:$4 sm:$0xff]  }
 0x17b   : > { %7076 = vmatprep.subr.bf16.mxu1 %v9800_v58  ;;  %v9850_v58 = vld [vmem:[%s10889_s28 + $0x1ac0] ss:$16 sps:$4 sm:$0xff]  }
 0x17d   : > { %7036 = vmatpush2.bf16.msra.mxu0 %v9795_v63 }
 0x17e   : > { %7077 = vmatpush2.bf16.msra.mxu1 %v9798_v0  ;;  %7037 = vmatprep.subr.bf16.mxu0 %v9803_v1 }
 0x17f   : > { %7078 = vmatprep.subr.bf16.mxu1 %v9806_v2 }
 0x181   : > { %7038 = vmatpush2.bf16.msra.mxu0 %v9801_v3 }
 0x182   : > { %7079 = vmatpush2.bf16.msra.mxu1 %v9804_v5  ;;  %7039 = vmatprep.subr.bf16.mxu0 %v9809_v6  ;;  %v9855_v5 = vld [vmem:[%s10889_s28 + $0x18a4] ss:$16 sps:$4 sm:$0xff]  }
 0x183   : > { %7080 = vmatprep.subr.bf16.mxu1 %v9812_v10  ;;  %v9858_v6 = vld [vmem:[%s10889_s28 + $0x1aa4] ss:$16 sps:$4 sm:$0xff]  }
 0x185   : > { %7040 = vmatpush2.bf16.msra.mxu0 %v9807_v9 }
 0x186   : > { %7081 = vmatpush2.bf16.msra.mxu1 %v9810_v11  ;;  %7041 = vmatprep.subr.bf16.mxu0 %v9815_v13  ;;  %v9853_v11 = vld [vmem:[%s10889_s28 + $0x18a0] ss:$16 sps:$4 sm:$0xff]  }
 0x187   : > { %7082 = vmatprep.subr.bf16.mxu1 %v9818_v15  ;;  %v9856_v13 = vld [vmem:[%s10889_s28 + $0x1aa0] ss:$16 sps:$4 sm:$0xff]  }
 0x189   : > { %7042 = vmatpush2.bf16.msra.mxu0 %v9813_v14 }
 0x18a   : > { %7083 = vmatpush2.bf16.msra.mxu1 %v9816_v16  ;;  %7043 = vmatprep.subr.bf16.mxu0 %v9821_v19 }
 0x18b   : > { %7084 = vmatprep.subr.bf16.mxu1 %v9824_v20  ;;  %v9864_v20 = vld [vmem:[%s10889_s28 + $0x1a84] ss:$16 sps:$4 sm:$0xff]  }
 0x18d   : > { %7044 = vmatpush2.bf16.msra.mxu0 %v9819_v21  ;;  %v9859_v21 = vld [vmem:[%s10889_s28 + $0x1880] ss:$16 sps:$4 sm:$0xff]  }
 0x18e   : > { %7085 = vmatpush2.bf16.msra.mxu1 %v9822_v22  ;;  %7045 = vmatprep.subr.bf16.mxu0 %v9827_v27  ;;  %v9862_v22 = vld [vmem:[%s10889_s28 + $0x1a80] ss:$16 sps:$4 sm:$0xff]   ;;  %v9867_v27 = vld [vmem:[%s10889_s28 + $0x1864] ss:$16 sps:$4 sm:$0xff]  }
 0x18f   : > { %7086 = vmatprep.subr.bf16.mxu1 %v9830_v28  ;;  %v9870_v28 = vld [vmem:[%s10889_s28 + $0x1a64] ss:$16 sps:$4 sm:$0xff]  }
 0x191   : > { %7046 = vmatpush2.bf16.msra.mxu0 %v9825_v29  ;;  %v9865_v29 = vld [vmem:[%s10889_s28 + $0x1860] ss:$16 sps:$4 sm:$0xff]  }
 0x192   : > { %7087 = vmatpush2.bf16.msra.mxu1 %v9828_v30  ;;  %7047 = vmatprep.subr.bf16.mxu0 %v9833_v31  ;;  %v9868_v30 = vld [vmem:[%s10889_s28 + $0x1a60] ss:$16 sps:$4 sm:$0xff]   ;;  %v9873_v31 = vld [vmem:[%s10889_s28 + $0x1844] ss:$16 sps:$4 sm:$0xff]  }
 0x193   : > { %7088 = vmatprep.subr.bf16.mxu1 %v9836_v32  ;;  %v9876_v32 = vld [vmem:[%s10889_s28 + $0x1a44] ss:$16 sps:$4 sm:$0xff]  }
 0x195   : > { %7048 = vmatpush2.bf16.msra.mxu0 %v9831_v33  ;;  %v9871_v33 = vld [vmem:[%s10889_s28 + $0x1840] ss:$16 sps:$4 sm:$0xff]  }
 0x196   : > { %7089 = vmatpush2.bf16.msra.mxu1 %v9834_v34  ;;  %7099 = vmatprep.subr.bf16.mxu0 %v9843_v35  ;;  %v9874_v34 = vld [vmem:[%s10889_s28 + $0x1a40] ss:$16 sps:$4 sm:$0xff]   ;;  %v9879_v35 = vld [vmem:[%s10889_s28 + $0x1824] ss:$16 sps:$4 sm:$0xff]  }
 0x197   : > { %7140 = vmatprep.subr.bf16.mxu1 %v9846_v36  ;;  %v9882_v36 = vld [vmem:[%s10889_s28 + $0x1a24] ss:$16 sps:$4 sm:$0xff]  }
 0x198   : > { %v6805_v63 = vpop.f32.mrf.mxu0  ;;  %7050 = vmatmul.mubr.bf16.vlgmr.msra.gmra.mxu0 %v11426_v45 }
 0x199   : > { %v6846_v0 = vpop.f32.mrf.mxu1  ;;  %7091 = vmatmul.mubr.bf16.vlgmr.msra.gmra.mxu1 %v11430_v46  ;;  %v6806_v1 = vadd.f32 %v6805_v63, %v11359_v4  ;;  %7100 = vmatpush1.bf16.msra.mxu0 %v9841_v43  ;;  %v9877_v43 = vld [vmem:[%s10889_s28 + $0x1820] ss:$16 sps:$4 sm:$0xff]   ;;  %v9891_v63 = vld [vmem:[%s10889_s28 + $0x19e4] ss:$16 sps:$4 sm:$0xff]  }
 0x19a   : > { %7141 = vmatpush1.bf16.msra.mxu1 %v9844_v44  ;;  %v6807_v2 = vpop.f32.mrf.mxu0  ;;  %7101 = vmatprep.subr.bf16.mxu0 %v9849_v55  ;;  %v9880_v44 = vld [vmem:[%s10889_s28 + $0x1a20] ss:$16 sps:$4 sm:$0xff]   ;;  %v9885_v55 = vld [vmem:[%s10889_s28 + $0x1804] ss:$16 sps:$4 sm:$0xff]  }
 0x19b   : > { %v6848_v3 = vpop.f32.mrf.mxu1  ;;  %7142 = vmatprep.subr.bf16.mxu1 %v9852_v56  ;;  %v11455_v10 = vadd.f32 %v6846_v0, %v6806_v1  ;;  %v6808_v9 = vadd.f32 %v6807_v2, %v11366_v12  ;;  %7131 = vmatprep.mubr.bf16.mxu0 %v11444_v50  ;;  %v9861_v12 = vld [vmem:[%s10889_s28 + $0x1884] ss:$16 sps:$4 sm:$0xff]   ;;  %v9889_v1 = vld [vmem:[%s10889_s28 + $0x19e0] ss:$16 sps:$4 sm:$0xff]  }
 0x19c   : > { %7172 = vmatprep.mubr.bf16.mxu1 %v11448_v51  ;;  %v6809_v4 = vpop.f32.mrf.mxu0  ;;  %v9888_v56 = vld [vmem:[%s10889_s28 + $0x1a04] ss:$16 sps:$4 sm:$0xff]   ;;  %v9892_v2 = vld [vmem:[%s10889_s28 + $0x1be0] ss:$16 sps:$4 sm:$0xff]  }
 0x19d   : > { %v6850_v15 = vpop.f32.mrf.mxu1  ;;  %v11462_v14 = vadd.f32 %v6848_v3, %v6808_v9  ;;  %7102 = vmatpush1.bf16.msra.mxu0 %v9847_v57  ;;  %v9883_v57 = vld [vmem:[%s10889_s28 + $0x1800] ss:$16 sps:$4 sm:$0xff]   ;;  %v9894_v0 = vld [vmem:[%s10889_s28 + $0x1be4] ss:$16 sps:$4 sm:$0xff]  }
 0x19e   : > { %7143 = vmatpush1.bf16.msra.mxu1 %v9850_v58  ;;  %v6810_v16 = vpop.f32.mrf.mxu0  ;;  %7103 = vmatprep.subr.bf16.mxu0 %v9855_v5  ;;  %v9886_v58 = vld [vmem:[%s10889_s28 + $0x1a00] ss:$16 sps:$4 sm:$0xff]   ;;  %v9897_v3 = vld [vmem:[%s10889_s28 + $0x19c4] ss:$16 sps:$4 sm:$0xff]  }
 0x19f   : > { %v6851_v19 = vpop.f32.mrf.mxu1  ;;  %7144 = vmatprep.subr.bf16.mxu1 %v9858_v6  ;;  %v9900_v5 = vld [vmem:[%s10889_s28 + $0x1bc4] ss:$16 sps:$4 sm:$0xff]   ;;  %v9895_v6 = vld [vmem:[%s10889_s28 + $0x19c0] ss:$16 sps:$4 sm:$0xff]  }
 0x1a0   : > { %v9898_v9 = vld [vmem:[%s10889_s28 + $0x1bc0] ss:$16 sps:$4 sm:$0xff]   ;;  %v9909_v16 = vld [vmem:[%s10889_s28 + $0x1984] ss:$16 sps:$4 sm:$0xff]  }
 0x1a1   : > { %7104 = vmatpush1.bf16.msra.mxu0 %v9853_v11  ;;  %v9903_v11 = vld [vmem:[%s10889_s28 + $0x19a4] ss:$16 sps:$4 sm:$0xff]   ;;  %v9901_v4 = vld [vmem:[%s10889_s28 + $0x19a0] ss:$16 sps:$4 sm:$0xff]  }
 0x1a2   : > { %7145 = vmatpush1.bf16.msra.mxu1 %v9856_v13  ;;  %7105 = vmatprep.subr.bf16.mxu0 %v9861_v12  ;;  %v9906_v13 = vld [vmem:[%s10889_s28 + $0x1ba4] ss:$16 sps:$4 sm:$0xff]   ;;  %v9904_v15 = vld [vmem:[%s10889_s28 + $0x1ba0] ss:$16 sps:$4 sm:$0xff]  }
 0x1a3   : > { %7146 = vmatprep.subr.bf16.mxu1 %v9864_v20  ;;  %v9912_v19 = vld [vmem:[%s10889_s28 + $0x1b84] ss:$16 sps:$4 sm:$0xff]   ;;  %v9907_v12 = vld [vmem:[%s10889_s28 + $0x1980] ss:$16 sps:$4 sm:$0xff]  }
 0x1a4   : > { %v9910_v20 = vld [vmem:[%s10889_s28 + $0x1b80] ss:$16 sps:$4 sm:$0xff]  }
 0x1a5   : > { %7106 = vmatpush1.bf16.msra.mxu0 %v9859_v21  ;;  %v9915_v21 = vld [vmem:[%s10889_s28 + $0x1964] ss:$16 sps:$4 sm:$0xff]  }
 0x1a6   : > { %7147 = vmatpush1.bf16.msra.mxu1 %v9862_v22  ;;  %7107 = vmatprep.subr.bf16.mxu0 %v9867_v27  ;;  %v9918_v22 = vld [vmem:[%s10889_s28 + $0x1b64] ss:$16 sps:$4 sm:$0xff]   ;;  %v9913_v27 = vld [vmem:[%s10889_s28 + $0x1960] ss:$16 sps:$4 sm:$0xff]  }
 0x1a7   : > { %7148 = vmatprep.subr.bf16.mxu1 %v9870_v28  ;;  %v9916_v28 = vld [vmem:[%s10889_s28 + $0x1b60] ss:$16 sps:$4 sm:$0xff]  }
 0x1a9   : > { %7108 = vmatpush1.bf16.msra.mxu0 %v9865_v29  ;;  %v9921_v29 = vld [vmem:[%s10889_s28 + $0x1944] ss:$16 sps:$4 sm:$0xff]  }
 0x1aa   : > { %7149 = vmatpush1.bf16.msra.mxu1 %v9868_v30  ;;  %7109 = vmatprep.subr.bf16.mxu0 %v9873_v31  ;;  %v9924_v30 = vld [vmem:[%s10889_s28 + $0x1b44] ss:$16 sps:$4 sm:$0xff]   ;;  %v9919_v31 = vld [vmem:[%s10889_s28 + $0x1940] ss:$16 sps:$4 sm:$0xff]  }
 0x1ab   : > { %7150 = vmatprep.subr.bf16.mxu1 %v9876_v32  ;;  %v9922_v32 = vld [vmem:[%s10889_s28 + $0x1b40] ss:$16 sps:$4 sm:$0xff]  }
 0x1ad   : > { %7110 = vmatpush1.bf16.msra.mxu0 %v9871_v33  ;;  %v9927_v33 = vld [vmem:[%s10889_s28 + $0x1924] ss:$16 sps:$4 sm:$0xff]  }
 0x1ae   : > { %7151 = vmatpush1.bf16.msra.mxu1 %v9874_v34  ;;  %7111 = vmatprep.subr.bf16.mxu0 %v9879_v35  ;;  %v9930_v34 = vld [vmem:[%s10889_s28 + $0x1b24] ss:$16 sps:$4 sm:$0xff]   ;;  %v9925_v35 = vld [vmem:[%s10889_s28 + $0x1920] ss:$16 sps:$4 sm:$0xff]  }
 0x1af   : > { %7152 = vmatprep.subr.bf16.mxu1 %v9882_v36  ;;  %v9928_v36 = vld [vmem:[%s10889_s28 + $0x1b20] ss:$16 sps:$4 sm:$0xff]  }
 0x1b1   : > { %7112 = vmatpush1.bf16.msra.mxu0 %v9877_v43  ;;  %v9933_v43 = vld [vmem:[%s10889_s28 + $0x1904] ss:$16 sps:$4 sm:$0xff]  }
 0x1b2   : > { %7153 = vmatpush1.bf16.msra.mxu1 %v9880_v44  ;;  %7113 = vmatprep.subr.bf16.mxu0 %v9885_v55  ;;  %v9936_v44 = vld [vmem:[%s10889_s28 + $0x1b04] ss:$16 sps:$4 sm:$0xff]   ;;  %v9931_v55 = vld [vmem:[%s10889_s28 + $0x1900] ss:$16 sps:$4 sm:$0xff]  }
 0x1b3   : > { %7154 = vmatprep.subr.bf16.mxu1 %v9888_v56  ;;  %v9934_v56 = vld [vmem:[%s10889_s28 + $0x1b00] ss:$16 sps:$4 sm:$0xff]  }
 0x1b5   : > { %7114 = vmatpush1.bf16.msra.mxu0 %v9883_v57  ;;  %v9943_v57 = vld [vmem:[%s10889_s28 + $0x1ce4] ss:$16 sps:$4 sm:$0xff]  }
 0x1b6   : > { %7155 = vmatpush1.bf16.msra.mxu1 %v9886_v58  ;;  %7115 = vmatprep.subr.bf16.mxu0 %v9891_v63  ;;  %v9946_v58 = vld [vmem:[%s10889_s28 + $0x1ee4] ss:$16 sps:$4 sm:$0xff]  }
 0x1b7   : > { %7156 = vmatprep.subr.bf16.mxu1 %v9894_v0  ;;  %v11519_v63 = vld [vmem:[%s10884_s24 + $0x70] sm:$0xff]  ;;  %v11522_v0 = vld [vmem:[%s10884_s24 + $0x78] sm:$0xff] }
 0x1b9   : > { %7116 = vmatpush2.bf16.msra.mxu0 %v9889_v1  ;;  %v9941_v1 = vld [vmem:[%s10889_s28 + $0x1ce0] ss:$16 sps:$4 sm:$0xff]  }
 0x1ba   : > { %7157 = vmatpush2.bf16.msra.mxu1 %v9892_v2  ;;  %7117 = vmatprep.subr.bf16.mxu0 %v9897_v3  ;;  %v9944_v2 = vld [vmem:[%s10889_s28 + $0x1ee0] ss:$16 sps:$4 sm:$0xff]   ;;  %v11528_v3 = vcombine.low %v11433_v53, %v11433_v53  ;;  %v11544_v53 = vcombine.high %v11522_v0, %v11522_v0 }
 0x1bb   : > { %7158 = vmatprep.subr.bf16.mxu1 %v9900_v5  ;;  %v11532_v5 = vcombine.low %v11436_v54, %v11436_v54 }
 0x1bd   : > { %7118 = vmatpush2.bf16.msra.mxu0 %v9895_v6  ;;  %v9949_v6 = vld [vmem:[%s10889_s28 + $0x1cc4] ss:$16 sps:$4 sm:$0xff]  }
 0x1be   : > { %7159 = vmatpush2.bf16.msra.mxu1 %v9898_v9  ;;  %7119 = vmatprep.subr.bf16.mxu0 %v9903_v11  ;;  %v9952_v9 = vld [vmem:[%s10889_s28 + $0x1ec4] ss:$16 sps:$4 sm:$0xff]   ;;  %v9947_v11 = vld [vmem:[%s10889_s28 + $0x1cc0] ss:$16 sps:$4 sm:$0xff]  }
 0x1bf   : > { %7160 = vmatprep.subr.bf16.mxu1 %v9906_v13  ;;  %v9950_v13 = vld [vmem:[%s10889_s28 + $0x1ec0] ss:$16 sps:$4 sm:$0xff]  }
 0x1c1   : > { %7120 = vmatpush2.bf16.msra.mxu0 %v9901_v4  ;;  %v11540_v4 = vcombine.high %v11519_v63, %v11519_v63 }
 0x1c2   : > { %7161 = vmatpush2.bf16.msra.mxu1 %v9904_v15  ;;  %7121 = vmatprep.subr.bf16.mxu0 %v9909_v16 }
 0x1c3   : > { %7162 = vmatprep.subr.bf16.mxu1 %v9912_v19 }
 0x1c5   : > { %7122 = vmatpush2.bf16.msra.mxu0 %v9907_v12 }
 0x1c6   : > { %7163 = vmatpush2.bf16.msra.mxu1 %v9910_v20  ;;  %7123 = vmatprep.subr.bf16.mxu0 %v9915_v21  ;;  %v9955_v20 = vld [vmem:[%s10889_s28 + $0x1ca4] ss:$16 sps:$4 sm:$0xff]  }
 0x1c7   : > { %7164 = vmatprep.subr.bf16.mxu1 %v9918_v22  ;;  %v9958_v21 = vld [vmem:[%s10889_s28 + $0x1ea4] ss:$16 sps:$4 sm:$0xff]  }
 0x1c9   : > { %7124 = vmatpush2.bf16.msra.mxu0 %v9913_v27 }
 0x1ca   : > { %7165 = vmatpush2.bf16.msra.mxu1 %v9916_v28  ;;  %7125 = vmatprep.subr.bf16.mxu0 %v9921_v29  ;;  %v9953_v28 = vld [vmem:[%s10889_s28 + $0x1ca0] ss:$16 sps:$4 sm:$0xff]  }
 0x1cb   : > { %7166 = vmatprep.subr.bf16.mxu1 %v9924_v30  ;;  %v9956_v29 = vld [vmem:[%s10889_s28 + $0x1ea0] ss:$16 sps:$4 sm:$0xff]  }
 0x1cd   : > { %7126 = vmatpush2.bf16.msra.mxu0 %v9919_v31 }
 0x1ce   : > { %7167 = vmatpush2.bf16.msra.mxu1 %v9922_v32  ;;  %7127 = vmatprep.subr.bf16.mxu0 %v9927_v33 }
 0x1cf   : > { %7168 = vmatprep.subr.bf16.mxu1 %v9930_v34  ;;  %v9964_v34 = vld [vmem:[%s10889_s28 + $0x1e84] ss:$16 sps:$4 sm:$0xff]  }
 0x1d1   : > { %7128 = vmatpush2.bf16.msra.mxu0 %v9925_v35  ;;  %v9959_v35 = vld [vmem:[%s10889_s28 + $0x1c80] ss:$16 sps:$4 sm:$0xff]  }
 0x1d2   : > { %7169 = vmatpush2.bf16.msra.mxu1 %v9928_v36  ;;  %7129 = vmatprep.subr.bf16.mxu0 %v9933_v43  ;;  %v9962_v36 = vld [vmem:[%s10889_s28 + $0x1e80] ss:$16 sps:$4 sm:$0xff]   ;;  %v9967_v43 = vld [vmem:[%s10889_s28 + $0x1c64] ss:$16 sps:$4 sm:$0xff]  }
 0x1d3   : > { %7170 = vmatprep.subr.bf16.mxu1 %v9936_v44  ;;  %v9970_v44 = vld [vmem:[%s10889_s28 + $0x1e64] ss:$16 sps:$4 sm:$0xff]  }
 0x1d5   : > { %7130 = vmatpush2.bf16.msra.mxu0 %v9931_v55  ;;  %v9965_v55 = vld [vmem:[%s10889_s28 + $0x1c60] ss:$16 sps:$4 sm:$0xff]  }
 0x1d6   : > { %7171 = vmatpush2.bf16.msra.mxu1 %v9934_v56  ;;  %7181 = vmatprep.subr.bf16.mxu0 %v9943_v57  ;;  %v9968_v56 = vld [vmem:[%s10889_s28 + $0x1e60] ss:$16 sps:$4 sm:$0xff]   ;;  %v9973_v57 = vld [vmem:[%s10889_s28 + $0x1c44] ss:$16 sps:$4 sm:$0xff]  }
 0x1d7   : > { %7222 = vmatprep.subr.bf16.mxu1 %v9946_v58  ;;  %v9976_v58 = vld [vmem:[%s10889_s28 + $0x1e44] ss:$16 sps:$4 sm:$0xff]  }
 0x1d8   : > { %v6887_v54 = vpop.f32.mrf.mxu0  ;;  %7132 = vmatmul.mubr.bf16.vlgmr.msra.gmra.mxu0 %v11528_v3 }
 0x1d9   : > { %v6928_v15 = vpop.f32.mrf.mxu1  ;;  %7173 = vmatmul.mubr.bf16.vlgmr.msra.gmra.mxu1 %v11532_v5  ;;  %v6888_v16 = vadd.f32 %v6887_v54, %v11455_v10  ;;  %7182 = vmatpush1.bf16.msra.mxu0 %v9941_v1  ;;  %v9971_v1 = vld [vmem:[%s10889_s28 + $0x1c40] ss:$16 sps:$4 sm:$0xff]   ;;  %v9985_v54 = vld [vmem:[%s10889_s28 + $0x1c04] ss:$16 sps:$4 sm:$0xff]  }
 0x1da   : > { %7223 = vmatpush1.bf16.msra.mxu1 %v9944_v2  ;;  %v6889_v19 = vpop.f32.mrf.mxu0  ;;  %7183 = vmatprep.subr.bf16.mxu0 %v9949_v6  ;;  %v9974_v2 = vld [vmem:[%s10889_s28 + $0x1e40] ss:$16 sps:$4 sm:$0xff]   ;;  %v9979_v6 = vld [vmem:[%s10889_s28 + $0x1c24] ss:$16 sps:$4 sm:$0xff]  }
 0x1db   : > { %v6930_v12 = vpop.f32.mrf.mxu1  ;;  %7224 = vmatprep.subr.bf16.mxu1 %v9952_v9  ;;  %v11551_v22 = vadd.f32 %v6928_v15, %v6888_v16  ;;  %v6890_v27 = vadd.f32 %v6889_v19, %v11462_v14  ;;  %7213 = vmatprep.mubr.bf16.mxu0 %v11540_v4  ;;  %v9961_v14 = vld [vmem:[%s10889_s28 + $0x1c84] ss:$16 sps:$4 sm:$0xff]   ;;  %v9983_v16 = vld [vmem:[%s10889_s28 + $0x1c00] ss:$16 sps:$4 sm:$0xff]  }
 0x1dc   : > { %7254 = vmatprep.mubr.bf16.mxu1 %v11544_v53  ;;  %v6891_v10 = vpop.f32.mrf.mxu0  ;;  %v9982_v9 = vld [vmem:[%s10889_s28 + $0x1e24] ss:$16 sps:$4 sm:$0xff]   ;;  %v9986_v19 = vld [vmem:[%s10889_s28 + $0x1e00] ss:$16 sps:$4 sm:$0xff]  }
 0x1dd   : > { %v6932_v30 = vpop.f32.mrf.mxu1  ;;  %v11558_v31 = vadd.f32 %v6930_v12, %v6890_v27  ;;  %7184 = vmatpush1.bf16.msra.mxu0 %v9947_v11  ;;  %v9977_v11 = vld [vmem:[%s10889_s28 + $0x1c20] ss:$16 sps:$4 sm:$0xff]   ;;  %v9988_v15 = vld [vmem:[%s10889_s28 + $0x1e04] ss:$16 sps:$4 sm:$0xff]  }
 0x1de   : > { %7225 = vmatpush1.bf16.msra.mxu1 %v9950_v13  ;;  %v6892_v32 = vpop.f32.mrf.mxu0  ;;  %7185 = vmatprep.subr.bf16.mxu0 %v9955_v20  ;;  %v9980_v13 = vld [vmem:[%s10889_s28 + $0x1e20] ss:$16 sps:$4 sm:$0xff]   ;;  %v9991_v12 = vld [vmem:[%s10889_s28 + $0x1de4] ss:$16 sps:$4 sm:$0xff]  }
 0x1df   : > { %v6933_v33 = vpop.f32.mrf.mxu1  ;;  %7226 = vmatprep.subr.bf16.mxu1 %v9958_v21  ;;  %v9994_v20 = vld [vmem:[%s10889_s28 + $0x1fe4] ss:$16 sps:$4 sm:$0xff]   ;;  %v9989_v21 = vld [vmem:[%s10889_s28 + $0x1de0] ss:$16 sps:$4 sm:$0xff]  }
 0x1e0   : > { %v9992_v27 = vld [vmem:[%s10889_s28 + $0x1fe0] ss:$16 sps:$4 sm:$0xff]   ;;  %v10003_v32 = vld [vmem:[%s10889_s28 + $0x1da4] ss:$16 sps:$4 sm:$0xff]  }
 0x1e1   : > { %7186 = vmatpush1.bf16.msra.mxu0 %v9953_v28  ;;  %v9997_v28 = vld [vmem:[%s10889_s28 + $0x1dc4] ss:$16 sps:$4 sm:$0xff]   ;;  %v9995_v10 = vld [vmem:[%s10889_s28 + $0x1dc0] ss:$16 sps:$4 sm:$0xff]  }
 0x1e2   : > { %7227 = vmatpush1.bf16.msra.mxu1 %v9956_v29  ;;  %7187 = vmatprep.subr.bf16.mxu0 %v9961_v14  ;;  %v10000_v29 = vld [vmem:[%s10889_s28 + $0x1fc4] ss:$16 sps:$4 sm:$0xff]   ;;  %v9998_v30 = vld [vmem:[%s10889_s28 + $0x1fc0] ss:$16 sps:$4 sm:$0xff]  }
 0x1e3   : > { %7228 = vmatprep.subr.bf16.mxu1 %v9964_v34  ;;  %v10006_v33 = vld [vmem:[%s10889_s28 + $0x1fa4] ss:$16 sps:$4 sm:$0xff]   ;;  %v10001_v14 = vld [vmem:[%s10889_s28 + $0x1da0] ss:$16 sps:$4 sm:$0xff]  }
 0x1e4   : > { %v10004_v34 = vld [vmem:[%s10889_s28 + $0x1fa0] ss:$16 sps:$4 sm:$0xff]  }
 0x1e5   : > { %7188 = vmatpush1.bf16.msra.mxu0 %v9959_v35  ;;  %v10009_v35 = vld [vmem:[%s10889_s28 + $0x1d84] ss:$16 sps:$4 sm:$0xff]  }
 0x1e6   : > { %7229 = vmatpush1.bf16.msra.mxu1 %v9962_v36  ;;  %7189 = vmatprep.subr.bf16.mxu0 %v9967_v43  ;;  %v10012_v36 = vld [vmem:[%s10889_s28 + $0x1f84] ss:$16 sps:$4 sm:$0xff]   ;;  %v10007_v43 = vld [vmem:[%s10889_s28 + $0x1d80] ss:$16 sps:$4 sm:$0xff]  }
 0x1e7   : > { %7230 = vmatprep.subr.bf16.mxu1 %v9970_v44  ;;  %v10010_v44 = vld [vmem:[%s10889_s28 + $0x1f80] ss:$16 sps:$4 sm:$0xff]  }
 0x1e9   : > { %7190 = vmatpush1.bf16.msra.mxu0 %v9965_v55  ;;  %v10015_v55 = vld [vmem:[%s10889_s28 + $0x1d64] ss:$16 sps:$4 sm:$0xff]  }
 0x1ea   : > { %7231 = vmatpush1.bf16.msra.mxu1 %v9968_v56  ;;  %7191 = vmatprep.subr.bf16.mxu0 %v9973_v57  ;;  %v10018_v56 = vld [vmem:[%s10889_s28 + $0x1f64] ss:$16 sps:$4 sm:$0xff]   ;;  %v10013_v57 = vld [vmem:[%s10889_s28 + $0x1d60] ss:$16 sps:$4 sm:$0xff]  }
 0x1eb   : > { %7232 = vmatprep.subr.bf16.mxu1 %v9976_v58  ;;  %v10016_v58 = vld [vmem:[%s10889_s28 + $0x1f60] ss:$16 sps:$4 sm:$0xff]  }
 0x1ed   : > { %7192 = vmatpush1.bf16.msra.mxu0 %v9971_v1  ;;  %v10021_v1 = vld [vmem:[%s10889_s28 + $0x1d44] ss:$16 sps:$4 sm:$0xff]  }
 0x1ee   : > { %7233 = vmatpush1.bf16.msra.mxu1 %v9974_v2  ;;  %7193 = vmatprep.subr.bf16.mxu0 %v9979_v6  ;;  %v10024_v2 = vld [vmem:[%s10889_s28 + $0x1f44] ss:$16 sps:$4 sm:$0xff]   ;;  %v10019_v6 = vld [vmem:[%s10889_s28 + $0x1d40] ss:$16 sps:$4 sm:$0xff]  }
 0x1ef   : > { %7234 = vmatprep.subr.bf16.mxu1 %v9982_v9  ;;  %v10022_v9 = vld [vmem:[%s10889_s28 + $0x1f40] ss:$16 sps:$4 sm:$0xff]  }
 0x1f1   : > { %7194 = vmatpush1.bf16.msra.mxu0 %v9977_v11  ;;  %v10027_v11 = vld [vmem:[%s10889_s28 + $0x1d24] ss:$16 sps:$4 sm:$0xff]  }
 0x1f2   : > { %7235 = vmatpush1.bf16.msra.mxu1 %v9980_v13  ;;  %7195 = vmatprep.subr.bf16.mxu0 %v9985_v54  ;;  %v10030_v13 = vld [vmem:[%s10889_s28 + $0x1f24] ss:$16 sps:$4 sm:$0xff]   ;;  %v10025_v54 = vld [vmem:[%s10889_s28 + $0x1d20] ss:$16 sps:$4 sm:$0xff]  }
 0x1f3   : > { %7236 = vmatprep.subr.bf16.mxu1 %v9988_v15  ;;  %v10028_v15 = vld [vmem:[%s10889_s28 + $0x1f20] ss:$16 sps:$4 sm:$0xff]  }
 0x1f5   : > { %7196 = vmatpush1.bf16.msra.mxu0 %v9983_v16  ;;  %v10033_v16 = vld [vmem:[%s10889_s28 + $0x1d04] ss:$16 sps:$4 sm:$0xff]  }
 0x1f6   : > { %7237 = vmatpush1.bf16.msra.mxu1 %v9986_v19  ;;  %7197 = vmatprep.subr.bf16.mxu0 %v9991_v12  ;;  %v10036_v19 = vld [vmem:[%s10889_s28 + $0x1f04] ss:$16 sps:$4 sm:$0xff]   ;;  %v10031_v12 = vld [vmem:[%s10889_s28 + $0x1d00] ss:$16 sps:$4 sm:$0xff]  }
 0x1f7   : > { %7238 = vmatprep.subr.bf16.mxu1 %v9994_v20  ;;  %v10034_v20 = vld [vmem:[%s10889_s28 + $0x1f00] ss:$16 sps:$4 sm:$0xff]  }
 0x1f9   : > { %7198 = vmatpush2.bf16.msra.mxu0 %v9989_v21  ;;  %v10043_v21 = vld [vmem:[%s10889_s28 + $0xec] ss:$16 sps:$4 sm:$0xff]  }
 0x1fa   : > { %7239 = vmatpush2.bf16.msra.mxu1 %v9992_v27  ;;  %7199 = vmatprep.subr.bf16.mxu0 %v9997_v28  ;;  %v10046_v27 = vld [vmem:[%s10889_s28 + $0x2ec] ss:$16 sps:$4 sm:$0xff]   ;;  %v10041_v28 = vld [vmem:[%s10889_s28 + $0xe8] ss:$16 sps:$4 sm:$0xff]  }
 0x1fb   : > { %7240 = vmatprep.subr.bf16.mxu1 %v10000_v29  ;;  %v10044_v29 = vld [vmem:[%s10889_s28 + $0x2e8] ss:$16 sps:$4 sm:$0xff]  }
 0x1fd   : > { %7200 = vmatpush2.bf16.msra.mxu0 %v9995_v10  ;;  %v11618_v10 = vcombine.low %v11519_v63, %v11519_v63 }
 0x1fe   : > { %7241 = vmatpush2.bf16.msra.mxu1 %v9998_v30  ;;  %7201 = vmatprep.subr.bf16.mxu0 %v10003_v32  ;;  %v11622_v30 = vcombine.low %v11522_v0, %v11522_v0  ;;  %v10049_v32 = vld [vmem:[%s10889_s28 + $0xcc] ss:$16 sps:$4 sm:$0xff]  }
 0x1ff   : > { %7242 = vmatprep.subr.bf16.mxu1 %v10006_v33  ;;  %v10052_v33 = vld [vmem:[%s10889_s28 + $0x2cc] ss:$16 sps:$4 sm:$0xff]  }
 0x201   : > { %7202 = vmatpush2.bf16.msra.mxu0 %v10001_v14  ;;  %v10047_v14 = vld [vmem:[%s10889_s28 + $0xc8] ss:$16 sps:$4 sm:$0xff]  }
 0x202   : > { %7243 = vmatpush2.bf16.msra.mxu1 %v10004_v34  ;;  %7203 = vmatprep.subr.bf16.mxu0 %v10009_v35  ;;  %v10050_v34 = vld [vmem:[%s10889_s28 + $0x2c8] ss:$16 sps:$4 sm:$0xff]  }
 0x203   : > { %7244 = vmatprep.subr.bf16.mxu1 %v10012_v36 }
 0x205   : > { %7204 = vmatpush2.bf16.msra.mxu0 %v10007_v43 }
 0x206   : > { %7245 = vmatpush2.bf16.msra.mxu1 %v10010_v44  ;;  %7205 = vmatprep.subr.bf16.mxu0 %v10015_v55  ;;  %v10055_v44 = vld [vmem:[%s10889_s28 + $0xac] ss:$16 sps:$4 sm:$0xff]  }
 0x207   : > { %7246 = vmatprep.subr.bf16.mxu1 %v10018_v56  ;;  %v10058_v55 = vld [vmem:[%s10889_s28 + $0x2ac] ss:$16 sps:$4 sm:$0xff]  }
 0x209   : > { %7206 = vmatpush2.bf16.msra.mxu0 %v10013_v57 }
 0x20a   : > { %7247 = vmatpush2.bf16.msra.mxu1 %v10016_v58  ;;  %7207 = vmatprep.subr.bf16.mxu0 %v10021_v1  ;;  %v10053_v58 = vld [vmem:[%s10889_s28 + $0xa8] ss:$16 sps:$4 sm:$0xff]  }
 0x20b   : > { %7248 = vmatprep.subr.bf16.mxu1 %v10024_v2  ;;  %v10056_v1 = vld [vmem:[%s10889_s28 + $0x2a8] ss:$16 sps:$4 sm:$0xff]  }
 0x20d   : > { %7208 = vmatpush2.bf16.msra.mxu0 %v10019_v6 }
 0x20e   : > { %7249 = vmatpush2.bf16.msra.mxu1 %v10022_v9  ;;  %7209 = vmatprep.subr.bf16.mxu0 %v10027_v11 }
 0x20f   : > { %7250 = vmatprep.subr.bf16.mxu1 %v10030_v13  ;;  %v10062_v13 = vld [vmem:[%s10889_s28 + $0x288] ss:$16 sps:$4 sm:$0xff]  }
 0x211   : > { %7210 = vmatpush2.bf16.msra.mxu0 %v10025_v54  ;;  %v10067_v54 = vld [vmem:[%s10889_s28 + $0x6c] ss:$16 sps:$4 sm:$0xff]  }
 0x212   : > { %7251 = vmatpush2.bf16.msra.mxu1 %v10028_v15  ;;  %7211 = vmatprep.subr.bf16.mxu0 %v10033_v16  ;;  %v10070_v15 = vld [vmem:[%s10889_s28 + $0x26c] ss:$16 sps:$4 sm:$0xff]   ;;  %v10065_v16 = vld [vmem:[%s10889_s28 + $0x68] ss:$16 sps:$4 sm:$0xff]  }
 0x213   : > { %7252 = vmatprep.subr.bf16.mxu1 %v10036_v19  ;;  %v10068_v19 = vld [vmem:[%s10889_s28 + $0x268] ss:$16 sps:$4 sm:$0xff]  }
 0x215   : > { %7212 = vmatpush2.bf16.msra.mxu0 %v10031_v12  ;;  %v10073_v12 = vld [vmem:[%s10889_s28 + $0x4c] ss:$16 sps:$4 sm:$0xff]  }
 0x216   : > { %7253 = vmatpush2.bf16.msra.mxu1 %v10034_v20  ;;  %7263 = vmatprep.subr.bf16.mxu0 %v10043_v21  ;;  %v10076_v20 = vld [vmem:[%s10889_s28 + $0x24c] ss:$16 sps:$4 sm:$0xff]   ;;  %v10071_v21 = vld [vmem:[%s10889_s28 + $0x48] ss:$16 sps:$4 sm:$0xff]  }
 0x217   : > { %7304 = vmatprep.subr.bf16.mxu1 %v10046_v27  ;;  %v10074_v27 = vld [vmem:[%s10889_s28 + $0x248] ss:$16 sps:$4 sm:$0xff]  }
 0x218   : > { %v6969_v35 = vpop.f32.mrf.mxu0  ;;  %7214 = vmatmul.mubr.bf16.vlgmr.msra.gmra.mxu0 %v11618_v10 }
 0x219   : > { %v7010_v36 = vpop.f32.mrf.mxu1  ;;  %7255 = vmatmul.mubr.bf16.vlgmr.msra.gmra.mxu1 %v11622_v30  ;;  %v6970_v63 = vadd.f32 %v6969_v35, %v11551_v22  ;;  %7264 = vmatpush1.bf16.msra.mxu0 %v10041_v28  ;;  %v10079_v28 = vld [vmem:[%s10889_s28 + $0x2c] ss:$16 sps:$4 sm:$0xff]   ;;  %v10083_v35 = vld [vmem:[%s10889_s28 + $0x8] ss:$16 sps:$4 sm:$0xff]  }
 0x21a   : > { %7305 = vmatpush1.bf16.msra.mxu1 %v10044_v29  ;;  %v6971_v0 = vpop.f32.mrf.mxu0  ;;  %7265 = vmatprep.subr.bf16.mxu0 %v10049_v32  ;;  %v10082_v29 = vld [vmem:[%s10889_s28 + $0x22c] ss:$16 sps:$4 sm:$0xff]   ;;  %v10077_v32 = vld [vmem:[%s10889_s28 + $0x28] ss:$16 sps:$4 sm:$0xff]  }
 0x21b   : > { %v7012_v43 = vpop.f32.mrf.mxu1  ;;  %7306 = vmatprep.subr.bf16.mxu1 %v10052_v33  ;;  %v11633_v56 = vadd.f32 %v7010_v36, %v6970_v63  ;;  %v6972_v57 = vadd.f32 %v6971_v0, %v11558_v31  ;;  %7295 = vmatprep.mubr.bf16.mxu0 %v10939_v48  ;;  %v10061_v31 = vld [vmem:[%s10889_s28 + $0x8c] ss:$16 sps:$4 sm:$0xff]   ;;  %v10080_v33 = vld [vmem:[%s10889_s28 + $0x228] ss:$16 sps:$4 sm:$0xff]  }
 0x21c   : > { %7336 = vmatprep.mubr.bf16.mxu1 %v10944_v52  ;;  %v6973_v22 = vpop.f32.mrf.mxu0  ;;  %v10064_v48 = vld [vmem:[%s10889_s28 + $0x28c] ss:$16 sps:$4 sm:$0xff]   ;;  %v10059_v52 = vld [vmem:[%s10889_s28 + $0x88] ss:$16 sps:$4 sm:$0xff]  }
 0x21d   : > { %v7014_v2 = vpop.f32.mrf.mxu1  ;;  %v11640_v6 = vadd.f32 %v7012_v43, %v6972_v57  ;;  %7266 = vmatpush1.bf16.msra.mxu0 %v10047_v14  ;;  %v10085_v14 = vld [vmem:[%s10889_s28 + $0xc] ss:$16 sps:$4 sm:$0xff]   ;;  %v10086_v36 = vld [vmem:[%s10889_s28 + $0x208] ss:$16 sps:$4 sm:$0xff]  }
 0x21e   : > { %7307 = vmatpush1.bf16.msra.mxu1 %v10050_v34  ;;  %v6974_v9 = vpop.f32.mrf.mxu0  ;;  %7267 = vmatprep.subr.bf16.mxu0 %v10055_v44  ;;  %v10088_v34 = vld [vmem:[%s10889_s28 + $0x20c] ss:$16 sps:$4 sm:$0xff]   ;;  %v10089_v43 = vld [vmem:[%s10889_s28 + $0x1e8] ss:$16 sps:$4 sm:$0xff]  }
 0x21f   : > { %v7015_v11 = vpop.f32.mrf.mxu1  ;;  %7308 = vmatprep.subr.bf16.mxu1 %v10058_v55  ;;  %v10091_v63 = vld [vmem:[%s10889_s28 + $0x1ec] ss:$16 sps:$4 sm:$0xff]   ;;  %v10092_v44 = vld [vmem:[%s10889_s28 + $0x3e8] ss:$16 sps:$4 sm:$0xff]  }
 0x220   : > { %v10094_v0 = vld [vmem:[%s10889_s28 + $0x3ec] ss:$16 sps:$4 sm:$0xff]   ;;  %v10101_v9 = vld [vmem:[%s10889_s28 + $0x1a8] ss:$16 sps:$4 sm:$0xff]  }
 0x221   : > { %7268 = vmatpush1.bf16.msra.mxu0 %v10053_v58  ;;  %v10097_v55 = vld [vmem:[%s10889_s28 + $0x1cc] ss:$16 sps:$4 sm:$0xff]   ;;  %v10095_v58 = vld [vmem:[%s10889_s28 + $0x1c8] ss:$16 sps:$4 sm:$0xff]  }
 0x222   : > { %7309 = vmatpush1.bf16.msra.mxu1 %v10056_v1  ;;  %7269 = vmatprep.subr.bf16.mxu0 %v10061_v31  ;;  %v10100_v57 = vld [vmem:[%s10889_s28 + $0x3cc] ss:$16 sps:$4 sm:$0xff]   ;;  %v10098_v1 = vld [vmem:[%s10889_s28 + $0x3c8] ss:$16 sps:$4 sm:$0xff]  }
 0x223   : > { %7310 = vmatprep.subr.bf16.mxu1 %v10064_v48  ;;  %v10103_v22 = vld [vmem:[%s10889_s28 + $0x1ac] ss:$16 sps:$4 sm:$0xff]   ;;  %v10104_v11 = vld [vmem:[%s10889_s28 + $0x3a8] ss:$16 sps:$4 sm:$0xff]  }
 0x224   : > { %v10106_v2 = vld [vmem:[%s10889_s28 + $0x3ac] ss:$16 sps:$4 sm:$0xff]  }
 0x225   : > { %7270 = vmatpush1.bf16.msra.mxu0 %v10059_v52  ;;  %v10109_v31 = vld [vmem:[%s10889_s28 + $0x18c] ss:$16 sps:$4 sm:$0xff]   ;;  %v10107_v52 = vld [vmem:[%s10889_s28 + $0x188] ss:$16 sps:$4 sm:$0xff]  }
 0x226   : > { %7311 = vmatpush1.bf16.msra.mxu1 %v10062_v13  ;;  %7271 = vmatprep.subr.bf16.mxu0 %v10067_v54  ;;  %v10112_v48 = vld [vmem:[%s10889_s28 + $0x38c] ss:$16 sps:$4 sm:$0xff]   ;;  %v10110_v13 = vld [vmem:[%s10889_s28 + $0x388] ss:$16 sps:$4 sm:$0xff]  }
 0x227   : > { %7312 = vmatprep.subr.bf16.mxu1 %v10070_v15  ;;  %v10115_v54 = vld [vmem:[%s10889_s28 + $0x16c] ss:$16 sps:$4 sm:$0xff]  }
 0x228   : > { %v10118_v15 = vld [vmem:[%s10889_s28 + $0x36c] ss:$16 sps:$4 sm:$0xff]  }
 0x229   : > { %7272 = vmatpush1.bf16.msra.mxu0 %v10065_v16  ;;  %v10113_v16 = vld [vmem:[%s10889_s28 + $0x168] ss:$16 sps:$4 sm:$0xff]  }
 0x22a   : > { %7313 = vmatpush1.bf16.msra.mxu1 %v10068_v19  ;;  %7273 = vmatprep.subr.bf16.mxu0 %v10073_v12  ;;  %v10116_v19 = vld [vmem:[%s10889_s28 + $0x368] ss:$16 sps:$4 sm:$0xff]   ;;  %v10121_v12 = vld [vmem:[%s10889_s28 + $0x14c] ss:$16 sps:$4 sm:$0xff]  }
 0x22b   : > { %7314 = vmatprep.subr.bf16.mxu1 %v10076_v20  ;;  %v10124_v20 = vld [vmem:[%s10889_s28 + $0x34c] ss:$16 sps:$4 sm:$0xff]  }
 0x22d   : > { %7274 = vmatpush1.bf16.msra.mxu0 %v10071_v21  ;;  %v10119_v21 = vld [vmem:[%s10889_s28 + $0x148] ss:$16 sps:$4 sm:$0xff]  }
 0x22e   : > { %7315 = vmatpush1.bf16.msra.mxu1 %v10074_v27  ;;  %7275 = vmatprep.subr.bf16.mxu0 %v10079_v28  ;;  %v10122_v27 = vld [vmem:[%s10889_s28 + $0x348] ss:$16 sps:$4 sm:$0xff]   ;;  %v10127_v28 = vld [vmem:[%s10889_s28 + $0x12c] ss:$16 sps:$4 sm:$0xff]  }
 0x22f   : > { %7316 = vmatprep.subr.bf16.mxu1 %v10082_v29  ;;  %v10130_v29 = vld [vmem:[%s10889_s28 + $0x32c] ss:$16 sps:$4 sm:$0xff]  }
 0x231   : > { %7276 = vmatpush1.bf16.msra.mxu0 %v10077_v32  ;;  %v10125_v32 = vld [vmem:[%s10889_s28 + $0x128] ss:$16 sps:$4 sm:$0xff]  }
 0x232   : > { %7317 = vmatpush1.bf16.msra.mxu1 %v10080_v33  ;;  %7277 = vmatprep.subr.bf16.mxu0 %v10085_v14  ;;  %v10128_v33 = vld [vmem:[%s10889_s28 + $0x328] ss:$16 sps:$4 sm:$0xff]   ;;  %v10133_v14 = vld [vmem:[%s10889_s28 + $0x10c] ss:$16 sps:$4 sm:$0xff]  }
 0x233   : > { %7318 = vmatprep.subr.bf16.mxu1 %v10088_v34  ;;  %v10136_v34 = vld [vmem:[%s10889_s28 + $0x30c] ss:$16 sps:$4 sm:$0xff]  }
 0x235   : > { %7278 = vmatpush1.bf16.msra.mxu0 %v10083_v35  ;;  %v10131_v35 = vld [vmem:[%s10889_s28 + $0x108] ss:$16 sps:$4 sm:$0xff]  }
 0x236   : > { %7319 = vmatpush1.bf16.msra.mxu1 %v10086_v36  ;;  %7279 = vmatprep.subr.bf16.mxu0 %v10091_v63  ;;  %v10134_v36 = vld [vmem:[%s10889_s28 + $0x308] ss:$16 sps:$4 sm:$0xff]   ;;  %v10139_v63 = vld [vmem:[%s10889_s28 + $0x4ec] ss:$16 sps:$4 sm:$0xff]  }
 0x237   : > { %7320 = vmatprep.subr.bf16.mxu1 %v10094_v0  ;;  %v10142_v0 = vld [vmem:[%s10889_s28 + $0x6ec] ss:$16 sps:$4 sm:$0xff]  }
 0x239   : > { %7280 = vmatpush2.bf16.msra.mxu0 %v10089_v43  ;;  %v10137_v43 = vld [vmem:[%s10889_s28 + $0x4e8] ss:$16 sps:$4 sm:$0xff]  }
 0x23a   : > { %7321 = vmatpush2.bf16.msra.mxu1 %v10092_v44  ;;  %7281 = vmatprep.subr.bf16.mxu0 %v10097_v55  ;;  %v10140_v44 = vld [vmem:[%s10889_s28 + $0x6e8] ss:$16 sps:$4 sm:$0xff]   ;;  %v10145_v55 = vld [vmem:[%s10889_s28 + $0x4cc] ss:$16 sps:$4 sm:$0xff]  }
 0x23b   : > { %7322 = vmatprep.subr.bf16.mxu1 %v10100_v57  ;;  %v10148_v57 = vld [vmem:[%s10889_s28 + $0x6cc] ss:$16 sps:$4 sm:$0xff]  }
 0x23d   : > { %7282 = vmatpush2.bf16.msra.mxu0 %v10095_v58  ;;  %v10143_v58 = vld [vmem:[%s10889_s28 + $0x4c8] ss:$16 sps:$4 sm:$0xff]  }
 0x23e   : > { %7323 = vmatpush2.bf16.msra.mxu1 %v10098_v1  ;;  %7283 = vmatprep.subr.bf16.mxu0 %v10103_v22 }
 0x23f   : > { %7324 = vmatprep.subr.bf16.mxu1 %v10106_v2 }
 0x241   : > { %7284 = vmatpush2.bf16.msra.mxu0 %v10101_v9  ;;  %v10146_v9 = vld [vmem:[%s10889_s28 + $0x6c8] ss:$16 sps:$4 sm:$0xff]  }
 0x242   : > { %7325 = vmatpush2.bf16.msra.mxu1 %v10104_v11  ;;  %7285 = vmatprep.subr.bf16.mxu0 %v10109_v31 }
 0x243   : > { %7326 = vmatprep.subr.bf16.mxu1 %v10112_v48  ;;  %v10151_v48 = vld [vmem:[%s10889_s28 + $0x4ac] ss:$16 sps:$4 sm:$0xff]  }
 0x245   : > { %7286 = vmatpush2.bf16.msra.mxu0 %v10107_v52  ;;  %v10154_v52 = vld [vmem:[%s10889_s28 + $0x6ac] ss:$16 sps:$4 sm:$0xff]  }
 0x246   : > { %7327 = vmatpush2.bf16.msra.mxu1 %v10110_v13  ;;  %7287 = vmatprep.subr.bf16.mxu0 %v10115_v54 }
 0x247   : > { %7328 = vmatprep.subr.bf16.mxu1 %v10118_v15  ;;  %v10149_v15 = vld [vmem:[%s10889_s28 + $0x4a8] ss:$16 sps:$4 sm:$0xff]  }
 0x249   : > { %7288 = vmatpush2.bf16.msra.mxu0 %v10113_v16  ;;  %v10152_v16 = vld [vmem:[%s10889_s28 + $0x6a8] ss:$16 sps:$4 sm:$0xff]  }
 0x24a   : > { %7329 = vmatpush2.bf16.msra.mxu1 %v10116_v19  ;;  %7289 = vmatprep.subr.bf16.mxu0 %v10121_v12 }
 0x24b   : > { %7330 = vmatprep.subr.bf16.mxu1 %v10124_v20  ;;  %v10158_v20 = vld [vmem:[%s10889_s28 + $0x688] ss:$16 sps:$4 sm:$0xff]  }
 0x24d   : > { %7290 = vmatpush2.bf16.msra.mxu0 %v10119_v21  ;;  %v10163_v21 = vld [vmem:[%s10889_s28 + $0x46c] ss:$16 sps:$4 sm:$0xff]  }
 0x24e   : > { %7331 = vmatpush2.bf16.msra.mxu1 %v10122_v27  ;;  %7291 = vmatprep.subr.bf16.mxu0 %v10127_v28  ;;  %v10166_v27 = vld [vmem:[%s10889_s28 + $0x66c] ss:$16 sps:$4 sm:$0xff]   ;;  %v10161_v28 = vld [vmem:[%s10889_s28 + $0x468] ss:$16 sps:$4 sm:$0xff]  }
 0x24f   : > { %7332 = vmatprep.subr.bf16.mxu1 %v10130_v29  ;;  %v10164_v29 = vld [vmem:[%s10889_s28 + $0x668] ss:$16 sps:$4 sm:$0xff]  }
 0x251   : > { %7292 = vmatpush2.bf16.msra.mxu0 %v10125_v32  ;;  %v10169_v32 = vld [vmem:[%s10889_s28 + $0x44c] ss:$16 sps:$4 sm:$0xff]  }
 0x252   : > { %7333 = vmatpush2.bf16.msra.mxu1 %v10128_v33  ;;  %7293 = vmatprep.subr.bf16.mxu0 %v10133_v14  ;;  %v10172_v33 = vld [vmem:[%s10889_s28 + $0x64c] ss:$16 sps:$4 sm:$0xff]   ;;  %v10167_v14 = vld [vmem:[%s10889_s28 + $0x448] ss:$16 sps:$4 sm:$0xff]  }
 0x253   : > { %7334 = vmatprep.subr.bf16.mxu1 %v10136_v34  ;;  %v10170_v34 = vld [vmem:[%s10889_s28 + $0x648] ss:$16 sps:$4 sm:$0xff]  }
 0x255   : > { %7294 = vmatpush2.bf16.msra.mxu0 %v10131_v35  ;;  %v10175_v35 = vld [vmem:[%s10889_s28 + $0x42c] ss:$16 sps:$4 sm:$0xff]  }
 0x256   : > { %7335 = vmatpush2.bf16.msra.mxu1 %v10134_v36  ;;  %7345 = vmatprep.subr.bf16.mxu0 %v10139_v63  ;;  %v10178_v36 = vld [vmem:[%s10889_s28 + $0x62c] ss:$16 sps:$4 sm:$0xff]   ;;  %v10173_v63 = vld [vmem:[%s10889_s28 + $0x428] ss:$16 sps:$4 sm:$0xff]  }
 0x257   : > { %7386 = vmatprep.subr.bf16.mxu1 %v10142_v0  ;;  %v10176_v0 = vld [vmem:[%s10889_s28 + $0x628] ss:$16 sps:$4 sm:$0xff]  }
 0x258   : > { %v7051_v1 = vpop.f32.mrf.mxu0  ;;  %7296 = vmatmul.mubr.bf16.vlgmr.msra.gmra.mxu0 %v10966_v7 }
 0x259   : > { %v7092_v22 = vpop.f32.mrf.mxu1  ;;  %7337 = vmatmul.mubr.bf16.vlgmr.msra.gmra.mxu1 %v10968_v8  ;;  %v7052_v2 = vadd.f32 %v7051_v1, %v11633_v56  ;;  %7346 = vmatpush1.bf16.msra.mxu0 %v10137_v43  ;;  %v10181_v43 = vld [vmem:[%s10889_s28 + $0x40c] ss:$16 sps:$4 sm:$0xff]  }
 0x25a   : > { %7387 = vmatpush1.bf16.msra.mxu1 %v10140_v44  ;;  %v7053_v11 = vpop.f32.mrf.mxu0  ;;  %7347 = vmatprep.subr.bf16.mxu0 %v10145_v55  ;;  %v10184_v44 = vld [vmem:[%s10889_s28 + $0x60c] ss:$16 sps:$4 sm:$0xff]   ;;  %v10179_v55 = vld [vmem:[%s10889_s28 + $0x408] ss:$16 sps:$4 sm:$0xff]  }
 0x25b   : > { %v7094_v31 = vpop.f32.mrf.mxu1  ;;  %7388 = vmatprep.subr.bf16.mxu1 %v10148_v57  ;;  %v11707_v13 = vadd.f32 %v7092_v22, %v7052_v2  ;;  %v7054_v7 = vadd.f32 %v7053_v11, %v11640_v6  ;;  %7377 = vmatprep.mubr.bf16.mxu0 %v11006_v37  ;;  %v10157_v37 = vld [vmem:[%s10889_s28 + $0x48c] ss:$16 sps:$4 sm:$0xff]   ;;  %v10155_v6 = vld [vmem:[%s10889_s28 + $0x488] ss:$16 sps:$4 sm:$0xff]  }
 0x25c   : > { %7418 = vmatprep.mubr.bf16.mxu1 %v11010_v38  ;;  %v7055_v8 = vpop.f32.mrf.mxu0  ;;  %v10160_v38 = vld [vmem:[%s10889_s28 + $0x68c] ss:$16 sps:$4 sm:$0xff]   ;;  %v10182_v57 = vld [vmem:[%s10889_s28 + $0x608] ss:$16 sps:$4 sm:$0xff]  }
 0x25d   : > { %v7096_v56 = vpop.f32.mrf.mxu1  ;;  %v11712_v54 = vadd.f32 %v7094_v31, %v7054_v7  ;;  %7348 = vmatpush1.bf16.msra.mxu0 %v10143_v58  ;;  %v10187_v58 = vld [vmem:[%s10889_s28 + $0x5ec] ss:$16 sps:$4 sm:$0xff]   ;;  %v10185_v22 = vld [vmem:[%s10889_s28 + $0x5e8] ss:$16 sps:$4 sm:$0xff]  }
 0x25e   : > { %7389 = vmatpush1.bf16.msra.mxu1 %v10146_v9  ;;  %v7056_v19 = vpop.f32.mrf.mxu0  ;;  %7349 = vmatprep.subr.bf16.mxu0 %v10151_v48  ;;  %v10190_v1 = vld [vmem:[%s10889_s28 + $0x7ec] ss:$16 sps:$4 sm:$0xff]   ;;  %v10188_v2 = vld [vmem:[%s10889_s28 + $0x7e8] ss:$16 sps:$4 sm:$0xff]  }
 0x25f   : > { %v7097_v12 = vpop.f32.mrf.mxu1  ;;  %7390 = vmatprep.subr.bf16.mxu1 %v10154_v52  ;;  %v10193_v9 = vld [vmem:[%s10889_s28 + $0x5cc] ss:$16 sps:$4 sm:$0xff]   ;;  %v10191_v31 = vld [vmem:[%s10889_s28 + $0x5c8] ss:$16 sps:$4 sm:$0xff]  }
 0x260   : > { %v10196_v11 = vld [vmem:[%s10889_s28 + $0x7cc] ss:$16 sps:$4 sm:$0xff]   ;;  %v10194_v48 = vld [vmem:[%s10889_s28 + $0x7c8] ss:$16 sps:$4 sm:$0xff]  }
 0x261   : > { %7350 = vmatpush1.bf16.msra.mxu0 %v10149_v15  ;;  %v10199_v52 = vld [vmem:[%s10889_s28 + $0x5ac] ss:$16 sps:$4 sm:$0xff]   ;;  %v10197_v8 = vld [vmem:[%s10889_s28 + $0x5a8] ss:$16 sps:$4 sm:$0xff]  }
 0x262   : > { %7391 = vmatpush1.bf16.msra.mxu1 %v10152_v16  ;;  %7351 = vmatprep.subr.bf16.mxu0 %v10157_v37  ;;  %v10202_v7 = vld [vmem:[%s10889_s28 + $0x7ac] ss:$16 sps:$4 sm:$0xff]   ;;  %v10200_v56 = vld [vmem:[%s10889_s28 + $0x7a8] ss:$16 sps:$4 sm:$0xff]  }
 0x263   : > { %7392 = vmatprep.subr.bf16.mxu1 %v10160_v38  ;;  %v10205_v15 = vld [vmem:[%s10889_s28 + $0x58c] ss:$16 sps:$4 sm:$0xff]   ;;  %v10203_v19 = vld [vmem:[%s10889_s28 + $0x588] ss:$16 sps:$4 sm:$0xff]  }
 0x264   : > { %v10208_v16 = vld [vmem:[%s10889_s28 + $0x78c] ss:$16 sps:$4 sm:$0xff]   ;;  %v10206_v12 = vld [vmem:[%s10889_s28 + $0x788] ss:$16 sps:$4 sm:$0xff]  }
 0x265   : > { %7352 = vmatpush1.bf16.msra.mxu0 %v10155_v6  ;;  %v10211_v37 = vld [vmem:[%s10889_s28 + $0x56c] ss:$16 sps:$4 sm:$0xff]   ;;  %v10209_v6 = vld [vmem:[%s10889_s28 + $0x568] ss:$16 sps:$4 sm:$0xff]  }
 0x266   : > { %7393 = vmatpush1.bf16.msra.mxu1 %v10158_v20  ;;  %7353 = vmatprep.subr.bf16.mxu0 %v10163_v21  ;;  %v10214_v38 = vld [vmem:[%s10889_s28 + $0x76c] ss:$16 sps:$4 sm:$0xff]   ;;  %v10212_v20 = vld [vmem:[%s10889_s28 + $0x768] ss:$16 sps:$4 sm:$0xff]  }
 0x267   : > { %7394 = vmatprep.subr.bf16.mxu1 %v10166_v27  ;;  %v10217_v21 = vld [vmem:[%s10889_s28 + $0x54c] ss:$16 sps:$4 sm:$0xff]  }
 0x268   : > { %v10220_v27 = vld [vmem:[%s10889_s28 + $0x74c] ss:$16 sps:$4 sm:$0xff]  }
 0x269   : > { %7354 = vmatpush1.bf16.msra.mxu0 %v10161_v28  ;;  %v10215_v28 = vld [vmem:[%s10889_s28 + $0x548] ss:$16 sps:$4 sm:$0xff]  }
 0x26a   : > { %7395 = vmatpush1.bf16.msra.mxu1 %v10164_v29  ;;  %7355 = vmatprep.subr.bf16.mxu0 %v10169_v32  ;;  %v10218_v29 = vld [vmem:[%s10889_s28 + $0x748] ss:$16 sps:$4 sm:$0xff]   ;;  %v10223_v32 = vld [vmem:[%s10889_s28 + $0x52c] ss:$16 sps:$4 sm:$0xff]  }
 0x26b   : > { %7396 = vmatprep.subr.bf16.mxu1 %v10172_v33  ;;  %v10226_v33 = vld [vmem:[%s10889_s28 + $0x72c] ss:$16 sps:$4 sm:$0xff]  }
 0x26d   : > { %7356 = vmatpush1.bf16.msra.mxu0 %v10167_v14  ;;  %v10221_v14 = vld [vmem:[%s10889_s28 + $0x528] ss:$16 sps:$4 sm:$0xff]  }
 0x26e   : > { %7397 = vmatpush1.bf16.msra.mxu1 %v10170_v34  ;;  %7357 = vmatprep.subr.bf16.mxu0 %v10175_v35  ;;  %v10224_v34 = vld [vmem:[%s10889_s28 + $0x728] ss:$16 sps:$4 sm:$0xff]   ;;  %v10229_v35 = vld [vmem:[%s10889_s28 + $0x50c] ss:$16 sps:$4 sm:$0xff]  }
 0x26f   : > { %7398 = vmatprep.subr.bf16.mxu1 %v10178_v36  ;;  %v10232_v36 = vld [vmem:[%s10889_s28 + $0x70c] ss:$16 sps:$4 sm:$0xff]  }
 0x271   : > { %7358 = vmatpush1.bf16.msra.mxu0 %v10173_v63  ;;  %v10227_v63 = vld [vmem:[%s10889_s28 + $0x508] ss:$16 sps:$4 sm:$0xff]  }
 0x272   : > { %7399 = vmatpush1.bf16.msra.mxu1 %v10176_v0  ;;  %7359 = vmatprep.subr.bf16.mxu0 %v10181_v43  ;;  %v10230_v0 = vld [vmem:[%s10889_s28 + $0x708] ss:$16 sps:$4 sm:$0xff]   ;;  %v10235_v43 = vld [vmem:[%s10889_s28 + $0x8ec] ss:$16 sps:$4 sm:$0xff]  }
 0x273   : > { %7400 = vmatprep.subr.bf16.mxu1 %v10184_v44  ;;  %v10238_v44 = vld [vmem:[%s10889_s28 + $0xaec] ss:$16 sps:$4 sm:$0xff]  }
 0x275   : > { %7360 = vmatpush1.bf16.msra.mxu0 %v10179_v55  ;;  %v10233_v55 = vld [vmem:[%s10889_s28 + $0x8e8] ss:$16 sps:$4 sm:$0xff]  }
 0x276   : > { %7401 = vmatpush1.bf16.msra.mxu1 %v10182_v57  ;;  %7361 = vmatprep.subr.bf16.mxu0 %v10187_v58  ;;  %v10236_v57 = vld [vmem:[%s10889_s28 + $0xae8] ss:$16 sps:$4 sm:$0xff]   ;;  %v10241_v58 = vld [vmem:[%s10889_s28 + $0x8cc] ss:$16 sps:$4 sm:$0xff]  }
 0x277   : > { %7402 = vmatprep.subr.bf16.mxu1 %v10190_v1  ;;  %v10244_v1 = vld [vmem:[%s10889_s28 + $0xacc] ss:$16 sps:$4 sm:$0xff]  }
 0x279   : > { %7362 = vmatpush2.bf16.msra.mxu0 %v10185_v22 }
 0x27a   : > { %7403 = vmatpush2.bf16.msra.mxu1 %v10188_v2  ;;  %7363 = vmatprep.subr.bf16.mxu0 %v10193_v9  ;;  %v10239_v9 = vld [vmem:[%s10889_s28 + $0x8c8] ss:$16 sps:$4 sm:$0xff]  }
 0x27b   : > { %7404 = vmatprep.subr.bf16.mxu1 %v10196_v11  ;;  %v10242_v11 = vld [vmem:[%s10889_s28 + $0xac8] ss:$16 sps:$4 sm:$0xff]  }
 0x27d   : > { %7364 = vmatpush2.bf16.msra.mxu0 %v10191_v31 }
 0x27e   : > { %7405 = vmatpush2.bf16.msra.mxu1 %v10194_v48  ;;  %7365 = vmatprep.subr.bf16.mxu0 %v10199_v52  ;;  %v10247_v52 = vld [vmem:[%s10889_s28 + $0x8ac] ss:$16 sps:$4 sm:$0xff]  }
 0x27f   : > { %7406 = vmatprep.subr.bf16.mxu1 %v10202_v7  ;;  %v10250_v7 = vld [vmem:[%s10889_s28 + $0xaac] ss:$16 sps:$4 sm:$0xff]  }
 0x281   : > { %7366 = vmatpush2.bf16.msra.mxu0 %v10197_v8  ;;  %v10245_v8 = vld [vmem:[%s10889_s28 + $0x8a8] ss:$16 sps:$4 sm:$0xff]  }
 0x282   : > { %7407 = vmatpush2.bf16.msra.mxu1 %v10200_v56  ;;  %7367 = vmatprep.subr.bf16.mxu0 %v10205_v15  ;;  %v10248_v56 = vld [vmem:[%s10889_s28 + $0xaa8] ss:$16 sps:$4 sm:$0xff]  }
 0x283   : > { %7408 = vmatprep.subr.bf16.mxu1 %v10208_v16 }
 0x285   : > { %7368 = vmatpush2.bf16.msra.mxu0 %v10203_v19  ;;  %v10253_v19 = vld [vmem:[%s10889_s28 + $0x88c] ss:$16 sps:$4 sm:$0xff]  }
 0x286   : > { %7409 = vmatpush2.bf16.msra.mxu1 %v10206_v12  ;;  %7369 = vmatprep.subr.bf16.mxu0 %v10211_v37  ;;  %v10254_v12 = vld [vmem:[%s10889_s28 + $0xa88] ss:$16 sps:$4 sm:$0xff]   ;;  %v10259_v37 = vld [vmem:[%s10889_s28 + $0x86c] ss:$16 sps:$4 sm:$0xff]  }
 0x287   : > { %7410 = vmatprep.subr.bf16.mxu1 %v10214_v38  ;;  %v10262_v38 = vld [vmem:[%s10889_s28 + $0xa6c] ss:$16 sps:$4 sm:$0xff]  }
 0x289   : > { %7370 = vmatpush2.bf16.msra.mxu0 %v10209_v6  ;;  %v10257_v6 = vld [vmem:[%s10889_s28 + $0x868] ss:$16 sps:$4 sm:$0xff]  }
 0x28a   : > { %7411 = vmatpush2.bf16.msra.mxu1 %v10212_v20  ;;  %7371 = vmatprep.subr.bf16.mxu0 %v10217_v21  ;;  %v10260_v20 = vld [vmem:[%s10889_s28 + $0xa68] ss:$16 sps:$4 sm:$0xff]   ;;  %v10265_v21 = vld [vmem:[%s10889_s28 + $0x84c] ss:$16 sps:$4 sm:$0xff]  }
 0x28b   : > { %7412 = vmatprep.subr.bf16.mxu1 %v10220_v27  ;;  %v10268_v27 = vld [vmem:[%s10889_s28 + $0xa4c] ss:$16 sps:$4 sm:$0xff]  }
 0x28d   : > { %7372 = vmatpush2.bf16.msra.mxu0 %v10215_v28  ;;  %v10263_v28 = vld [vmem:[%s10889_s28 + $0x848] ss:$16 sps:$4 sm:$0xff]  }
 0x28e   : > { %7413 = vmatpush2.bf16.msra.mxu1 %v10218_v29  ;;  %7373 = vmatprep.subr.bf16.mxu0 %v10223_v32  ;;  %v10266_v29 = vld [vmem:[%s10889_s28 + $0xa48] ss:$16 sps:$4 sm:$0xff]   ;;  %v10271_v32 = vld [vmem:[%s10889_s28 + $0x82c] ss:$16 sps:$4 sm:$0xff]  }
 0x28f   : > { %7414 = vmatprep.subr.bf16.mxu1 %v10226_v33  ;;  %v10274_v33 = vld [vmem:[%s10889_s28 + $0xa2c] ss:$16 sps:$4 sm:$0xff]  }
 0x291   : > { %7374 = vmatpush2.bf16.msra.mxu0 %v10221_v14  ;;  %v10269_v14 = vld [vmem:[%s10889_s28 + $0x828] ss:$16 sps:$4 sm:$0xff]  }
 0x292   : > { %7415 = vmatpush2.bf16.msra.mxu1 %v10224_v34  ;;  %7375 = vmatprep.subr.bf16.mxu0 %v10229_v35  ;;  %v10272_v34 = vld [vmem:[%s10889_s28 + $0xa28] ss:$16 sps:$4 sm:$0xff]   ;;  %v10277_v35 = vld [vmem:[%s10889_s28 + $0x80c] ss:$16 sps:$4 sm:$0xff]  }
 0x293   : > { %7416 = vmatprep.subr.bf16.mxu1 %v10232_v36  ;;  %v10280_v36 = vld [vmem:[%s10889_s28 + $0xa0c] ss:$16 sps:$4 sm:$0xff]  }
 0x295   : > { %7376 = vmatpush2.bf16.msra.mxu0 %v10227_v63  ;;  %v10275_v63 = vld [vmem:[%s10889_s28 + $0x808] ss:$16 sps:$4 sm:$0xff]  }
 0x296   : > { %7417 = vmatpush2.bf16.msra.mxu1 %v10230_v0  ;;  %7427 = vmatprep.subr.bf16.mxu0 %v10235_v43  ;;  %v10278_v0 = vld [vmem:[%s10889_s28 + $0xa08] ss:$16 sps:$4 sm:$0xff]   ;;  %v10283_v43 = vld [vmem:[%s10889_s28 + $0x9ec] ss:$16 sps:$4 sm:$0xff]  }
 0x297   : > { %7468 = vmatprep.subr.bf16.mxu1 %v10238_v44  ;;  %v10286_v44 = vld [vmem:[%s10889_s28 + $0xbec] ss:$16 sps:$4 sm:$0xff]  }
 0x298   : > { %v11774_v22 = vpop.f32.mrf.mxu0  ;;  %7378 = vmatmul.mubr.bf16.vlgmr.msra.gmra.mxu0 %v11054_v17 }
 0x299   : > { %v11776_v2 = vpop.f32.mrf.mxu1  ;;  %7419 = vmatmul.mubr.bf16.vlgmr.msra.gmra.mxu1 %v11058_v18  ;;  %7428 = vmatpush1.bf16.msra.mxu0 %v10233_v55  ;;  %v10281_v55 = vld [vmem:[%s10889_s28 + $0x9e8] ss:$16 sps:$4 sm:$0xff]  }
 0x29a   : > { %7469 = vmatpush1.bf16.msra.mxu1 %v10236_v57  ;;  %v11782_v31 = vpop.f32.mrf.mxu0  ;;  %7429 = vmatprep.subr.bf16.mxu0 %v10241_v58  ;;  %v10284_v57 = vld [vmem:[%s10889_s28 + $0xbe8] ss:$16 sps:$4 sm:$0xff]   ;;  %v10289_v58 = vld [vmem:[%s10889_s28 + $0x9cc] ss:$16 sps:$4 sm:$0xff]  }
 0x29b   : > { %v11784_v48 = vpop.f32.mrf.mxu1  ;;  %7470 = vmatprep.subr.bf16.mxu1 %v10244_v1  ;;  %7459 = vmatprep.mubr.bf16.mxu0 %v11072_v25  ;;  %v10256_v25 = vld [vmem:[%s10889_s28 + $0xa8c] ss:$16 sps:$4 sm:$0xff]  }
 0x29c   : > { %7500 = vmatprep.mubr.bf16.mxu1 %v11076_v26  ;;  %v7137_v17 = vpop.f32.mrf.mxu0  ;;  %v10251_v26 = vld [vmem:[%s10889_s28 + $0x888] ss:$16 sps:$4 sm:$0xff]   ;;  %v10292_v1 = vld [vmem:[%s10889_s28 + $0xbcc] ss:$16 sps:$4 sm:$0xff]  }
 0x29d   : > { %v7178_v18 = vpop.f32.mrf.mxu1  ;;  %7430 = vmatpush1.bf16.msra.mxu0 %v10239_v9  ;;  %v10287_v9 = vld [vmem:[%s10889_s28 + $0x9c8] ss:$16 sps:$4 sm:$0xff]  }
 0x29e   : > { %7471 = vmatpush1.bf16.msra.mxu1 %v10242_v11  ;;  %v7138_v15 = vpop.f32.mrf.mxu0  ;;  %7431 = vmatprep.subr.bf16.mxu0 %v10247_v52  ;;  %v10290_v11 = vld [vmem:[%s10889_s28 + $0xbc8] ss:$16 sps:$4 sm:$0xff]   ;;  %v10295_v52 = vld [vmem:[%s10889_s28 + $0x9ac] ss:$16 sps:$4 sm:$0xff]  }
 0x29f   : > { %v7179_v16 = vpop.f32.mrf.mxu1  ;;  %7472 = vmatprep.subr.bf16.mxu1 %v10250_v7  ;;  %v10298_v7 = vld [vmem:[%s10889_s28 + $0xbac] ss:$16 sps:$4 sm:$0xff]   ;;  %v10293_v17 = vld [vmem:[%s10889_s28 + $0x9a8] ss:$16 sps:$4 sm:$0xff]  }
 0x2a0   : > { %v10296_v18 = vld [vmem:[%s10889_s28 + $0xba8] ss:$16 sps:$4 sm:$0xff]  }
 0x2a1   : > { %7432 = vmatpush1.bf16.msra.mxu0 %v10245_v8  ;;  %v10301_v8 = vld [vmem:[%s10889_s28 + $0x98c] ss:$16 sps:$4 sm:$0xff]   ;;  %v10299_v15 = vld [vmem:[%s10889_s28 + $0x988] ss:$16 sps:$4 sm:$0xff]  }
 0x2a2   : > { %7473 = vmatpush1.bf16.msra.mxu1 %v10248_v56  ;;  %7433 = vmatprep.subr.bf16.mxu0 %v10253_v19  ;;  %v10304_v56 = vld [vmem:[%s10889_s28 + $0xb8c] ss:$16 sps:$4 sm:$0xff]   ;;  %v10302_v16 = vld [vmem:[%s10889_s28 + $0xb88] ss:$16 sps:$4 sm:$0xff]  }
 0x2a3   : > { %7474 = vmatprep.subr.bf16.mxu1 %v10256_v25  ;;  %v10307_v19 = vld [vmem:[%s10889_s28 + $0x96c] ss:$16 sps:$4 sm:$0xff]  }
 0x2a4   : > { %v10310_v25 = vld [vmem:[%s10889_s28 + $0xb6c] ss:$16 sps:$4 sm:$0xff]  }
 0x2a5   : > { %7434 = vmatpush1.bf16.msra.mxu0 %v10251_v26  ;;  %v10305_v26 = vld [vmem:[%s10889_s28 + $0x968] ss:$16 sps:$4 sm:$0xff]  }
 0x2a6   : > { %7475 = vmatpush1.bf16.msra.mxu1 %v10254_v12  ;;  %7435 = vmatprep.subr.bf16.mxu0 %v10259_v37  ;;  %v10308_v12 = vld [vmem:[%s10889_s28 + $0xb68] ss:$16 sps:$4 sm:$0xff]   ;;  %v10313_v37 = vld [vmem:[%s10889_s28 + $0x94c] ss:$16 sps:$4 sm:$0xff]  }
 0x2a7   : > { %7476 = vmatprep.subr.bf16.mxu1 %v10262_v38  ;;  %v10316_v38 = vld [vmem:[%s10889_s28 + $0xb4c] ss:$16 sps:$4 sm:$0xff]  }
 0x2a9   : > { %7436 = vmatpush1.bf16.msra.mxu0 %v10257_v6  ;;  %v10311_v6 = vld [vmem:[%s10889_s28 + $0x948] ss:$16 sps:$4 sm:$0xff]  }
 0x2aa   : > { %7477 = vmatpush1.bf16.msra.mxu1 %v10260_v20  ;;  %7437 = vmatprep.subr.bf16.mxu0 %v10265_v21  ;;  %v10314_v20 = vld [vmem:[%s10889_s28 + $0xb48] ss:$16 sps:$4 sm:$0xff]   ;;  %v10319_v21 = vld [vmem:[%s10889_s28 + $0x92c] ss:$16 sps:$4 sm:$0xff]  }
 0x2ab   : > { %7478 = vmatprep.subr.bf16.mxu1 %v10268_v27  ;;  %v10322_v27 = vld [vmem:[%s10889_s28 + $0xb2c] ss:$16 sps:$4 sm:$0xff]  }
 0x2ad   : > { %7438 = vmatpush1.bf16.msra.mxu0 %v10263_v28  ;;  %v10317_v28 = vld [vmem:[%s10889_s28 + $0x928] ss:$16 sps:$4 sm:$0xff]  }
 0x2ae   : > { %7479 = vmatpush1.bf16.msra.mxu1 %v10266_v29  ;;  %7439 = vmatprep.subr.bf16.mxu0 %v10271_v32  ;;  %v10320_v29 = vld [vmem:[%s10889_s28 + $0xb28] ss:$16 sps:$4 sm:$0xff]   ;;  %v10325_v32 = vld [vmem:[%s10889_s28 + $0x90c] ss:$16 sps:$4 sm:$0xff]  }
 0x2af   : > { %7480 = vmatprep.subr.bf16.mxu1 %v10274_v33  ;;  %v10328_v33 = vld [vmem:[%s10889_s28 + $0xb0c] ss:$16 sps:$4 sm:$0xff]  }
 0x2b1   : > { %7440 = vmatpush1.bf16.msra.mxu0 %v10269_v14  ;;  %v10323_v14 = vld [vmem:[%s10889_s28 + $0x908] ss:$16 sps:$4 sm:$0xff]  }
 0x2b2   : > { %7481 = vmatpush1.bf16.msra.mxu1 %v10272_v34  ;;  %7441 = vmatprep.subr.bf16.mxu0 %v10277_v35  ;;  %v10326_v34 = vld [vmem:[%s10889_s28 + $0xb08] ss:$16 sps:$4 sm:$0xff]   ;;  %v10331_v35 = vld [vmem:[%s10889_s28 + $0xcec] ss:$16 sps:$4 sm:$0xff]  }
 0x2b3   : > { %7482 = vmatprep.subr.bf16.mxu1 %v10280_v36  ;;  %v10334_v36 = vld [vmem:[%s10889_s28 + $0xeec] ss:$16 sps:$4 sm:$0xff]  }
 0x2b5   : > { %7442 = vmatpush1.bf16.msra.mxu0 %v10275_v63  ;;  %v7134_v63 = vadd.f32 %v11774_v22, %v11707_v13  ;;  %v10335_v22 = vld [vmem:[%s10889_s28 + $0xcc8] ss:$16 sps:$4 sm:$0xff]  }
 0x2b6   : > { %7483 = vmatpush1.bf16.msra.mxu1 %v10278_v0  ;;  %7443 = vmatprep.subr.bf16.mxu0 %v10283_v43  ;;  %v7136_v0 = vadd.f32 %v11782_v31, %v11712_v54  ;;  %v10329_v43 = vld [vmem:[%s10889_s28 + $0xce8] ss:$16 sps:$4 sm:$0xff]  }
 0x2b7   : > { %7484 = vmatprep.subr.bf16.mxu1 %v10286_v44  ;;  %v10332_v44 = vld [vmem:[%s10889_s28 + $0xee8] ss:$16 sps:$4 sm:$0xff]  }
 0x2b8   : > { %v7177_v13 = vadd.f32 %v11784_v48, %v7136_v0  ;;  %v10338_v31 = vld [vmem:[%s10889_s28 + $0xec8] ss:$16 sps:$4 sm:$0xff]   ;;  %v10376_v0 = vld [vmem:[%s10889_s28 + $0xe0c] ss:$16 sps:$4 sm:$0xff]  }
 0x2b9   : > { %7444 = vmatpush2.bf16.msra.mxu0 %v10281_v55  ;;  %v10337_v55 = vld [vmem:[%s10889_s28 + $0xccc] ss:$16 sps:$4 sm:$0xff]  }
 0x2ba   : > { %7485 = vmatpush2.bf16.msra.mxu1 %v10284_v57  ;;  %7445 = vmatprep.subr.bf16.mxu0 %v10289_v58  ;;  %v10340_v57 = vld [vmem:[%s10889_s28 + $0xecc] ss:$16 sps:$4 sm:$0xff]   ;;  %v7175_v58 = vadd.f32 %v11776_v2, %v7134_v63 }
 0x2bb   : > { %7486 = vmatprep.subr.bf16.mxu1 %v10292_v1  ;;  %v10343_v2 = vld [vmem:[%s10889_s28 + $0xcac] ss:$16 sps:$4 sm:$0xff]  }
 0x2bc   : > { %v10373_v63 = vld [vmem:[%s10889_s28 + $0xc0c] ss:$16 sps:$4 sm:$0xff]  }
 0x2bd   : > { %7446 = vmatpush2.bf16.msra.mxu0 %v10287_v9 }
 0x2be   : > { %7487 = vmatpush2.bf16.msra.mxu1 %v10290_v11  ;;  %7447 = vmatprep.subr.bf16.mxu0 %v10295_v52  ;;  %v331_v11 = vld [vmem:[#allocation2 + $0x10] sm:$0xff] }
 0x2bf   : > { %7488 = vmatprep.subr.bf16.mxu1 %v10298_v7 }
 0x2c1   : > { %7448 = vmatpush2.bf16.msra.mxu0 %v10293_v17  ;;  %v10346_v17 = vld [vmem:[%s10889_s28 + $0xeac] ss:$16 sps:$4 sm:$0xff]  }
 0x2c2   : > { %7489 = vmatpush2.bf16.msra.mxu1 %v10296_v18  ;;  %7449 = vmatprep.subr.bf16.mxu0 %v10301_v8 }
 0x2c3   : > { %7490 = vmatprep.subr.bf16.mxu1 %v10304_v56 }
 0x2c5   : > { %7450 = vmatpush2.bf16.msra.mxu0 %v10299_v15 }
 0x2c6   : > { %7491 = vmatpush2.bf16.msra.mxu1 %v10302_v16  ;;  %7451 = vmatprep.subr.bf16.mxu0 %v10307_v19  ;;  %v10341_v16 = vld [vmem:[%s10889_s28 + $0xca8] ss:$16 sps:$4 sm:$0xff]  }
 0x2c7   : > { %7492 = vmatprep.subr.bf16.mxu1 %v10310_v25  ;;  %v10344_v19 = vld [vmem:[%s10889_s28 + $0xea8] ss:$16 sps:$4 sm:$0xff]  }
 0x2c9   : > { %7452 = vmatpush2.bf16.msra.mxu0 %v10305_v26 }
 0x2ca   : > { %7493 = vmatpush2.bf16.msra.mxu1 %v10308_v12  ;;  %7453 = vmatprep.subr.bf16.mxu0 %v10313_v37  ;;  %v10347_v37 = vld [vmem:[%s10889_s28 + $0xc88] ss:$16 sps:$4 sm:$0xff]  }
 0x2cb   : > { %7494 = vmatprep.subr.bf16.mxu1 %v10316_v38  ;;  %v10350_v38 = vld [vmem:[%s10889_s28 + $0xe88] ss:$16 sps:$4 sm:$0xff]  }
 0x2cd   : > { %7454 = vmatpush2.bf16.msra.mxu0 %v10311_v6  ;;  %v10355_v6 = vld [vmem:[%s10889_s28 + $0xc6c] ss:$16 sps:$4 sm:$0xff]  }
 0x2ce   : > { %7495 = vmatpush2.bf16.msra.mxu1 %v10314_v20  ;;  %7455 = vmatprep.subr.bf16.mxu0 %v10319_v21  ;;  %v10358_v20 = vld [vmem:[%s10889_s28 + $0xe6c] ss:$16 sps:$4 sm:$0xff]   ;;  %v10353_v21 = vld [vmem:[%s10889_s28 + $0xc68] ss:$16 sps:$4 sm:$0xff]  }
 0x2cf   : > { %7496 = vmatprep.subr.bf16.mxu1 %v10322_v27  ;;  %v10356_v27 = vld [vmem:[%s10889_s28 + $0xe68] ss:$16 sps:$4 sm:$0xff]  }
 0x2d1   : > { %7456 = vmatpush2.bf16.msra.mxu0 %v10317_v28  ;;  %v10361_v28 = vld [vmem:[%s10889_s28 + $0xc4c] ss:$16 sps:$4 sm:$0xff]  }
 0x2d2   : > { %7497 = vmatpush2.bf16.msra.mxu1 %v10320_v29  ;;  %7457 = vmatprep.subr.bf16.mxu0 %v10325_v32  ;;  %v10364_v29 = vld [vmem:[%s10889_s28 + $0xe4c] ss:$16 sps:$4 sm:$0xff]   ;;  %v10359_v32 = vld [vmem:[%s10889_s28 + $0xc48] ss:$16 sps:$4 sm:$0xff]  }
 0x2d3   : > { %7498 = vmatprep.subr.bf16.mxu1 %v10328_v33  ;;  %v10362_v33 = vld [vmem:[%s10889_s28 + $0xe48] ss:$16 sps:$4 sm:$0xff]  }
 0x2d5   : > { %7458 = vmatpush2.bf16.msra.mxu0 %v10323_v14  ;;  %v10367_v14 = vld [vmem:[%s10889_s28 + $0xc2c] ss:$16 sps:$4 sm:$0xff]  }
 0x2d6   : > { %7499 = vmatpush2.bf16.msra.mxu1 %v10326_v34  ;;  %7509 = vmatprep.subr.bf16.mxu0 %v10331_v35  ;;  %v10370_v34 = vld [vmem:[%s10889_s28 + $0xe2c] ss:$16 sps:$4 sm:$0xff]   ;;  %v10365_v35 = vld [vmem:[%s10889_s28 + $0xc28] ss:$16 sps:$4 sm:$0xff]  }
 0x2d7   : > { %7550 = vmatprep.subr.bf16.mxu1 %v10334_v36  ;;  %v10368_v36 = vld [vmem:[%s10889_s28 + $0xe28] ss:$16 sps:$4 sm:$0xff]  }
 0x2d8   : > { %v7215_v1 = vpop.f32.mrf.mxu0  ;;  %7460 = vmatmul.mubr.bf16.vlgmr.msra.gmra.mxu0 %v11146_v39 }
 0x2d9   : > { %v7256_v9 = vpop.f32.mrf.mxu1  ;;  %7501 = vmatmul.mubr.bf16.vlgmr.msra.gmra.mxu1 %v11150_v40  ;;  %v7216_v54 = vadd.f32 %v7215_v1, %v7175_v58  ;;  %7510 = vmatpush1.bf16.msra.mxu0 %v10329_v43  ;;  %v332_v40 = vld [vmem:[#allocation2] sm:$0xff]  ;;  %v10371_v43 = vld [vmem:[%s10889_s28 + $0xc08] ss:$16 sps:$4 sm:$0xff]  }
 0x2da   : > { %7551 = vmatpush1.bf16.msra.mxu1 %v10332_v44  ;;  %v7217_v52 = vpop.f32.mrf.mxu0  ;;  %7511 = vmatprep.subr.bf16.mxu0 %v10337_v55  ;;  %v10374_v44 = vld [vmem:[%s10889_s28 + $0xe08] ss:$16 sps:$4 sm:$0xff]   ;;  %v10379_v55 = vld [vmem:[%s10889_s28 + $0xdec] ss:$16 sps:$4 sm:$0xff]  }
 0x2db   : > { %v7258_v7 = vpop.f32.mrf.mxu1  ;;  %7552 = vmatprep.subr.bf16.mxu1 %v10340_v57  ;;  %v7257_v18 = vadd.f32 %v7256_v9, %v7216_v54  ;;  %v7218_v39 = vadd.f32 %v7217_v52, %v7177_v13  ;;  %7541 = vmatprep.mubr.bf16.mxu0 %v11162_v23  ;;  %v10349_v23 = vld [vmem:[%s10889_s28 + $0xc8c] ss:$16 sps:$4 sm:$0xff]   ;;  %v10377_v58 = vld [vmem:[%s10889_s28 + $0xde8] ss:$16 sps:$4 sm:$0xff]  }
 0x2dc   : > { %7582 = vmatprep.mubr.bf16.mxu1 %v11166_v24  ;;  %v7219_v48 = vpop.f32.mrf.mxu0  ;;  %v10352_v24 = vld [vmem:[%s10889_s28 + $0xe8c] ss:$16 sps:$4 sm:$0xff]   ;;  %v10380_v1 = vld [vmem:[%s10889_s28 + $0xfe8] ss:$16 sps:$4 sm:$0xff]  }
 0x2dd   : > { %v7260_v8 = vpop.f32.mrf.mxu1  ;;  %v7919_v56 = vadd.f32 %v7257_v18, %v331_v11  ;;  %v7259_v15 = vadd.f32 %v7258_v7, %v7218_v39  ;;  %7512 = vmatpush1.bf16.msra.mxu0 %v10335_v22  ;;  %v10382_v57 = vld [vmem:[%s10889_s28 + $0xfec] ss:$16 sps:$4 sm:$0xff]   ;;  %v10383_v54 = vld [vmem:[%s10889_s28 + $0xdc8] ss:$16 sps:$4 sm:$0xff]  }
 0x2de   : > { %7553 = vmatpush1.bf16.msra.mxu1 %v10338_v31  ;;  %v7220_v25 = vpop.f32.mrf.mxu0  ;;  %7513 = vmatprep.subr.bf16.mxu0 %v10343_v2  ;;  %v10385_v9 = vld [vmem:[%s10889_s28 + $0xdcc] ss:$16 sps:$4 sm:$0xff]   ;;  %v10386_v22 = vld [vmem:[%s10889_s28 + $0xfc8] ss:$16 sps:$4 sm:$0xff]  }
 0x2df   : > { %v7261_v26 = vpop.f32.mrf.mxu1  ;;  %7554 = vmatprep.subr.bf16.mxu1 %v10346_v17  ;;  %7923 = vst [vmem:[#allocation2 + $0x10] sm:$0xff] %v7919_v56  ;;  %v7920_v12 = vadd.f32 %v7259_v15, %v332_v40  ;;  %v10388_v13 = vld [vmem:[%s10889_s28 + $0xfcc] ss:$16 sps:$4 sm:$0xff]   ;;  %v10389_v52 = vld [vmem:[%s10889_s28 + $0xda8] ss:$16 sps:$4 sm:$0xff]  }
 0x2e0   : > { %v10391_v31 = vld [vmem:[%s10889_s28 + $0xdac] ss:$16 sps:$4 sm:$0xff]   ;;  %v10392_v7 = vld [vmem:[%s10889_s28 + $0xfa8] ss:$16 sps:$4 sm:$0xff]  }
 0x2e1   : > { %7924 = vst [vmem:[#allocation2] sm:$0xff] %v7920_v12  ;;  %7514 = vmatpush1.bf16.msra.mxu0 %v10341_v16  ;;  %v10394_v11 = vld [vmem:[%s10889_s28 + $0xfac] ss:$16 sps:$4 sm:$0xff]   ;;  %v10395_v18 = vld [vmem:[%s10889_s28 + $0xd88] ss:$16 sps:$4 sm:$0xff]  }
 0x2e2   : > { %7555 = vmatpush1.bf16.msra.mxu1 %v10344_v19  ;;  %7515 = vmatprep.subr.bf16.mxu0 %v10349_v23  ;;  %v10397_v2 = vld [vmem:[%s10889_s28 + $0xd8c] ss:$16 sps:$4 sm:$0xff]   ;;  %v10398_v39 = vld [vmem:[%s10889_s28 + $0xf88] ss:$16 sps:$4 sm:$0xff]  }
 0x2e3   : > { %7556 = vmatprep.subr.bf16.mxu1 %v10352_v24  ;;  %v10400_v17 = vld [vmem:[%s10889_s28 + $0xf8c] ss:$16 sps:$4 sm:$0xff]   ;;  %v10401_v8 = vld [vmem:[%s10889_s28 + $0xd68] ss:$16 sps:$4 sm:$0xff]  }
 0x2e4   : > { %v10403_v40 = vld [vmem:[%s10889_s28 + $0xd6c] ss:$16 sps:$4 sm:$0xff]   ;;  %v10404_v56 = vld [vmem:[%s10889_s28 + $0xf68] ss:$16 sps:$4 sm:$0xff]  }
 0x2e5   : > { %7516 = vmatpush1.bf16.msra.mxu0 %v10347_v37  ;;  %v10406_v48 = vld [vmem:[%s10889_s28 + $0xf6c] ss:$16 sps:$4 sm:$0xff]   ;;  %v10407_v19 = vld [vmem:[%s10889_s28 + $0xd48] ss:$16 sps:$4 sm:$0xff]  }
 0x2e6   : > { %7557 = vmatpush1.bf16.msra.mxu1 %v10350_v38  ;;  %7517 = vmatprep.subr.bf16.mxu0 %v10355_v6  ;;  %v10409_v15 = vld [vmem:[%s10889_s28 + $0xd4c] ss:$16 sps:$4 sm:$0xff]   ;;  %v10410_v25 = vld [vmem:[%s10889_s28 + $0xf48] ss:$16 sps:$4 sm:$0xff]  }
 0x2e7   : > { %7558 = vmatprep.subr.bf16.mxu1 %v10358_v20  ;;  %v10412_v16 = vld [vmem:[%s10889_s28 + $0xf4c] ss:$16 sps:$4 sm:$0xff]   ;;  %v10413_v24 = vld [vmem:[%s10889_s28 + $0xd28] ss:$16 sps:$4 sm:$0xff]  }
 0x2e8   : > { %v10415_v26 = vld [vmem:[%s10889_s28 + $0xd2c] ss:$16 sps:$4 sm:$0xff]   ;;  %v10416_v12 = vld [vmem:[%s10889_s28 + $0xf28] ss:$16 sps:$4 sm:$0xff]  }
 0x2e9   : > { %7518 = vmatpush1.bf16.msra.mxu0 %v10353_v21  ;;  %v10418_v23 = vld [vmem:[%s10889_s28 + $0xf2c] ss:$16 sps:$4 sm:$0xff]   ;;  %v10419_v6 = vld [vmem:[%s10889_s28 + $0xd08] ss:$16 sps:$4 sm:$0xff]  }
 0x2ea   : > { %7559 = vmatpush1.bf16.msra.mxu1 %v10356_v27  ;;  %7519 = vmatprep.subr.bf16.mxu0 %v10361_v28  ;;  %v10421_v37 = vld [vmem:[%s10889_s28 + $0xd0c] ss:$16 sps:$4 sm:$0xff]   ;;  %v10422_v20 = vld [vmem:[%s10889_s28 + $0xf08] ss:$16 sps:$4 sm:$0xff]  }
 0x2eb   : > { %7560 = vmatprep.subr.bf16.mxu1 %v10364_v29  ;;  %v10424_v38 = vld [vmem:[%s10889_s28 + $0xf0c] ss:$16 sps:$4 sm:$0xff]   ;;  %v10425_v28 = vld [vmem:[%s10889_s28 + $0x10e8] ss:$16 sps:$4 sm:$0xff]  }
 0x2ec   : > { %v10427_v21 = vld [vmem:[%s10889_s28 + $0x10ec] ss:$16 sps:$4 sm:$0xff]   ;;  %v10428_v29 = vld [vmem:[%s10889_s28 + $0x12e8] ss:$16 sps:$4 sm:$0xff]  }
 0x2ed   : > { %7520 = vmatpush1.bf16.msra.mxu0 %v10359_v32  ;;  %v10430_v27 = vld [vmem:[%s10889_s28 + $0x12ec] ss:$16 sps:$4 sm:$0xff]  }
 0x2ee   : > { %7561 = vmatpush1.bf16.msra.mxu1 %v10362_v33  ;;  %7521 = vmatprep.subr.bf16.mxu0 %v10367_v14  ;;  %v10433_v32 = vld [vmem:[%s10889_s28 + $0x10cc] ss:$16 sps:$4 sm:$0xff]  }
 0x2ef   : > { %7562 = vmatprep.subr.bf16.mxu1 %v10370_v34  ;;  %v10436_v33 = vld [vmem:[%s10889_s28 + $0x12cc] ss:$16 sps:$4 sm:$0xff]  }
 0x2f1   : > { %7522 = vmatpush1.bf16.msra.mxu0 %v10365_v35 }
 0x2f2   : > { %7563 = vmatpush1.bf16.msra.mxu1 %v10368_v36  ;;  %7523 = vmatprep.subr.bf16.mxu0 %v10373_v63  ;;  %v10431_v36 = vld [vmem:[%s10889_s28 + $0x10c8] ss:$16 sps:$4 sm:$0xff]  }
 0x2f3   : > { %7564 = vmatprep.subr.bf16.mxu1 %v10376_v0  ;;  %v10434_v63 = vld [vmem:[%s10889_s28 + $0x12c8] ss:$16 sps:$4 sm:$0xff]  }
 0x2f5   : > { %7524 = vmatpush1.bf16.msra.mxu0 %v10371_v43 }
 0x2f6   : > { %7565 = vmatpush1.bf16.msra.mxu1 %v10374_v44  ;;  %7525 = vmatprep.subr.bf16.mxu0 %v10379_v55  ;;  %v10439_v44 = vld [vmem:[%s10889_s28 + $0x10ac] ss:$16 sps:$4 sm:$0xff]  }
 0x2f7   : > { %7566 = vmatprep.subr.bf16.mxu1 %v10382_v57  ;;  %v10442_v55 = vld [vmem:[%s10889_s28 + $0x12ac] ss:$16 sps:$4 sm:$0xff]  }
 0x2f9   : > { %7526 = vmatpush2.bf16.msra.mxu0 %v10377_v58  ;;  %v10437_v58 = vld [vmem:[%s10889_s28 + $0x10a8] ss:$16 sps:$4 sm:$0xff]  }
 0x2fa   : > { %7567 = vmatpush2.bf16.msra.mxu1 %v10380_v1  ;;  %7527 = vmatprep.subr.bf16.mxu0 %v10385_v9  ;;  %v10440_v1 = vld [vmem:[%s10889_s28 + $0x12a8] ss:$16 sps:$4 sm:$0xff]  }
 0x2fb   : > { %7568 = vmatprep.subr.bf16.mxu1 %v10388_v13 }
 0x2fd   : > { %7528 = vmatpush2.bf16.msra.mxu0 %v10383_v54  ;;  %v10445_v54 = vld [vmem:[%s10889_s28 + $0x108c] ss:$16 sps:$4 sm:$0xff]  }
 0x2fe   : > { %7569 = vmatpush2.bf16.msra.mxu1 %v10386_v22  ;;  %7529 = vmatprep.subr.bf16.mxu0 %v10391_v31  ;;  %v10446_v22 = vld [vmem:[%s10889_s28 + $0x1288] ss:$16 sps:$4 sm:$0xff]   ;;  %v10451_v31 = vld [vmem:[%s10889_s28 + $0x106c] ss:$16 sps:$4 sm:$0xff]  }
 0x2ff   : > { %7570 = vmatprep.subr.bf16.mxu1 %v10394_v11  ;;  %v10454_v11 = vld [vmem:[%s10889_s28 + $0x126c] ss:$16 sps:$4 sm:$0xff]  }
 0x301   : > { %7530 = vmatpush2.bf16.msra.mxu0 %v10389_v52  ;;  %v10449_v52 = vld [vmem:[%s10889_s28 + $0x1068] ss:$16 sps:$4 sm:$0xff]  }
 0x302   : > { %7571 = vmatpush2.bf16.msra.mxu1 %v10392_v7  ;;  %7531 = vmatprep.subr.bf16.mxu0 %v10397_v2  ;;  %v10452_v7 = vld [vmem:[%s10889_s28 + $0x1268] ss:$16 sps:$4 sm:$0xff]   ;;  %v10457_v2 = vld [vmem:[%s10889_s28 + $0x104c] ss:$16 sps:$4 sm:$0xff]  }
 0x303   : > { %7572 = vmatprep.subr.bf16.mxu1 %v10400_v17  ;;  %v10460_v17 = vld [vmem:[%s10889_s28 + $0x124c] ss:$16 sps:$4 sm:$0xff]  }
 0x305   : > { %7532 = vmatpush2.bf16.msra.mxu0 %v10395_v18  ;;  %v10455_v18 = vld [vmem:[%s10889_s28 + $0x1048] ss:$16 sps:$4 sm:$0xff]  }
 0x306   : > { %7573 = vmatpush2.bf16.msra.mxu1 %v10398_v39  ;;  %7533 = vmatprep.subr.bf16.mxu0 %v10403_v40  ;;  %v10458_v39 = vld [vmem:[%s10889_s28 + $0x1248] ss:$16 sps:$4 sm:$0xff]   ;;  %v10463_v40 = vld [vmem:[%s10889_s28 + $0x102c] ss:$16 sps:$4 sm:$0xff]  }
 0x307   : > { %7574 = vmatprep.subr.bf16.mxu1 %v10406_v48  ;;  %v10466_v48 = vld [vmem:[%s10889_s28 + $0x122c] ss:$16 sps:$4 sm:$0xff]  }
 0x309   : > { %7534 = vmatpush2.bf16.msra.mxu0 %v10401_v8  ;;  %v10461_v8 = vld [vmem:[%s10889_s28 + $0x1028] ss:$16 sps:$4 sm:$0xff]  }
 0x30a   : > { %7575 = vmatpush2.bf16.msra.mxu1 %v10404_v56  ;;  %7535 = vmatprep.subr.bf16.mxu0 %v10409_v15  ;;  %v10464_v56 = vld [vmem:[%s10889_s28 + $0x1228] ss:$16 sps:$4 sm:$0xff]   ;;  %v10469_v15 = vld [vmem:[%s10889_s28 + $0x100c] ss:$16 sps:$4 sm:$0xff]  }
 0x30b   : > { %7576 = vmatprep.subr.bf16.mxu1 %v10412_v16  ;;  %v10472_v16 = vld [vmem:[%s10889_s28 + $0x120c] ss:$16 sps:$4 sm:$0xff]  }
 0x30d   : > { %7536 = vmatpush2.bf16.msra.mxu0 %v10407_v19  ;;  %v10467_v19 = vld [vmem:[%s10889_s28 + $0x1008] ss:$16 sps:$4 sm:$0xff]  }
 0x30e   : > { %7577 = vmatpush2.bf16.msra.mxu1 %v10410_v25  ;;  %7537 = vmatprep.subr.bf16.mxu0 %v10415_v26  ;;  %v10470_v25 = vld [vmem:[%s10889_s28 + $0x1208] ss:$16 sps:$4 sm:$0xff]   ;;  %v10475_v26 = vld [vmem:[%s10889_s28 + $0x11ec] ss:$16 sps:$4 sm:$0xff]  }
 0x30f   : > { %7578 = vmatprep.subr.bf16.mxu1 %v10418_v23  ;;  %v10478_v23 = vld [vmem:[%s10889_s28 + $0x13ec] ss:$16 sps:$4 sm:$0xff]  }
 0x311   : > { %7538 = vmatpush2.bf16.msra.mxu0 %v10413_v24  ;;  %v10473_v24 = vld [vmem:[%s10889_s28 + $0x11e8] ss:$16 sps:$4 sm:$0xff]  }
 0x312   : > { %7579 = vmatpush2.bf16.msra.mxu1 %v10416_v12  ;;  %7539 = vmatprep.subr.bf16.mxu0 %v10421_v37  ;;  %v10476_v12 = vld [vmem:[%s10889_s28 + $0x13e8] ss:$16 sps:$4 sm:$0xff]   ;;  %v10481_v37 = vld [vmem:[%s10889_s28 + $0x11cc] ss:$16 sps:$4 sm:$0xff]  }
 0x313   : > { %7580 = vmatprep.subr.bf16.mxu1 %v10424_v38  ;;  %v10484_v38 = vld [vmem:[%s10889_s28 + $0x13cc] ss:$16 sps:$4 sm:$0xff]  }
 0x315   : > { %7540 = vmatpush2.bf16.msra.mxu0 %v10419_v6  ;;  %v10479_v6 = vld [vmem:[%s10889_s28 + $0x11c8] ss:$16 sps:$4 sm:$0xff]  }
 0x316   : > { %7581 = vmatpush2.bf16.msra.mxu1 %v10422_v20  ;;  %7591 = vmatprep.subr.bf16.mxu0 %v10427_v21  ;;  %v10482_v20 = vld [vmem:[%s10889_s28 + $0x13c8] ss:$16 sps:$4 sm:$0xff]   ;;  %v10487_v21 = vld [vmem:[%s10889_s28 + $0x11ac] ss:$16 sps:$4 sm:$0xff]  }
 0x317   : > { %7632 = vmatprep.subr.bf16.mxu1 %v10430_v27  ;;  %v10490_v27 = vld [vmem:[%s10889_s28 + $0x13ac] ss:$16 sps:$4 sm:$0xff]  }
 0x318   : > { %v7297_v14 = vpop.f32.mrf.mxu0  ;;  %7542 = vmatmul.mubr.bf16.vlgmr.msra.gmra.mxu0 %v11237_v60 }
 0x319   : > { %v7338_v34 = vpop.f32.mrf.mxu1  ;;  %7583 = vmatmul.mubr.bf16.vlgmr.msra.gmra.mxu1 %v11241_v61  ;;  %7592 = vmatpush1.bf16.msra.mxu0 %v10425_v28  ;;  %v10485_v28 = vld [vmem:[%s10889_s28 + $0x11a8] ss:$16 sps:$4 sm:$0xff]  }
 0x31a   : > { %v11926_v35 = vadd.f32 %v7338_v34, %v7297_v14  ;;  %7633 = vmatpush1.bf16.msra.mxu1 %v10428_v29  ;;  %v7299_v0 = vpop.f32.mrf.mxu0  ;;  %7593 = vmatprep.subr.bf16.mxu0 %v10433_v32  ;;  %v10488_v29 = vld [vmem:[%s10889_s28 + $0x13a8] ss:$16 sps:$4 sm:$0xff]   ;;  %v10493_v32 = vld [vmem:[%s10889_s28 + $0x118c] ss:$16 sps:$4 sm:$0xff]  }
 0x31b   : > { %v7340_v43 = vpop.f32.mrf.mxu1  ;;  %7634 = vmatprep.subr.bf16.mxu1 %v10436_v33  ;;  %7623 = vmatprep.mubr.bf16.mxu0 %v11252_v41  ;;  %v10448_v41 = vld [vmem:[%s10889_s28 + $0x128c] ss:$16 sps:$4 sm:$0xff]   ;;  %v10491_v14 = vld [vmem:[%s10889_s28 + $0x1188] ss:$16 sps:$4 sm:$0xff]  }
 0x31c   : > { %v11932_v57 = vadd.f32 %v7340_v43, %v7299_v0  ;;  %7664 = vmatprep.mubr.bf16.mxu1 %v11256_v42  ;;  %v7301_v60 = vpop.f32.mrf.mxu0  ;;  %v10443_v42 = vld [vmem:[%s10889_s28 + $0x1088] ss:$16 sps:$4 sm:$0xff]   ;;  %v10496_v33 = vld [vmem:[%s10889_s28 + $0x138c] ss:$16 sps:$4 sm:$0xff]  }
 0x31d   : > { %v7342_v61 = vpop.f32.mrf.mxu1  ;;  %7594 = vmatpush1.bf16.msra.mxu0 %v10431_v36  ;;  %v10494_v34 = vld [vmem:[%s10889_s28 + $0x1388] ss:$16 sps:$4 sm:$0xff]   ;;  %v10499_v36 = vld [vmem:[%s10889_s28 + $0x116c] ss:$16 sps:$4 sm:$0xff]  }
 0x31e   : > { %7635 = vmatpush1.bf16.msra.mxu1 %v10434_v63  ;;  %v7302_v9 = vpop.f32.mrf.mxu0  ;;  %7595 = vmatprep.subr.bf16.mxu0 %v10439_v44  ;;  %v10502_v63 = vld [vmem:[%s10889_s28 + $0x136c] ss:$16 sps:$4 sm:$0xff]   ;;  %v10497_v0 = vld [vmem:[%s10889_s28 + $0x1168] ss:$16 sps:$4 sm:$0xff]  }
 0x31f   : > { %v7343_v13 = vpop.f32.mrf.mxu1  ;;  %7636 = vmatprep.subr.bf16.mxu1 %v10442_v55  ;;  %v10500_v43 = vld [vmem:[%s10889_s28 + $0x1368] ss:$16 sps:$4 sm:$0xff]   ;;  %v10505_v44 = vld [vmem:[%s10889_s28 + $0x114c] ss:$16 sps:$4 sm:$0xff]  }
 0x320   : > { %v10508_v55 = vld [vmem:[%s10889_s28 + $0x134c] ss:$16 sps:$4 sm:$0xff]   ;;  %v10503_v60 = vld [vmem:[%s10889_s28 + $0x1148] ss:$16 sps:$4 sm:$0xff]  }
 0x321   : > { %7596 = vmatpush1.bf16.msra.mxu0 %v10437_v58  ;;  %v10506_v61 = vld [vmem:[%s10889_s28 + $0x1348] ss:$16 sps:$4 sm:$0xff]   ;;  %v10511_v58 = vld [vmem:[%s10889_s28 + $0x112c] ss:$16 sps:$4 sm:$0xff]  }
 0x322   : > { %7637 = vmatpush1.bf16.msra.mxu1 %v10440_v1  ;;  %7597 = vmatprep.subr.bf16.mxu0 %v10445_v54  ;;  %v10514_v1 = vld [vmem:[%s10889_s28 + $0x132c] ss:$16 sps:$4 sm:$0xff]   ;;  %v10509_v9 = vld [vmem:[%s10889_s28 + $0x1128] ss:$16 sps:$4 sm:$0xff]  }
 0x323   : > { %7638 = vmatprep.subr.bf16.mxu1 %v10448_v41  ;;  %v10512_v13 = vld [vmem:[%s10889_s28 + $0x1328] ss:$16 sps:$4 sm:$0xff]   ;;  %v10517_v54 = vld [vmem:[%s10889_s28 + $0x110c] ss:$16 sps:$4 sm:$0xff]  }
 0x324   : > { %v10520_v41 = vld [vmem:[%s10889_s28 + $0x130c] ss:$16 sps:$4 sm:$0xff]  }
 0x325   : > { %7598 = vmatpush1.bf16.msra.mxu0 %v10443_v42  ;;  %v10515_v42 = vld [vmem:[%s10889_s28 + $0x1108] ss:$16 sps:$4 sm:$0xff]  }
 0x326   : > { %7639 = vmatpush1.bf16.msra.mxu1 %v10446_v22  ;;  %7599 = vmatprep.subr.bf16.mxu0 %v10451_v31  ;;  %v10518_v22 = vld [vmem:[%s10889_s28 + $0x1308] ss:$16 sps:$4 sm:$0xff]   ;;  %v10523_v31 = vld [vmem:[%s10889_s28 + $0x14ec] ss:$16 sps:$4 sm:$0xff]  }
 0x327   : > { %7640 = vmatprep.subr.bf16.mxu1 %v10454_v11  ;;  %v10526_v11 = vld [vmem:[%s10889_s28 + $0x16ec] ss:$16 sps:$4 sm:$0xff]  }
 0x329   : > { %7600 = vmatpush1.bf16.msra.mxu0 %v10449_v52  ;;  %v10521_v52 = vld [vmem:[%s10889_s28 + $0x14e8] ss:$16 sps:$4 sm:$0xff]  }
 0x32a   : > { %7641 = vmatpush1.bf16.msra.mxu1 %v10452_v7  ;;  %7601 = vmatprep.subr.bf16.mxu0 %v10457_v2  ;;  %v10524_v7 = vld [vmem:[%s10889_s28 + $0x16e8] ss:$16 sps:$4 sm:$0xff]   ;;  %v10529_v2 = vld [vmem:[%s10889_s28 + $0x14cc] ss:$16 sps:$4 sm:$0xff]  }
 0x32b   : > { %7642 = vmatprep.subr.bf16.mxu1 %v10460_v17  ;;  %v10532_v17 = vld [vmem:[%s10889_s28 + $0x16cc] ss:$16 sps:$4 sm:$0xff]  }
 0x32d   : > { %7602 = vmatpush1.bf16.msra.mxu0 %v10455_v18 }
 0x32e   : > { %7643 = vmatpush1.bf16.msra.mxu1 %v10458_v39  ;;  %7603 = vmatprep.subr.bf16.mxu0 %v10463_v40 }
 0x32f   : > { %7644 = vmatprep.subr.bf16.mxu1 %v10466_v48  ;;  %v10527_v48 = vld [vmem:[%s10889_s28 + $0x14c8] ss:$16 sps:$4 sm:$0xff]  }
 0x331   : > { %7604 = vmatpush1.bf16.msra.mxu0 %v10461_v8  ;;  %v10530_v8 = vld [vmem:[%s10889_s28 + $0x16c8] ss:$16 sps:$4 sm:$0xff]  }
 0x332   : > { %7645 = vmatpush1.bf16.msra.mxu1 %v10464_v56  ;;  %7605 = vmatprep.subr.bf16.mxu0 %v10469_v15 }
 0x333   : > { %7646 = vmatprep.subr.bf16.mxu1 %v10472_v16  ;;  %v10535_v16 = vld [vmem:[%s10889_s28 + $0x14ac] ss:$16 sps:$4 sm:$0xff]  }
 0x335   : > { %7606 = vmatpush1.bf16.msra.mxu0 %v10467_v19  ;;  %v10538_v19 = vld [vmem:[%s10889_s28 + $0x16ac] ss:$16 sps:$4 sm:$0xff]  }
 0x336   : > { %7647 = vmatpush1.bf16.msra.mxu1 %v10470_v25  ;;  %7607 = vmatprep.subr.bf16.mxu0 %v10475_v26 }
 0x337   : > { %7648 = vmatprep.subr.bf16.mxu1 %v10478_v23  ;;  %v10533_v23 = vld [vmem:[%s10889_s28 + $0x14a8] ss:$16 sps:$4 sm:$0xff]  }
 0x339   : > { %7608 = vmatpush2.bf16.msra.mxu0 %v10473_v24  ;;  %v10536_v24 = vld [vmem:[%s10889_s28 + $0x16a8] ss:$16 sps:$4 sm:$0xff]  }
 0x33a   : > { %7649 = vmatpush2.bf16.msra.mxu1 %v10476_v12  ;;  %7609 = vmatprep.subr.bf16.mxu0 %v10481_v37 }
 0x33b   : > { %7650 = vmatprep.subr.bf16.mxu1 %v10484_v38  ;;  %v10542_v38 = vld [vmem:[%s10889_s28 + $0x1688] ss:$16 sps:$4 sm:$0xff]  }
 0x33d   : > { %7610 = vmatpush2.bf16.msra.mxu0 %v10479_v6  ;;  %v10547_v6 = vld [vmem:[%s10889_s28 + $0x146c] ss:$16 sps:$4 sm:$0xff]  }
 0x33e   : > { %7651 = vmatpush2.bf16.msra.mxu1 %v10482_v20  ;;  %7611 = vmatprep.subr.bf16.mxu0 %v10487_v21  ;;  %v10550_v20 = vld [vmem:[%s10889_s28 + $0x166c] ss:$16 sps:$4 sm:$0xff]   ;;  %v10545_v21 = vld [vmem:[%s10889_s28 + $0x1468] ss:$16 sps:$4 sm:$0xff]  }
 0x33f   : > { %7652 = vmatprep.subr.bf16.mxu1 %v10490_v27  ;;  %v10548_v27 = vld [vmem:[%s10889_s28 + $0x1668] ss:$16 sps:$4 sm:$0xff]  }
 0x341   : > { %7612 = vmatpush2.bf16.msra.mxu0 %v10485_v28  ;;  %v10553_v28 = vld [vmem:[%s10889_s28 + $0x144c] ss:$16 sps:$4 sm:$0xff]  }
 0x342   : > { %7653 = vmatpush2.bf16.msra.mxu1 %v10488_v29  ;;  %7613 = vmatprep.subr.bf16.mxu0 %v10493_v32  ;;  %v10556_v29 = vld [vmem:[%s10889_s28 + $0x164c] ss:$16 sps:$4 sm:$0xff]   ;;  %v10551_v32 = vld [vmem:[%s10889_s28 + $0x1448] ss:$16 sps:$4 sm:$0xff]  }
 0x343   : > { %7654 = vmatprep.subr.bf16.mxu1 %v10496_v33  ;;  %v10554_v33 = vld [vmem:[%s10889_s28 + $0x1648] ss:$16 sps:$4 sm:$0xff]  }
 0x345   : > { %7614 = vmatpush2.bf16.msra.mxu0 %v10491_v14  ;;  %v10559_v14 = vld [vmem:[%s10889_s28 + $0x142c] ss:$16 sps:$4 sm:$0xff]  }
 0x346   : > { %7655 = vmatpush2.bf16.msra.mxu1 %v10494_v34  ;;  %7615 = vmatprep.subr.bf16.mxu0 %v10499_v36  ;;  %v10562_v34 = vld [vmem:[%s10889_s28 + $0x162c] ss:$16 sps:$4 sm:$0xff]   ;;  %v10557_v36 = vld [vmem:[%s10889_s28 + $0x1428] ss:$16 sps:$4 sm:$0xff]  }
 0x347   : > { %7656 = vmatprep.subr.bf16.mxu1 %v10502_v63  ;;  %v10560_v63 = vld [vmem:[%s10889_s28 + $0x1628] ss:$16 sps:$4 sm:$0xff]  }
 0x349   : > { %7616 = vmatpush2.bf16.msra.mxu0 %v10497_v0  ;;  %v10565_v0 = vld [vmem:[%s10889_s28 + $0x140c] ss:$16 sps:$4 sm:$0xff]  }
 0x34a   : > { %7657 = vmatpush2.bf16.msra.mxu1 %v10500_v43  ;;  %7617 = vmatprep.subr.bf16.mxu0 %v10505_v44  ;;  %v10568_v43 = vld [vmem:[%s10889_s28 + $0x160c] ss:$16 sps:$4 sm:$0xff]   ;;  %v10563_v44 = vld [vmem:[%s10889_s28 + $0x1408] ss:$16 sps:$4 sm:$0xff]  }
 0x34b   : > { %7658 = vmatprep.subr.bf16.mxu1 %v10508_v55  ;;  %v10566_v55 = vld [vmem:[%s10889_s28 + $0x1608] ss:$16 sps:$4 sm:$0xff]  }
 0x34d   : > { %7618 = vmatpush2.bf16.msra.mxu0 %v10503_v60  ;;  %v10571_v60 = vld [vmem:[%s10889_s28 + $0x15ec] ss:$16 sps:$4 sm:$0xff]  }
 0x34e   : > { %7659 = vmatpush2.bf16.msra.mxu1 %v10506_v61  ;;  %7619 = vmatprep.subr.bf16.mxu0 %v10511_v58  ;;  %v10574_v61 = vld [vmem:[%s10889_s28 + $0x17ec] ss:$16 sps:$4 sm:$0xff]   ;;  %v10569_v58 = vld [vmem:[%s10889_s28 + $0x15e8] ss:$16 sps:$4 sm:$0xff]  }
 0x34f   : > { %7660 = vmatprep.subr.bf16.mxu1 %v10514_v1  ;;  %v10572_v1 = vld [vmem:[%s10889_s28 + $0x17e8] ss:$16 sps:$4 sm:$0xff]  }
 0x351   : > { %7620 = vmatpush2.bf16.msra.mxu0 %v10509_v9  ;;  %v10577_v9 = vld [vmem:[%s10889_s28 + $0x15cc] ss:$16 sps:$4 sm:$0xff]  }
 0x352   : > { %7661 = vmatpush2.bf16.msra.mxu1 %v10512_v13  ;;  %7621 = vmatprep.subr.bf16.mxu0 %v10517_v54  ;;  %v10580_v13 = vld [vmem:[%s10889_s28 + $0x17cc] ss:$16 sps:$4 sm:$0xff]   ;;  %v10575_v54 = vld [vmem:[%s10889_s28 + $0x15c8] ss:$16 sps:$4 sm:$0xff]  }
 0x353   : > { %7662 = vmatprep.subr.bf16.mxu1 %v10520_v41  ;;  %v10578_v41 = vld [vmem:[%s10889_s28 + $0x17c8] ss:$16 sps:$4 sm:$0xff]  }
 0x355   : > { %7622 = vmatpush2.bf16.msra.mxu0 %v10515_v42  ;;  %v10583_v42 = vld [vmem:[%s10889_s28 + $0x15ac] ss:$16 sps:$4 sm:$0xff]  }
 0x356   : > { %7663 = vmatpush2.bf16.msra.mxu1 %v10518_v22  ;;  %7673 = vmatprep.subr.bf16.mxu0 %v10523_v31  ;;  %v10586_v22 = vld [vmem:[%s10889_s28 + $0x17ac] ss:$16 sps:$4 sm:$0xff]   ;;  %v10581_v31 = vld [vmem:[%s10889_s28 + $0x15a8] ss:$16 sps:$4 sm:$0xff]  }
 0x357   : > { %7714 = vmatprep.subr.bf16.mxu1 %v10526_v11  ;;  %v10584_v11 = vld [vmem:[%s10889_s28 + $0x17a8] ss:$16 sps:$4 sm:$0xff]  }
 0x358   : > { %v7379_v18 = vpop.f32.mrf.mxu0  ;;  %7624 = vmatmul.mubr.bf16.vlgmr.msra.gmra.mxu0 %v11330_v47 }
 0x359   : > { %v7420_v39 = vpop.f32.mrf.mxu1  ;;  %7665 = vmatmul.mubr.bf16.vlgmr.msra.gmra.mxu1 %v11334_v49  ;;  %v7380_v40 = vadd.f32 %v7379_v18, %v11926_v35  ;;  %7674 = vmatpush1.bf16.msra.mxu0 %v10521_v52  ;;  %v10589_v52 = vld [vmem:[%s10889_s28 + $0x158c] ss:$16 sps:$4 sm:$0xff]  }
 0x35a   : > { %7715 = vmatpush1.bf16.msra.mxu1 %v10524_v7  ;;  %v7381_v56 = vpop.f32.mrf.mxu0  ;;  %7675 = vmatprep.subr.bf16.mxu0 %v10529_v2  ;;  %v10592_v7 = vld [vmem:[%s10889_s28 + $0x178c] ss:$16 sps:$4 sm:$0xff]   ;;  %v10587_v2 = vld [vmem:[%s10889_s28 + $0x1588] ss:$16 sps:$4 sm:$0xff]  }
 0x35b   : > { %v7422_v15 = vpop.f32.mrf.mxu1  ;;  %7716 = vmatprep.subr.bf16.mxu1 %v10532_v17  ;;  %v12003_v25 = vadd.f32 %v7420_v39, %v7380_v40  ;;  %v7382_v47 = vadd.f32 %v7381_v56, %v11932_v57  ;;  %7705 = vmatprep.mubr.bf16.mxu0 %v11348_v59  ;;  %v10541_v59 = vld [vmem:[%s10889_s28 + $0x148c] ss:$16 sps:$4 sm:$0xff]   ;;  %v10539_v57 = vld [vmem:[%s10889_s28 + $0x1488] ss:$16 sps:$4 sm:$0xff]  }
 0x35c   : > { %7746 = vmatprep.mubr.bf16.mxu1 %v11352_v62  ;;  %v7383_v49 = vpop.f32.mrf.mxu0  ;;  %v10544_v62 = vld [vmem:[%s10889_s28 + $0x168c] ss:$16 sps:$4 sm:$0xff]   ;;  %v10590_v17 = vld [vmem:[%s10889_s28 + $0x1788] ss:$16 sps:$4 sm:$0xff]  }
 0x35d   : > { %v7424_v35 = vpop.f32.mrf.mxu1  ;;  %v12008_v26 = vadd.f32 %v7422_v15, %v7382_v47  ;;  %7676 = vmatpush1.bf16.msra.mxu0 %v10527_v48  ;;  %v10595_v18 = vld [vmem:[%s10889_s28 + $0x156c] ss:$16 sps:$4 sm:$0xff]   ;;  %v10593_v40 = vld [vmem:[%s10889_s28 + $0x1568] ss:$16 sps:$4 sm:$0xff]  }
 0x35e   : > { %7717 = vmatpush1.bf16.msra.mxu1 %v10530_v8  ;;  %v7384_v12 = vpop.f32.mrf.mxu0  ;;  %7677 = vmatprep.subr.bf16.mxu0 %v10535_v16  ;;  %v10598_v39 = vld [vmem:[%s10889_s28 + $0x176c] ss:$16 sps:$4 sm:$0xff]   ;;  %v10596_v48 = vld [vmem:[%s10889_s28 + $0x1768] ss:$16 sps:$4 sm:$0xff]  }
 0x35f   : > { %v7425_v37 = vpop.f32.mrf.mxu1  ;;  %7718 = vmatprep.subr.bf16.mxu1 %v10538_v19  ;;  %v10601_v8 = vld [vmem:[%s10889_s28 + $0x154c] ss:$16 sps:$4 sm:$0xff]   ;;  %v10599_v15 = vld [vmem:[%s10889_s28 + $0x1548] ss:$16 sps:$4 sm:$0xff]  }
 0x360   : > { %v10604_v56 = vld [vmem:[%s10889_s28 + $0x174c] ss:$16 sps:$4 sm:$0xff]   ;;  %v10602_v16 = vld [vmem:[%s10889_s28 + $0x1748] ss:$16 sps:$4 sm:$0xff]  }
 0x361   : > { %7678 = vmatpush1.bf16.msra.mxu0 %v10533_v23  ;;  %v10607_v19 = vld [vmem:[%s10889_s28 + $0x152c] ss:$16 sps:$4 sm:$0xff]   ;;  %v10605_v49 = vld [vmem:[%s10889_s28 + $0x1528] ss:$16 sps:$4 sm:$0xff]  }
 0x362   : > { %7719 = vmatpush1.bf16.msra.mxu1 %v10536_v24  ;;  %7679 = vmatprep.subr.bf16.mxu0 %v10541_v59  ;;  %v10610_v47 = vld [vmem:[%s10889_s28 + $0x172c] ss:$16 sps:$4 sm:$0xff]   ;;  %v10608_v35 = vld [vmem:[%s10889_s28 + $0x1728] ss:$16 sps:$4 sm:$0xff]  }
 0x363   : > { %7720 = vmatprep.subr.bf16.mxu1 %v10544_v62  ;;  %v10613_v23 = vld [vmem:[%s10889_s28 + $0x150c] ss:$16 sps:$4 sm:$0xff]   ;;  %v10611_v12 = vld [vmem:[%s10889_s28 + $0x1508] ss:$16 sps:$4 sm:$0xff]  }
 0x364   : > { %v10616_v24 = vld [vmem:[%s10889_s28 + $0x170c] ss:$16 sps:$4 sm:$0xff]   ;;  %v10614_v37 = vld [vmem:[%s10889_s28 + $0x1708] ss:$16 sps:$4 sm:$0xff]  }
 0x365   : > { %7680 = vmatpush1.bf16.msra.mxu0 %v10539_v57  ;;  %v10619_v59 = vld [vmem:[%s10889_s28 + $0x18ec] ss:$16 sps:$4 sm:$0xff]   ;;  %v10617_v57 = vld [vmem:[%s10889_s28 + $0x18e8] ss:$16 sps:$4 sm:$0xff]  }
 0x366   : > { %7721 = vmatpush1.bf16.msra.mxu1 %v10542_v38  ;;  %7681 = vmatprep.subr.bf16.mxu0 %v10547_v6  ;;  %v10622_v62 = vld [vmem:[%s10889_s28 + $0x1aec] ss:$16 sps:$4 sm:$0xff]   ;;  %v10620_v38 = vld [vmem:[%s10889_s28 + $0x1ae8] ss:$16 sps:$4 sm:$0xff]  }
 0x367   : > { %7722 = vmatprep.subr.bf16.mxu1 %v10550_v20  ;;  %v10625_v6 = vld [vmem:[%s10889_s28 + $0x18cc] ss:$16 sps:$4 sm:$0xff]  }
 0x368   : > { %v10628_v20 = vld [vmem:[%s10889_s28 + $0x1acc] ss:$16 sps:$4 sm:$0xff]  }
 0x369   : > { %7682 = vmatpush1.bf16.msra.mxu0 %v10545_v21 }
 0x36a   : > { %7723 = vmatpush1.bf16.msra.mxu1 %v10548_v27  ;;  %7683 = vmatprep.subr.bf16.mxu0 %v10553_v28 }
 0x36b   : > { %7724 = vmatprep.subr.bf16.mxu1 %v10556_v29  ;;  %v10623_v29 = vld [vmem:[%s10889_s28 + $0x18c8] ss:$16 sps:$4 sm:$0xff]  }
 0x36d   : > { %7684 = vmatpush1.bf16.msra.mxu0 %v10551_v32  ;;  %v10626_v32 = vld [vmem:[%s10889_s28 + $0x1ac8] ss:$16 sps:$4 sm:$0xff]  }
 0x36e   : > { %7725 = vmatpush1.bf16.msra.mxu1 %v10554_v33  ;;  %7685 = vmatprep.subr.bf16.mxu0 %v10559_v14 }
 0x36f   : > { %7726 = vmatprep.subr.bf16.mxu1 %v10562_v34  ;;  %v10631_v34 = vld [vmem:[%s10889_s28 + $0x18ac] ss:$16 sps:$4 sm:$0xff]  }
 0x371   : > { %7686 = vmatpush1.bf16.msra.mxu0 %v10557_v36  ;;  %v10634_v36 = vld [vmem:[%s10889_s28 + $0x1aac] ss:$16 sps:$4 sm:$0xff]  }
 0x372   : > { %7727 = vmatpush1.bf16.msra.mxu1 %v10560_v63  ;;  %7687 = vmatprep.subr.bf16.mxu0 %v10565_v0 }
 0x373   : > { %7728 = vmatprep.subr.bf16.mxu1 %v10568_v43  ;;  %v10629_v43 = vld [vmem:[%s10889_s28 + $0x18a8] ss:$16 sps:$4 sm:$0xff]  }
 0x375   : > { %7688 = vmatpush1.bf16.msra.mxu0 %v10563_v44  ;;  %v10632_v44 = vld [vmem:[%s10889_s28 + $0x1aa8] ss:$16 sps:$4 sm:$0xff]  }
 0x376   : > { %7729 = vmatpush1.bf16.msra.mxu1 %v10566_v55  ;;  %7689 = vmatprep.subr.bf16.mxu0 %v10571_v60 }
 0x377   : > { %7730 = vmatprep.subr.bf16.mxu1 %v10574_v61  ;;  %v10638_v61 = vld [vmem:[%s10889_s28 + $0x1a88] ss:$16 sps:$4 sm:$0xff]  }
 0x379   : > { %7690 = vmatpush2.bf16.msra.mxu0 %v10569_v58  ;;  %v10643_v58 = vld [vmem:[%s10889_s28 + $0x186c] ss:$16 sps:$4 sm:$0xff]  }
 0x37a   : > { %7731 = vmatpush2.bf16.msra.mxu1 %v10572_v1  ;;  %7691 = vmatprep.subr.bf16.mxu0 %v10577_v9  ;;  %v10646_v1 = vld [vmem:[%s10889_s28 + $0x1a6c] ss:$16 sps:$4 sm:$0xff]   ;;  %v10641_v9 = vld [vmem:[%s10889_s28 + $0x1868] ss:$16 sps:$4 sm:$0xff]  }
 0x37b   : > { %7732 = vmatprep.subr.bf16.mxu1 %v10580_v13  ;;  %v10644_v13 = vld [vmem:[%s10889_s28 + $0x1a68] ss:$16 sps:$4 sm:$0xff]  }
 0x37d   : > { %7692 = vmatpush2.bf16.msra.mxu0 %v10575_v54  ;;  %v10649_v54 = vld [vmem:[%s10889_s28 + $0x184c] ss:$16 sps:$4 sm:$0xff]  }
 0x37e   : > { %7733 = vmatpush2.bf16.msra.mxu1 %v10578_v41  ;;  %7693 = vmatprep.subr.bf16.mxu0 %v10583_v42  ;;  %v10652_v41 = vld [vmem:[%s10889_s28 + $0x1a4c] ss:$16 sps:$4 sm:$0xff]   ;;  %v10647_v42 = vld [vmem:[%s10889_s28 + $0x1848] ss:$16 sps:$4 sm:$0xff]  }
 0x37f   : > { %7734 = vmatprep.subr.bf16.mxu1 %v10586_v22  ;;  %v10650_v22 = vld [vmem:[%s10889_s28 + $0x1a48] ss:$16 sps:$4 sm:$0xff]  }
 0x381   : > { %7694 = vmatpush2.bf16.msra.mxu0 %v10581_v31  ;;  %v10655_v31 = vld [vmem:[%s10889_s28 + $0x182c] ss:$16 sps:$4 sm:$0xff]  }
 0x382   : > { %7735 = vmatpush2.bf16.msra.mxu1 %v10584_v11  ;;  %7695 = vmatprep.subr.bf16.mxu0 %v10589_v52  ;;  %v10658_v11 = vld [vmem:[%s10889_s28 + $0x1a2c] ss:$16 sps:$4 sm:$0xff]   ;;  %v10653_v52 = vld [vmem:[%s10889_s28 + $0x1828] ss:$16 sps:$4 sm:$0xff]  }
 0x383   : > { %7736 = vmatprep.subr.bf16.mxu1 %v10592_v7  ;;  %v10656_v7 = vld [vmem:[%s10889_s28 + $0x1a28] ss:$16 sps:$4 sm:$0xff]  }
 0x385   : > { %7696 = vmatpush2.bf16.msra.mxu0 %v10587_v2  ;;  %v10661_v2 = vld [vmem:[%s10889_s28 + $0x180c] ss:$16 sps:$4 sm:$0xff]  }
 0x386   : > { %7737 = vmatpush2.bf16.msra.mxu1 %v10590_v17  ;;  %7697 = vmatprep.subr.bf16.mxu0 %v10595_v18  ;;  %v10664_v17 = vld [vmem:[%s10889_s28 + $0x1a0c] ss:$16 sps:$4 sm:$0xff]   ;;  %v10659_v18 = vld [vmem:[%s10889_s28 + $0x1808] ss:$16 sps:$4 sm:$0xff]  }
 0x387   : > { %7738 = vmatprep.subr.bf16.mxu1 %v10598_v39  ;;  %v10662_v39 = vld [vmem:[%s10889_s28 + $0x1a08] ss:$16 sps:$4 sm:$0xff]  }
 0x389   : > { %7698 = vmatpush2.bf16.msra.mxu0 %v10593_v40  ;;  %v10667_v40 = vld [vmem:[%s10889_s28 + $0x19ec] ss:$16 sps:$4 sm:$0xff]  }
 0x38a   : > { %7739 = vmatpush2.bf16.msra.mxu1 %v10596_v48  ;;  %7699 = vmatprep.subr.bf16.mxu0 %v10601_v8  ;;  %v10670_v48 = vld [vmem:[%s10889_s28 + $0x1bec] ss:$16 sps:$4 sm:$0xff]   ;;  %v10665_v8 = vld [vmem:[%s10889_s28 + $0x19e8] ss:$16 sps:$4 sm:$0xff]  }
 0x38b   : > { %7740 = vmatprep.subr.bf16.mxu1 %v10604_v56  ;;  %v10668_v56 = vld [vmem:[%s10889_s28 + $0x1be8] ss:$16 sps:$4 sm:$0xff]  }
 0x38d   : > { %7700 = vmatpush2.bf16.msra.mxu0 %v10599_v15  ;;  %v10673_v15 = vld [vmem:[%s10889_s28 + $0x19cc] ss:$16 sps:$4 sm:$0xff]  }
 0x38e   : > { %7741 = vmatpush2.bf16.msra.mxu1 %v10602_v16  ;;  %7701 = vmatprep.subr.bf16.mxu0 %v10607_v19  ;;  %v10676_v16 = vld [vmem:[%s10889_s28 + $0x1bcc] ss:$16 sps:$4 sm:$0xff]   ;;  %v10671_v19 = vld [vmem:[%s10889_s28 + $0x19c8] ss:$16 sps:$4 sm:$0xff]  }
 0x38f   : > { %7742 = vmatprep.subr.bf16.mxu1 %v10610_v47  ;;  %v10674_v47 = vld [vmem:[%s10889_s28 + $0x1bc8] ss:$16 sps:$4 sm:$0xff]  }
 0x391   : > { %7702 = vmatpush2.bf16.msra.mxu0 %v10605_v49  ;;  %v10679_v49 = vld [vmem:[%s10889_s28 + $0x19ac] ss:$16 sps:$4 sm:$0xff]  }
 0x392   : > { %7743 = vmatpush2.bf16.msra.mxu1 %v10608_v35  ;;  %7703 = vmatprep.subr.bf16.mxu0 %v10613_v23  ;;  %v10682_v35 = vld [vmem:[%s10889_s28 + $0x1bac] ss:$16 sps:$4 sm:$0xff]   ;;  %v10677_v23 = vld [vmem:[%s10889_s28 + $0x19a8] ss:$16 sps:$4 sm:$0xff]  }
 0x393   : > { %7744 = vmatprep.subr.bf16.mxu1 %v10616_v24  ;;  %v10680_v24 = vld [vmem:[%s10889_s28 + $0x1ba8] ss:$16 sps:$4 sm:$0xff]  }
 0x395   : > { %7704 = vmatpush2.bf16.msra.mxu0 %v10611_v12  ;;  %v10685_v12 = vld [vmem:[%s10889_s28 + $0x198c] ss:$16 sps:$4 sm:$0xff]  }
 0x396   : > { %7745 = vmatpush2.bf16.msra.mxu1 %v10614_v37  ;;  %7755 = vmatprep.subr.bf16.mxu0 %v10619_v59  ;;  %v10688_v37 = vld [vmem:[%s10889_s28 + $0x1b8c] ss:$16 sps:$4 sm:$0xff]   ;;  %v10683_v59 = vld [vmem:[%s10889_s28 + $0x1988] ss:$16 sps:$4 sm:$0xff]  }
 0x397   : > { %7796 = vmatprep.subr.bf16.mxu1 %v10622_v62  ;;  %v10686_v62 = vld [vmem:[%s10889_s28 + $0x1b88] ss:$16 sps:$4 sm:$0xff]  }
 0x398   : > { %v7461_v21 = vpop.f32.mrf.mxu0  ;;  %7706 = vmatmul.mubr.bf16.vlgmr.msra.gmra.mxu0 %v11426_v45 }
 0x399   : > { %v7502_v27 = vpop.f32.mrf.mxu1  ;;  %7747 = vmatmul.mubr.bf16.vlgmr.msra.gmra.mxu1 %v11430_v46  ;;  %v7462_v28 = vadd.f32 %v7461_v21, %v12003_v25  ;;  %7756 = vmatpush1.bf16.msra.mxu0 %v10617_v57  ;;  %v10691_v57 = vld [vmem:[%s10889_s28 + $0x196c] ss:$16 sps:$4 sm:$0xff]  }
 0x39a   : > { %7797 = vmatpush1.bf16.msra.mxu1 %v10620_v38  ;;  %v7463_v33 = vpop.f32.mrf.mxu0  ;;  %7757 = vmatprep.subr.bf16.mxu0 %v10625_v6  ;;  %v10694_v38 = vld [vmem:[%s10889_s28 + $0x1b6c] ss:$16 sps:$4 sm:$0xff]   ;;  %v10689_v6 = vld [vmem:[%s10889_s28 + $0x1968] ss:$16 sps:$4 sm:$0xff]  }
 0x39b   : > { %v7504_v14 = vpop.f32.mrf.mxu1  ;;  %7798 = vmatprep.subr.bf16.mxu1 %v10628_v20  ;;  %v12077_v63 = vadd.f32 %v7502_v27, %v7462_v28  ;;  %v7464_v45 = vadd.f32 %v7463_v33, %v12008_v26  ;;  %7787 = vmatprep.mubr.bf16.mxu0 %v11444_v50  ;;  %v10637_v50 = vld [vmem:[%s10889_s28 + $0x188c] ss:$16 sps:$4 sm:$0xff]   ;;  %v10635_v26 = vld [vmem:[%s10889_s28 + $0x1888] ss:$16 sps:$4 sm:$0xff]  }
 0x39c   : > { %7828 = vmatprep.mubr.bf16.mxu1 %v11448_v51  ;;  %v7465_v46 = vpop.f32.mrf.mxu0  ;;  %v10640_v51 = vld [vmem:[%s10889_s28 + $0x1a8c] ss:$16 sps:$4 sm:$0xff]   ;;  %v10692_v20 = vld [vmem:[%s10889_s28 + $0x1b68] ss:$16 sps:$4 sm:$0xff]  }
 0x39d   : > { %v7506_v25 = vpop.f32.mrf.mxu1  ;;  %v12082_v0 = vadd.f32 %v7504_v14, %v7464_v45  ;;  %7758 = vmatpush1.bf16.msra.mxu0 %v10623_v29  ;;  %v10697_v21 = vld [vmem:[%s10889_s28 + $0x194c] ss:$16 sps:$4 sm:$0xff]   ;;  %v10695_v28 = vld [vmem:[%s10889_s28 + $0x1948] ss:$16 sps:$4 sm:$0xff]  }
 0x39e   : > { %7799 = vmatpush1.bf16.msra.mxu1 %v10626_v32  ;;  %v7466_v55 = vpop.f32.mrf.mxu0  ;;  %7759 = vmatprep.subr.bf16.mxu0 %v10631_v34  ;;  %v10700_v27 = vld [vmem:[%s10889_s28 + $0x1b4c] ss:$16 sps:$4 sm:$0xff]   ;;  %v10698_v29 = vld [vmem:[%s10889_s28 + $0x1b48] ss:$16 sps:$4 sm:$0xff]  }
 0x39f   : > { %v7507_v60 = vpop.f32.mrf.mxu1  ;;  %7800 = vmatprep.subr.bf16.mxu1 %v10634_v36  ;;  %v10703_v32 = vld [vmem:[%s10889_s28 + $0x192c] ss:$16 sps:$4 sm:$0xff]   ;;  %v10701_v14 = vld [vmem:[%s10889_s28 + $0x1928] ss:$16 sps:$4 sm:$0xff]  }
 0x3a0   : > { %v10706_v33 = vld [vmem:[%s10889_s28 + $0x1b2c] ss:$16 sps:$4 sm:$0xff]   ;;  %v10704_v34 = vld [vmem:[%s10889_s28 + $0x1b28] ss:$16 sps:$4 sm:$0xff]  }
 0x3a1   : > { %7760 = vmatpush1.bf16.msra.mxu0 %v10629_v43  ;;  %v10709_v36 = vld [vmem:[%s10889_s28 + $0x190c] ss:$16 sps:$4 sm:$0xff]   ;;  %v10707_v46 = vld [vmem:[%s10889_s28 + $0x1908] ss:$16 sps:$4 sm:$0xff]  }
 0x3a2   : > { %7801 = vmatpush1.bf16.msra.mxu1 %v10632_v44  ;;  %7761 = vmatprep.subr.bf16.mxu0 %v10637_v50  ;;  %v10712_v45 = vld [vmem:[%s10889_s28 + $0x1b0c] ss:$16 sps:$4 sm:$0xff]   ;;  %v10710_v25 = vld [vmem:[%s10889_s28 + $0x1b08] ss:$16 sps:$4 sm:$0xff]  }
 0x3a3   : > { %7802 = vmatprep.subr.bf16.mxu1 %v10640_v51  ;;  %v10715_v43 = vld [vmem:[%s10889_s28 + $0x1cec] ss:$16 sps:$4 sm:$0xff]   ;;  %v10713_v55 = vld [vmem:[%s10889_s28 + $0x1ce8] ss:$16 sps:$4 sm:$0xff]  }
 0x3a4   : > { %v10718_v44 = vld [vmem:[%s10889_s28 + $0x1eec] ss:$16 sps:$4 sm:$0xff]   ;;  %v10716_v60 = vld [vmem:[%s10889_s28 + $0x1ee8] ss:$16 sps:$4 sm:$0xff]  }
 0x3a5   : > { %7762 = vmatpush1.bf16.msra.mxu0 %v10635_v26  ;;  %v10721_v50 = vld [vmem:[%s10889_s28 + $0x1ccc] ss:$16 sps:$4 sm:$0xff]  }
 0x3a6   : > { %7803 = vmatpush1.bf16.msra.mxu1 %v10638_v61  ;;  %7763 = vmatprep.subr.bf16.mxu0 %v10643_v58  ;;  %v10724_v51 = vld [vmem:[%s10889_s28 + $0x1ecc] ss:$16 sps:$4 sm:$0xff]  }
 0x3a7   : > { %7804 = vmatprep.subr.bf16.mxu1 %v10646_v1  ;;  %v10719_v1 = vld [vmem:[%s10889_s28 + $0x1cc8] ss:$16 sps:$4 sm:$0xff]  }
 0x3a9   : > { %7764 = vmatpush1.bf16.msra.mxu0 %v10641_v9  ;;  %v10722_v9 = vld [vmem:[%s10889_s28 + $0x1ec8] ss:$16 sps:$4 sm:$0xff]  }
 0x3aa   : > { %7805 = vmatpush1.bf16.msra.mxu1 %v10644_v13  ;;  %7765 = vmatprep.subr.bf16.mxu0 %v10649_v54 }
 0x3ab   : > { %7806 = vmatprep.subr.bf16.mxu1 %v10652_v41  ;;  %v10727_v41 = vld [vmem:[%s10889_s28 + $0x1cac] ss:$16 sps:$4 sm:$0xff]  }
 0x3ad   : > { %7766 = vmatpush1.bf16.msra.mxu0 %v10647_v42  ;;  %v10730_v42 = vld [vmem:[%s10889_s28 + $0x1eac] ss:$16 sps:$4 sm:$0xff]  }
 0x3ae   : > { %7807 = vmatpush1.bf16.msra.mxu1 %v10650_v22  ;;  %7767 = vmatprep.subr.bf16.mxu0 %v10655_v31 }
 0x3af   : > { %7808 = vmatprep.subr.bf16.mxu1 %v10658_v11  ;;  %v10725_v11 = vld [vmem:[%s10889_s28 + $0x1ca8] ss:$16 sps:$4 sm:$0xff]  }
 0x3b1   : > { %7768 = vmatpush1.bf16.msra.mxu0 %v10653_v52  ;;  %v10728_v52 = vld [vmem:[%s10889_s28 + $0x1ea8] ss:$16 sps:$4 sm:$0xff]  }
 0x3b2   : > { %7809 = vmatpush1.bf16.msra.mxu1 %v10656_v7  ;;  %7769 = vmatprep.subr.bf16.mxu0 %v10661_v2 }
 0x3b3   : > { %7810 = vmatprep.subr.bf16.mxu1 %v10664_v17  ;;  %v10734_v17 = vld [vmem:[%s10889_s28 + $0x1e88] ss:$16 sps:$4 sm:$0xff]  }
 0x3b5   : > { %7770 = vmatpush1.bf16.msra.mxu0 %v10659_v18  ;;  %v10739_v18 = vld [vmem:[%s10889_s28 + $0x1c6c] ss:$16 sps:$4 sm:$0xff]  }
 0x3b6   : > { %7811 = vmatpush1.bf16.msra.mxu1 %v10662_v39  ;;  %7771 = vmatprep.subr.bf16.mxu0 %v10667_v40  ;;  %v10742_v39 = vld [vmem:[%s10889_s28 + $0x1e6c] ss:$16 sps:$4 sm:$0xff]   ;;  %v10737_v40 = vld [vmem:[%s10889_s28 + $0x1c68] ss:$16 sps:$4 sm:$0xff]  }
 0x3b7   : > { %7812 = vmatprep.subr.bf16.mxu1 %v10670_v48  ;;  %v10740_v48 = vld [vmem:[%s10889_s28 + $0x1e68] ss:$16 sps:$4 sm:$0xff]  }
 0x3b9   : > { %7772 = vmatpush2.bf16.msra.mxu0 %v10665_v8  ;;  %v10745_v8 = vld [vmem:[%s10889_s28 + $0x1c4c] ss:$16 sps:$4 sm:$0xff]  }
 0x3ba   : > { %7813 = vmatpush2.bf16.msra.mxu1 %v10668_v56  ;;  %7773 = vmatprep.subr.bf16.mxu0 %v10673_v15  ;;  %v10748_v56 = vld [vmem:[%s10889_s28 + $0x1e4c] ss:$16 sps:$4 sm:$0xff]   ;;  %v10743_v15 = vld [vmem:[%s10889_s28 + $0x1c48] ss:$16 sps:$4 sm:$0xff]  }
 0x3bb   : > { %7814 = vmatprep.subr.bf16.mxu1 %v10676_v16  ;;  %v10746_v16 = vld [vmem:[%s10889_s28 + $0x1e48] ss:$16 sps:$4 sm:$0xff]  }
 0x3bd   : > { %7774 = vmatpush2.bf16.msra.mxu0 %v10671_v19  ;;  %v10751_v19 = vld [vmem:[%s10889_s28 + $0x1c2c] ss:$16 sps:$4 sm:$0xff]  }
 0x3be   : > { %7815 = vmatpush2.bf16.msra.mxu1 %v10674_v47  ;;  %7775 = vmatprep.subr.bf16.mxu0 %v10679_v49  ;;  %v10754_v47 = vld [vmem:[%s10889_s28 + $0x1e2c] ss:$16 sps:$4 sm:$0xff]   ;;  %v10749_v49 = vld [vmem:[%s10889_s28 + $0x1c28] ss:$16 sps:$4 sm:$0xff]  }
 0x3bf   : > { %7816 = vmatprep.subr.bf16.mxu1 %v10682_v35  ;;  %v10752_v35 = vld [vmem:[%s10889_s28 + $0x1e28] ss:$16 sps:$4 sm:$0xff]  }
 0x3c1   : > { %7776 = vmatpush2.bf16.msra.mxu0 %v10677_v23  ;;  %v10757_v23 = vld [vmem:[%s10889_s28 + $0x1c0c] ss:$16 sps:$4 sm:$0xff]  }
 0x3c2   : > { %7817 = vmatpush2.bf16.msra.mxu1 %v10680_v24  ;;  %7777 = vmatprep.subr.bf16.mxu0 %v10685_v12  ;;  %v10760_v24 = vld [vmem:[%s10889_s28 + $0x1e0c] ss:$16 sps:$4 sm:$0xff]   ;;  %v10755_v12 = vld [vmem:[%s10889_s28 + $0x1c08] ss:$16 sps:$4 sm:$0xff]  }
 0x3c3   : > { %7818 = vmatprep.subr.bf16.mxu1 %v10688_v37  ;;  %v10758_v37 = vld [vmem:[%s10889_s28 + $0x1e08] ss:$16 sps:$4 sm:$0xff]  }
 0x3c5   : > { %7778 = vmatpush2.bf16.msra.mxu0 %v10683_v59  ;;  %v10763_v59 = vld [vmem:[%s10889_s28 + $0x1dec] ss:$16 sps:$4 sm:$0xff]  }
 0x3c6   : > { %7819 = vmatpush2.bf16.msra.mxu1 %v10686_v62  ;;  %7779 = vmatprep.subr.bf16.mxu0 %v10691_v57  ;;  %v10766_v62 = vld [vmem:[%s10889_s28 + $0x1fec] ss:$16 sps:$4 sm:$0xff]   ;;  %v10761_v57 = vld [vmem:[%s10889_s28 + $0x1de8] ss:$16 sps:$4 sm:$0xff]  }
 0x3c7   : > { %7820 = vmatprep.subr.bf16.mxu1 %v10694_v38  ;;  %v10764_v38 = vld [vmem:[%s10889_s28 + $0x1fe8] ss:$16 sps:$4 sm:$0xff]  }
 0x3c9   : > { %7780 = vmatpush2.bf16.msra.mxu0 %v10689_v6  ;;  %v10769_v6 = vld [vmem:[%s10889_s28 + $0x1dcc] ss:$16 sps:$4 sm:$0xff]  }
 0x3ca   : > { %7821 = vmatpush2.bf16.msra.mxu1 %v10692_v20  ;;  %7781 = vmatprep.subr.bf16.mxu0 %v10697_v21  ;;  %v10772_v20 = vld [vmem:[%s10889_s28 + $0x1fcc] ss:$16 sps:$4 sm:$0xff]   ;;  %v10767_v21 = vld [vmem:[%s10889_s28 + $0x1dc8] ss:$16 sps:$4 sm:$0xff]  }
 0x3cb   : > { %7822 = vmatprep.subr.bf16.mxu1 %v10700_v27  ;;  %v10770_v27 = vld [vmem:[%s10889_s28 + $0x1fc8] ss:$16 sps:$4 sm:$0xff]  }
 0x3cd   : > { %7782 = vmatpush2.bf16.msra.mxu0 %v10695_v28  ;;  %v10775_v28 = vld [vmem:[%s10889_s28 + $0x1dac] ss:$16 sps:$4 sm:$0xff]  }
 0x3ce   : > { %7823 = vmatpush2.bf16.msra.mxu1 %v10698_v29  ;;  %7783 = vmatprep.subr.bf16.mxu0 %v10703_v32  ;;  %v10778_v29 = vld [vmem:[%s10889_s28 + $0x1fac] ss:$16 sps:$4 sm:$0xff]   ;;  %v10773_v32 = vld [vmem:[%s10889_s28 + $0x1da8] ss:$16 sps:$4 sm:$0xff]  }
 0x3cf   : > { %7824 = vmatprep.subr.bf16.mxu1 %v10706_v33  ;;  %v10776_v33 = vld [vmem:[%s10889_s28 + $0x1fa8] ss:$16 sps:$4 sm:$0xff]  }
 0x3d1   : > { %7784 = vmatpush2.bf16.msra.mxu0 %v10701_v14  ;;  %v10781_v14 = vld [vmem:[%s10889_s28 + $0x1d8c] ss:$16 sps:$4 sm:$0xff]  }
 0x3d2   : > { %7825 = vmatpush2.bf16.msra.mxu1 %v10704_v34  ;;  %7785 = vmatprep.subr.bf16.mxu0 %v10709_v36  ;;  %v10784_v34 = vld [vmem:[%s10889_s28 + $0x1f8c] ss:$16 sps:$4 sm:$0xff]   ;;  %v10779_v36 = vld [vmem:[%s10889_s28 + $0x1d88] ss:$16 sps:$4 sm:$0xff]  }
 0x3d3   : > { %7826 = vmatprep.subr.bf16.mxu1 %v10712_v45  ;;  %v10782_v45 = vld [vmem:[%s10889_s28 + $0x1f88] ss:$16 sps:$4 sm:$0xff]  }
 0x3d5   : > { %7786 = vmatpush2.bf16.msra.mxu0 %v10707_v46  ;;  %v10787_v46 = vld [vmem:[%s10889_s28 + $0x1d6c] ss:$16 sps:$4 sm:$0xff]  }
 0x3d6   : > { %7827 = vmatpush2.bf16.msra.mxu1 %v10710_v25  ;;  %7837 = vmatprep.subr.bf16.mxu0 %v10715_v43  ;;  %v10790_v25 = vld [vmem:[%s10889_s28 + $0x1f6c] ss:$16 sps:$4 sm:$0xff]   ;;  %v10785_v43 = vld [vmem:[%s10889_s28 + $0x1d68] ss:$16 sps:$4 sm:$0xff]  }
 0x3d7   : > { %7878 = vmatprep.subr.bf16.mxu1 %v10718_v44  ;;  %v10788_v44 = vld [vmem:[%s10889_s28 + $0x1f68] ss:$16 sps:$4 sm:$0xff]  }
 0x3d8   : > { %v7543_v26 = vpop.f32.mrf.mxu0  ;;  %7788 = vmatmul.mubr.bf16.vlgmr.msra.gmra.mxu0 %v11528_v3 }
 0x3d9   : > { %v7584_v61 = vpop.f32.mrf.mxu1  ;;  %7829 = vmatmul.mubr.bf16.vlgmr.msra.gmra.mxu1 %v11532_v5  ;;  %v7544_v58 = vadd.f32 %v7543_v26, %v12077_v63  ;;  %7838 = vmatpush1.bf16.msra.mxu0 %v10713_v55  ;;  %v10793_v55 = vld [vmem:[%s10889_s28 + $0x1d4c] ss:$16 sps:$4 sm:$0xff]  }
 0x3da   : > { %7879 = vmatpush1.bf16.msra.mxu1 %v10716_v60  ;;  %v7545_v13 = vpop.f32.mrf.mxu0  ;;  %7839 = vmatprep.subr.bf16.mxu0 %v10721_v50  ;;  %v10796_v60 = vld [vmem:[%s10889_s28 + $0x1f4c] ss:$16 sps:$4 sm:$0xff]   ;;  %v10791_v50 = vld [vmem:[%s10889_s28 + $0x1d48] ss:$16 sps:$4 sm:$0xff]  }
 0x3db   : > { %v7586_v54 = vpop.f32.mrf.mxu1  ;;  %7880 = vmatprep.subr.bf16.mxu1 %v10724_v51  ;;  %v12151_v22 = vadd.f32 %v7584_v61, %v7544_v58  ;;  %v7546_v3 = vadd.f32 %v7545_v13, %v12082_v0  ;;  %7869 = vmatprep.mubr.bf16.mxu0 %v11540_v4  ;;  %v10733_v4 = vld [vmem:[%s10889_s28 + $0x1c8c] ss:$16 sps:$4 sm:$0xff]   ;;  %v10731_v0 = vld [vmem:[%s10889_s28 + $0x1c88] ss:$16 sps:$4 sm:$0xff]  }
 0x3dc   : > { %7910 = vmatprep.mubr.bf16.mxu1 %v11544_v53  ;;  %v7547_v5 = vpop.f32.mrf.mxu0  ;;  %v10736_v53 = vld [vmem:[%s10889_s28 + $0x1e8c] ss:$16 sps:$4 sm:$0xff]   ;;  %v10794_v51 = vld [vmem:[%s10889_s28 + $0x1f48] ss:$16 sps:$4 sm:$0xff]  }
 0x3dd   : > { %v7588_v63 = vpop.f32.mrf.mxu1  ;;  %v12156_v31 = vadd.f32 %v7586_v54, %v7546_v3  ;;  %7840 = vmatpush1.bf16.msra.mxu0 %v10719_v1  ;;  %v10799_v26 = vld [vmem:[%s10889_s28 + $0x1d2c] ss:$16 sps:$4 sm:$0xff]   ;;  %v10797_v58 = vld [vmem:[%s10889_s28 + $0x1d28] ss:$16 sps:$4 sm:$0xff]  }
 0x3de   : > { %7881 = vmatpush1.bf16.msra.mxu1 %v10722_v9  ;;  %v7548_v7 = vpop.f32.mrf.mxu0  ;;  %7841 = vmatprep.subr.bf16.mxu0 %v10727_v41  ;;  %v10802_v61 = vld [vmem:[%s10889_s28 + $0x1f2c] ss:$16 sps:$4 sm:$0xff]   ;;  %v10800_v1 = vld [vmem:[%s10889_s28 + $0x1f28] ss:$16 sps:$4 sm:$0xff]  }
 0x3df   : > { %v7589_v2 = vpop.f32.mrf.mxu1  ;;  %7882 = vmatprep.subr.bf16.mxu1 %v10730_v42  ;;  %v10805_v9 = vld [vmem:[%s10889_s28 + $0x1d0c] ss:$16 sps:$4 sm:$0xff]   ;;  %v10803_v54 = vld [vmem:[%s10889_s28 + $0x1d08] ss:$16 sps:$4 sm:$0xff]  }
 0x3e0   : > { %v10808_v13 = vld [vmem:[%s10889_s28 + $0x1f0c] ss:$16 sps:$4 sm:$0xff]   ;;  %v10806_v41 = vld [vmem:[%s10889_s28 + $0x1f08] ss:$16 sps:$4 sm:$0xff]  }
 0x3e1   : > { %7842 = vmatpush1.bf16.msra.mxu0 %v10725_v11 }
 0x3e2   : > { %7883 = vmatpush1.bf16.msra.mxu1 %v10728_v52  ;;  %7843 = vmatprep.subr.bf16.mxu0 %v10733_v4 }
 0x3e3   : > { %7884 = vmatprep.subr.bf16.mxu1 %v10736_v53 }
 0x3e5   : > { %7844 = vmatpush1.bf16.msra.mxu0 %v10731_v0 }
 0x3e6   : > { %7885 = vmatpush1.bf16.msra.mxu1 %v10734_v17  ;;  %7845 = vmatprep.subr.bf16.mxu0 %v10739_v18 }
 0x3e7   : > { %7886 = vmatprep.subr.bf16.mxu1 %v10742_v39 }
 0x3e9   : > { %7846 = vmatpush1.bf16.msra.mxu0 %v10737_v40 }
 0x3ea   : > { %7887 = vmatpush1.bf16.msra.mxu1 %v10740_v48  ;;  %7847 = vmatprep.subr.bf16.mxu0 %v10745_v8 }
 0x3eb   : > { %7888 = vmatprep.subr.bf16.mxu1 %v10748_v56 }
 0x3ed   : > { %7848 = vmatpush1.bf16.msra.mxu0 %v10743_v15 }
 0x3ee   : > { %7889 = vmatpush1.bf16.msra.mxu1 %v10746_v16  ;;  %7849 = vmatprep.subr.bf16.mxu0 %v10751_v19 }
 0x3ef   : > { %7890 = vmatprep.subr.bf16.mxu1 %v10754_v47 }
 0x3f1   : > { %7850 = vmatpush1.bf16.msra.mxu0 %v10749_v49 }
 0x3f2   : > { %7891 = vmatpush1.bf16.msra.mxu1 %v10752_v35  ;;  %7851 = vmatprep.subr.bf16.mxu0 %v10757_v23 }
 0x3f3   : > { %7892 = vmatprep.subr.bf16.mxu1 %v10760_v24 }
 0x3f5   : > { %7852 = vmatpush1.bf16.msra.mxu0 %v10755_v12 }
 0x3f6   : > { %7893 = vmatpush1.bf16.msra.mxu1 %v10758_v37  ;;  %7853 = vmatprep.subr.bf16.mxu0 %v10763_v59 }
 0x3f7   : > { %7894 = vmatprep.subr.bf16.mxu1 %v10766_v62 }
 0x3f9   : > { %7854 = vmatpush2.bf16.msra.mxu0 %v10761_v57 }
 0x3fa   : > { %7895 = vmatpush2.bf16.msra.mxu1 %v10764_v38  ;;  %7855 = vmatprep.subr.bf16.mxu0 %v10769_v6 }
 0x3fb   : > { %7896 = vmatprep.subr.bf16.mxu1 %v10772_v20 }
 0x3fd   : > { %7856 = vmatpush2.bf16.msra.mxu0 %v10767_v21 }
 0x3fe   : > { %7897 = vmatpush2.bf16.msra.mxu1 %v10770_v27  ;;  %7857 = vmatprep.subr.bf16.mxu0 %v10775_v28  ;;  %v333_v27 = vld [vmem:[#allocation2 + $0x18] sm:$0xff] }
 0x3ff   : > { %7898 = vmatprep.subr.bf16.mxu1 %v10778_v29 }
 0x401   : > { %7858 = vmatpush2.bf16.msra.mxu0 %v10773_v32 }
 0x402   : > { %7899 = vmatpush2.bf16.msra.mxu1 %v10776_v33  ;;  %7859 = vmatprep.subr.bf16.mxu0 %v10781_v14  ;;  %v334_v14 = vld [vmem:[#allocation2 + $0x8] sm:$0xff] }
 0x403   : > { %7900 = vmatprep.subr.bf16.mxu1 %v10784_v34 }
 0x405   : > { %7860 = vmatpush2.bf16.msra.mxu0 %v10779_v36 }
 0x406   : > { %7901 = vmatpush2.bf16.msra.mxu1 %v10782_v45  ;;  %7861 = vmatprep.subr.bf16.mxu0 %v10787_v46 }
 0x407   : > { %7902 = vmatprep.subr.bf16.mxu1 %v10790_v25 }
 0x409   : > { %7862 = vmatpush2.bf16.msra.mxu0 %v10785_v43 }
 0x40a   : > { %7903 = vmatpush2.bf16.msra.mxu1 %v10788_v44  ;;  %7863 = vmatprep.subr.bf16.mxu0 %v10793_v55 }
 0x40b   : > { %7904 = vmatprep.subr.bf16.mxu1 %v10796_v60 }
 0x40d   : > { %7864 = vmatpush2.bf16.msra.mxu0 %v10791_v50 }
 0x40e   : > { %7905 = vmatpush2.bf16.msra.mxu1 %v10794_v51  ;;  %7865 = vmatprep.subr.bf16.mxu0 %v10799_v26 }
 0x40f   : > { %7906 = vmatprep.subr.bf16.mxu1 %v10802_v61 }
 0x411   : > { %7866 = vmatpush2.bf16.msra.mxu0 %v10797_v58 }
 0x412   : > { %7907 = vmatpush2.bf16.msra.mxu1 %v10800_v1  ;;  %7867 = vmatprep.subr.bf16.mxu0 %v10805_v9 }
 0x413   : > { %7908 = vmatprep.subr.bf16.mxu1 %v10808_v13 }
 0x415   : > { %7868 = vmatpush2.bf16.msra.mxu0 %v10803_v54 }
 0x416   : > { %7909 = vmatpush2.bf16.msra.mxu1 %v10806_v41 }
 0x418   : > { %v7625_v42 = vpop.f32.mrf.mxu0  ;;  %7870 = vmatmul.mubr.bf16.vlgmr.msra.gmra.mxu0 %v11618_v10 }
 0x419   : > { %v7666_v3 = vpop.f32.mrf.mxu1  ;;  %7911 = vmatmul.mubr.bf16.vlgmr.msra.gmra.mxu1 %v11622_v30  ;;  %v7626_v5 = vadd.f32 %v7625_v42, %v12151_v22 }
 0x41a   : > { %v7627_v63 = vpop.f32.mrf.mxu0 }
 0x41b   : > { %v7668_v11 = vpop.f32.mrf.mxu1  ;;  %v7667_v52 = vadd.f32 %v7666_v3, %v7626_v5  ;;  %v7628_v7 = vadd.f32 %v7627_v63, %v12156_v31 }
 0x41c   : > { %v7629_v2 = vpop.f32.mrf.mxu0 }
 0x41d   : > { %v7670_v4 = vpop.f32.mrf.mxu1  ;;  %v7669_v53 = vadd.f32 %v7668_v11, %v7628_v7 }
 0x41e   : > { %v7630_v0 = vpop.f32.mrf.mxu0 }
 0x41f   : > { %v7671_v17 = vpop.f32.mrf.mxu1 }
 0x458   : > { %v7707_v18 = vpop.f32.mrf.mxu0 }
 0x459   : > { %v7748_v39 = vpop.f32.mrf.mxu1  ;;  %v7708_v40 = vadd.f32 %v7707_v18, %v7667_v52 }
 0x45a   : > { %v7709_v48 = vpop.f32.mrf.mxu0 }
 0x45b   : > { %v7750_v8 = vpop.f32.mrf.mxu1  ;;  %v7749_v10 = vadd.f32 %v7748_v39, %v7708_v40  ;;  %v7710_v56 = vadd.f32 %v7709_v48, %v7669_v53 }
 0x45c   : > { %v7711_v30 = vpop.f32.mrf.mxu0 }
 0x45d   : > { %v7752_v15 = vpop.f32.mrf.mxu1  ;;  %v7751_v22 = vadd.f32 %v7750_v8, %v7710_v56 }
 0x45e   : > { %v7712_v16 = vpop.f32.mrf.mxu0 }
 0x45f   : > { %v7753_v19 = vpop.f32.mrf.mxu1 }
 0x498   : > { %v7789_v47 = vpop.f32.mrf.mxu0 }
 0x499   : > { %v7830_v49 = vpop.f32.mrf.mxu1  ;;  %v7790_v59 = vadd.f32 %v7789_v47, %v7749_v10 }
 0x49a   : > { %v7791_v31 = vpop.f32.mrf.mxu0 }
 0x49b   : > { %v7832_v35 = vpop.f32.mrf.mxu1  ;;  %v7792_v62 = vadd.f32 %v7791_v31, %v7751_v22  ;;  %v7831_v57 = vadd.f32 %v7830_v49, %v7790_v59 }
 0x49c   : > { %v7793_v23 = vpop.f32.mrf.mxu0 }
 0x49d   : > { %v7834_v24 = vpop.f32.mrf.mxu1  ;;  %v7833_v20 = vadd.f32 %v7832_v35, %v7792_v62 }
 0x49e   : > { %v7794_v12 = vpop.f32.mrf.mxu0 }
 0x49f   : > { %v7835_v37 = vpop.f32.mrf.mxu1 }
 0x4d8   : > { %v7871_v38 = vpop.f32.mrf.mxu0 }
 0x4d9   : > { %v7912_v6 = vpop.f32.mrf.mxu1  ;;  %v7872_v21 = vadd.f32 %v7871_v38, %v7831_v57 }
 0x4da   : > { %v7873_v28 = vpop.f32.mrf.mxu0 }
 0x4db   : > { %v7914_v29 = vpop.f32.mrf.mxu1  ;;  %v7913_v32 = vadd.f32 %v7912_v6, %v7872_v21  ;;  %v7874_v33 = vadd.f32 %v7873_v28, %v7833_v20 }
 0x4dc   : > { %v7875_v34 = vpop.f32.mrf.mxu0 }
 0x4dd   : > { %v7916_v36 = vpop.f32.mrf.mxu1  ;;  %v7921_v45 = vadd.f32 %v7913_v32, %v333_v27  ;;  %v7915_v46 = vadd.f32 %v7914_v29, %v7874_v33  ;;  %7930 = sbr.rel (%p9206_p7) target bundleno = 1268 (0x4f4), region = 44 }
 0x4de   : > { %v7876_v25 = vpop.f32.mrf.mxu0 }
 0x4df   : > { %v7917_v43 = vpop.f32.mrf.mxu1  ;;  %7925 = vst [vmem:[#allocation2 + $0x18] sm:$0xff] %v7921_v45  ;;  %v7922_v44 = vadd.f32 %v7915_v46, %v334_v14 }
 0x4e1   : > { %7926 = vst [vmem:[#allocation2 + $0x8] sm:$0xff] %v7922_v44 }
 0x4e2   : > { %v7937_v55 = vlaneseq  ;;  %v7935_v50 = vld [vmem:[%s12240_s2] sm:$0xf]  ;;  %v7931_v9 = vld [vmem:[#allocation2 + $0x10] sm:$0xff] }
 0x4e3   : > { %v7961_v51 = vld [vmem:[%s12241_s3] sm:$0xf] }
 0x4e4   : > { %v7938_v60 = vshrl.u32 %v7937_v55, 7  ;;  %v7932_v13 = vld [vmem:[#allocation2] sm:$0xff] }
 0x4e6   : > { %v7939_v26 = vsub.s32 0, %v7938_v60  ;;  %v7943_v61 = vsub.s32 1, %v7938_v60  ;;  %v7947_v58 = vsub.s32 2, %v7938_v60  ;;  %v7951_v1 = vsub.s32 3, %v7938_v60  ;;  %v7933_v5 = vld [vmem:[#allocation2 + $0x18] sm:$0xff] }
 0x4e8   : > { %v7940_v54 = vrot.slane %v7935_v50, %v7939_v26  ;;  %v7944_v41 = vrot.slane %v7935_v50, %v7943_v61  ;;  %v7966_v42 = vrot.slane %v7961_v51, %v7939_v26  ;;  %v7970_v3 = vrot.slane %v7961_v51, %v7943_v61  ;;  %v7934_v63 = vld [vmem:[#allocation2 + $0x8] sm:$0xff] }
 0x4e9   : > { %v7948_v11 = vrot.slane %v7935_v50, %v7947_v58  ;;  %v7952_v52 = vrot.slane %v7935_v50, %v7951_v1  ;;  %v7974_v7 = vrot.slane %v7961_v51, %v7947_v58  ;;  %v7978_v2 = vrot.slane %v7961_v51, %v7951_v1 }
 0x4ea   : > { %v7957_v4 = vmul.f32 %v7940_v54, %v7931_v9  ;;  %v7958_v53 = vmul.f32 %v7944_v41, %v7932_v13 }
 0x4eb   : > { %v7959_v0 = vmul.f32 %v7948_v11, %v7933_v5  ;;  %v7960_v17 = vmul.f32 %v7952_v52, %v7934_v63 }
 0x4ec   : > { %v7983_v18 = vadd.f32 %v7966_v42, %v7957_v4  ;;  %v7984_v39 = vadd.f32 %v7970_v3, %v7958_v53 }
 0x4ed   : > { %v7985_v40 = vadd.f32 %v7974_v7, %v7959_v0  ;;  %v7986_v48 = vadd.f32 %v7978_v2, %v7960_v17 }
 0x4ee   : > { %v7987_v8 = vmax.f32 %v7983_v18, 0.0  ;;  %v7988_v10 = vmax.f32 %v7984_v39, 0.0 }
 0x4ef   : > { %v7989_v56 = vmax.f32 %v7985_v40, 0.0  ;;  %v7990_v30 = vmax.f32 %v7986_v48, 0.0 }
 0x4f0   : > { %v9214_v15 = vpack.c.bf16 %v7988_v10, %v7987_v8 }
 0x4f1   : > { %v9215_v22 = vpack.c.bf16 %v7990_v30, %v7989_v56 }
 0x4f2   : > { %8007 = vst [vmem:[%s12242_s4] sm:$0xff] %v9214_v15 }
 0x4f3   : > { %8008 = vst [vmem:[%s12242_s4 + $0x8] sm:$0xff] %v9215_v22 }
 0x4f4 PF: > { %s14_s17 = sadd.s32 1, %s10831_s17   ;;  %s12243_s15 = smov %s10827_s16 }
 0x4f5   : > { %p11_p8 = scmp.ge.s32.totalorder %s14_s17, 20   ;;  %s12244_s16 = smov %s12246_s18 }
 0x4f7   :  { %13 = sbr.rel (!%p11_p8) target bundleno = 2 (0x2), region = 83 }

</bundles_post_ra>
